<compile_context>
chip_gen: v5e
topology: v5e:2x2
jax: 0.10.0
libtpu: 0.0.40
codegen_flags: <defaults>
</compile_context>

<pallas_src>
import functools

import jax
import jax.numpy as jnp
from jax import lax
from jax.experimental import pallas as pl
from jax.experimental.pallas import tpu as pltpu


# --------------------------- kernel helpers ---------------------------------


def _layer_norm_f32(x_ref, gamma_ref, beta_ref, eps):
    """LayerNorm over the feature axis, all math in f32 (VPU/EUP)."""
    x = x_ref[...].astype(jnp.float32)                       # (TM, D)
    mean = jnp.mean(x, axis=-1, keepdims=True)
    var = jnp.mean((x - mean) ** 2, axis=-1, keepdims=True)
    xn = (x - mean) * lax.rsqrt(var + eps)
    return xn * gamma_ref[...] + beta_ref[...]               # f32 (TM, D)


def _swish_to_bf16(h_f32, b1_ref, swish_bf16):
    """Bias-add (f32) + Swish; returns bf16 MXU operand for the 2nd matmul."""
    h = h_f32 + b1_ref[...]                                   # f32 (TM, TH)
    if swish_bf16:
        hb = h.astype(jnp.bfloat16)
        return hb * jax.nn.sigmoid(hb)                        # bf16 EUP (v6e/v7x)
    h = h * jax.nn.sigmoid(h)                                 # f32 (v5e-safe)
    return h.astype(jnp.bfloat16)


# TODO(synk): dropout is identity here (inference mode); training-mode dropout
# would use pltpu.prng_seed + pltpu.stateful_bernoulli.


def _ffn_kernel_resident(x_ref, gamma_ref, beta_ref, w1_ref, b1_ref,
                         w2_ref, b2_ref, o_ref, *, eps, swish_bf16):
    """Grid = (row_tiles,). Full bf16 w1/w2 are VMEM-resident (constant idx)."""
    xn = _layer_norm_f32(x_ref, gamma_ref, beta_ref, eps).astype(jnp.bfloat16)
    h = jnp.dot(xn, w1_ref[...], preferred_element_type=jnp.float32)
    hb = _swish_to_bf16(h, b1_ref, swish_bf16)
    y = jnp.dot(hb, w2_ref[...], preferred_element_type=jnp.float32)
    o_ref[...] = (y + b2_ref[...]).astype(o_ref.dtype)


def _ffn_kernel_chunked(x_ref, gamma_ref, beta_ref, w1_ref, b1_ref,
                        w2_ref, b2_ref, o_ref, xn_ref, acc_ref,
                        *, eps, swish_bf16):
    """Grid = (row_tiles, hidden_chunks). Hidden dim accumulated in f32 VMEM."""
    k = pl.program_id(1)

    @pl.when(k == 0)
    def _():
        xn_ref[...] = _layer_norm_f32(x_ref, gamma_ref, beta_ref,
                                      eps).astype(jnp.bfloat16)
        acc_ref[...] = jnp.zeros_like(acc_ref)

    h = jnp.dot(xn_ref[...], w1_ref[...], preferred_element_type=jnp.float32)
    hb = _swish_to_bf16(h, b1_ref, swish_bf16)
    acc_ref[...] += jnp.dot(hb, w2_ref[...], preferred_element_type=jnp.float32)

    @pl.when(k == pl.num_programs(1) - 1)
    def _():
        o_ref[...] = (acc_ref[...] + b2_ref[...]).astype(o_ref.dtype)


# ------------------------------ wrapper --------------------------------------


def _device_kind():
    try:
        return jax.devices()[0].device_kind.lower()
    except Exception:
        return ""


def _swish_in_bf16():
    kind = _device_kind()
    # v5e (and older) have no bf16 VPU/EUP; keep Swish math in f32 there.
    return not any(tag in kind for tag in ("v2", "v3", "v4", "v5"))


def _physical_vmem_bytes():
    try:
        return int(pltpu.get_tpu_info().vmem_capacity_bytes)
    except Exception:
        return 64 * 1024 * 1024        # conservative: v7x per-TC VMEM


def _pick_hidden_tile(hidden, cap):
    """Largest lane-aligned divisor of `hidden` that is <= cap."""
    cap = min(cap, hidden)
    for quantum in (256, 128):         # prefer 256-wide for v6e/v7x MXU
        t = (cap // quantum) * quantum
        while t >= quantum:
            if hidden % t == 0:
                return t
            t -= quantum
    return hidden


def _weight_spec(shape, index_map, buffers):
    """Weight BlockSpec with deeper pipelining when streamed along k."""
    try:
        return pl.BlockSpec(shape, index_map, pipeline_mode=pl.Buffered(buffers))
    except (TypeError, AttributeError):
        return pl.BlockSpec(shape, index_map)


def feed_forward_module(x, gamma, beta, w1, b1, w2, b2, *, eps=1e-5,
                        row_tile=512, hidden_tile=512, force_chunked=False):
    """Conformer FFN forward. x: (batch, seq, D) channel-last; same shape out.

    Pass w1/w2 already cast to bfloat16 to keep the per-call weight cast out
    of the hot path (they are cast here only if needed).
    """
    batch, seq, d = x.shape
    d_w1, hidden = w1.shape
    assert d_w1 == d and w2.shape == (hidden, d)
    assert d % 128 == 0, "encoder_dim must be a multiple of 128 (lane-dense)"
    assert hidden % 128 == 0, "hidden dim must be a multiple of 128"

    swish_bf16 = _swish_in_bf16()
    phys_vmem = _physical_vmem_bytes()
    vmem_budget = phys_vmem * 3 // 4          # headroom for compiler scratch

    n = batch * seq
    row_tile = max(8, min(row_tile, ((max(n, 8) + 7) // 8) * 8))
    x_bytes = x.dtype.itemsize
    w_bytes = 2 * d * hidden * 2              # w1 + w2 in bf16
    vec_bytes = (2 * d + hidden + d) * 4      # gamma, beta, b1, b2 (f32)

    def resident_vmem(tm):
        # x tile + out tile (double-buffered) + both weights (double-buffered).
        return 2 * tm * d * x_bytes * 2 + 2 * w_bytes + 2 * vec_bytes

    def chunked_vmem(tm, th):
        wt = 3 * (d * th + th * d) * 2        # Buffered(3) bf16 weight chunks
        scratch = tm * d * (2 + 4)            # xn (bf16) + acc (f32)
        return 2 * tm * d * x_bytes * 2 + wt + scratch + 2 * vec_bytes

    resident = (not force_chunked) and resident_vmem(row_tile) <= vmem_budget

    if not resident:
        th = _pick_hidden_tile(hidden, hidden_tile)
        while chunked_vmem(row_tile, th) > vmem_budget and th > 128:
            th = _pick_hidden_tile(hidden, th // 2)

    n_pad = ((n + row_tile - 1) // row_tile) * row_tile
    x2 = x.reshape(n, d)
    if n_pad != n:
        x2 = jnp.pad(x2, ((0, n_pad - n), (0, 0)))   # zero rows, sliced later

    # Cast only if needed (callers should pre-cast; astype of bf16 is a no-op).
    w1b = w1 if w1.dtype == jnp.bfloat16 else w1.astype(jnp.bfloat16)
    w2b = w2 if w2.dtype == jnp.bfloat16 else w2.astype(jnp.bfloat16)
    gamma2 = gamma.reshape(1, d).astype(jnp.float32)
    beta2 = beta.reshape(1, d).astype(jnp.float32)
    b1_2 = b1.reshape(1, hidden).astype(jnp.float32)
    b2_2 = b2.reshape(1, d).astype(jnp.float32)

    n_row_tiles = n_pad // row_tile

    if resident:
        grid = (n_row_tiles,)
        kernel = functools.partial(_ffn_kernel_resident, eps=eps,
                                   swish_bf16=swish_bf16)
        in_specs = [
            pl.BlockSpec((row_tile, d), lambda i: (i, 0)),       # x tile
            pl.BlockSpec((1, d), lambda i: (0, 0)),              # gamma
            pl.BlockSpec((1, d), lambda i: (0, 0)),              # beta
            pl.BlockSpec((d, hidden), lambda i: (0, 0)),         # w1 (resident)
            pl.BlockSpec((1, hidden), lambda i: (0, 0)),         # b1
            pl.BlockSpec((hidden, d), lambda i: (0, 0)),         # w2 (resident)
            pl.BlockSpec((1, d), lambda i: (0, 0)),              # b2
        ]
        out_specs = pl.BlockSpec((row_tile, d), lambda i: (i, 0))
        scratch_shapes = []
        dim_sem = ("parallel",)
        weight_fetches = 1
        vmem_need = resident_vmem(row_tile)
    else:
        grid = (n_row_tiles, hidden // th)
        kernel = functools.partial(_ffn_kernel_chunked, eps=eps,
                                   swish_bf16=swish_bf16)
        in_specs = [
            pl.BlockSpec((row_tile, d), lambda i, k: (i, 0)),            # x tile
            pl.BlockSpec((1, d), lambda i, k: (0, 0)),                   # gamma
            pl.BlockSpec((1, d), lambda i, k: (0, 0)),                   # beta
            _weight_spec((d, th), lambda i, k: (0, k), 3),               # w1 chunk
            pl.BlockSpec((1, th), lambda i, k: (0, k)),                  # b1 chunk
            _weight_spec((th, d), lambda i, k: (k, 0), 3),               # w2 chunk
            pl.BlockSpec((1, d), lambda i, k: (0, 0)),                   # b2
        ]
        out_specs = pl.BlockSpec((row_tile, d), lambda i, k: (i, 0))
        scratch_shapes = [
            pltpu.VMEM((row_tile, d), jnp.bfloat16),   # cached LayerNorm output
            pltpu.VMEM((row_tile, d), jnp.float32),    # f32 output accumulator
        ]
        dim_sem = ("parallel", "arbitrary")
        weight_fetches = n_row_tiles
        vmem_need = chunked_vmem(row_tile, th)

    vmem_limit = min(max(int(vmem_need) + (8 << 20), 16 << 20),
                     int(phys_vmem * 0.9))

    cost = pl.CostEstimate(
        flops=4 * n_pad * d * hidden,                 # two matmuls
        transcendentals=n_pad * hidden,               # sigmoid
        bytes_accessed=(2 * n_pad * d * x_bytes       # x in + y out
                        + weight_fetches * w_bytes    # actual weight traffic
                        + vec_bytes))

    out = pl.pallas_call(
        kernel,
        out_shape=jax.ShapeDtypeStruct((n_pad, d), x.dtype),
        grid_spec=pltpu.PrefetchScalarGridSpec(
            num_scalar_prefetch=0,
            grid=grid,
            in_specs=in_specs,
            out_specs=out_specs,
            scratch_shapes=scratch_shapes,
        ),
        compiler_params=pltpu.CompilerParams(
            dimension_semantics=dim_sem,
            vmem_limit_bytes=vmem_limit),
        cost_estimate=cost,
    )(x2, gamma2, beta2, w1b, b1_2, w2b, b2_2)

    return out[:n].reshape(batch, seq, d)


# ------------------------------ reference ------------------------------------


def _reference(x, gamma, beta, w1, b1, w2, b2, eps=1e-5):
    xf = x.astype(jnp.float32)
    mean = jnp.mean(xf, axis=-1, keepdims=True)
    var = jnp.mean((xf - mean) ** 2, axis=-1, keepdims=True)
    xn = (xf - mean) * lax.rsqrt(var + eps) * gamma + beta
    h = xn @ w1 + b1
    h = h * jax.nn.sigmoid(h)
    y = h @ w2 + b2
    return y.astype(x.dtype)


if __name__ == "__main__":
    # Small shapes consistent with the module; encoder_dim kept a multiple of
    # 256 so the contraction dims fill the v6e/v7x 256-wide MXU.
    # encoder_dim=256, expansion_factor=4 -> hidden=1024; batch*seq = 128 rows.
    batch, seq, encoder_dim, expansion = 2, 64, 256, 4
    hidden = encoder_dim * expansion  # 1024

    key = jax.random.PRNGKey(0)
    kx, kw1, kb1, kw2, kb2, kg, kb = jax.random.split(key, 7)

    x = jax.random.normal(kx, (batch, seq, encoder_dim), dtype=jnp.float32)

    # Deterministic parameter init (synthetic; not a checkpoint load).
    gamma = 1.0 + 0.01 * jax.random.normal(kg, (encoder_dim,), jnp.float32)
    beta = 0.01 * jax.random.normal(kb, (encoder_dim,), jnp.float32)
    w1 = jax.random.normal(kw1, (encoder_dim, hidden), jnp.float32) * 0.05
    b1 = jax.random.normal(kb1, (hidden,), jnp.float32) * 0.01
    w2 = jax.random.normal(kw2, (hidden, encoder_dim), jnp.float32) * 0.05
    b2 = jax.random.normal(kb2, (encoder_dim,), jnp.float32) * 0.01

    # Pre-cast weights to bf16 once (hoisted out of the per-call hot path).
    w1b = jax.block_until_ready(w1.astype(jnp.bfloat16))
    w2b = jax.block_until_ready(w2.astype(jnp.bfloat16))

    y_ref = _reference(x, gamma, beta, w1, b1, w2, b2)

    # 1) Default path: resident bf16 weights, 1-D grid over row tiles.
    y = feed_forward_module(x, gamma, beta, w1b, b1, w2b, b2, row_tile=128)
    y = jax.block_until_ready(y)
    assert y.shape == x.shape
    assert jnp.allclose(y, y_ref, atol=5e-2, rtol=5e-2), \
        "resident path mismatch vs reference"

    # 2) Hidden-chunked fallback (weights streamed along k), exercised
    #    explicitly to validate the accumulator path.
    y2 = feed_forward_module(x, gamma, beta, w1b, b1, w2b, b2,
                             row_tile=128, hidden_tile=512, force_chunked=True)
    y2 = jax.block_until_ready(y2)
    assert jnp.allclose(y2, y_ref, atol=5e-2, rtol=5e-2), \
        "chunked path mismatch vs reference"

    print("KERNEL_OK")
</pallas_src>

<mosaic_0001>
module attributes {stable_mosaic.version = 11 : i64} {
  func.func @_ffn_kernel_resident(%arg0: i32, %arg1: memref<128x256xf32, #tpu.memory_space<vmem>>, %arg2: memref<1x256xf32, #tpu.memory_space<vmem>>, %arg3: memref<1x256xf32, #tpu.memory_space<vmem>>, %arg4: memref<256x1024xbf16, #tpu.memory_space<vmem>>, %arg5: memref<1x1024xf32, #tpu.memory_space<vmem>>, %arg6: memref<1024x256xbf16, #tpu.memory_space<vmem>>, %arg7: memref<1x256xf32, #tpu.memory_space<vmem>>, %arg8: memref<128x256xf32, #tpu.memory_space<vmem>>) attributes {dimension_semantics = [#tpu.dimension_semantics<parallel>], iteration_bounds = array<i64: 1>, scalar_prefetch = 0 : i64, scratch_operands = 0 : i64, tpu.core_type = #tpu.core_type<tc>, window_params = [{transform_indices = @transform_0, window_bounds = array<i64: 128, 256>}, {pipeline_mode = #tpu.pipeline_mode<synchronous>, transform_indices = @transform_1, window_bounds = array<i64: 1, 256>}, {pipeline_mode = #tpu.pipeline_mode<synchronous>, transform_indices = @transform_2, window_bounds = array<i64: 1, 256>}, {pipeline_mode = #tpu.pipeline_mode<synchronous>, transform_indices = @transform_3, window_bounds = array<i64: 256, 1024>}, {pipeline_mode = #tpu.pipeline_mode<synchronous>, transform_indices = @transform_4, window_bounds = array<i64: 1, 1024>}, {pipeline_mode = #tpu.pipeline_mode<synchronous>, transform_indices = @transform_5, window_bounds = array<i64: 1024, 256>}, {pipeline_mode = #tpu.pipeline_mode<synchronous>, transform_indices = @transform_6, window_bounds = array<i64: 1, 256>}, {transform_indices = @transform_7, window_bounds = array<i64: 128, 256>}]} {
    %c0 = arith.constant 0 : index
    %c0_0 = arith.constant 0 : index
    %0 = vector.load %arg1[%c0, %c0_0] : memref<128x256xf32, #tpu.memory_space<vmem>>, vector<128x256xf32>
    %cst = arith.constant dense<0.000000e+00> : vector<128xf32>
    %1 = vector.multi_reduction <add>, %0, %cst [1] : vector<128x256xf32> to vector<128xf32>
    %2 = vector.shape_cast %1 : vector<128xf32> to vector<128x1xf32>
    %cst_1 = arith.constant 2.560000e+02 : f32
    %3 = vector.broadcast %cst_1 : f32 to vector<128x1xf32>
    %4 = arith.divf %2, %3 : vector<128x1xf32>
    %5 = vector.broadcast %4 : vector<128x1xf32> to vector<128x256xf32>
    %6 = arith.subf %0, %5 : vector<128x256xf32>
    %7 = arith.mulf %6, %6 : vector<128x256xf32>
    %cst_2 = arith.constant dense<0.000000e+00> : vector<128xf32>
    %8 = vector.multi_reduction <add>, %7, %cst_2 [1] : vector<128x256xf32> to vector<128xf32>
    %9 = vector.shape_cast %8 : vector<128xf32> to vector<128x1xf32>
    %cst_3 = arith.constant 2.560000e+02 : f32
    %10 = vector.broadcast %cst_3 : f32 to vector<128x1xf32>
    %11 = arith.divf %9, %10 : vector<128x1xf32>
    %12 = vector.broadcast %4 : vector<128x1xf32> to vector<128x256xf32>
    %13 = arith.subf %0, %12 : vector<128x256xf32>
    %cst_4 = arith.constant 9.99999974E-6 : f32
    %14 = vector.broadcast %cst_4 : f32 to vector<128x1xf32>
    %15 = arith.addf %11, %14 : vector<128x1xf32>
    %16 = math.rsqrt %15 : vector<128x1xf32>
    %17 = vector.broadcast %16 : vector<128x1xf32> to vector<128x256xf32>
    %18 = arith.mulf %13, %17 : vector<128x256xf32>
    %c0_5 = arith.constant 0 : index
    %c0_6 = arith.constant 0 : index
    %19 = vector.load %arg2[%c0_5, %c0_6] : memref<1x256xf32, #tpu.memory_space<vmem>>, vector<1x256xf32>
    %20 = vector.broadcast %19 : vector<1x256xf32> to vector<128x256xf32>
    %21 = arith.mulf %18, %20 : vector<128x256xf32>
    %c0_7 = arith.constant 0 : index
    %c0_8 = arith.constant 0 : index
    %22 = vector.load %arg3[%c0_7, %c0_8] : memref<1x256xf32, #tpu.memory_space<vmem>>, vector<1x256xf32>
    %23 = vector.broadcast %22 : vector<1x256xf32> to vector<128x256xf32>
    %24 = arith.addf %21, %23 : vector<128x256xf32>
    %25 = arith.truncf %24 : vector<128x256xf32> to vector<128x256xbf16>
    %c0_9 = arith.constant 0 : index
    %c0_10 = arith.constant 0 : index
    %26 = vector.load %arg4[%c0_9, %c0_10] : memref<256x1024xbf16, #tpu.memory_space<vmem>>, vector<256x1024xbf16>
    %cst_11 = arith.constant dense<0.000000e+00> : vector<128x1024xf32>
    %27 = tpu.matmul %25, %26, %cst_11 {dimension_numbers = #tpu.dot_dimension_numbers<[1], [0], [0], [1], [0, 0, 1, 1], [], []>} : vector<128x256xbf16>, vector<256x1024xbf16>, vector<128x1024xf32> -> vector<128x1024xf32>
    %c0_12 = arith.constant 0 : index
    %c0_13 = arith.constant 0 : index
    %28 = vector.load %arg5[%c0_12, %c0_13] : memref<1x1024xf32, #tpu.memory_space<vmem>>, vector<1x1024xf32>
    %29 = vector.broadcast %28 : vector<1x1024xf32> to vector<128x1024xf32>
    %30 = arith.addf %27, %29 : vector<128x1024xf32>
    %31 = arith.truncf %30 : vector<128x1024xf32> to vector<128x1024xbf16>
    %32 = arith.negf %31 : vector<128x1024xbf16>
    %33 = math.exp %32 : vector<128x1024xbf16>
    %cst_14 = arith.constant 1.000000e+00 : bf16
    %34 = vector.broadcast %cst_14 : bf16 to vector<128x1024xbf16>
    %35 = arith.addf %34, %33 : vector<128x1024xbf16>
    %36 = arith.divf %34, %35 : vector<128x1024xbf16>
    %37 = arith.mulf %31, %36 : vector<128x1024xbf16>
    %c0_15 = arith.constant 0 : index
    %c0_16 = arith.constant 0 : index
    %38 = vector.load %arg6[%c0_15, %c0_16] : memref<1024x256xbf16, #tpu.memory_space<vmem>>, vector<1024x256xbf16>
    %cst_17 = arith.constant dense<0.000000e+00> : vector<128x256xf32>
    %39 = tpu.matmul %37, %38, %cst_17 {dimension_numbers = #tpu.dot_dimension_numbers<[1], [0], [0], [1], [0, 0, 1, 1], [], []>} : vector<128x1024xbf16>, vector<1024x256xbf16>, vector<128x256xf32> -> vector<128x256xf32>
    %c0_18 = arith.constant 0 : index
    %c0_19 = arith.constant 0 : index
    %40 = vector.load %arg7[%c0_18, %c0_19] : memref<1x256xf32, #tpu.memory_space<vmem>>, vector<1x256xf32>
    %41 = vector.broadcast %40 : vector<1x256xf32> to vector<128x256xf32>
    %42 = arith.addf %39, %41 : vector<128x256xf32>
    %c0_20 = arith.constant 0 : index
    %c0_21 = arith.constant 0 : index
    %43 = vector.load %arg8[%c0_20, %c0_21] : memref<128x256xf32, #tpu.memory_space<vmem>>, vector<128x256xf32>
    tpu.vector_store %arg8[%c0_20, %c0_21], %42 {strides = array<i32>} : memref<128x256xf32, #tpu.memory_space<vmem>>, vector<128x256xf32>,
    return
  }
  func.func @transform_0(%arg0: i32) -> (i32, i32) {
    %c0_i32 = arith.constant 0 : i32
    %c0_i32_0 = arith.constant 0 : i32
    return %arg0, %c0_i32 : i32, i32
  }
  func.func @transform_1(%arg0: i32) -> (i32, i32) {
    %c0_i32 = arith.constant 0 : i32
    %c0_i32_0 = arith.constant 0 : i32
    %c0_i32_1 = arith.constant 0 : i32
    return %c0_i32, %c0_i32_0 : i32, i32
  }
  func.func @transform_2(%arg0: i32) -> (i32, i32) {
    %c0_i32 = arith.constant 0 : i32
    %c0_i32_0 = arith.constant 0 : i32
    %c0_i32_1 = arith.constant 0 : i32
    return %c0_i32, %c0_i32_0 : i32, i32
  }
  func.func @transform_3(%arg0: i32) -> (i32, i32) {
    %c0_i32 = arith.constant 0 : i32
    %c0_i32_0 = arith.constant 0 : i32
    %c0_i32_1 = arith.constant 0 : i32
    return %c0_i32, %c0_i32_0 : i32, i32
  }
  func.func @transform_4(%arg0: i32) -> (i32, i32) {
    %c0_i32 = arith.constant 0 : i32
    %c0_i32_0 = arith.constant 0 : i32
    %c0_i32_1 = arith.constant 0 : i32
    return %c0_i32, %c0_i32_0 : i32, i32
  }
  func.func @transform_5(%arg0: i32) -> (i32, i32) {
    %c0_i32 = arith.constant 0 : i32
    %c0_i32_0 = arith.constant 0 : i32
    %c0_i32_1 = arith.constant 0 : i32
    return %c0_i32, %c0_i32_0 : i32, i32
  }
  func.func @transform_6(%arg0: i32) -> (i32, i32) {
    %c0_i32 = arith.constant 0 : i32
    %c0_i32_0 = arith.constant 0 : i32
    %c0_i32_1 = arith.constant 0 : i32
    return %c0_i32, %c0_i32_0 : i32, i32
  }
  func.func @transform_7(%arg0: i32) -> (i32, i32) {
    %c0_i32 = arith.constant 0 : i32
    %c0_i32_0 = arith.constant 0 : i32
    return %arg0, %c0_i32 : i32, i32
  }
}

</mosaic_0001>

<bundles_post_ra>
// kernel: tpu_custom_call.1
= control target key start
LH: loop header
LB: loop body
LE: loop exit
PB: predicated region body
PF: predicated region fallthrough
CT: control target
= control target key end

     0   :  { %12 = vsyncpa [#allocation3], 0  ;;  %s10286_s0 = inlined_call_operand.hbm [shape: f32[128,256], index: 0, kind: input, shape index: {}]   ;;  %s10287_s1 = inlined_call_operand.hbm [shape: f32[1,256], index: 1, kind: input, shape index: {}]   ;;  %s10288_s2 = inlined_call_operand.hbm [shape: f32[1,256], index: 2, kind: input, shape index: {}]   ;;  %s10289_s3 = inlined_call_operand.hbm [shape: bf16[256,1024], index: 3, kind: input, shape index: {}]   ;;  %s10290_s4 = inlined_call_operand.hbm [shape: f32[1,1024], index: 4, kind: input, shape index: {}]   ;;  %s10291_s5 = inlined_call_operand.hbm [shape: bf16[1024,256], index: 5, kind: input, shape index: {}]   ;;  %s10292_s6 = inlined_call_operand.vmem [shape: f32[1,256], index: 6, kind: input, shape index: {}]   ;;  %s10293_s7 = inlined_call_operand.hbm [shape: f32[128,256], index: 7, kind: output, shape index: {}]  }
   0x1   :  { %13 = vsyncpa [#allocation6], 0 }
   0x2   :  { %14 = vsyncpa [#allocation9], 0 }
   0x3   :  { %15 = vsyncpa [#allocation12], 0  ;;  %s35_s26 = sshll.u32 %s10287_s1, 4  ;;  %s36_s26 = int_to_ptr.hbm [resolvable:$true] %s35_s26 }
   0x4   :  { %16 = vsyncpa [#allocation4], 0  ;;  %s7646_s27 = smov [#allocation5]   ;;  %s56_s8 = sshll.u32 %s10289_s3, 4  ;;  %s57_s8 = int_to_ptr.hbm [resolvable:$true] %s56_s8 }
   0x5   :  { %s37_s28 = sshll.u32 %s7646_s27, 4  ;;  %s7647_s9 = smov [#allocation8]   ;;  %s38_s28 = int_to_ptr.vmem [resolvable:$true] %s37_s28 }
   0x6   :  { %40 = dma.hbm_to_vmem [thread:$0]  %s36_s26, 32, %s38_s28, [#allocation6]  }
   0x7   :  { %s58_s10 = sshll.u32 %s7647_s9, 4  ;;  %s7648_s11 = smov 512   ;;  %s59_s10 = int_to_ptr.vmem [resolvable:$true] %s58_s10 }
   0x8   :  { %s7649_s12 = smov 32   ;;  %s21_s1 = sshll.u32 %s10286_s0, 4  ;;  %s22_s1 = int_to_ptr.hbm [resolvable:$true] %s21_s1 }
   0x9   :  { %64 = dma.hbm_to_vmem [thread:$0]  %s57_s8, 16384, %s59_s10, [#allocation9], %s7648_s11, %s7648_s11, %s7649_s12  }
   0xa   :  { %s7650_s15 = smov [#allocation2]   ;;  %s46_s3 = sshll.u32 %s10288_s2, 4  ;;  %s47_s3 = int_to_ptr.hbm [resolvable:$true] %s46_s3 }
   0xb   :  { %s23_s16 = sshll.u32 %s7650_s15, 4  ;;  %s7651_s19 = smov 256   ;;  %s24_s16 = int_to_ptr.vmem [resolvable:$true] %s23_s16 }
   0xc   :  { %s7652_s20 = smov 16   ;;  %s7653_s21 = smov [#allocation7]  }
   0xd   :  { %29 = dma.hbm_to_vmem [thread:$0]  %s22_s1, 4096, %s24_s16, [#allocation3], %s7651_s19, %s7651_s19, %s7652_s20  }
   0xe   :  { %s48_s22 = sshll.u32 %s7653_s21, 4  ;;  %s70_s0 = sshll.u32 %s10290_s4, 4  ;;  %s49_s22 = int_to_ptr.vmem [resolvable:$true] %s48_s22  ;;  %s71_s0 = int_to_ptr.hbm [resolvable:$true] %s70_s0 }
   0xf   :  { %51 = dma.hbm_to_vmem [thread:$0]  %s47_s3, 32, %s49_s22, [#allocation6]  }
  0x10   :  { %s80_s2 = sshll.u32 %s10291_s5, 4  ;;  %s7654_s27 = smov [#allocation10]   ;;  %s81_s2 = int_to_ptr.hbm [resolvable:$true] %s80_s2 }
  0x11   :  { %s72_s28 = sshll.u32 %s7654_s27, 4  ;;  %s7655_s29 = smov [#allocation11]   ;;  %s73_s28 = int_to_ptr.vmem [resolvable:$true] %s72_s28 }
  0x12   :  { %75 = dma.hbm_to_vmem [thread:$0]  %s71_s0, 128, %s73_s28, [#allocation9]  }
  0x13   :  { %s82_s30 = sshll.u32 %s7655_s29, 4  ;;  %s7656_s8 = smov 128   ;;  %s83_s30 = int_to_ptr.vmem [resolvable:$true] %s82_s30 }
  0x14   :  { %s7657_s9 = smov 8  }
  0x15   :  { %88 = dma.hbm_to_vmem [thread:$0]  %s81_s2, 16384, %s83_s30, [#allocation12], %s7656_s8, %s7656_s8, %s7657_s9  }
  0x16   :  { %7636 = dma.done.wait [#allocation3], 4096  }
  0x17   :  { %7637 = vsyncadd [#allocation3], 4294963200 }
  0x18   :  { %7638 = dma.done.wait [#allocation6], 64  }
  0x19   :  { %7639 = vsyncadd [#allocation6], 4294967232 }
  0x1a   :  { %7640 = dma.done.wait [#allocation9], 16512  }
  0x1b   :  { %7641 = vsyncadd [#allocation9], 4294950784 }
  0x1c   :  { %7642 = dma.done.wait [#allocation12], 16384  }
  0x1d   :  { %7643 = vsyncadd [#allocation12], 4294950912  ;;  %v7722_v0 = vld [vmem:[#allocation2 + $0x20] sm:$0xff]  ;;  %v7724_v1 = vld [vmem:[#allocation2 + $0x28] sm:$0xff]  ;;  %v7658_v27 = vmov 256.0   ;;  %s5607_s1 = sshll.u32 %s10293_s7, 4  ;;  %s5608_s1 = int_to_ptr.hbm [resolvable:$true] %s5607_s1 }
  0x1e   :  { %v116_v2 = vld [vmem:[#allocation2] sm:$0xff]  ;;  %v154_v3 = vadd.f32 %v7724_v1, %v7722_v0  ;;  %v117_v4 = vld [vmem:[#allocation2 + $0x8] sm:$0xff]  ;;  %v122_v8 = vld [vmem:[#allocation2 + $0x30] sm:$0xff]  ;;  %6918 = vrcp.f32 %v7658_v27 }
  0x1f   :  { %v148_v5 = vadd.f32 %v117_v4, %v116_v2  ;;  %v124_v6 = vld [vmem:[#allocation2 + $0x40] sm:$0xff]  ;;  %v125_v7 = vld [vmem:[#allocation2 + $0x48] sm:$0xff]  ;;  %v123_v9 = vld [vmem:[#allocation2 + $0x38] sm:$0xff] }
  0x20   :  { %155 = vadd.xlane.f32.xlu1 %v154_v3  ;;  %v160_v10 = vadd.f32 %v125_v7, %v124_v6  ;;  %v118_v11 = vld [vmem:[#allocation2 + $0x10] sm:$0xff]  ;;  %v119_v12 = vld [vmem:[#allocation2 + $0x18] sm:$0xff]  ;;  %v157_v13 = vadd.f32 %v123_v9, %v122_v8  ;;  %v7738_v20 = vld [vmem:[#allocation2 + $0x60] sm:$0xff] }
  0x21   :  { %149 = vadd.xlane.f32.xlu0 %v148_v5  ;;  %v7728_v14 = vld [vmem:[#allocation2 + $0x50] sm:$0xff]  ;;  %v7730_v15 = vld [vmem:[#allocation2 + $0x58] sm:$0xff]  ;;  %v151_v16 = vadd.f32 %v119_v12, %v118_v11  ;;  %v7740_v21 = vld [vmem:[#allocation2 + $0x68] sm:$0xff] }
  0x22   :  { %161 = vadd.xlane.f32.xlu2 %v160_v10  ;;  %v163_v17 = vadd.f32 %v7730_v15, %v7728_v14  ;;  %v7734_v18 = vld [vmem:[#allocation2 + $0x70] sm:$0xff]  ;;  %v7736_v19 = vld [vmem:[#allocation2 + $0x78] sm:$0xff]  ;;  %v166_v23 = vadd.f32 %v7740_v21, %v7738_v20  ;;  %v7746_v24 = vld [vmem:[#allocation2 + $0x80] sm:$0xff] }
  0x23   :  { %v169_v22 = vadd.f32 %v7736_v19, %v7734_v18  ;;  %v7748_v25 = vld [vmem:[#allocation2 + $0x88] sm:$0xff]  ;;  %v7765_v47 = vld [vmem:[#allocation2 + $0x90] sm:$0xff]  ;;  %v7767_v48 = vld [vmem:[#allocation2 + $0x98] sm:$0xff] }
  0x24   :  { %v172_v26 = vadd.f32 %v7748_v25, %v7746_v24  ;;  %v6919_v28 = vpop.eup %6918  ;;  %v175_v55 = vadd.f32 %v7767_v48, %v7765_v47  ;;  %v7829_v27 = vld [vmem:[#allocation2 + $0xb0] sm:$0xff] }
  0x25   :  { %v197_v29 = vmul.f32 256.0, %v6919_v28  ;;  %vm201_vm0 = vweird.f32 %v6919_v28 }
  0x27   :  { %v198_v30 = vsub.f32 1.0, %v197_v29 }
  0x28   :  { %158 = vadd.xlane.f32.xlu1 %v157_v13 }
  0x29   :  { %152 = vadd.xlane.f32.xlu0 %v151_v16  ;;  %v199_v31 = vmul.f32 %v6919_v28, %v198_v30 }
  0x2a   :  { %164 = vadd.xlane.f32.xlu2 %v163_v17 }
  0x2b   :  { %v200_v32 = vadd.f32 %v6919_v28, %v199_v31 }
  0x2d   :  { %v7752_v33 = vsel %vm201_vm0, %v6919_v28, %v200_v32  ;;  %v7831_v28 = vld [vmem:[#allocation2 + $0xb8] sm:$0xff] }
  0x30   :  { %170 = vadd.xlane.f32.xlu1 %v169_v22 }
  0x31   :  { %167 = vadd.xlane.f32.xlu0 %v166_v23  ;;  %v7821_v23 = vld [vmem:[#allocation2 + $0xd0] sm:$0xff] }
  0x38   :  { %173 = vadd.xlane.f32.xlu1 %v172_v26  ;;  %v7823_v26 = vld [vmem:[#allocation2 + $0xd8] sm:$0xff] }
  0x39   :  { %v187_v29 = vadd.f32 %v7823_v26, %v7821_v23 }
  0x93   :  { %v156_v34 = vpop.xlane.xlu1 %155 }
  0x94   :  { %v150_v35 = vpop.xlane.xlu0 %149  ;;  %v205_v49 = vmul.f32 %v7752_v33, %v156_v34 }
  0x95   :  { %v203_v36 = vmul.f32 %v7752_v33, %v150_v35  ;;  %v162_v39 = vpop.xlane.xlu2 %161  ;;  %v181_v35 = vadd.f32 %v7831_v28, %v7829_v27 }
  0x96   :  { %v207_v46 = vmul.f32 %v7752_v33, %v162_v39  ;;  %v7790_v60 = vsub.f32 %v7722_v0, %v205_v49  ;;  %v7793_v61 = vsub.f32 %v7724_v1, %v205_v49  ;;  %v7844_v39 = vld [vmem:[#allocation2 + $0xe0] sm:$0xff] }
  0x97   :  { %v7755_v37 = vsub.f32 %v116_v2, %v203_v36  ;;  %v7757_v38 = vsub.f32 %v117_v4, %v203_v36 }
  0x98   :  { %v7781_v56 = vsub.f32 %v124_v6, %v207_v46  ;;  %v7783_v57 = vsub.f32 %v125_v7, %v207_v46  ;;  %v255_v6 = vmul.f32 %v7790_v60, %v7790_v60  ;;  %v256_v7 = vmul.f32 %v7793_v61, %v7793_v61 }
  0x99   :  { %v251_v40 = vmul.f32 %v7755_v37, %v7755_v37  ;;  %v252_v41 = vmul.f32 %v7757_v38, %v7757_v38 }
  0x9a   :  { %v259_v5 = vmul.f32 %v7781_v56, %v7781_v56  ;;  %v260_v0 = vmul.f32 %v7783_v57, %v7783_v57  ;;  %v289_v16 = vadd.f32 %v256_v7, %v255_v6  ;;  %v6105_v6 = vld [vmem:[#allocation8 + $0x3c0] sm:$0xf] }
  0x9b   :  { %v159_v42 = vpop.xlane.xlu1 %158  ;;  %v283_v43 = vadd.f32 %v252_v41, %v251_v40  ;;  %v7846_v40 = vld [vmem:[#allocation2 + $0xe8] sm:$0xff]  ;;  %v7852_v41 = vld [vmem:[#allocation2 + $0xc0] sm:$0xff] }
  0x9c   :  { %v206_v44 = vmul.f32 %v7752_v33, %v159_v42  ;;  %v153_v45 = vpop.xlane.xlu0 %152  ;;  %v295_v10 = vadd.f32 %v260_v0, %v259_v5  ;;  %v7854_v42 = vld [vmem:[#allocation2 + $0xc8] sm:$0xff] }
  0x9d   :  { %v204_v50 = vmul.f32 %v7752_v33, %v153_v45  ;;  %284 = vadd.xlane.f32.xlu2 %v283_v43  ;;  %v165_v3 = vpop.xlane.xlu2 %164  ;;  %v190_v43 = vadd.f32 %v7846_v40, %v7844_v39  ;;  %v184_v46 = vadd.f32 %v7854_v42, %v7852_v41 }
  0x9e   :  { %v7771_v51 = vsub.f32 %v122_v8, %v206_v44  ;;  %v7773_v52 = vsub.f32 %v123_v9, %v206_v44  ;;  %v208_v1 = vmul.f32 %v7752_v33, %v165_v3  ;;  %v7808_v8 = vld [vmem:[#allocation2 + $0xa0] sm:$0xff]  ;;  %v7810_v9 = vld [vmem:[#allocation2 + $0xa8] sm:$0xff] }
  0x9f   :  { %v7775_v53 = vsub.f32 %v118_v11, %v204_v50  ;;  %v7777_v54 = vsub.f32 %v119_v12, %v204_v50  ;;  %v178_v13 = vadd.f32 %v7810_v9, %v7808_v8 }
  0xa0   :  { %v257_v58 = vmul.f32 %v7771_v51, %v7771_v51  ;;  %v258_v59 = vmul.f32 %v7773_v52, %v7773_v52  ;;  %v7813_v11 = vsub.f32 %v7728_v14, %v208_v1  ;;  %v7816_v12 = vsub.f32 %v7730_v15, %v208_v1  ;;  %v5849_v1 = vld [vmem:[#allocation8 + $0x1c0] sm:$0xf] }
  0xa1   :  { %v253_v62 = vmul.f32 %v7775_v53, %v7775_v53  ;;  %v254_v63 = vmul.f32 %v7777_v54, %v7777_v54 }
  0xa2   :  { %v292_v2 = vadd.f32 %v258_v59, %v257_v58  ;;  %v261_v14 = vmul.f32 %v7813_v11, %v7813_v11  ;;  %v262_v15 = vmul.f32 %v7816_v12, %v7816_v12  ;;  %v7871_v59 = vld [vmem:[#allocation2 + $0xf0] sm:$0xff] }
  0xa3   :  { %v286_v4 = vadd.f32 %v254_v63, %v253_v62  ;;  %v171_v30 = vpop.xlane.xlu1 %170 }
  0xa4   :  { %293 = vadd.xlane.f32.xlu1 %v292_v2  ;;  %v168_v17 = vpop.xlane.xlu0 %167  ;;  %v298_v34 = vadd.f32 %v262_v15, %v261_v14  ;;  %v210_v36 = vmul.f32 %v7752_v33, %v171_v30  ;;  %v6107_v14 = vld [vmem:[#allocation8 + $0x3e0] sm:$0xf0]  ;;  %v6699_v30 = vld [vmem:[#allocation8 + $0x19c] sm:$0xf0] }
  0xa5   :  { %176 = vadd.xlane.f32.xlu2 %v175_v55  ;;  %287 = vadd.xlane.f32.xlu0 %v286_v4  ;;  %v209_v22 = vmul.f32 %v7752_v33, %v168_v17 }
  0xa6   :  { %v7859_v44 = vsub.f32 %v7734_v18, %v210_v36  ;;  %v7862_v45 = vsub.f32 %v7736_v19, %v210_v36  ;;  %v7873_v19 = vld [vmem:[#allocation2 + $0xf8] sm:$0xff]  ;;  %v6763_v36 = vld [vmem:[#allocation8 + $0x39c] sm:$0xf0] }
  0xa7   :  { %v7836_v31 = vsub.f32 %v7738_v20, %v209_v22  ;;  %v7839_v32 = vsub.f32 %v7740_v21, %v209_v22  ;;  %v193_v3 = vadd.f32 %v7873_v19, %v7871_v59  ;;  %v6767_v22 = vld [vmem:[#allocation8 + $0x3c4] sm:$0xf] }
  0xa8   :  { %v265_v58 = vmul.f32 %v7859_v44, %v7859_v44  ;;  %v266_v18 = vmul.f32 %v7862_v45, %v7862_v45  ;;  %v6110_v15 = vor.u32 %v6767_v22, %v6107_v14  ;;  %v6747_v22 = vld [vmem:[#allocation8 + $0x31c] sm:$0xf0]  ;;  %v6679_v14 = vld [vmem:[#allocation8 + $0x104] sm:$0xf] }
  0xa9   :  { %v263_v20 = vmul.f32 %v7836_v31, %v7836_v31  ;;  %v264_v21 = vmul.f32 %v7839_v32, %v7839_v32 }
  0xaa   :  { %v304_v2 = vadd.f32 %v266_v18, %v265_v58  ;;  %1580 = vmatpush.bf16.msra.mxu3 %v6110_v15  ;;  %v5785_v58 = vld [vmem:[#allocation8 + $0x140] sm:$0xf]  ;;  %v5755_v15 = vld [vmem:[#allocation8 + $0x120] sm:$0xf0] }
  0xab   :  { %v301_v49 = vadd.f32 %v264_v21, %v263_v20  ;;  %v174_v50 = vpop.xlane.xlu1 %173  ;;  %v6695_v20 = vld [vmem:[#allocation8 + $0x184] sm:$0xf]  ;;  %v6691_v18 = vld [vmem:[#allocation8 + $0x15c] sm:$0xf0] }
  0xac   :  { %296 = vadd.xlane.f32.xlu1 %v295_v10  ;;  %v211_v55 = vmul.f32 %v7752_v33, %v174_v50  ;;  %v6703_v10 = vld [vmem:[#allocation8 + $0x1c4] sm:$0xf] }
  0xad   :  { %179 = vadd.xlane.f32.xlu2 %v178_v13  ;;  %290 = vadd.xlane.f32.xlu0 %v289_v16  ;;  %v5851_v13 = vld [vmem:[#allocation8 + $0x1e0] sm:$0xf0] }
  0xae   :  { %v7876_v62 = vsub.f32 %v7746_v24, %v211_v55  ;;  %v7879_v63 = vsub.f32 %v7748_v25, %v211_v55  ;;  %v6707_v24 = vld [vmem:[#allocation8 + $0x1dc] sm:$0xf0]  ;;  %v5854_v17 = vor.u32 %v6703_v10, %v5851_v13  ;;  %v5819_v21 = vld [vmem:[#allocation8 + $0x1a0] sm:$0xf0] }
  0xaf   :  { %v5850_v7 = vor.u32 %v6707_v24, %v5849_v1  ;;  %v6771_v25 = vld [vmem:[#allocation8 + $0x3dc] sm:$0xf0]  ;;  %v6075_v50 = vld [vmem:[#allocation8 + $0x3a0] sm:$0xf0] }
  0xb0   :  { %v267_v4 = vmul.f32 %v7876_v62, %v7876_v62  ;;  %v268_v5 = vmul.f32 %v7879_v63, %v7879_v63  ;;  %v6106_v16 = vor.u32 %v6771_v25, %v6105_v6  ;;  %1531 = vmatpush.bf16.msra.mxu2 %v5854_v17  ;;  %v6751_v6 = vld [vmem:[#allocation8 + $0x344] sm:$0xf]  ;;  %v5753_v10 = vld [vmem:[#allocation8 + $0x100] sm:$0xf] }
  0xb1   :  { %1433 = vmatpush.bf16.msra.mxu0 %v5850_v7  ;;  %v6043_v7 = vld [vmem:[#allocation8 + $0x360] sm:$0xf0]  ;;  %v6683_v13 = vld [vmem:[#allocation8 + $0x11c] sm:$0xf0] }
  0xb2   :  { %v307_v0 = vadd.f32 %v268_v5, %v267_v4  ;;  %1482 = vmatpush.bf16.msra.mxu1 %v6106_v16  ;;  %v6755_v4 = vld [vmem:[#allocation8 + $0x35c] sm:$0xf0]  ;;  %v6687_v5 = vld [vmem:[#allocation8 + $0x144] sm:$0xf]  ;;  %v6046_v25 = vor.u32 %v6751_v6, %v6043_v7  ;;  %v5754_v17 = vor.u32 %v6683_v13, %v5753_v10 }
  0xb3   :  { %v6009_v16 = vld [vmem:[#allocation8 + $0x300] sm:$0xf]  ;;  %v6663_v7 = vld [vmem:[#allocation8 + $0x84] sm:$0xf] }
  0xb4   :  { %188 = vadd.xlane.f32.xlu1 %v187_v29  ;;  %v5817_v29 = vld [vmem:[#allocation8 + $0x180] sm:$0xf] }
  0xb5   :  { %299 = vadd.xlane.f32.xlu2 %v298_v34  ;;  %182 = vadd.xlane.f32.xlu0 %v181_v35  ;;  %v6073_v34 = vld [vmem:[#allocation8 + $0x380] sm:$0xf]  ;;  %v5818_v35 = vor.u32 %v6699_v30, %v5817_v29  ;;  %v6010_v29 = vor.u32 %v6747_v22, %v6009_v16  ;;  %v5758_v30 = vor.u32 %v6679_v14, %v5755_v15  ;;  %v6727_v16 = vld [vmem:[#allocation8 + $0x284] sm:$0xf] }
  0xb6   :  { %v6731_v6 = vld [vmem:[#allocation8 + $0x29c] sm:$0xf0] }
  0xb7   :  { %1434 = vmatpush.bf16.msra.mxu0 %v5818_v35  ;;  %v6011_v35 = vld [vmem:[#allocation8 + $0x320] sm:$0xf0]  ;;  %v5657_v15 = vld [vmem:[#allocation8 + $0x40] sm:$0xf] }
  0xbc   :  { %191 = vadd.xlane.f32.xlu1 %v190_v43  ;;  %v6074_v43 = vor.u32 %v6763_v36, %v6073_v34  ;;  %v6743_v34 = vld [vmem:[#allocation8 + $0x304] sm:$0xf] }
  0xbd   :  { %185 = vadd.xlane.f32.xlu0 %v184_v46  ;;  %302 = vadd.xlane.f32.xlu2 %v301_v49  ;;  %v5822_v46 = vor.u32 %v6695_v20, %v5819_v21  ;;  %v6759_v49 = vld [vmem:[#allocation8 + $0x384] sm:$0xf]  ;;  %v6014_v36 = vor.u32 %v6743_v34, %v6011_v35  ;;  %v5721_v20 = vld [vmem:[#allocation8 + $0xc0] sm:$0xf] }
  0xbe   :  { %v6078_v55 = vor.u32 %v6759_v49, %v6075_v50  ;;  %1483 = vmatpush.bf16.msra.mxu1 %v6074_v43  ;;  %v6675_v21 = vld [vmem:[#allocation8 + $0xdc] sm:$0xf0]  ;;  %v6671_v50 = vld [vmem:[#allocation8 + $0xc4] sm:$0xf] }
  0xbf   :  { %1532 = vmatpush.bf16.msra.mxu2 %v5822_v46  ;;  %v5977_v43 = vld [vmem:[#allocation8 + $0x2c0] sm:$0xf]  ;;  %v5722_v46 = vor.u32 %v6675_v21, %v5721_v20  ;;  %v6655_v20 = vld [vmem:[#allocation8 + $0x44] sm:$0xf] }
  0xc0   :  { %1581 = vmatpush.bf16.msra.mxu3 %v6078_v55  ;;  %v6739_v49 = vld [vmem:[#allocation8 + $0x2dc] sm:$0xf0]  ;;  %v5723_v55 = vld [vmem:[#allocation8 + $0xe0] sm:$0xf0] }
  0xc1   :  { %v5659_v21 = vld [vmem:[#allocation8 + $0x60] sm:$0xf0] }
  0xc4   :  { %1582 = vmatpush.bf16.msra.mxu3 %v6046_v25  ;;  %v5691_v25 = vld [vmem:[#allocation8 + $0xa0] sm:$0xf0] }
  0xc5   :  { %305 = vadd.xlane.f32.xlu0 %v304_v2  ;;  %194 = vadd.xlane.f32.xlu2 %v193_v3  ;;  %v6041_v2 = vld [vmem:[#allocation8 + $0x340] sm:$0xf]  ;;  %v5786_v3 = vor.u32 %v6691_v18, %v5785_v58  ;;  %v5978_v58 = vor.u32 %v6739_v49, %v5977_v43  ;;  %v5726_v18 = vor.u32 %v6671_v50, %v5723_v55  ;;  %v6719_v49 = vld [vmem:[#allocation8 + $0x244] sm:$0xf] }
  0xc6   :  { %v6042_v1 = vor.u32 %v6755_v4, %v6041_v2  ;;  %v6735_v2 = vld [vmem:[#allocation8 + $0x2c4] sm:$0xf]  ;;  %v5694_v13 = vor.u32 %v6663_v7, %v5691_v25 }
  0xc7   :  { %1435 = vmatpush.bf16.msra.mxu0 %v5786_v3  ;;  %v5979_v3 = vld [vmem:[#allocation8 + $0x2e0] sm:$0xf0] }
  0xc8   :  { %1484 = vmatpush.bf16.msra.mxu1 %v6042_v1  ;;  %1583 = vmatpush.bf16.msra.mxu3 %v6014_v36  ;;  %v5982_v4 = vor.u32 %v6735_v2, %v5979_v3  ;;  %v5945_v1 = vld [vmem:[#allocation8 + $0x280] sm:$0xf]  ;;  %v5915_v50 = vld [vmem:[#allocation8 + $0x260] sm:$0xf0] }
  0xc9   :  { %v5946_v10 = vor.u32 %v6731_v6, %v5945_v1  ;;  %v6723_v36 = vld [vmem:[#allocation8 + $0x25c] sm:$0xf0] }
  0xcb   :  { %1436 = vmatpush.bf16.msra.mxu0 %v5754_v17  ;;  %v5947_v17 = vld [vmem:[#allocation8 + $0x2a0] sm:$0xf0] }
  0xcc   :  { %1485 = vmatpush.bf16.msra.mxu1 %v6010_v29  ;;  %1584 = vmatpush.bf16.msra.mxu3 %v5982_v4  ;;  %v5950_v22 = vor.u32 %v6727_v16, %v5947_v17  ;;  %v6659_v29 = vld [vmem:[#allocation8 + $0x5c] sm:$0xf0] }
  0xcd   :  { %308 = vadd.xlane.f32.xlu0 %v307_v0  ;;  %v5787_v0 = vld [vmem:[#allocation8 + $0x160] sm:$0xf0]  ;;  %v5658_v35 = vor.u32 %v6659_v29, %v5657_v15 }
  0xce   :  { %v5790_v24 = vor.u32 %v6687_v5, %v5787_v0  ;;  %v5689_v5 = vld [vmem:[#allocation8 + $0x80] sm:$0xf] }
  0xcf   :  { %1437 = vmatpush.bf16.msra.mxu0 %v5722_v46  ;;  %v6667_v0 = vld [vmem:[#allocation8 + $0x9c] sm:$0xf0]  ;;  %v5662_v46 = vor.u32 %v6655_v20, %v5659_v21 }
  0xd0   :  { %1533 = vmatpush.bf16.msra.mxu2 %v5790_v24  ;;  %1486 = vmatpush.bf16.msra.mxu1 %v5978_v58  ;;  %v5690_v24 = vor.u32 %v6667_v0, %v5689_v5  ;;  %v5918_v58 = vor.u32 %v6719_v49, %v5915_v50  ;;  %v6711_v50 = vld [vmem:[#allocation8 + $0x204] sm:$0xf] }
  0xd1   :  { %1585 = vmatpush.bf16.msra.mxu3 %v5950_v22  ;;  %v6651_v22 = vld [vmem:[#allocation8 + $0x1c] sm:$0xf0] }
  0xd3   :  { %1438 = vmatpush.bf16.msra.mxu0 %v5690_v24 }
  0xd4   :  { %1534 = vmatpush.bf16.msra.mxu2 %v5758_v30  ;;  %1487 = vmatpush.bf16.msra.mxu1 %v5946_v10  ;;  %v5913_v30 = vld [vmem:[#allocation8 + $0x240] sm:$0xf] }
  0xd5   :  { %v5914_v43 = vor.u32 %v6723_v36, %v5913_v30  ;;  %1586 = vmatpush.bf16.msra.mxu3 %v5918_v58  ;;  %v6715_v30 = vld [vmem:[#allocation8 + $0x21c] sm:$0xf0]  ;;  %v5883_v58 = vld [vmem:[#allocation8 + $0x220] sm:$0xf0] }
  0xd7   :  { %1439 = vmatpush.bf16.msra.mxu0 %v5658_v35  ;;  %v5627_v35 = vld [vmem:[#allocation8 + $0x20] sm:$0xf0] }
  0xd8   :  { %1535 = vmatpush.bf16.msra.mxu2 %v5726_v18  ;;  %1488 = vmatpush.bf16.msra.mxu1 %v5914_v43 }
  0xdc   :  { %1536 = vmatpush.bf16.msra.mxu2 %v5694_v13 }
  0xe0   :  { %1537 = vmatpush.bf16.msra.mxu2 %v5662_v46 }
 0x110   :  { %v285_v14 = vpop.xlane.xlu2 %284 }
 0x111   :  { %v331_v34 = vmul.f32 %v285_v14, %v7752_v33  ;;  %v5881_v14 = vld [vmem:[#allocation8 + $0x200] sm:$0xf] }
 0x112   :  { %v5882_v46 = vor.u32 %v6715_v30, %v5881_v14 }
 0x113   :  { %v7888_v55 = vadd.f32 1e-05, %v331_v34  ;;  %v6647_v34 = vld [vmem:[#allocation8 + $0x4] sm:$0xf] }
 0x114   :  { %v5630_v49 = vor.u32 %v6647_v34, %v5627_v35  ;;  %1489 = vmatpush.bf16.msra.mxu1 %v5882_v46 }
 0x115   :  { %6920 = vrsqrt.f32 %v7888_v55  ;;  %vm369_vm2 = vweird.f32 %v7888_v55 }
 0x116   :  { %1538 = vmatpush.bf16.msra.mxu2 %v5630_v49  ;;  %v593_v49 = vld [vmem:[#allocation7] sm:$0x3] }
 0x117   :  { %v294_v18 = vpop.xlane.xlu1 %293 }
 0x118   :  { %v334_v2 = vmul.f32 %v294_v18, %v7752_v33  ;;  %v177_v3 = vpop.xlane.xlu2 %176  ;;  %v288_v4 = vpop.xlane.xlu0 %287 }
 0x119   :  { %v212_v5 = vmul.f32 %v7752_v33, %v177_v3  ;;  %v332_v0 = vmul.f32 %v288_v4, %v7752_v33  ;;  %v5886_v3 = vor.u32 %v6711_v50, %v5883_v58 }
 0x11a   :  { %v7894_v1 = vadd.f32 1e-05, %v334_v2 }
 0x11b   :  { %v6921_v24 = vpop.eup %6920  ;;  %v7897_v6 = vsub.f32 %v7765_v47, %v212_v5  ;;  %v7900_v7 = vsub.f32 %v7767_v48, %v212_v5  ;;  %v7902_v25 = vadd.f32 1e-05, %v332_v0  ;;  %v5625_v47 = vld [vmem:[#allocation8] sm:$0xf]  ;;  %1587 = vmatpush.bf16.msra.mxu3 %v5886_v3 }
 0x11c   :  { %v364_v10 = vmul.f32 %v6921_v24, %v7888_v55  ;;  %6922 = vrsqrt.f32 %v7894_v1  ;;  %v5626_v29 = vor.u32 %v6651_v22, %v5625_v47  ;;  %vm370_vm1 = vweird.f32 %v6921_v24 }
 0x11d   :  { %6924 = vrsqrt.f32 %v7902_v25  ;;  %v269_v13 = vmul.f32 %v7897_v6, %v7897_v6  ;;  %v270_v16 = vmul.f32 %v7900_v7, %v7900_v7  ;;  %vm371_vm3 = vmor %vm369_vm2, %vm370_vm1  ;;  %vm379_vm5 = vweird.f32 %v7902_v25 }
 0x11e   :  { %v365_v17 = vmul.f32 %v6921_v24, %v364_v10  ;;  %1440 = vmatpush.bf16.msra.mxu0 %v5626_v29  ;;  %vm399_vm6 = vweird.f32 %v7894_v1 }
 0x11f   :  { %v297_v48 = vpop.xlane.xlu1 %296  ;;  %v310_v15 = vadd.f32 %v270_v16, %v269_v13 }
 0x120   :  { %v366_v36 = vmul.f32 0.5, %v365_v17  ;;  %v335_v20 = vmul.f32 %v297_v48, %v7752_v33  ;;  %v180_v21 = vpop.xlane.xlu2 %179  ;;  %v291_v43 = vpop.xlane.xlu0 %290 }
 0x121   :  { %v213_v18 = vmul.f32 %v7752_v33, %v180_v21  ;;  %v333_v2 = vmul.f32 %v291_v43, %v7752_v33  ;;  %311 = vadd.xlane.f32.xlu1 %v310_v15 }
 0x122   :  { %v7914_v4 = vpop.eup %6922  ;;  %v367_v5 = vsub.f32 1.5, %v366_v36  ;;  %v7916_v0 = vadd.f32 1e-05, %v335_v20 }
 0x123   :  { %v6925_v10 = vpop.eup %6924  ;;  %v394_v13 = vmul.f32 %v7914_v4, %v7894_v1  ;;  %v7921_v16 = vsub.f32 %v7808_v8, %v213_v18  ;;  %v7924_v17 = vsub.f32 %v7810_v9, %v213_v18  ;;  %v7929_v48 = vadd.f32 1e-05, %v333_v2  ;;  %v555_v9 = vld [vmem:[#allocation5] sm:$0x3] }
 0x124   :  { %v368_v47 = vmul.f32 %v6921_v24, %v367_v5  ;;  %v374_v22 = vmul.f32 %v6925_v10, %v7902_v25  ;;  %6926 = vrsqrt.f32 %v7916_v0  ;;  %v7938_v46 = vperm.slane %v555_v9, 0 }
 0x125   :  { %v395_v14 = vmul.f32 %v7914_v4, %v394_v13  ;;  %v271_v15 = vmul.f32 %v7921_v16, %v7921_v16  ;;  %v272_v8 = vmul.f32 %v7924_v17, %v7924_v17  ;;  %6928 = vrsqrt.f32 %v7929_v48 }
 0x126   :  { %v375_v29 = vmul.f32 %v6925_v10, %v374_v22  ;;  %v372_v30 = vsel %vm371_vm3, %v6921_v24, %v368_v47  ;;  %vm380_vm4 = vweird.f32 %v6925_v10  ;;  %v7941_v18 = vperm.slane %v555_v9, 1 }
 0x127   :  { %v313_v36 = vadd.f32 %v272_v8, %v271_v15  ;;  %v396_v20 = vmul.f32 0.5, %v395_v14  ;;  %v189_v21 = vpop.xlane.xlu1 %188  ;;  %v523_v50 = vmul.f32 %v372_v30, %v7755_v37  ;;  %v524_v24 = vmul.f32 %v372_v30, %v7757_v38  ;;  %vm381_vm7 = vmor %vm379_vm5, %vm380_vm4 }
 0x128   :  { %v376_v34 = vmul.f32 0.5, %v375_v29  ;;  %v300_v55 = vpop.xlane.xlu2 %299  ;;  %v183_v35 = vpop.xlane.xlu0 %182  ;;  %v7949_v47 = vperm.slane %v593_v49, 0  ;;  %v7951_v22 = vperm.slane %v593_v49, 1  ;;  %v216_v29 = vmul.f32 %v7752_v33, %v189_v21 }
 0x129   :  { %v336_v43 = vmul.f32 %v300_v55, %v7752_v33  ;;  %314 = vadd.xlane.f32.xlu2 %v313_v36  ;;  %v397_v37 = vsub.f32 1.5, %v396_v20  ;;  %v561_v14 = vmul.f32 %v7938_v46, %v523_v50  ;;  %v562_v25 = vmul.f32 %v7941_v18, %v524_v24 }
 0x12a   :  { %v377_v58 = vsub.f32 1.5, %v376_v34  ;;  %v7944_v2 = vpop.eup %6926  ;;  %vm400_vm8 = vweird.f32 %v7914_v4  ;;  %v214_v49 = vmul.f32 %v7752_v33, %v183_v35  ;;  %vm389_vm10 = vweird.f32 %v7929_v48 }
 0x12b   :  { %v7947_v5 = vadd.f32 1e-05, %v336_v43  ;;  %v6929_v13 = vpop.eup %6928  ;;  %v404_v30 = vmul.f32 %v7944_v2, %v7916_v0  ;;  %v398_v36 = vmul.f32 %v7914_v4, %v397_v37  ;;  %v599_v43 = vadd.f32 %v7949_v47, %v561_v14  ;;  %vm401_vm9 = vmor %vm399_vm6, %vm400_vm8 }
 0x12c   :  { %v378_v3 = vmul.f32 %v6925_v10, %v377_v58  ;;  %v384_v38 = vmul.f32 %v6929_v13, %v7929_v48  ;;  %v600_v50 = vadd.f32 %v7951_v22, %v562_v25  ;;  %vm390_vm11 = vweird.f32 %v6929_v13 }
 0x12d   :  { %6930 = vrsqrt.f32 %v7947_v5  ;;  %v405_v14 = vmul.f32 %v7944_v2, %v404_v30  ;;  %v7994_v30 = vsub.f32 %v7831_v28, %v214_v49  ;;  %vm391_vm12 = vmor %vm389_vm10, %vm390_vm11  ;;  %vm419_vm13 = vweird.f32 %v7947_v5 }
 0x12e   :  { %v382_v15 = vsel %vm381_vm7, %v6925_v10, %v378_v3  ;;  %v385_v34 = vmul.f32 %v6929_v13, %v384_v38  ;;  %v7986_v38 = vsub.f32 %v7823_v26, %v216_v29  ;;  %vm409_vm15 = vweird.f32 %v7916_v0 }
 0x12f   :  { %v525_v8 = vmul.f32 %v382_v15, %v7775_v53  ;;  %v526_v9 = vmul.f32 %v382_v15, %v7777_v54  ;;  %v7971_v54 = vsub.f32 %v7821_v23, %v216_v29  ;;  %v192_v3 = vpop.xlane.xlu1 %191  ;;  %v402_v23 = vsel %vm401_vm9, %v7914_v4, %v398_v36 }
 0x130   :  { %v303_v55 = vpop.xlane.xlu2 %302  ;;  %v186_v10 = vpop.xlane.xlu0 %185  ;;  %v386_v53 = vmul.f32 0.5, %v385_v34  ;;  %v217_v48 = vmul.f32 %v7752_v33, %v192_v3  ;;  %v530_v28 = vmul.f32 %v402_v23, %v7773_v52  ;;  %vm410_vm0 = vweird.f32 %v7944_v2 }
 0x131   :  { %v563_v20 = vmul.f32 %v7938_v46, %v525_v8  ;;  %v564_v21 = vmul.f32 %v7941_v18, %v526_v9  ;;  %v337_v37 = vmul.f32 %v303_v55, %v7752_v33  ;;  %v7991_v9 = vsub.f32 %v7829_v27, %v214_v49  ;;  %vm411_vm2 = vmor %vm409_vm15, %vm410_vm0 }
 0x132   :  { %v387_v15 = vsub.f32 1.5, %v386_v53  ;;  %v215_v26 = vmul.f32 %v7752_v33, %v186_v10  ;;  %v277_v29 = vmul.f32 %v7971_v54, %v7971_v54  ;;  %v529_v27 = vmul.f32 %v402_v23, %v7771_v51 }
 0x133   :  { %v601_v58 = vadd.f32 %v7949_v47, %v563_v20  ;;  %v602_v24 = vadd.f32 %v7951_v22, %v564_v21  ;;  %v7988_v25 = vpop.eup %6930  ;;  %v7999_v34 = vadd.f32 1e-05, %v337_v37  ;;  %v406_v55 = vmul.f32 0.5, %v405_v14 }
 0x134   :  { %v388_v8 = vmul.f32 %v6929_v13, %v387_v15  ;;  %v414_v4 = vmul.f32 %v7988_v25, %v7947_v5  ;;  %v8016_v51 = vsub.f32 %v7844_v39, %v217_v48  ;;  %v8019_v52 = vsub.f32 %v7846_v40, %v217_v48 }
 0x135   :  { %v7981_v1 = vpack.c.bf16 %v601_v58, %v599_v43  ;;  %v7983_v35 = vpack.c.bf16 %v602_v24, %v600_v50  ;;  %v278_v43 = vmul.f32 %v7986_v38, %v7986_v38  ;;  %6932 = vrsqrt.f32 %v7999_v34 }
 0x136   :  { %v392_v36 = vsel %vm391_vm12, %v6929_v13, %v388_v8  ;;  %v415_v10 = vmul.f32 %v7988_v25, %v414_v4  ;;  %v8027_v50 = vsub.f32 %v7852_v41, %v215_v26  ;;  %v8030_v24 = vsub.f32 %v7854_v42, %v215_v26 }
 0x137   :  { %10437 = vst [vmem:[#allocation19_spill] sm:$0xff] %v7983_v35  ;;  %1441 = vmatmul.bf16.vlgmr.msra.gmra.mxu0 %v7981_v1  ;;  %1490 = vmatmul.bf16.vlgmr.msra.gmra.mxu1 %v7983_v35  ;;  %v527_v20 = vmul.f32 %v392_v36, %v7790_v60  ;;  %v528_v21 = vmul.f32 %v392_v36, %v7793_v61  ;;  %v407_v48 = vsub.f32 1.5, %v406_v55  ;;  %vm420_vm14 = vweird.f32 %v7988_v25 }
 0x138   :  { %1539 = vmatmul.bf16.vlgmr.msra.gmra.mxu2 %v7981_v1  ;;  %1588 = vmatmul.bf16.vlgmr.msra.gmra.mxu3 %v7983_v35  ;;  %v195_v53 = vpop.xlane.xlu2 %194  ;;  %v306_v49 = vpop.xlane.xlu0 %305  ;;  %v273_v60 = vmul.f32 %v7991_v9, %v7991_v9  ;;  %v274_v61 = vmul.f32 %v7994_v30, %v7994_v30  ;;  %v416_v13 = vmul.f32 0.5, %v415_v10  ;;  %v322_v58 = vadd.f32 %v278_v43, %v277_v29  ;;  %vm421_vm1 = vmor %vm419_vm13, %vm420_vm14 }
 0x139   :  { %v218_v40 = vmul.f32 %v7752_v33, %v195_v53  ;;  %v338_v3 = vmul.f32 %v306_v49, %v7752_v33  ;;  %v567_v37 = vmul.f32 %v7938_v46, %v529_v27  ;;  %v565_v14 = vmul.f32 %v7938_v46, %v527_v20 }
 0x13a   :  { %v316_v39 = vadd.f32 %v274_v61, %v273_v60  ;;  %v566_v15 = vmul.f32 %v7941_v18, %v528_v21  ;;  %323 = vadd.xlane.f32.xlu2 %v322_v58  ;;  %v568_v23 = vmul.f32 %v7941_v18, %v530_v28  ;;  %v417_v41 = vsub.f32 1.5, %v416_v13 }
 0x13b   :  { %v279_v42 = vmul.f32 %v8016_v51, %v8016_v51  ;;  %v280_v8 = vmul.f32 %v8019_v52, %v8019_v52  ;;  %v8044_v4 = vadd.f32 1e-05, %v338_v3  ;;  %v8047_v26 = vsub.f32 %v7871_v59, %v218_v40  ;;  %v8056_v36 = vpop.eup %6932 }
 0x13c   :  { %317 = vadd.xlane.f32.xlu0 %v316_v39  ;;  %v8050_v29 = vsub.f32 %v7873_v19, %v218_v40  ;;  %v275_v27 = vmul.f32 %v8027_v50, %v8027_v50  ;;  %v276_v28 = vmul.f32 %v8030_v24, %v8030_v24  ;;  %v603_v55 = vadd.f32 %v7949_v47, %v565_v14 }
 0x13d   :  { %v604_v20 = vadd.f32 %v7951_v22, %v566_v15  ;;  %6934 = vrsqrt.f32 %v8044_v4  ;;  %v418_v59 = vmul.f32 %v7988_v25, %v417_v41  ;;  %v325_v19 = vadd.f32 %v280_v8, %v279_v42  ;;  %v5859_v15 = vld [vmem:[#allocation8 + $0x1e8] sm:$0xf0]  ;;  %v6708_v8 = vld [vmem:[#allocation8 + $0x1e4] sm:$0xf0] }
 0x13e   :  { %v319_v21 = vadd.f32 %v276_v28, %v275_v27  ;;  %v605_v10 = vadd.f32 %v7949_v47, %v567_v37  ;;  %v606_v43 = vadd.f32 %v7951_v22, %v568_v23  ;;  %v408_v53 = vmul.f32 %v7944_v2, %v407_v48  ;;  %v5857_v23 = vld [vmem:[#allocation8 + $0x1c8] sm:$0xf]  ;;  %v6768_v48 = vld [vmem:[#allocation8 + $0x3cc] sm:$0xf] }
 0x13f   :  { %v424_v49 = vmul.f32 %v8056_v36, %v7999_v34  ;;  %v281_v60 = vmul.f32 %v8047_v26, %v8047_v26  ;;  %v282_v61 = vmul.f32 %v8050_v29, %v8050_v29  ;;  %v422_v5 = vsel %vm421_vm1, %v7988_v25, %v418_v59  ;;  %v6704_v25 = vld [vmem:[#allocation8 + $0x1cc] sm:$0xf]  ;;  %v6113_v59 = vld [vmem:[#allocation8 + $0x3c8] sm:$0xf] }
 0x140   :  { %320 = vadd.xlane.f32.xlu1 %v319_v21  ;;  %v8079_v13 = vpack.c.bf16 %v605_v10, %v603_v55  ;;  %v8081_v58 = vpack.c.bf16 %v606_v43, %v604_v20  ;;  %v412_v40 = vsel %vm411_vm2, %v7944_v2, %v408_v53  ;;  %v533_v14 = vmul.f32 %v422_v5, %v7813_v11  ;;  %v6115_v20 = vld [vmem:[#allocation8 + $0x3e8] sm:$0xf0]  ;;  %v6772_v11 = vld [vmem:[#allocation8 + $0x3e4] sm:$0xf0] }
 0x141   :  { %v425_v3 = vmul.f32 %v8056_v36, %v424_v49  ;;  %v328_v37 = vadd.f32 %v282_v61, %v281_v60  ;;  %v534_v41 = vmul.f32 %v422_v5, %v7816_v12  ;;  %v5862_v2 = vor.u32 %v6704_v25, %v5859_v15  ;;  %v6696_v43 = vld [vmem:[#allocation8 + $0x18c] sm:$0xf]  ;;  %v5825_v61 = vld [vmem:[#allocation8 + $0x188] sm:$0xf] }
 0x142   :  { %10438 = vst [vmem:[#allocation20_spill] sm:$0xff] %v8079_v13  ;;  %v531_v27 = vmul.f32 %v412_v40, %v7781_v56  ;;  %v532_v28 = vmul.f32 %v412_v40, %v7783_v57  ;;  %v5858_v55 = vor.u32 %v6708_v8, %v5857_v23  ;;  %v6118_v10 = vor.u32 %v6768_v48, %v6115_v20  ;;  %v5827_v12 = vld [vmem:[#allocation8 + $0x1a8] sm:$0xf0]  ;;  %v6700_v56 = vld [vmem:[#allocation8 + $0x1a4] sm:$0xf0] }
 0x143   :  { %10439 = vst [vmem:[#allocation21_spill] sm:$0xff] %v8081_v58  ;;  %v8084_v39 = vpop.eup %6934  ;;  %1727 = vmatpush.bf16.msrb.mxu2 %v5862_v2  ;;  %v571_v53 = vmul.f32 %v7938_v46, %v533_v14  ;;  %v6114_v49 = vor.u32 %v6772_v11, %v6113_v59  ;;  %v5830_v60 = vor.u32 %v6696_v43, %v5827_v12  ;;  %v6081_v23 = vld [vmem:[#allocation8 + $0x388] sm:$0xf]  ;;  %vm439_vm3 = vweird.f32 %v8044_v4  ;;  %v5795_v8 = vld [vmem:[#allocation8 + $0x168] sm:$0xf0] }
 0x144   :  { %326 = vadd.xlane.f32.xlu0 %v325_v19  ;;  %v434_v0 = vmul.f32 %v8084_v39, %v8044_v4  ;;  %v426_v19 = vmul.f32 0.5, %v425_v3  ;;  %1629 = vmatpush.bf16.msrb.mxu0 %v5858_v55  ;;  %v572_v57 = vmul.f32 %v7941_v18, %v534_v41  ;;  %v5826_v40 = vor.u32 %v6700_v56, %v5825_v61  ;;  %v6083_v3 = vld [vmem:[#allocation8 + $0x3a8] sm:$0xf0]  ;;  %v6764_v14 = vld [vmem:[#allocation8 + $0x3a4] sm:$0xf0] }
 0x145   :  { %1776 = vmatpush.bf16.msrb.mxu3 %v6118_v10  ;;  %v570_v25 = vmul.f32 %v7941_v18, %v532_v28  ;;  %1678 = vmatpush.bf16.msrb.mxu1 %v6114_v49  ;;  %vm440_vm4 = vweird.f32 %v8084_v39  ;;  %v6082_v41 = vor.u32 %v6764_v14, %v6081_v23  ;;  %v609_v48 = vadd.f32 %v7949_v47, %v571_v53  ;;  %v6051_v14 = vld [vmem:[#allocation8 + $0x368] sm:$0xf0] }
 0x146   :  { %v435_v42 = vmul.f32 %v8084_v39, %v434_v0  ;;  %v6760_v0 = vld [vmem:[#allocation8 + $0x38c] sm:$0xf]  ;;  %v427_v2 = vsub.f32 1.5, %v426_v19  ;;  %vm429_vm5 = vweird.f32 %v7999_v34  ;;  %vm430_vm6 = vweird.f32 %v8056_v36  ;;  %vm441_vm7 = vmor %vm439_vm3, %vm440_vm4 }
 0x147   :  { %1446 = vmatmul.bf16.gmra.mxu0 %v8079_v13  ;;  %1495 = vmatmul.bf16.gmra.mxu1 %v8081_v58  ;;  %v6086_v15 = vor.u32 %v6760_v0, %v6083_v3  ;;  %v608_v20 = vadd.f32 %v7951_v22, %v570_v25  ;;  %vm431_vm8 = vmor %vm429_vm5, %vm430_vm6  ;;  %v6692_v25 = vld [vmem:[#allocation8 + $0x164] sm:$0xf0] }
 0x148   :  { %1544 = vmatmul.bf16.gmra.mxu2 %v8079_v13  ;;  %1593 = vmatmul.bf16.gmra.mxu3 %v8081_v58  ;;  %v436_v21 = vmul.f32 0.5, %v435_v42  ;;  %v6688_v42 = vld [vmem:[#allocation8 + $0x14c] sm:$0xf]  ;;  %v428_v59 = vmul.f32 %v8056_v36, %v427_v2  ;;  %v6756_v2 = vld [vmem:[#allocation8 + $0x364] sm:$0xf0] }
 0x149   :  { %329 = vadd.xlane.f32.xlu1 %v328_v37  ;;  %v569_v37 = vmul.f32 %v7938_v46, %v531_v27  ;;  %1728 = vmatpush.bf16.msrb.mxu2 %v5830_v60  ;;  %v5798_v55 = vor.u32 %v6688_v42, %v5795_v8  ;;  %v610_v27 = vadd.f32 %v7951_v22, %v572_v57  ;;  %v6049_v42 = vld [vmem:[#allocation8 + $0x348] sm:$0xf] }
 0x14a   :  { %v437_v5 = vsub.f32 1.5, %v436_v21  ;;  %1630 = vmatpush.bf16.msrb.mxu0 %v5826_v40  ;;  %1777 = vmatpush.bf16.msrb.mxu3 %v6086_v15  ;;  %v432_v21 = vsel %vm431_vm8, %v8056_v36, %v428_v59  ;;  %v6752_v15 = vld [vmem:[#allocation8 + $0x34c] sm:$0xf] }
 0x14b   :  { %v607_v4 = vadd.f32 %v7949_v47, %v569_v37  ;;  %1679 = vmatpush.bf16.msrb.mxu1 %v6082_v41  ;;  %v8115_v19 = vpack.c.bf16 %v610_v27, %v608_v20  ;;  %v535_v12 = vmul.f32 %v432_v21, %v7836_v31  ;;  %v536_v53 = vmul.f32 %v432_v21, %v7839_v32  ;;  %v309_v32 = vpop.xlane.xlu0 %308  ;;  %v5793_v37 = vld [vmem:[#allocation8 + $0x148] sm:$0xf]  ;;  %v6680_v20 = vld [vmem:[#allocation8 + $0x10c] sm:$0xf] }
 0x14c   :  { %v438_v28 = vmul.f32 %v8084_v39, %v437_v5  ;;  %v339_v5 = vmul.f32 %v309_v32, %v7752_v33  ;;  %v5794_v23 = vor.u32 %v6692_v25, %v5793_v37  ;;  %v6054_v8 = vor.u32 %v6752_v15, %v6051_v14  ;;  %v5763_v59 = vld [vmem:[#allocation8 + $0x128] sm:$0xf0] }
 0x14d   :  { %1729 = vmatpush.bf16.msrb.mxu2 %v5798_v55  ;;  %v8113_v11 = vpack.c.bf16 %v609_v48, %v607_v4  ;;  %10441 = vst [vmem:[#allocation23_spill] sm:$0xff] %v8115_v19  ;;  %v573_v36 = vmul.f32 %v7938_v46, %v535_v12  ;;  %v574_v60 = vmul.f32 %v7941_v18, %v536_v53 }
 0x14e   :  { %v442_v34 = vsel %vm441_vm7, %v8084_v39, %v438_v28  ;;  %v355_v40 = vadd.f32 1e-05, %v339_v5  ;;  %v6050_v48 = vor.u32 %v6756_v2, %v6049_v42  ;;  %1631 = vmatpush.bf16.msrb.mxu0 %v5794_v23  ;;  %1778 = vmatpush.bf16.msrb.mxu3 %v6054_v8  ;;  %v775_v23 = vld [vmem:[#allocation10] sm:$0xff]  ;;  %v5761_v2 = vld [vmem:[#allocation8 + $0x108] sm:$0xf] }
 0x14f   :  { %10440 = vst [vmem:[#allocation22_spill] sm:$0xff] %v8113_v11  ;;  %v537_v10 = vmul.f32 %v442_v34, %v7859_v44  ;;  %v538_v43 = vmul.f32 %v442_v34, %v7862_v45  ;;  %v611_v56 = vadd.f32 %v7949_v47, %v573_v36  ;;  %v612_v45 = vadd.f32 %v7951_v22, %v574_v60  ;;  %v6744_v8 = vld [vmem:[#allocation8 + $0x30c] sm:$0xf] }
 0x150   :  { %6936 = vrsqrt.f32 %v355_v40  ;;  %1680 = vmatpush.bf16.msrb.mxu1 %v6050_v48  ;;  %v5766_v34 = vor.u32 %v6680_v20, %v5763_v59  ;;  %vm449_vm9 = vweird.f32 %v355_v40  ;;  %v6748_v59 = vld [vmem:[#allocation8 + $0x324] sm:$0xf0] }
 0x151   :  { %v575_v39 = vmul.f32 %v7938_v46, %v537_v10  ;;  %v576_v49 = vmul.f32 %v7941_v18, %v538_v43 }
 0x152   :  { %1730 = vmatpush.bf16.msrb.mxu2 %v5766_v34 }
 0x153   :  { %v613_v61 = vadd.f32 %v7949_v47, %v575_v39  ;;  %v614_v44 = vadd.f32 %v7951_v22, %v576_v49 }
 0x155   :  { %v8135_v57 = vpack.c.bf16 %v613_v61, %v611_v56  ;;  %v8137_v31 = vpack.c.bf16 %v614_v44, %v612_v45 }
 0x156   :  { %v6937_v0 = vpop.eup %6936 }
 0x157   :  { %1451 = vmatmul.bf16.gmra.mxu0 %v8113_v11  ;;  %1500 = vmatmul.bf16.gmra.mxu1 %v8115_v19  ;;  %10442 = vst [vmem:[#allocation24_spill] sm:$0xff] %v8135_v57  ;;  %v444_v3 = vmul.f32 %v6937_v0, %v355_v40  ;;  %vm450_vm10 = vweird.f32 %v6937_v0 }
 0x158   :  { %1549 = vmatmul.bf16.gmra.mxu2 %v8113_v11  ;;  %1598 = vmatmul.bf16.gmra.mxu3 %v8115_v19  ;;  %10443 = vst [vmem:[#allocation25_spill] sm:$0xff] %v8137_v31  ;;  %vm451_vm11 = vmor %vm449_vm9, %vm450_vm10 }
 0x159   :  { %v445_v41 = vmul.f32 %v6937_v0, %v444_v3 }
 0x15b   :  { %v446_v28 = vmul.f32 0.5, %v445_v41  ;;  %v6684_v41 = vld [vmem:[#allocation8 + $0x124] sm:$0xf0] }
 0x15d   :  { %v447_v21 = vsub.f32 1.5, %v446_v28  ;;  %v6017_v28 = vld [vmem:[#allocation8 + $0x308] sm:$0xf] }
 0x15f   :  { %v448_v53 = vmul.f32 %v6937_v0, %v447_v21 }
 0x161   :  { %v452_v60 = vsel %vm451_vm11, %v6937_v0, %v448_v53 }
 0x162   :  { %v539_v44 = vmul.f32 %v452_v60, %v7876_v62  ;;  %v540_v56 = vmul.f32 %v452_v60, %v7879_v63 }
 0x164   :  { %v577_v40 = vmul.f32 %v7938_v46, %v539_v44  ;;  %v578_v3 = vmul.f32 %v7941_v18, %v540_v56 }
 0x166   :  { %v615_v14 = vadd.f32 %v7949_v47, %v577_v40  ;;  %v616_v42 = vadd.f32 %v7951_v22, %v578_v3  ;;  %v5731_v40 = vld [vmem:[#allocation8 + $0xe8] sm:$0xf0] }
 0x167   :  { %1456 = vmatmul.bf16.gmra.mxu0 %v8135_v57  ;;  %1505 = vmatmul.bf16.gmra.mxu1 %v8137_v31 }
 0x168   :  { %1554 = vmatmul.bf16.gmra.mxu2 %v8135_v57  ;;  %1603 = vmatmul.bf16.gmra.mxu3 %v8137_v31 }
 0x194   :  { %v312_v55 = vpop.xlane.xlu1 %311 }
 0x195   :  { %v340_v27 = vmul.f32 %v312_v55, %v7752_v33  ;;  %v5762_v55 = vor.u32 %v6684_v41, %v5761_v2 }
 0x197   :  { %v356_v4 = vadd.f32 1e-05, %v340_v27  ;;  %v6019_v27 = vld [vmem:[#allocation8 + $0x328] sm:$0xf0]  ;;  %1632 = vmatpush.bf16.msrb.mxu0 %v5762_v55 }
 0x198   :  { %v6022_v20 = vor.u32 %v6744_v8, %v6019_v27  ;;  %v6736_v55 = vld [vmem:[#allocation8 + $0x2cc] sm:$0xf] }
 0x199   :  { %6938 = vrsqrt.f32 %v356_v4  ;;  %vm459_vm13 = vweird.f32 %v356_v4 }
 0x19a   :  { %1779 = vmatpush.bf16.msrb.mxu3 %v6022_v20 }
 0x19c   :  { %v315_v10 = vpop.xlane.xlu2 %314 }
 0x19d   :  { %v341_v43 = vmul.f32 %v315_v10, %v7752_v33 }
 0x19f   :  { %v6939_v12 = vpop.eup %6938  ;;  %v8146_v49 = vadd.f32 1e-05, %v341_v43 }
 0x1a0   :  { %v454_v39 = vmul.f32 %v6939_v12, %v356_v4  ;;  %vm460_vm12 = vweird.f32 %v6939_v12 }
 0x1a1   :  { %6940 = vrsqrt.f32 %v8146_v49  ;;  %vm461_vm14 = vmor %vm459_vm13, %vm460_vm12  ;;  %vm469_vm15 = vweird.f32 %v8146_v49 }
 0x1a2   :  { %v455_v36 = vmul.f32 %v6939_v12, %v454_v39  ;;  %v6018_v39 = vor.u32 %v6748_v59, %v6017_v28  ;;  %v5987_v59 = vld [vmem:[#allocation8 + $0x2e8] sm:$0xf0] }
 0x1a4   :  { %v456_v61 = vmul.f32 0.5, %v455_v36  ;;  %1681 = vmatpush.bf16.msrb.mxu1 %v6018_v39  ;;  %v6740_v39 = vld [vmem:[#allocation8 + $0x2e4] sm:$0xf0] }
 0x1a6   :  { %v457_v45 = vsub.f32 1.5, %v456_v61 }
 0x1a7   :  { %v8151_v32 = vpop.eup %6940 }
 0x1a8   :  { %v458_v5 = vmul.f32 %v6939_v12, %v457_v45  ;;  %v464_v62 = vmul.f32 %v8151_v32, %v8146_v49  ;;  %vm470_vm0 = vweird.f32 %v8151_v32 }
 0x1a9   :  { %vm471_vm1 = vmor %vm469_vm15, %vm470_vm0 }
 0x1aa   :  { %v462_v37 = vsel %vm461_vm14, %v6939_v12, %v458_v5  ;;  %v8171_v12 = vperm.slane %v775_v23, 0  ;;  %v6672_v5 = vld [vmem:[#allocation8 + $0xcc] sm:$0xf] }
 0x1ab   :  { %v541_v25 = vmul.f32 %v462_v37, %v7897_v6  ;;  %v542_v0 = vmul.f32 %v462_v37, %v7900_v7  ;;  %v465_v7 = vmul.f32 %v8151_v32, %v464_v62 }
 0x1ad   :  { %v579_v63 = vmul.f32 %v7938_v46, %v541_v25  ;;  %v580_v15 = vmul.f32 %v7941_v18, %v542_v0  ;;  %v324_v4 = vpop.xlane.xlu2 %323  ;;  %v466_v36 = vmul.f32 0.5, %v465_v7  ;;  %v5734_v25 = vor.u32 %v6672_v5, %v5731_v40  ;;  %v6676_v7 = vld [vmem:[#allocation8 + $0xe4] sm:$0xf0] }
 0x1ae   :  { %v344_v10 = vmul.f32 %v324_v4, %v7752_v33 }
 0x1af   :  { %v617_v48 = vadd.f32 %v7949_v47, %v579_v63  ;;  %v618_v6 = vadd.f32 %v7951_v22, %v580_v15  ;;  %v318_v43 = vpop.xlane.xlu0 %317  ;;  %v467_v3 = vsub.f32 1.5, %v466_v36  ;;  %1731 = vmatpush.bf16.msrb.mxu2 %v5734_v25 }
 0x1b0   :  { %v342_v53 = vmul.f32 %v318_v43, %v7752_v33  ;;  %v8174_v60 = vadd.f32 1e-05, %v344_v10  ;;  %v5985_v10 = vld [vmem:[#allocation8 + $0x2c8] sm:$0xf] }
 0x1b1   :  { %v8166_v34 = vpack.c.bf16 %v617_v48, %v615_v14  ;;  %v8168_v21 = vpack.c.bf16 %v618_v6, %v616_v42  ;;  %v8188_v14 = vperm.slane %v775_v23, 1  ;;  %v468_v2 = vmul.f32 %v8151_v32, %v467_v3  ;;  %v5729_v6 = vld [vmem:[#allocation8 + $0xc8] sm:$0xf] }
 0x1b2   :  { %v8178_v61 = vadd.f32 1e-05, %v342_v53  ;;  %6942 = vrsqrt.f32 %v8174_v60  ;;  %v5730_v20 = vor.u32 %v6676_v7, %v5729_v6  ;;  %v5990_v53 = vor.u32 %v6736_v55, %v5987_v59 }
 0x1b3   :  { %10444 = vst [vmem:[#allocation26_spill] sm:$0xff] %v8166_v34  ;;  %1461 = vmatmul.bf16.gmra.mxu0 %v8166_v34  ;;  %1510 = vmatmul.bf16.gmra.mxu1 %v8168_v21  ;;  %v321_v37 = vpop.xlane.xlu1 %320  ;;  %v5986_v40 = vor.u32 %v6740_v39, %v5985_v10  ;;  %vm499_vm5 = vweird.f32 %v8174_v60 }
 0x1b4   :  { %10445 = vst [vmem:[#allocation27_spill] sm:$0xff] %v8168_v21  ;;  %1559 = vmatmul.bf16.gmra.mxu2 %v8166_v34  ;;  %v1442_v44 = vpop.f32.mrf.mxu0  ;;  %v1491_v56 = vpop.f32.mrf.mxu1  ;;  %1608 = vmatmul.bf16.gmra.mxu3 %v8168_v21  ;;  %6944 = vrsqrt.f32 %v8178_v61  ;;  %v343_v62 = vmul.f32 %v321_v37, %v7752_v33  ;;  %vm479_vm3 = vweird.f32 %v8178_v61 }
 0x1b5   :  { %v1443_v45 = vadd.f32 %v1442_v44, %v8171_v12  ;;  %v472_v44 = vsel %vm471_vm1, %v8151_v32, %v468_v2  ;;  %1633 = vmatpush.bf16.msrb.mxu0 %v5730_v20  ;;  %1780 = vmatpush.bf16.msrb.mxu3 %v5990_v53 }
 0x1b6   :  { %v8186_v15 = vadd.f32 1e-05, %v343_v62  ;;  %1682 = vmatpush.bf16.msrb.mxu1 %v5986_v40  ;;  %v544_v6 = vmul.f32 %v472_v44, %v7924_v17 }
 0x1b7   :  { %v1492_v0 = vadd.f32 %v1491_v56, %v1443_v45  ;;  %v327_v63 = vpop.xlane.xlu0 %326 }
 0x1b8   :  { %v8190_v42 = vpop.eup %6942  ;;  %v345_v41 = vmul.f32 %v327_v63, %v7752_v33  ;;  %6946 = vrsqrt.f32 %v8186_v15  ;;  %v543_v63 = vmul.f32 %v472_v44, %v7921_v16  ;;  %v582_v10 = vmul.f32 %v7941_v18, %v544_v6 }
 0x1b9   :  { %v494_v28 = vmul.f32 %v8190_v42, %v8174_v60  ;;  %vm500_vm6 = vweird.f32 %v8190_v42  ;;  %vm489_vm7 = vweird.f32 %v8186_v15 }
 0x1ba   :  { %v6945_v48 = vpop.eup %6944  ;;  %v8210_v45 = vadd.f32 1e-05, %v345_v41  ;;  %vm501_vm9 = vmor %vm499_vm5, %vm500_vm6 }
 0x1bb   :  { %v1540_v8 = vpop.f32.mrf.mxu2  ;;  %v1589_v27 = vpop.f32.mrf.mxu3  ;;  %v474_v4 = vmul.f32 %v6945_v48, %v8178_v61  ;;  %v495_v25 = vmul.f32 %v8190_v42, %v494_v28  ;;  %vm480_vm2 = vweird.f32 %v6945_v48 }
 0x1bc   :  { %v8197_v23 = vpop.f32.mrf.mxu0  ;;  %v8202_v43 = vpop.f32.mrf.mxu1  ;;  %v1541_v36 = vadd.f32 %v1540_v8, %v8188_v14  ;;  %6948 = vrsqrt.f32 %v8210_v45  ;;  %vm481_vm4 = vmor %vm479_vm3, %vm480_vm2  ;;  %vm509_vm13 = vweird.f32 %v8210_v45 }
 0x1bd   :  { %v475_v56 = vmul.f32 %v6945_v48, %v474_v4  ;;  %v330_v5 = vpop.xlane.xlu1 %329  ;;  %v496_v16 = vmul.f32 0.5, %v495_v25  ;;  %v581_v4 = vmul.f32 %v7938_v46, %v543_v63 }
 0x1be   :  { %v346_v3 = vmul.f32 %v330_v5, %v7752_v33  ;;  %v1590_v37 = vadd.f32 %v1589_v27, %v1541_v36  ;;  %v6947_v62 = vpop.eup %6946 }
 0x1bf   :  { %v476_v49 = vmul.f32 0.5, %v475_v56  ;;  %v484_v41 = vmul.f32 %v6947_v62, %v8186_v15  ;;  %v497_v36 = vsub.f32 1.5, %v496_v16  ;;  %v619_v56 = vadd.f32 %v7949_v47, %v581_v4 }
 0x1c0   :  { %v8215_v8 = vadd.f32 1e-05, %v346_v3  ;;  %v8217_v32 = vpack.c.bf16 %v1590_v37, %v1492_v0  ;;  %vm490_vm8 = vweird.f32 %v6947_v62  ;;  %v620_v3 = vadd.f32 %v7951_v22, %v582_v10 }
 0x1c1   :  { %v477_v2 = vsub.f32 1.5, %v476_v49  ;;  %v485_v0 = vmul.f32 %v6947_v62, %v484_v41  ;;  %v498_v41 = vmul.f32 %v8190_v42, %v497_v36  ;;  %vm491_vm10 = vmor %vm489_vm7, %vm490_vm8 }
 0x1c2   :  { %6950 = vrsqrt.f32 %v8215_v8  ;;  %v8234_v39 = vpop.eup %6948  ;;  %vm519_vm11 = vweird.f32 %v8215_v8 }
 0x1c3   :  { %v8221_v33 = vpop.f32.mrf.mxu2  ;;  %v8225_v7 = vpop.f32.mrf.mxu3  ;;  %v478_v27 = vmul.f32 %v6945_v48, %v477_v2  ;;  %v486_v59 = vmul.f32 0.5, %v485_v0  ;;  %v504_v49 = vmul.f32 %v8234_v39, %v8210_v45  ;;  %v502_v60 = vsel %vm501_vm9, %v8190_v42, %v498_v41  ;;  %v5699_v42 = vld [vmem:[#allocation8 + $0xa8] sm:$0xf0] }
 0x1c4   :  { %v1447_v55 = vpop.f32.mrf.mxu0  ;;  %v8228_v28 = vpop.f32.mrf.mxu1  ;;  %v550_v36 = vmul.f32 %v502_v60, %v7986_v38  ;;  %vm510_vm14 = vweird.f32 %v8234_v39 }
 0x1c5   :  { %v482_v20 = vsel %vm481_vm4, %v6945_v48, %v478_v27  ;;  %v487_v61 = vsub.f32 1.5, %v486_v59  ;;  %vm511_vm0 = vmor %vm509_vm13, %vm510_vm14 }
 0x1c6   :  { %v545_v17 = vmul.f32 %v482_v20, %v7991_v9  ;;  %v546_v53 = vmul.f32 %v482_v20, %v7994_v30  ;;  %v505_v20 = vmul.f32 %v8234_v39, %v504_v49  ;;  %v5953_v49 = vld [vmem:[#allocation8 + $0x288] sm:$0xf] }
 0x1c7   :  { %v488_v40 = vmul.f32 %v6947_v62, %v487_v61 }
 0x1c8   :  { %v8237_v44 = vpop.eup %6950  ;;  %v583_v48 = vmul.f32 %v7938_v46, %v545_v17  ;;  %v584_v5 = vmul.f32 %v7941_v18, %v546_v53  ;;  %v549_v53 = vmul.f32 %v502_v60, %v7971_v54  ;;  %v506_v61 = vmul.f32 0.5, %v505_v20  ;;  %v6732_v54 = vld [vmem:[#allocation8 + $0x2a4] sm:$0xf0] }
 0x1c9   :  { %v514_v9 = vmul.f32 %v8237_v44, %v8215_v8  ;;  %v492_v0 = vsel %vm491_vm10, %v6947_v62, %v488_v40  ;;  %v1448_v62 = vadd.f32 %v1447_v55, %v8171_v12  ;;  %v588_v20 = vmul.f32 %v7941_v18, %v550_v36  ;;  %v6660_v36 = vld [vmem:[#allocation8 + $0x64] sm:$0xf0] }
 0x1ca   :  { %v621_v37 = vadd.f32 %v7949_v47, %v583_v48  ;;  %v622_v25 = vadd.f32 %v7951_v22, %v584_v5  ;;  %v547_v59 = vmul.f32 %v492_v0, %v8027_v50  ;;  %v548_v15 = vmul.f32 %v492_v0, %v8030_v24  ;;  %v6668_v50 = vld [vmem:[#allocation8 + $0xa4] sm:$0xf0] }
 0x1cb   :  { %v1545_v30 = vpop.f32.mrf.mxu2  ;;  %v1594_v63 = vpop.f32.mrf.mxu3  ;;  %v515_v4 = vmul.f32 %v8237_v44, %v514_v9  ;;  %v5697_v9 = vld [vmem:[#allocation8 + $0x88] sm:$0xf]  ;;  %v1497_v0 = vadd.f32 %v8228_v28, %v1448_v62  ;;  %vm520_vm12 = vweird.f32 %v8237_v44 }
 0x1cc   :  { %v8251_v2 = vpop.f32.mrf.mxu0  ;;  %v8258_v6 = vpop.f32.mrf.mxu1  ;;  %v8260_v16 = vpack.c.bf16 %v621_v37, %v619_v56  ;;  %v8262_v27 = vpack.c.bf16 %v622_v25, %v620_v3  ;;  %v6664_v56 = vld [vmem:[#allocation8 + $0x8c] sm:$0xf]  ;;  %v585_v37 = vmul.f32 %v7938_v46, %v547_v59  ;;  %v586_v55 = vmul.f32 %v7941_v18, %v548_v15  ;;  %vm8301_vm15 = vmor %vm519_vm11, %vm520_vm12 }
 0x1cd   :  { %v516_v10 = vmul.f32 0.5, %v515_v4  ;;  %v5702_v40 = vor.u32 %v6664_v56, %v5699_v42  ;;  %v6728_v3 = vld [vmem:[#allocation8 + $0x28c] sm:$0xf]  ;;  %v1546_v38 = vadd.f32 %v1545_v30, %v8188_v14  ;;  %v587_v4 = vmul.f32 %v7938_v46, %v549_v53  ;;  %v5665_v53 = vld [vmem:[#allocation8 + $0x48] sm:$0xf] }
 0x1ce   :  { %10446 = vst [vmem:[#allocation28_spill] sm:$0xff] %v8260_v16  ;;  %1466 = vmatmul.bf16.gmra.mxu0 %v8260_v16  ;;  %1515 = vmatmul.bf16.gmra.mxu1 %v8262_v27  ;;  %v5955_v25 = vld [vmem:[#allocation8 + $0x2a8] sm:$0xf0]  ;;  %v5698_v60 = vor.u32 %v6668_v50, %v5697_v9  ;;  %v507_v42 = vsub.f32 1.5, %v506_v61  ;;  %v5954_v59 = vor.u32 %v6732_v54, %v5953_v49 }
 0x1cf   :  { %10447 = vst [vmem:[#allocation29_spill] sm:$0xff] %v8262_v27  ;;  %1564 = vmatmul.bf16.gmra.mxu2 %v8260_v16  ;;  %1613 = vmatmul.bf16.gmra.mxu3 %v8262_v27  ;;  %v517_v41 = vsub.f32 1.5, %v516_v10  ;;  %v5958_v56 = vor.u32 %v6728_v3, %v5955_v25  ;;  %v6656_v15 = vld [vmem:[#allocation8 + $0x4c] sm:$0xf]  ;;  %v623_v30 = vadd.f32 %v7949_v47, %v585_v37 }
 0x1d0   :  { %1732 = vmatpush.bf16.msrb.mxu2 %v5702_v40  ;;  %v5667_v27 = vld [vmem:[#allocation8 + $0x68] sm:$0xf0]  ;;  %v624_v10 = vadd.f32 %v7951_v22, %v586_v55  ;;  %1634 = vmatpush.bf16.msrb.mxu0 %v5698_v60  ;;  %v1595_v28 = vadd.f32 %v1594_v63, %v1546_v38  ;;  %v625_v40 = vadd.f32 %v7949_v47, %v587_v4  ;;  %v6724_v4 = vld [vmem:[#allocation8 + $0x264] sm:$0xf0] }
 0x1d1   :  { %1781 = vmatpush.bf16.msrb.mxu3 %v5958_v56  ;;  %v518_v62 = vmul.f32 %v8237_v44, %v517_v41  ;;  %1683 = vmatpush.bf16.msrb.mxu1 %v5954_v59  ;;  %v626_v9 = vadd.f32 %v7951_v22, %v588_v20  ;;  %v5670_v3 = vor.u32 %v6656_v15, %v5667_v27  ;;  %v6720_v37 = vld [vmem:[#allocation8 + $0x24c] sm:$0xf]  ;;  %v5921_v41 = vld [vmem:[#allocation8 + $0x248] sm:$0xf] }
 0x1d2   :  { %v8305_v50 = vpack.c.bf16 %v1595_v28, %v1497_v0  ;;  %v508_v49 = vmul.f32 %v8234_v39, %v507_v42  ;;  %v5923_v38 = vld [vmem:[#allocation8 + $0x268] sm:$0xf0]  ;;  %v8311_v20 = vpack.c.bf16 %v625_v40, %v623_v30  ;;  %v5666_v27 = vor.u32 %v6660_v36, %v5665_v53  ;;  %v5633_v36 = vld [vmem:[#allocation8 + $0x8] sm:$0xf] }
 0x1d3   :  { %v8276_v17 = vpop.f32.mrf.mxu2  ;;  %v8280_v48 = vpop.f32.mrf.mxu3  ;;  %v8313_v8 = vpack.c.bf16 %v626_v9, %v624_v10  ;;  %v522_v0 = vsel %vm8301_vm15, %v8237_v44, %v518_v62  ;;  %v5926_v56 = vor.u32 %v6720_v37, %v5923_v38  ;;  %v5922_v42 = vor.u32 %v6724_v4, %v5921_v41  ;;  %v6648_v30 = vld [vmem:[#allocation8 + $0xc] sm:$0xf]  ;;  %v6652_v40 = vld [vmem:[#allocation8 + $0x24] sm:$0xf0] }
 0x1d4   :  { %v1452_v5 = vpop.f32.mrf.mxu0  ;;  %v1501_v24 = vpop.f32.mrf.mxu1  ;;  %10450 = vst [vmem:[#allocation30_spill] sm:$0xff] %v8305_v50  ;;  %1733 = vmatpush.bf16.msrb.mxu2 %v5670_v3  ;;  %v512_v59 = vsel %vm511_vm0, %v8234_v39, %v508_v49  ;;  %v553_v15 = vmul.f32 %v522_v0, %v8047_v26  ;;  %v554_v44 = vmul.f32 %v522_v0, %v8050_v29  ;;  %v5635_v10 = vld [vmem:[#allocation8 + $0x28] sm:$0xf0]  ;;  %v6716_v38 = vld [vmem:[#allocation8 + $0x224] sm:$0xf0] }
 0x1d5   :  { %v1453_v54 = vadd.f32 %v1452_v5, %v8171_v12  ;;  %10451 = vst [vmem:[#allocation31_spill] sm:$0xff] %v8311_v20  ;;  %1635 = vmatpush.bf16.msrb.mxu0 %v5666_v27  ;;  %1782 = vmatpush.bf16.msrb.mxu3 %v5926_v56  ;;  %v551_v28 = vmul.f32 %v512_v59, %v8016_v51  ;;  %v6712_v49 = vld [vmem:[#allocation8 + $0x20c] sm:$0xf] }
 0x1d6   :  { %10452 = vst [vmem:[#allocation32_spill] sm:$0xff] %v8313_v8  ;;  %1684 = vmatpush.bf16.msrb.mxu1 %v5922_v42  ;;  %v552_v39 = vmul.f32 %v512_v59, %v8019_v52  ;;  %v592_v26 = vmul.f32 %v7941_v18, %v554_v44  ;;  %v5638_v63 = vor.u32 %v6648_v30, %v5635_v10  ;;  %v6705_v44 = vld [vmem:[#allocation8 + $0x1d4] sm:$0xf] }
 0x1d7   :  { %v1502_v60 = vadd.f32 %v1501_v24, %v1453_v54  ;;  %v5634_v37 = vor.u32 %v6652_v40, %v5633_v36  ;;  %v589_v51 = vmul.f32 %v7938_v46, %v551_v28  ;;  %v5889_v54 = vld [vmem:[#allocation8 + $0x208] sm:$0xf]  ;;  %v5867_v30 = vld [vmem:[#allocation8 + $0x1f0] sm:$0xf0]  ;;  %v5865_v28 = vld [vmem:[#allocation8 + $0x1d0] sm:$0xf] }
 0x1d8   :  { %v590_v52 = vmul.f32 %v7941_v18, %v552_v39  ;;  %1734 = vmatpush.bf16.msrb.mxu2 %v5638_v63  ;;  %v630_v27 = vadd.f32 %v7951_v22, %v592_v26  ;;  %v5890_v56 = vor.u32 %v6716_v38, %v5889_v54  ;;  %v6769_v39 = vld [vmem:[#allocation8 + $0x3d4] sm:$0xf]  ;;  %v6121_v40 = vld [vmem:[#allocation8 + $0x3d0] sm:$0xf] }
 0x1d9   :  { %1636 = vmatpush.bf16.msrb.mxu0 %v5634_v37  ;;  %v627_v59 = vadd.f32 %v7949_v47, %v589_v51  ;;  %v5835_v37 = vld [vmem:[#allocation8 + $0x1b0] sm:$0xf0]  ;;  %v5833_v51 = vld [vmem:[#allocation8 + $0x190] sm:$0xf] }
 0x1da   :  { %1685 = vmatpush.bf16.msrb.mxu1 %v5890_v56  ;;  %v6091_v38 = vld [vmem:[#allocation8 + $0x3b0] sm:$0xf0] }
 0x1db   :  { %v1550_v61 = vpop.f32.mrf.mxu2  ;;  %v1599_v55 = vpop.f32.mrf.mxu3  ;;  %v6689_v56 = vld [vmem:[#allocation8 + $0x154] sm:$0xf] }
 0x1dc   :  { %v8307_v25 = vpop.f32.mrf.mxu0  ;;  %v8322_v5 = vpop.f32.mrf.mxu1  ;;  %v1551_v45 = vadd.f32 %v1550_v61, %v8188_v14  ;;  %v591_v61 = vmul.f32 %v7938_v46, %v553_v15  ;;  %v628_v46 = vadd.f32 %v7951_v22, %v590_v52  ;;  %v6709_v22 = vld [vmem:[#allocation8 + $0x1ec] sm:$0xf0] }
 0x1dd   :  { %v5866_v26 = vor.u32 %v6709_v22, %v5865_v28  ;;  %v6701_v52 = vld [vmem:[#allocation8 + $0x1ac] sm:$0xf0] }
 0x1de   :  { %1471 = vmatmul.bf16.gmra.mxu0 %v8311_v20  ;;  %1520 = vmatmul.bf16.gmra.mxu1 %v8313_v8  ;;  %v1600_v62 = vadd.f32 %v1599_v55, %v1551_v45  ;;  %v5891_v55 = vld [vmem:[#allocation8 + $0x228] sm:$0xf0]  ;;  %v629_v4 = vadd.f32 %v7949_v47, %v591_v61  ;;  %v8352_v15 = vpack.c.bf16 %v630_v27, %v628_v46  ;;  %v6773_v61 = vld [vmem:[#allocation8 + $0x3ec] sm:$0xf0] }
 0x1df   :  { %1569 = vmatmul.bf16.gmra.mxu2 %v8311_v20  ;;  %1618 = vmatmul.bf16.gmra.mxu3 %v8313_v8  ;;  %v5834_v27 = vor.u32 %v6701_v52, %v5833_v51  ;;  %v6757_v22 = vld [vmem:[#allocation8 + $0x36c] sm:$0xf0] }
 0x1e0   :  { %v8338_v29 = vpack.c.bf16 %v1600_v62, %v1502_v60  ;;  %v5894_v60 = vor.u32 %v6712_v49, %v5891_v55  ;;  %v8350_v45 = vpack.c.bf16 %v629_v4, %v627_v59  ;;  %10455 = vst [vmem:[#allocation35_spill] sm:$0xff] %v8352_v15  ;;  %v6123_v62 = vld [vmem:[#allocation8 + $0x3f0] sm:$0xf0]  ;;  %1825 = vmatpush.bf16.msra.mxu0 %v5866_v26  ;;  %v6765_v4 = vld [vmem:[#allocation8 + $0x3ac] sm:$0xf0] }
 0x1e1   :  { %v6126_v63 = vor.u32 %v6769_v39, %v6123_v62  ;;  %v6122_v49 = vor.u32 %v6773_v61, %v6121_v40  ;;  %v6761_v55 = vld [vmem:[#allocation8 + $0x394] sm:$0xf]  ;;  %v5801_v59 = vld [vmem:[#allocation8 + $0x150] sm:$0xf] }
 0x1e2   :  { %10453 = vst [vmem:[#allocation33_spill] sm:$0xff] %v8338_v29  ;;  %1783 = vmatpush.bf16.msrb.mxu3 %v5894_v60  ;;  %v6681_v62 = vld [vmem:[#allocation8 + $0x114] sm:$0xf]  ;;  %v5769_v40 = vld [vmem:[#allocation8 + $0x110] sm:$0xf] }
 0x1e3   :  { %v8332_v24 = vpop.f32.mrf.mxu2  ;;  %v8340_v9 = vpop.f32.mrf.mxu3  ;;  %10454 = vst [vmem:[#allocation34_spill] sm:$0xff] %v8350_v45  ;;  %1874 = vmatpush.bf16.msra.mxu1 %v6122_v49  ;;  %v6685_v26 = vld [vmem:[#allocation8 + $0x12c] sm:$0xf0] }
 0x1e4   :  { %v1457_v53 = vpop.f32.mrf.mxu0  ;;  %v1506_v41 = vpop.f32.mrf.mxu1  ;;  %1826 = vmatpush.bf16.msra.mxu0 %v5834_v27  ;;  %v6025_v51 = vld [vmem:[#allocation8 + $0x310] sm:$0xf] }
 0x1e5   :  { %v1458_v3 = vadd.f32 %v1457_v53, %v8171_v12  ;;  %v5870_v53 = vor.u32 %v6705_v44, %v5867_v30  ;;  %v6753_v44 = vld [vmem:[#allocation8 + $0x354] sm:$0xf]  ;;  %v6749_v52 = vld [vmem:[#allocation8 + $0x32c] sm:$0xf0] }
 0x1e6   :  { %1972 = vmatpush.bf16.msra.mxu3 %v6126_v63  ;;  %v6059_v30 = vld [vmem:[#allocation8 + $0x370] sm:$0xf0] }
 0x1e7   :  { %v1507_v0 = vadd.f32 %v1506_v41, %v1458_v3  ;;  %1923 = vmatpush.bf16.msra.mxu2 %v5870_v53  ;;  %v6697_v3 = vld [vmem:[#allocation8 + $0x194] sm:$0xf]  ;;  %v6089_v41 = vld [vmem:[#allocation8 + $0x390] sm:$0xf]  ;;  %v6062_v28 = vor.u32 %v6753_v44, %v6059_v30 }
 0x1e8   :  { %v5838_v54 = vor.u32 %v6697_v3, %v5835_v37  ;;  %v6090_v60 = vor.u32 %v6765_v4, %v6089_v41  ;;  %v5771_v53 = vld [vmem:[#allocation8 + $0x130] sm:$0xf0]  ;;  %v5770_v37 = vor.u32 %v6685_v26, %v5769_v40  ;;  %v1543_v4 = vadd.f32 %v8221_v33, %v8188_v14  ;;  %v6677_v33 = vld [vmem:[#allocation8 + $0xec] sm:$0xf0] }
 0x1e9   :  { %v5774_v61 = vor.u32 %v6681_v62, %v5771_v53  ;;  %v6745_v63 = vld [vmem:[#allocation8 + $0x314] sm:$0xf] }
 0x1ea   :  { %1875 = vmatpush.bf16.msra.mxu1 %v6090_v60  ;;  %v6027_v3 = vld [vmem:[#allocation8 + $0x330] sm:$0xf0]  ;;  %v1445_v60 = vadd.f32 %v8197_v23, %v8171_v12 }
 0x1eb   :  { %v1555_v42 = vpop.f32.mrf.mxu2  ;;  %v1604_v10 = vpop.f32.mrf.mxu3  ;;  %1924 = vmatpush.bf16.msra.mxu2 %v5838_v54  ;;  %v6030_v49 = vor.u32 %v6745_v63, %v6027_v3  ;;  %v2281_v54 = vxor.u32 2147516416, %v8217_v32  ;;  %v6737_v44 = vld [vmem:[#allocation8 + $0x2d4] sm:$0xf] }
 0x1ec   :  { %v1556_v18 = vadd.f32 %v1555_v42, %v8188_v14  ;;  %v5803_v42 = vld [vmem:[#allocation8 + $0x170] sm:$0xf0]  ;;  %v8384_v53 = vpop.f32.mrf.mxu1 }
 0x1ed   :  { %v5806_v46 = vor.u32 %v6689_v56, %v5803_v42  ;;  %v2346_v41 = vunpack.c.h.bf16 %v2281_v54  ;;  %v6673_v56 = vld [vmem:[#allocation8 + $0xd4] sm:$0xf] }
 0x1ee   :  { %1476 = vmatmul.bf16.gmra.mxu0 %v8350_v45  ;;  %1525 = vmatmul.bf16.gmra.mxu1 %v8352_v15  ;;  %v1605_v47 = vadd.f32 %v1604_v10, %v1556_v18  ;;  %v6693_v18 = vld [vmem:[#allocation8 + $0x16c] sm:$0xf0]  ;;  %v5739_v42 = vld [vmem:[#allocation8 + $0xf0] sm:$0xf0] }
 0x1ef   :  { %1574 = vmatmul.bf16.gmra.mxu2 %v8350_v45  ;;  %1623 = vmatmul.bf16.gmra.mxu3 %v8352_v15  ;;  %v5802_v10 = vor.u32 %v6693_v18, %v5801_v59  ;;  %v5737_v59 = vld [vmem:[#allocation8 + $0xd0] sm:$0xf]  ;;  %v5742_v18 = vor.u32 %v6673_v56, %v5739_v42  ;;  %v5995_v30 = vld [vmem:[#allocation8 + $0x2f0] sm:$0xf0] }
 0x1f0   :  { %v8358_v36 = vpack.c.bf16 %v1605_v47, %v1507_v0  ;;  %v6094_v0 = vor.u32 %v6761_v55, %v6091_v38  ;;  %v6057_v47 = vld [vmem:[#allocation8 + $0x350] sm:$0xf]  ;;  %1925 = vmatpush.bf16.msra.mxu2 %v5806_v46  ;;  %v6026_v55 = vor.u32 %v6749_v52, %v6025_v51  ;;  %v2345_v38 = vunpack.c.l.bf16 %v2281_v54 }
 0x1f1   :  { %v6058_v39 = vor.u32 %v6757_v22, %v6057_v47  ;;  %1827 = vmatpush.bf16.msra.mxu0 %v5802_v10  ;;  %v1592_v46 = vadd.f32 %v8225_v7, %v1543_v4  ;;  %v5738_v10 = vor.u32 %v6677_v33, %v5737_v59  ;;  %v5998_v23 = vor.u32 %v6737_v44, %v5995_v30  ;;  %v8381_v22 = vpop.f32.mrf.mxu0  ;;  %v5705_v33 = vld [vmem:[#allocation8 + $0x90] sm:$0xf] }
 0x1f2   :  { %10456 = vst [vmem:[#allocation36_spill] sm:$0xff] %v8358_v36  ;;  %1973 = vmatpush.bf16.msra.mxu3 %v6094_v0  ;;  %v2473_v27 = vmul.f32 1.442695, %v2345_v38  ;;  %v2475_v0 = vmul.f32 1.442695, %v2346_v41  ;;  %v1548_v30 = vadd.f32 %v8276_v17, %v8188_v14 }
 0x1f3   :  { %1876 = vmatpush.bf16.msra.mxu1 %v6058_v39  ;;  %v8386_v63 = vpop.f32.mrf.mxu2  ;;  %v8388_v3 = vpop.f32.mrf.mxu3 }
 0x1f4   :  { %1926 = vmatpush.bf16.msra.mxu2 %v5774_v61  ;;  %6952 = vpow2.f32 %v2473_v27 }
 0x1f5   :  { %1828 = vmatpush.bf16.msra.mxu0 %v5770_v37  ;;  %6954 = vpow2.f32 %v2475_v0  ;;  %v5993_v37 = vld [vmem:[#allocation8 + $0x2d0] sm:$0xf] }
 0x1f6   :  { %1974 = vmatpush.bf16.msra.mxu3 %v6062_v28  ;;  %v1494_v28 = vadd.f32 %v8202_v43, %v1445_v60 }
 0x1f7   :  { %1877 = vmatpush.bf16.msra.mxu1 %v6026_v55 }
 0x1f8   :  { %1927 = vmatpush.bf16.msra.mxu2 %v5742_v18  ;;  %v8379_v47 = vpack.c.bf16 %v1592_v46, %v1494_v28  ;;  %v6665_v46 = vld [vmem:[#allocation8 + $0x94] sm:$0xf] }
 0x1f9   :  { %1829 = vmatpush.bf16.msra.mxu0 %v5738_v10  ;;  %v5707_v18 = vld [vmem:[#allocation8 + $0xb0] sm:$0xf0] }
 0x1fa   :  { %1975 = vmatpush.bf16.msra.mxu3 %v6030_v49  ;;  %v6953_v39 = vpop.eup %6952  ;;  %v2285_v7 = vxor.u32 2147516416, %v8379_v47  ;;  %v6741_v49 = vld [vmem:[#allocation8 + $0x2ec] sm:$0xf0]  ;;  %v5710_v10 = vor.u32 %v6665_v46, %v5707_v18  ;;  %v6729_v28 = vld [vmem:[#allocation8 + $0x294] sm:$0xf] }
 0x1fb   :  { %v6955_v62 = vpop.eup %6954  ;;  %v5994_v54 = vor.u32 %v6741_v49, %v5993_v37 }
 0x1fc   :  { %v2729_v40 = vpack.c.bf16 %v6955_v62, %v6953_v39  ;;  %v2353_v61 = vunpack.c.l.bf16 %v2285_v7  ;;  %v2354_v26 = vunpack.c.h.bf16 %v2285_v7  ;;  %v5963_v39 = vld [vmem:[#allocation8 + $0x2b0] sm:$0xf0]  ;;  %1928 = vmatpush.bf16.msra.mxu2 %v5710_v10 }
 0x1fd   :  { %1878 = vmatpush.bf16.msra.mxu1 %v5994_v54 }
 0x1fe   :  { %1637 = vmatmul.bf16.vlgmr.msrb.gmra.mxu0 %v7981_v1  ;;  %1686 = vmatmul.bf16.vlgmr.msrb.gmra.mxu1 %v7983_v35  ;;  %v2793_v51 = vunpack.c.l.bf16 %v2729_v40  ;;  %v2794_v52 = vunpack.c.h.bf16 %v2729_v40  ;;  %v2489_v38 = vmul.f32 1.442695, %v2353_v61  ;;  %v2491_v4 = vmul.f32 1.442695, %v2354_v26 }
 0x1ff   :  { %1735 = vmatmul.bf16.vlgmr.msrb.gmra.mxu2 %v7981_v1  ;;  %1784 = vmatmul.bf16.vlgmr.msrb.gmra.mxu3 %v7983_v35  ;;  %v5966_v40 = vor.u32 %v6729_v28, %v5963_v39  ;;  %v2289_v61 = vxor.u32 2147516416, %v8305_v50  ;;  %v1450_v26 = vadd.f32 %v8251_v2, %v8171_v12 }
 0x200   :  { %1976 = vmatpush.bf16.msra.mxu3 %v5998_v23  ;;  %v2921_v0 = vadd.f32 1.0, %v2793_v51  ;;  %v2922_v60 = vadd.f32 1.0, %v2794_v52  ;;  %6956 = vpow2.f32 %v2489_v38  ;;  %v6669_v23 = vld [vmem:[#allocation8 + $0xac] sm:$0xf0]  ;;  %v1597_v52 = vadd.f32 %v8280_v48, %v1548_v30 }
 0x201   :  { %6958 = vpow2.f32 %v2491_v4  ;;  %v5706_v7 = vor.u32 %v6669_v23, %v5705_v33  ;;  %v1499_v4 = vadd.f32 %v8258_v6, %v1450_v26  ;;  %v2362_v48 = vunpack.c.h.bf16 %v2289_v61 }
 0x202   :  { %v3049_v44 = vpack.c.bf16 %v2922_v60, %v2921_v0 }
 0x203   :  { %1830 = vmatpush.bf16.msra.mxu0 %v5706_v7  ;;  %v2507_v39 = vmul.f32 1.442695, %v2362_v48 }
 0x204   :  { %1977 = vmatpush.bf16.msra.mxu3 %v5966_v40  ;;  %v3115_v51 = vunpack.c.h.bf16 %v3049_v44  ;;  %v3116_v38 = vunpack.c.l.bf16 %v3049_v44 }
 0x206   :  { %v6957_v37 = vpop.eup %6956  ;;  %6960 = vrcp.f32 %v3115_v51 }
 0x207   :  { %v6959_v17 = vpop.eup %6958  ;;  %6962 = vrcp.f32 %v3116_v38 }
 0x208   :  { %v2733_v0 = vpack.c.bf16 %v6959_v17, %v6957_v37 }
 0x20a   :  { %v2801_v10 = vunpack.c.l.bf16 %v2733_v0  ;;  %v2802_v23 = vunpack.c.h.bf16 %v2733_v0 }
 0x20c   :  { %v6961_v40 = vpop.eup %6960  ;;  %v2930_v26 = vadd.f32 1.0, %v2802_v23  ;;  %v5961_v23 = vld [vmem:[#allocation8 + $0x290] sm:$0xf] }
 0x20d   :  { %v6963_v17 = vpop.eup %6962 }
 0x20e   :  { %1642 = vmatmul.bf16.gmra.mxu0 %v8079_v13  ;;  %1691 = vmatmul.bf16.gmra.mxu1 %v8081_v58 }
 0x20f   :  { %1740 = vmatmul.bf16.gmra.mxu2 %v8079_v13  ;;  %1789 = vmatmul.bf16.gmra.mxu3 %v8081_v58 }
 0x21e   :  { %1647 = vmatmul.bf16.gmra.mxu0 %v8113_v11  ;;  %1696 = vmatmul.bf16.gmra.mxu1 %v8115_v19 }
 0x21f   :  { %1745 = vmatmul.bf16.gmra.mxu2 %v8113_v11  ;;  %1794 = vmatmul.bf16.gmra.mxu3 %v8115_v19 }
 0x22e   :  { %1652 = vmatmul.bf16.gmra.mxu0 %v8135_v57  ;;  %1701 = vmatmul.bf16.gmra.mxu1 %v8137_v31 }
 0x22f   :  { %1750 = vmatmul.bf16.gmra.mxu2 %v8135_v57  ;;  %1799 = vmatmul.bf16.gmra.mxu3 %v8137_v31 }
 0x230   :  { %v1462_v43 = vpop.f32.mrf.mxu0  ;;  %v1511_v41 = vpop.f32.mrf.mxu1 }
 0x231   :  { %v1463_v55 = vadd.f32 %v1462_v43, %v8171_v12 }
 0x233   :  { %v1512_v27 = vadd.f32 %v1511_v41, %v1463_v55  ;;  %v2361_v41 = vunpack.c.l.bf16 %v2289_v61  ;;  %v2929_v61 = vadd.f32 1.0, %v2801_v10 }
 0x235   :  { %v2505_v30 = vmul.f32 1.442695, %v2361_v41  ;;  %v3053_v48 = vpack.c.bf16 %v2930_v26, %v2929_v61 }
 0x237   :  { %v1560_v56 = vpop.f32.mrf.mxu2  ;;  %v1609_v59 = vpop.f32.mrf.mxu3 }
 0x238   :  { %v1561_v42 = vadd.f32 %v1560_v56, %v8188_v14  ;;  %v1464_v43 = vpop.f32.mrf.mxu0 }
 0x239   :  { %v1465_v54 = vadd.f32 %v1464_v43, %v8171_v12 }
 0x23a   :  { %v1610_v62 = vadd.f32 %v1609_v59, %v1561_v42  ;;  %v8410_v42 = vpack.c.bf16 %v1597_v52, %v1499_v4  ;;  %v1513_v59 = vpop.f32.mrf.mxu1 }
 0x23b   :  { %v1514_v33 = vadd.f32 %v1513_v59, %v1465_v54  ;;  %v2297_v59 = vxor.u32 2147516416, %v8338_v29 }
 0x23c   :  { %v8401_v49 = vpack.c.bf16 %v1610_v62, %v1512_v27  ;;  %10457 = vst [vmem:[#allocation37_spill] sm:$0xff] %v8410_v42  ;;  %v2293_v62 = vxor.u32 2147516416, %v8410_v42 }
 0x23e   :  { %v2313_v55 = vxor.u32 2147516416, %v8401_v49  ;;  %1657 = vmatmul.bf16.gmra.mxu0 %v8166_v34  ;;  %1706 = vmatmul.bf16.gmra.mxu1 %v8168_v21  ;;  %v2369_v51 = vunpack.c.l.bf16 %v2293_v62 }
 0x23f   :  { %v1562_v2 = vpop.f32.mrf.mxu2  ;;  %1755 = vmatmul.bf16.gmra.mxu2 %v8166_v34  ;;  %1804 = vmatmul.bf16.gmra.mxu3 %v8168_v21  ;;  %v1611_v6 = vpop.f32.mrf.mxu3 }
 0x240   :  { %v2409_v27 = vunpack.c.l.bf16 %v2313_v55  ;;  %v2410_v60 = vunpack.c.h.bf16 %v2313_v55  ;;  %v1563_v56 = vadd.f32 %v1562_v2, %v8188_v14  ;;  %v7659_v55 = vmov 1065369472  }
 0x241   :  { %v8418_v54 = vunpack.c.h.bf16 %v7659_v55  ;;  %v8420_v38 = vunpack.c.l.bf16 %v7659_v55  ;;  %v3143_v55 = vunpack.c.h.bf16 %v3053_v48 }
 0x242   :  { %v2601_v46 = vmul.f32 1.442695, %v2409_v27  ;;  %v2603_v18 = vmul.f32 1.442695, %v2410_v60  ;;  %v1612_v44 = vadd.f32 %v1611_v6, %v1563_v56  ;;  %v2370_v56 = vunpack.c.h.bf16 %v2293_v62 }
 0x243   :  { %v3118_v62 = vmul.f32 %v6961_v40, %v8418_v54  ;;  %v3144_v40 = vunpack.c.l.bf16 %v3053_v48 }
 0x244   :  { %6964 = vpow2.f32 %v2601_v46  ;;  %v8414_v28 = vpack.c.bf16 %v1612_v44, %v1514_v33  ;;  %v1455_v33 = vadd.f32 %v8307_v25, %v8171_v12  ;;  %v1553_v44 = vadd.f32 %v8332_v24, %v8188_v14 }
 0x245   :  { %6966 = vpow2.f32 %v2603_v18  ;;  %v2521_v18 = vmul.f32 1.442695, %v2369_v51  ;;  %v2523_v51 = vmul.f32 1.442695, %v2370_v56  ;;  %v2377_v24 = vunpack.c.l.bf16 %v2297_v59 }
 0x246   :  { %v2317_v7 = vxor.u32 2147516416, %v8414_v28  ;;  %6968 = vpow2.f32 %v2505_v30 }
 0x247   :  { %6970 = vpow2.f32 %v2507_v39  ;;  %v6733_v39 = vld [vmem:[#allocation8 + $0x2ac] sm:$0xf0] }
 0x248   :  { %v2417_v43 = vunpack.c.l.bf16 %v2317_v7  ;;  %v2418_v37 = vunpack.c.h.bf16 %v2317_v7  ;;  %v3120_v7 = vmul.f32 %v6963_v17, %v8420_v38  ;;  %v5962_v26 = vor.u32 %v6733_v39, %v5961_v23 }
 0x249   :  { %v1602_v23 = vadd.f32 %v8340_v9, %v1553_v44  ;;  %v2537_v9 = vmul.f32 1.442695, %v2377_v24  ;;  %v6661_v24 = vld [vmem:[#allocation8 + $0x6c] sm:$0xf0] }
 0x24a   :  { %v6965_v52 = vpop.eup %6964  ;;  %v2617_v41 = vmul.f32 1.442695, %v2417_v43  ;;  %v2619_v4 = vmul.f32 1.442695, %v2418_v37  ;;  %1879 = vmatpush.bf16.msra.mxu1 %v5962_v26  ;;  %v5675_v26 = vld [vmem:[#allocation8 + $0x70] sm:$0xf0] }
 0x24b   :  { %v6967_v2 = vpop.eup %6966  ;;  %v1467_v30 = vpop.f32.mrf.mxu0 }
 0x24c   :  { %v2761_v6 = vpack.c.bf16 %v6967_v2, %v6965_v52  ;;  %6972 = vpow2.f32 %v2617_v41  ;;  %v6969_v46 = vpop.eup %6968  ;;  %v1516_v10 = vpop.f32.mrf.mxu1  ;;  %v1468_v61 = vadd.f32 %v1467_v30, %v8171_v12  ;;  %v2378_v41 = vunpack.c.h.bf16 %v2297_v59  ;;  %v10458_v2 = vld [vmem:[#allocation29_spill] sm:$0xff] }
 0x24d   :  { %6974 = vpow2.f32 %v2619_v4  ;;  %v6971_v43 = vpop.eup %6970 }
 0x24e   :  { %v2857_v25 = vunpack.c.l.bf16 %v2761_v6  ;;  %v2858_v52 = vunpack.c.h.bf16 %v2761_v6  ;;  %v1517_v4 = vadd.f32 %v1516_v10, %v1468_v61  ;;  %1662 = vmatmul.bf16.gmra.mxu0 %v8260_v16  ;;  %1711 = vmatmul.bf16.gmra.mxu1 %v10458_v2  ;;  %v8441_v6 = vpack.c.bf16 %v3118_v62, %v3120_v7  ;;  %v6657_v7 = vld [vmem:[#allocation8 + $0x54] sm:$0xf] }
 0x24f   :  { %1760 = vmatmul.bf16.gmra.mxu2 %v8260_v16  ;;  %1809 = vmatmul.bf16.gmra.mxu3 %v10458_v2  ;;  %v2737_v59 = vpack.c.bf16 %v6971_v43, %v6969_v46  ;;  %6976 = vpow2.f32 %v2521_v18  ;;  %v1504_v10 = vadd.f32 %v8322_v5, %v1455_v33  ;;  %v8445_v44 = vmul.f32 1.442695, %v2378_v41  ;;  %v5673_v43 = vld [vmem:[#allocation8 + $0x50] sm:$0xf]  ;;  %v6721_v41 = vld [vmem:[#allocation8 + $0x254] sm:$0xf] }
 0x250   :  { %6978 = vpow2.f32 %v2523_v51  ;;  %v2985_v61 = vadd.f32 1.0, %v2857_v25  ;;  %v2986_v30 = vadd.f32 1.0, %v2858_v52  ;;  %v3691_v51 = vunpack.c.l.bf16 %v8441_v6 }
 0x251   :  { %6980 = vrcp.f32 %v3143_v55  ;;  %v8448_v18 = vpack.c.bf16 %v1602_v23, %v1504_v10  ;;  %v2809_v25 = vunpack.c.l.bf16 %v2737_v59  ;;  %v5678_v55 = vor.u32 %v6657_v7, %v5675_v26  ;;  %v6725_v7 = vld [vmem:[#allocation8 + $0x26c] sm:$0xf0] }
 0x252   :  { %v6973_v56 = vpop.eup %6972  ;;  %v1565_v37 = vpop.f32.mrf.mxu2  ;;  %6982 = vrcp.f32 %v3144_v40  ;;  %v5931_v40 = vld [vmem:[#allocation8 + $0x270] sm:$0xf0]  ;;  %v3081_v10 = vpack.c.bf16 %v2986_v30, %v2985_v61 }
 0x253   :  { %v6975_v39 = vpop.eup %6974  ;;  %v1614_v60 = vpop.f32.mrf.mxu3  ;;  %v1566_v5 = vadd.f32 %v1565_v37, %v8188_v14  ;;  %v5934_v23 = vor.u32 %v6721_v41, %v5931_v40  ;;  %v2810_v37 = vunpack.c.h.bf16 %v2737_v59  ;;  %1929 = vmatpush.bf16.msra.mxu2 %v5678_v55  ;;  %v2301_v50 = vxor.u32 2147516416, %v8448_v18 }
 0x254   :  { %v2765_v17 = vpack.c.bf16 %v6975_v39, %v6973_v56  ;;  %v1469_v33 = vpop.f32.mrf.mxu0  ;;  %v1518_v62 = vpop.f32.mrf.mxu1  ;;  %v5674_v39 = vor.u32 %v6661_v24, %v5673_v43  ;;  %v3339_v26 = vunpack.c.h.bf16 %v3081_v10  ;;  %6984 = vpow2.f32 %v2537_v9 }
 0x255   :  { %v1470_v52 = vadd.f32 %v1469_v33, %v8171_v12  ;;  %v1615_v56 = vadd.f32 %v1614_v60, %v1566_v5  ;;  %v6977_v46 = vpop.eup %6976  ;;  %1978 = vmatpush.bf16.msra.mxu3 %v5934_v23  ;;  %v5929_v33 = vld [vmem:[#allocation8 + $0x250] sm:$0xf]  ;;  %v3340_v60 = vunpack.c.l.bf16 %v3081_v10  ;;  %v8467_v43 = vadd.f32 1.0, %v2809_v25  ;;  %v6649_v25 = vld [vmem:[#allocation8 + $0x14] sm:$0xf] }
 0x256   :  { %v2865_v48 = vunpack.c.l.bf16 %v2765_v17  ;;  %v2866_v27 = vunpack.c.h.bf16 %v2765_v17  ;;  %v6979_v29 = vpop.eup %6978  ;;  %1831 = vmatpush.bf16.msra.mxu0 %v5674_v39  ;;  %v8459_v17 = vadd.f32 %v8381_v22, %v8171_v12  ;;  %v5930_v59 = vor.u32 %v6725_v7, %v5929_v33  ;;  %v5643_v33 = vld [vmem:[#allocation8 + $0x30] sm:$0xf0]  ;;  %v5641_v7 = vld [vmem:[#allocation8 + $0x10] sm:$0xf] }
 0x257   :  { %v1519_v0 = vadd.f32 %v1518_v62, %v1470_v52  ;;  %v8454_v2 = vpack.c.bf16 %v1615_v56, %v1517_v4  ;;  %v6981_v5 = vpop.eup %6980  ;;  %v10459_v4 = vunpack.c.l.bf16 %v8217_v32  ;;  %6986 = vrcp.f32 %v3339_v26  ;;  %v6713_v26 = vld [vmem:[#allocation8 + $0x214] sm:$0xf] }
 0x258   :  { %v8461_v61 = vpop.eup %6982  ;;  %v8470_v55 = vadd.f32 1.0, %v2810_v37  ;;  %v2993_v24 = vadd.f32 1.0, %v2865_v48  ;;  %v2994_v9 = vadd.f32 1.0, %v2866_v27  ;;  %1880 = vmatpush.bf16.msra.mxu1 %v5930_v59  ;;  %6988 = vrcp.f32 %v3340_v60  ;;  %v6653_v37 = vld [vmem:[#allocation8 + $0x2c] sm:$0xf0] }
 0x259   :  { %v8465_v62 = vmul.f32 %v3691_v51, %v10459_v4  ;;  %v2321_v52 = vxor.u32 2147516416, %v8454_v2  ;;  %v2385_v22 = vunpack.c.l.bf16 %v2301_v50  ;;  %v8473_v4 = vpack.c.bf16 %v6979_v29, %v6977_v46  ;;  %v5899_v60 = vld [vmem:[#allocation8 + $0x230] sm:$0xf0] }
 0x25a   :  { %v1567_v41 = vpop.f32.mrf.mxu2  ;;  %6990 = vpow2.f32 %v8445_v44  ;;  %v5646_v48 = vor.u32 %v6649_v25, %v5643_v33  ;;  %v5642_v16 = vor.u32 %v6653_v37, %v5641_v7  ;;  %v6985_v21 = vpop.eup %6984  ;;  %v2386_v34 = vunpack.c.h.bf16 %v2301_v50  ;;  %v6717_v44 = vld [vmem:[#allocation8 + $0x22c] sm:$0xf0] }
 0x25b   :  { %v1616_v40 = vpop.f32.mrf.mxu3  ;;  %v2425_v56 = vunpack.c.l.bf16 %v2321_v52  ;;  %v2426_v39 = vunpack.c.h.bf16 %v2321_v52  ;;  %v1568_v23 = vadd.f32 %v1567_v41, %v8188_v14  ;;  %v5897_v41 = vld [vmem:[#allocation8 + $0x210] sm:$0xf]  ;;  %v5902_v29 = vor.u32 %v6713_v26, %v5899_v60 }
 0x25c   :  { %v1472_v51 = vpop.f32.mrf.mxu0  ;;  %v1521_v10 = vpop.f32.mrf.mxu1  ;;  %v3085_v46 = vpack.c.bf16 %v2994_v9, %v2993_v24  ;;  %v2553_v25 = vmul.f32 1.442695, %v2385_v22  ;;  %v2817_v50 = vunpack.c.l.bf16 %v8473_v4  ;;  %1930 = vmatpush.bf16.msra.mxu2 %v5646_v48  ;;  %1832 = vmatpush.bf16.msra.mxu0 %v5642_v16  ;;  %v3146_v24 = vmul.f32 %v6981_v5, %v8418_v54 }
 0x25d   :  { %v1473_v27 = vadd.f32 %v1472_v51, %v8171_v12  ;;  %v2633_v59 = vmul.f32 1.442695, %v2425_v56  ;;  %v2635_v30 = vmul.f32 1.442695, %v2426_v39  ;;  %v1617_v52 = vadd.f32 %v1616_v40, %v1568_v23  ;;  %v6987_v51 = vpop.eup %6986  ;;  %1979 = vmatpush.bf16.msra.mxu3 %v5902_v29 }
 0x25e   :  { %1667 = vmatmul.bf16.gmra.mxu0 %v8311_v20  ;;  %1716 = vmatmul.bf16.gmra.mxu1 %v8313_v8  ;;  %v5898_v40 = vor.u32 %v6717_v44, %v5897_v41  ;;  %v6989_v56 = vpop.eup %6988  ;;  %v3367_v39 = vunpack.c.h.bf16 %v3085_v46  ;;  %v3368_v23 = vunpack.c.l.bf16 %v3085_v46  ;;  %v2555_v7 = vmul.f32 1.442695, %v2386_v34 }
 0x25f   :  { %v1522_v31 = vadd.f32 %v1521_v10, %v1473_v27  ;;  %6992 = vpow2.f32 %v2633_v59  ;;  %v8479_v33 = vpack.c.bf16 %v1617_v52, %v1519_v0  ;;  %1765 = vmatmul.bf16.gmra.mxu2 %v8311_v20  ;;  %1814 = vmatmul.bf16.gmra.mxu3 %v8313_v8  ;;  %v1558_v0 = vadd.f32 %v8386_v63, %v8188_v14 }
 0x260   :  { %6994 = vpow2.f32 %v2635_v30  ;;  %1881 = vmatpush.bf16.msra.mxu1 %v5898_v40  ;;  %v6991_v10 = vpop.eup %6990  ;;  %v3342_v30 = vmul.f32 %v6987_v51, %v8418_v54  ;;  %v3344_v16 = vmul.f32 %v6989_v56, %v8420_v38  ;;  %v3148_v59 = vmul.f32 %v8461_v61, %v8420_v38 }
 0x261   :  { %v2325_v22 = vxor.u32 2147516416, %v8479_v33  ;;  %6996 = vrcp.f32 %v3367_v39  ;;  %v10309_v52 = vxor.u32 2147516416, %v8358_v36  ;;  %v1607_v29 = vadd.f32 %v8388_v3, %v1558_v0 }
 0x262   :  { %v1570_v27 = vpop.f32.mrf.mxu2  ;;  %6998 = vpow2.f32 %v2553_v25  ;;  %v1509_v40 = vadd.f32 %v8384_v53, %v8459_v17  ;;  %v3345_v39 = vpack.c.bf16 %v3342_v30, %v3344_v16  ;;  %v8505_v3 = vpack.c.bf16 %v6991_v10, %v6985_v21 }
 0x263   :  { %v1619_v37 = vpop.f32.mrf.mxu3  ;;  %v2433_v5 = vunpack.c.l.bf16 %v2325_v22  ;;  %v2434_v48 = vunpack.c.h.bf16 %v2325_v22  ;;  %v1571_v26 = vadd.f32 %v1570_v27, %v8188_v14  ;;  %7000 = vrcp.f32 %v3368_v23 }
 0x264   :  { %v1474_v60 = vpop.f32.mrf.mxu0  ;;  %v1523_v63 = vpop.f32.mrf.mxu1  ;;  %7002 = vpow2.f32 %v2555_v7  ;;  %v8499_v22 = vadd.f32 1.0, %v2817_v50  ;;  %v8509_v0 = vunpack.c.l.bf16 %v10309_v52  ;;  %v8513_v53 = vpack.c.bf16 %v1607_v29, %v1509_v40 }
 0x265   :  { %v1475_v34 = vadd.f32 %v1474_v60, %v8171_v12  ;;  %v6993_v41 = vpop.eup %6992  ;;  %v2649_v44 = vmul.f32 1.442695, %v2433_v5  ;;  %v2651_v46 = vmul.f32 1.442695, %v2434_v48  ;;  %v1620_v51 = vadd.f32 %v1619_v37, %v1571_v26 }
 0x266   :  { %v6995_v25 = vpop.eup %6994  ;;  %v8503_v60 = vpack.c.bf16 %v3146_v24, %v3148_v59  ;;  %10460 = vst [vmem:[#allocation38_spill] sm:$0xff] %v8513_v53  ;;  %v3627_v30 = vunpack.c.l.bf16 %v8401_v49  ;;  %v3628_v24 = vunpack.c.h.bf16 %v8401_v49  ;;  %v3755_v5 = vunpack.c.l.bf16 %v3345_v39 }
 0x267   :  { %v1524_v56 = vadd.f32 %v1523_v63, %v1475_v34  ;;  %v2769_v61 = vpack.c.bf16 %v6995_v25, %v6993_v41  ;;  %7004 = vpow2.f32 %v2649_v44  ;;  %v8501_v27 = vpack.c.bf16 %v1620_v51, %v1522_v31  ;;  %v6997_v23 = vpop.eup %6996 }
 0x268   :  { %7006 = vpow2.f32 %v2651_v46  ;;  %v8511_v7 = vpop.eup %6998  ;;  %v3370_v16 = vmul.f32 %v6997_v23, %v8418_v54  ;;  %v3635_v49 = vunpack.c.l.bf16 %v8414_v28  ;;  %v3756_v23 = vunpack.c.h.bf16 %v3345_v39 }
 0x269   :  { %v2873_v17 = vunpack.c.l.bf16 %v2769_v61  ;;  %v2874_v50 = vunpack.c.h.bf16 %v2769_v61  ;;  %v2329_v37 = vxor.u32 2147516416, %v8501_v27  ;;  %v7001_v31 = vpop.eup %7000 }
 0x26a   :  { %v1572_v21 = vpop.f32.mrf.mxu2  ;;  %v8519_v29 = vpop.eup %7002  ;;  %v3372_v51 = vmul.f32 %v7001_v31, %v8420_v38  ;;  %v3883_v31 = vmul.f32 %v3755_v5, %v3627_v30 }
 0x26b   :  { %v1621_v10 = vpop.f32.mrf.mxu3  ;;  %v3001_v48 = vadd.f32 1.0, %v2873_v17  ;;  %v3002_v26 = vadd.f32 1.0, %v2874_v50  ;;  %v2441_v63 = vunpack.c.l.bf16 %v2329_v37  ;;  %v2442_v59 = vunpack.c.h.bf16 %v2329_v37 }
 0x26c   :  { %v1477_v34 = vpop.f32.mrf.mxu0  ;;  %v1526_v41 = vpop.f32.mrf.mxu1  ;;  %v1573_v44 = vadd.f32 %v1572_v21, %v8188_v14  ;;  %v3373_v9 = vpack.c.bf16 %v3370_v16, %v3372_v51  ;;  %v3636_v21 = vunpack.c.h.bf16 %v8414_v28 }
 0x26d   :  { %v1478_v46 = vadd.f32 %v1477_v34, %v8171_v12  ;;  %v7005_v25 = vpop.eup %7004  ;;  %v2665_v40 = vmul.f32 1.442695, %v2441_v63  ;;  %v2667_v61 = vmul.f32 1.442695, %v2442_v59  ;;  %v3089_v17 = vpack.c.bf16 %v3002_v26, %v3001_v48 }
 0x26e   :  { %v7007_v50 = vpop.eup %7006  ;;  %v1622_v52 = vadd.f32 %v1621_v10, %v1573_v44  ;;  %1672 = vmatmul.bf16.gmra.mxu0 %v8350_v45  ;;  %1721 = vmatmul.bf16.gmra.mxu1 %v8352_v15  ;;  %v3763_v10 = vunpack.c.l.bf16 %v3373_v9  ;;  %v3764_v48 = vunpack.c.h.bf16 %v3373_v9  ;;  %v3884_v44 = vmul.f32 %v3756_v23, %v3628_v24  ;;  %v5875_v24 = vld [vmem:[#allocation8 + $0x1f8] sm:$0xf0]  ;;  %v5873_v23 = vld [vmem:[#allocation8 + $0x1d8] sm:$0xf] }
 0x26f   :  { %v1527_v37 = vadd.f32 %v1526_v41, %v1478_v46  ;;  %v2773_v34 = vpack.c.bf16 %v7007_v50, %v7005_v25  ;;  %1770 = vmatmul.bf16.gmra.mxu2 %v8350_v45  ;;  %1819 = vmatmul.bf16.gmra.mxu3 %v8352_v15  ;;  %v3395_v63 = vunpack.c.h.bf16 %v3089_v17  ;;  %v3396_v59 = vunpack.c.l.bf16 %v3089_v17 }
 0x270   :  { %7008 = vpow2.f32 %v2665_v40  ;;  %v8530_v39 = vpack.c.bf16 %v1622_v52, %v1524_v56  ;;  %v3891_v51 = vmul.f32 %v3763_v10, %v3635_v49  ;;  %v3892_v25 = vmul.f32 %v3764_v48, %v3636_v21  ;;  %v6710_v21 = vld [vmem:[#allocation8 + $0x1f4] sm:$0xf0]  ;;  %v6131_v10 = vld [vmem:[#allocation8 + $0x3f8] sm:$0xf0] }
 0x271   :  { %v2881_v26 = vunpack.c.l.bf16 %v2773_v34  ;;  %v2882_v41 = vunpack.c.h.bf16 %v2773_v34  ;;  %7010 = vpow2.f32 %v2667_v61  ;;  %v6706_v61 = vld [vmem:[#allocation8 + $0x1dc] sm:$0xf] }
 0x272   :  { %v2333_v16 = vxor.u32 2147516416, %v8530_v39  ;;  %v1575_v28 = vpop.f32.mrf.mxu2  ;;  %7012 = vrcp.f32 %v3395_v63  ;;  %v8535_v34 = vpack.c.bf16 %v3891_v51, %v3883_v31  ;;  %v5878_v49 = vor.u32 %v6706_v61, %v5875_v24  ;;  %v6770_v63 = vld [vmem:[#allocation8 + $0x3dc] sm:$0xf] }
 0x273   :  { %v1624_v46 = vpop.f32.mrf.mxu3  ;;  %v3009_v50 = vadd.f32 1.0, %v2881_v26  ;;  %v3010_v30 = vadd.f32 1.0, %v2882_v41  ;;  %v1576_v5 = vadd.f32 %v1575_v28, %v8188_v14  ;;  %7014 = vrcp.f32 %v3396_v59 }
 0x274   :  { %v1479_v40 = vpop.f32.mrf.mxu0  ;;  %v1528_v52 = vpop.f32.mrf.mxu1  ;;  %v2449_v56 = vunpack.c.l.bf16 %v2333_v16  ;;  %v2450_v9 = vunpack.c.h.bf16 %v2333_v16  ;;  %10461 = vst [vmem:[#allocation39_spill] sm:$0xff] %v8535_v34  ;;  %v8537_v48 = vpack.c.bf16 %v3892_v25, %v3884_v44  ;;  %v5874_v16 = vor.u32 %v6710_v21, %v5873_v23  ;;  %2119 = vmatpush.bf16.msrb.mxu2 %v5878_v49  ;;  %v7464_v44 = vld [vmem:[#allocation10] sm:$0xff] }
 0x275   :  { %v1480_v17 = vadd.f32 %v1479_v40, %v8171_v12  ;;  %v1625_v15 = vadd.f32 %v1624_v46, %v1576_v5  ;;  %v3093_v26 = vpack.c.bf16 %v3010_v30, %v3009_v50  ;;  %v2309_v12 = vxor.u32 2147516416, %v8513_v53 }
 0x276   :  { %10462 = vst [vmem:[#allocation40_spill] sm:$0xff] %v8537_v48  ;;  %v7009_v41 = vpop.eup %7008  ;;  %v2681_v28 = vmul.f32 1.442695, %v2449_v56  ;;  %v2683_v59 = vmul.f32 1.442695, %v2450_v9  ;;  %v6134_v31 = vor.u32 %v6770_v63, %v6131_v10  ;;  %v10463_v5 = vunpack.c.h.bf16 %v8473_v4  ;;  %2021 = vmatpush.bf16.msrb.mxu0 %v5874_v16 }
 0x277   :  { %v1529_v45 = vadd.f32 %v1528_v52, %v1480_v17  ;;  %v7011_v8 = vpop.eup %7010  ;;  %v8540_v40 = vpack.c.bf16 %v1625_v15, %v1527_v37  ;;  %v3423_v46 = vunpack.c.h.bf16 %v3093_v26  ;;  %v8544_v25 = vperm.slane %v7464_v44, 2 }
 0x278   :  { %v7013_v51 = vpop.eup %7012  ;;  %v2946_v61 = vadd.f32 1.0, %v10463_v5  ;;  %7016 = vpow2.f32 %v2681_v28  ;;  %v3424_v50 = vunpack.c.l.bf16 %v3093_v26  ;;  %v2825_v56 = vunpack.c.l.bf16 %v8505_v3  ;;  %2168 = vmatpush.bf16.msrb.mxu3 %v6134_v31 }
 0x279   :  { %v7015_v30 = vpop.eup %7014  ;;  %v10464_v15 = vxor.u32 2147516416, %v8358_v36  ;;  %7018 = vpow2.f32 %v2683_v59  ;;  %v2826_v4 = vunpack.c.h.bf16 %v8505_v3  ;;  %v2569_v17 = vmul.f32 1.442695, %v8509_v0 }
 0x27a   :  { %v1577_v24 = vpop.f32.mrf.mxu2  ;;  %7020 = vrcp.f32 %v3423_v46  ;;  %v8555_v49 = vpack.c.bf16 %v8519_v29, %v8511_v7  ;;  %v2401_v21 = vunpack.c.l.bf16 %v2309_v12  ;;  %v2777_v63 = vpack.c.bf16 %v7011_v8, %v7009_v41 }
 0x27b   :  { %v2394_v37 = vunpack.c.h.bf16 %v10464_v15  ;;  %v1626_v23 = vpop.f32.mrf.mxu3  ;;  %v3398_v28 = vmul.f32 %v7013_v51, %v8418_v54  ;;  %v1578_v59 = vadd.f32 %v1577_v24, %v8188_v14  ;;  %v3400_v3 = vmul.f32 %v7015_v30, %v8420_v38 }
 0x27c   :  { %v1638_v10 = vpop.f32.mrf.mxu0  ;;  %v1687_v26 = vpop.f32.mrf.mxu1  ;;  %7022 = vrcp.f32 %v3424_v50  ;;  %v8561_v0 = vadd.f32 1.0, %v2825_v56  ;;  %v2402_v46 = vunpack.c.h.bf16 %v2309_v12  ;;  %v8565_v7 = vpack.c.bf16 %v8470_v55, %v8467_v43 }
 0x27d   :  { %v1639_v16 = vadd.f32 %v1638_v10, %v8544_v25  ;;  %v2571_v31 = vmul.f32 1.442695, %v2394_v37  ;;  %v8567_v29 = vadd.f32 1.0, %v2826_v4  ;;  %v1627_v41 = vadd.f32 %v1626_v23, %v1578_v59 }
 0x27e   :  { %v7017_v8 = vpop.eup %7016  ;;  %1833 = vmatmul.bf16.vlgmr.msra.gmra.mxu0 %v7981_v1  ;;  %1882 = vmatmul.bf16.vlgmr.msra.gmra.mxu1 %v7983_v35  ;;  %v8572_v14 = vpack.c.bf16 %v2946_v61, %v8499_v22  ;;  %v2833_v50 = vunpack.c.l.bf16 %v8555_v49  ;;  %7024 = vpow2.f32 %v2569_v17  ;;  %v2585_v12 = vmul.f32 1.442695, %v2401_v21 }
 0x27f   :  { %v1688_v51 = vadd.f32 %v1687_v26, %v1639_v16  ;;  %v7019_v5 = vpop.eup %7018  ;;  %1931 = vmatmul.bf16.vlgmr.msra.gmra.mxu2 %v7981_v1  ;;  %1980 = vmatmul.bf16.vlgmr.msra.gmra.mxu3 %v7983_v35  ;;  %v8577_v43 = vperm.slane %v7464_v44, 3  ;;  %v2889_v30 = vunpack.c.l.bf16 %v2777_v63  ;;  %v2890_v56 = vunpack.c.h.bf16 %v2777_v63 }
 0x280   :  { %v7021_v55 = vpop.eup %7020  ;;  %v8579_v15 = vpack.c.bf16 %v1627_v41, %v1529_v45  ;;  %v3401_v37 = vpack.c.bf16 %v3398_v28, %v3400_v3  ;;  %v2834_v22 = vunpack.c.h.bf16 %v8555_v49  ;;  %7026 = vpow2.f32 %v2571_v31 }
 0x281   :  { %v2587_v61 = vmul.f32 1.442695, %v2402_v46  ;;  %v3426_v4 = vmul.f32 %v7021_v55, %v8418_v54  ;;  %v2781_v24 = vpack.c.bf16 %v7019_v5, %v7017_v8  ;;  %v3171_v10 = vunpack.c.h.bf16 %v8565_v7 }
 0x282   :  { %v7023_v17 = vpop.eup %7022  ;;  %v1736_v23 = vpop.f32.mrf.mxu2  ;;  %v3172_v44 = vunpack.c.l.bf16 %v8565_v7  ;;  %v3199_v26 = vunpack.c.h.bf16 %v8572_v14  ;;  %v8586_v63 = vadd.f32 1.0, %v2833_v50  ;;  %7028 = vpow2.f32 %v2585_v12 }
 0x283   :  { %v1785_v21 = vpop.f32.mrf.mxu3  ;;  %v1737_v45 = vadd.f32 %v1736_v23, %v8577_v43  ;;  %v3428_v16 = vmul.f32 %v7023_v17, %v8420_v38  ;;  %v3017_v3 = vadd.f32 1.0, %v2889_v30  ;;  %v3018_v31 = vadd.f32 1.0, %v2890_v56 }
 0x284   :  { %v1640_v28 = vpop.f32.mrf.mxu0  ;;  %v1689_v49 = vpop.f32.mrf.mxu1  ;;  %v3771_v46 = vunpack.c.l.bf16 %v3401_v37  ;;  %v3772_v50 = vunpack.c.h.bf16 %v3401_v37  ;;  %7030 = vpow2.f32 %v2587_v61  ;;  %v3643_v55 = vunpack.c.l.bf16 %v8454_v2 }
 0x285   :  { %v8591_v8 = vpop.eup %7024  ;;  %v1786_v41 = vadd.f32 %v1785_v21, %v1737_v45  ;;  %v1641_v7 = vadd.f32 %v1640_v28, %v8544_v25  ;;  %v3429_v5 = vpack.c.bf16 %v3426_v4, %v3428_v16  ;;  %v2897_v23 = vunpack.c.l.bf16 %v2781_v24 }
 0x286   :  { %v2898_v9 = vunpack.c.h.bf16 %v2781_v24  ;;  %v8595_v52 = vpop.eup %7026  ;;  %v3644_v17 = vunpack.c.h.bf16 %v8454_v2  ;;  %7032 = vrcp.f32 %v3171_v10  ;;  %v3651_v21 = vunpack.c.l.bf16 %v8479_v33 }
 0x287   :  { %v8598_v12 = vpack.c.bf16 %v1786_v41, %v1688_v51  ;;  %v1690_v30 = vadd.f32 %v1689_v49, %v1641_v7  ;;  %v3779_v56 = vunpack.c.l.bf16 %v3429_v5  ;;  %v3652_v45 = vunpack.c.h.bf16 %v8479_v33 }
 0x288   :  { %v3780_v4 = vunpack.c.h.bf16 %v3429_v5  ;;  %v3899_v61 = vmul.f32 %v3771_v46, %v3643_v55  ;;  %v3900_v28 = vmul.f32 %v3772_v50, %v3644_v17  ;;  %v8603_v16 = vpack.c.bf16 %v3018_v31, %v3017_v3  ;;  %v8605_v24 = vpop.eup %7028 }
 0x289   :  { %v2282_v37 = vxor.u32 2147516416, %v8598_v12  ;;  %v3025_v59 = vadd.f32 1.0, %v2897_v23  ;;  %v3026_v2 = vadd.f32 1.0, %v2898_v9  ;;  %v3907_v49 = vmul.f32 %v3779_v56, %v3651_v21 }
 0x28a   :  { %v1738_v51 = vpop.f32.mrf.mxu2  ;;  %v3908_v7 = vmul.f32 %v3780_v4, %v3652_v45  ;;  %7034 = vrcp.f32 %v3172_v44  ;;  %v3065_v33 = vpack.c.bf16 %v8567_v29, %v8561_v0  ;;  %v8609_v46 = vpop.eup %7030  ;;  %v2962_v50 = vadd.f32 1.0, %v2834_v22  ;;  %v6129_v4 = vld [vmem:[#allocation8 + $0x3d8] sm:$0xf] }
 0x28b   :  { %v1787_v41 = vpop.f32.mrf.mxu3  ;;  %v2347_v10 = vunpack.c.l.bf16 %v2282_v37  ;;  %v2348_v48 = vunpack.c.h.bf16 %v2282_v37  ;;  %v1739_v3 = vadd.f32 %v1738_v51, %v8577_v43  ;;  %v8613_v5 = vpack.c.bf16 %v3907_v49, %v3899_v61 }
 0x28c   :  { %v1643_v34 = vpop.f32.mrf.mxu0  ;;  %v1692_v35 = vpop.f32.mrf.mxu1  ;;  %v8615_v9 = vpack.c.bf16 %v3908_v7, %v3900_v28  ;;  %7036 = vrcp.f32 %v3199_v26  ;;  %v3101_v0 = vpack.c.bf16 %v3026_v2, %v3025_v59  ;;  %v3451_v29 = vunpack.c.h.bf16 %v8603_v16 }
 0x28d   :  { %v1644_v31 = vadd.f32 %v1643_v34, %v8544_v25  ;;  %10465 = vst [vmem:[#allocation41_spill] sm:$0xff] %v8613_v5  ;;  %v2477_v55 = vmul.f32 1.442695, %v2347_v10  ;;  %v2479_v23 = vmul.f32 1.442695, %v2348_v48  ;;  %v8617_v17 = vpop.eup %7032  ;;  %v1788_v44 = vadd.f32 %v1787_v41, %v1739_v3 }
 0x28e   :  { %10466 = vst [vmem:[#allocation42_spill] sm:$0xff] %v8615_v9  ;;  %1838 = vmatmul.bf16.gmra.mxu0 %v8079_v13  ;;  %1887 = vmatmul.bf16.gmra.mxu1 %v8081_v58  ;;  %v10467_v34 = vunpack.c.h.bf16 %v8217_v32  ;;  %v10468_v21 = vunpack.c.h.bf16 %v8441_v6  ;;  %v10469_v22 = vunpack.c.l.bf16 %v8379_v47  ;;  %v10470_v48 = vunpack.c.l.bf16 %v8503_v60  ;;  %v6067_v5 = vld [vmem:[#allocation8 + $0x378] sm:$0xf0] }
 0x28f   :  { %v1693_v56 = vadd.f32 %v1692_v35, %v1644_v31  ;;  %7038 = vpow2.f32 %v2477_v55  ;;  %v6774_v35 = vld [vmem:[#allocation8 + $0x3f4] sm:$0xf0]  ;;  %1936 = vmatmul.bf16.gmra.mxu2 %v8079_v13  ;;  %1985 = vmatmul.bf16.gmra.mxu3 %v8081_v58  ;;  %v3227_v59 = vunpack.c.h.bf16 %v3065_v33  ;;  %v8632_v61 = vpack.c.bf16 %v1788_v44, %v1690_v30 }
 0x290   :  { %v3820_v45 = vmul.f32 %v10468_v21, %v10467_v34  ;;  %v3827_v26 = vmul.f32 %v10470_v48, %v10469_v22  ;;  %7040 = vpow2.f32 %v2479_v23  ;;  %v6130_v37 = vor.u32 %v6774_v35, %v6129_v4  ;;  %v8635_v6 = vpop.eup %7034 }
 0x291   :  { %v3452_v32 = vunpack.c.l.bf16 %v8603_v16  ;;  %v10471_v28 = vunpack.c.h.bf16 %v8379_v47  ;;  %v10472_v2 = vunpack.c.h.bf16 %v8503_v60  ;;  %v10473_v49 = vunpack.c.l.bf16 %v8572_v14 }
 0x292   :  { %v3228_v7 = vunpack.c.l.bf16 %v3065_v33  ;;  %2070 = vmatpush.bf16.msrb.mxu1 %v6130_v37  ;;  %v2286_v10 = vxor.u32 2147516416, %v8632_v61  ;;  %v1741_v30 = vpop.f32.mrf.mxu2  ;;  %v8646_v16 = vpack.c.bf16 %v2962_v50, %v8586_v63  ;;  %v3479_v31 = vunpack.c.h.bf16 %v3101_v0  ;;  %v8648_v47 = vpop.eup %7036 }
 0x293   :  { %v3828_v51 = vmul.f32 %v10472_v2, %v10471_v28  ;;  %7042 = vrcp.f32 %v10473_v49  ;;  %v1790_v3 = vpop.f32.mrf.mxu3  ;;  %v1742_v55 = vadd.f32 %v1741_v30, %v8577_v43  ;;  %v3480_v33 = vunpack.c.l.bf16 %v3101_v0  ;;  %v5841_v2 = vld [vmem:[#allocation8 + $0x198] sm:$0xf] }
 0x294   :  { %7044 = vrcp.f32 %v3451_v29  ;;  %v1645_v23 = vpop.f32.mrf.mxu0  ;;  %v1694_v14 = vpop.f32.mrf.mxu1  ;;  %v2355_v44 = vunpack.c.l.bf16 %v2286_v10  ;;  %v2356_v34 = vunpack.c.h.bf16 %v2286_v10  ;;  %v8653_v21 = vpack.c.bf16 %v3827_v26, %v8465_v62 }
 0x295   :  { %7046 = vrcp.f32 %v3227_v59  ;;  %v7039_v63 = vpop.eup %7038  ;;  %v1791_v50 = vadd.f32 %v1790_v3, %v1742_v55  ;;  %v1646_v29 = vadd.f32 %v1645_v23, %v8544_v25  ;;  %v8656_v22 = vpack.c.bf16 %v3828_v51, %v3820_v45  ;;  %v5843_v45 = vld [vmem:[#allocation8 + $0x1b8] sm:$0xf0]  ;;  %v5809_v51 = vld [vmem:[#allocation8 + $0x158] sm:$0xf] }
 0x296   :  { %10474 = vst [vmem:[#allocation43_spill] sm:$0xff] %v8653_v21  ;;  %7048 = vrcp.f32 %v3452_v32  ;;  %v7041_v48 = vpop.eup %7040  ;;  %v2493_v4 = vmul.f32 1.442695, %v2355_v44  ;;  %v2495_v35 = vmul.f32 1.442695, %v2356_v34  ;;  %v3255_v37 = vunpack.c.h.bf16 %v8646_v16 }
 0x297   :  { %10475 = vst [vmem:[#allocation44_spill] sm:$0xff] %v8656_v22  ;;  %7050 = vrcp.f32 %v3228_v7  ;;  %v2730_v59 = vpack.c.bf16 %v7041_v48, %v7039_v63  ;;  %v8661_v28 = vpack.c.bf16 %v1791_v50, %v1693_v56  ;;  %v8663_v62 = vadd.f32 %v1694_v14, %v1646_v29  ;;  %v6698_v32 = vld [vmem:[#allocation8 + $0x19c] sm:$0xf]  ;;  %v6097_v63 = vld [vmem:[#allocation8 + $0x398] sm:$0xf] }
 0x298   :  { %7052 = vrcp.f32 %v3479_v31  ;;  %v5846_v56 = vor.u32 %v6698_v32, %v5843_v45  ;;  %v6702_v31 = vld [vmem:[#allocation8 + $0x1b4] sm:$0xf0]  ;;  %v6762_v55 = vld [vmem:[#allocation8 + $0x39c] sm:$0xf] }
 0x299   :  { %v8659_v0 = vpop.eup %7042  ;;  %7054 = vrcp.f32 %v3480_v33  ;;  %v2795_v30 = vunpack.c.l.bf16 %v2730_v59  ;;  %v2796_v3 = vunpack.c.h.bf16 %v2730_v59  ;;  %v6099_v23 = vld [vmem:[#allocation8 + $0x3b8] sm:$0xf0]  ;;  %v5842_v33 = vor.u32 %v6702_v31, %v5841_v2  ;;  %v6766_v50 = vld [vmem:[#allocation8 + $0x3b4] sm:$0xf0] }
 0x29a   :  { %v7045_v26 = vpop.eup %7044  ;;  %7056 = vpow2.f32 %v2493_v4  ;;  %v6102_v44 = vor.u32 %v6762_v55, %v6099_v23  ;;  %v2290_v34 = vxor.u32 2147516416, %v8661_v28  ;;  %v1743_v29 = vpop.f32.mrf.mxu2  ;;  %2120 = vmatpush.bf16.msrb.mxu2 %v5846_v56  ;;  %v6690_v45 = vld [vmem:[#allocation8 + $0x15c] sm:$0xf]  ;;  %v6065_v22 = vld [vmem:[#allocation8 + $0x358] sm:$0xf] }
 0x29b   :  { %v8668_v10 = vpop.eup %7046  ;;  %7058 = vpow2.f32 %v2495_v35  ;;  %v1792_v48 = vpop.f32.mrf.mxu3  ;;  %v2923_v60 = vadd.f32 1.0, %v2795_v30  ;;  %v2924_v41 = vadd.f32 1.0, %v2796_v3  ;;  %v6098_v35 = vor.u32 %v6766_v50, %v6097_v63  ;;  %v5811_v7 = vld [vmem:[#allocation8 + $0x178] sm:$0xf0]  ;;  %2022 = vmatpush.bf16.msrb.mxu0 %v5842_v33  ;;  %v6694_v30 = vld [vmem:[#allocation8 + $0x174] sm:$0xf0] }
 0x29c   :  { %v7049_v14 = vpop.eup %7048  ;;  %7060 = vrcp.f32 %v3255_v37  ;;  %v1648_v59 = vpop.f32.mrf.mxu0  ;;  %v3454_v2 = vmul.f32 %v7045_v26, %v8418_v54  ;;  %2169 = vmatpush.bf16.msrb.mxu3 %v6102_v44  ;;  %v2363_v55 = vunpack.c.l.bf16 %v2290_v34  ;;  %v2364_v23 = vunpack.c.h.bf16 %v2290_v34  ;;  %v6754_v3 = vld [vmem:[#allocation8 + $0x35c] sm:$0xf]  ;;  %v6758_v26 = vld [vmem:[#allocation8 + $0x374] sm:$0xf0] }
 0x29d   :  { %v8671_v4 = vpop.eup %7050  ;;  %v1697_v32 = vpop.f32.mrf.mxu1  ;;  %v1744_v49 = vadd.f32 %v1743_v29, %v8577_v43  ;;  %v1649_v37 = vadd.f32 %v1648_v59, %v8544_v25  ;;  %v3050_v63 = vpack.c.bf16 %v2924_v41, %v2923_v60  ;;  %2071 = vmatpush.bf16.msrb.mxu1 %v6098_v35  ;;  %v5814_v50 = vor.u32 %v6690_v45, %v5811_v7 }
 0x29e   :  { %10476 = vst [vmem:[#allocation45_spill] sm:$0xff] %v8671_v4  ;;  %v7053_v31 = vpop.eup %7052  ;;  %v5810_v9 = vor.u32 %v6694_v30, %v5809_v51  ;;  %v3456_v33 = vmul.f32 %v7049_v14, %v8420_v38  ;;  %v2509_v21 = vmul.f32 1.442695, %v2363_v55  ;;  %v2511_v34 = vmul.f32 1.442695, %v2364_v23  ;;  %1843 = vmatmul.bf16.gmra.mxu0 %v8113_v11  ;;  %1892 = vmatmul.bf16.gmra.mxu1 %v8115_v19 }
 0x29f   :  { %v7055_v56 = vpop.eup %7054  ;;  %v1793_v36 = vadd.f32 %v1792_v48, %v1744_v49  ;;  %v1698_v29 = vadd.f32 %v1697_v32, %v1649_v37  ;;  %v3122_v42 = vunpack.c.h.bf16 %v3050_v63  ;;  %v3123_v41 = vunpack.c.l.bf16 %v3050_v63  ;;  %1941 = vmatmul.bf16.gmra.mxu2 %v8113_v11  ;;  %1990 = vmatmul.bf16.gmra.mxu3 %v8115_v19  ;;  %v6682_v63 = vld [vmem:[#allocation8 + $0x11c] sm:$0xf] }
 0x2a0   :  { %v7057_v44 = vpop.eup %7056  ;;  %v6070_v60 = vor.u32 %v6754_v3, %v6067_v5  ;;  %v6066_v51 = vor.u32 %v6758_v26, %v6065_v22  ;;  %7062 = vpow2.f32 %v2509_v21  ;;  %2121 = vmatpush.bf16.msrb.mxu2 %v5814_v50  ;;  %2023 = vmatpush.bf16.msrb.mxu0 %v5810_v9  ;;  %v3482_v32 = vmul.f32 %v7053_v31, %v8418_v54  ;;  %v5779_v50 = vld [vmem:[#allocation8 + $0x138] sm:$0xf0] }
 0x2a1   :  { %v7059_v59 = vpop.eup %7058  ;;  %v8684_v49 = vpack.c.bf16 %v1793_v36, %v8663_v62  ;;  %7064 = vrcp.f32 %v3122_v42  ;;  %v3484_v5 = vmul.f32 %v7055_v56, %v8420_v38  ;;  %v8692_v37 = vpack.c.bf16 %v3454_v2, %v3456_v33 }
 0x2a2   :  { %v8681_v7 = vpop.eup %7060  ;;  %v2734_v14 = vpack.c.bf16 %v7059_v59, %v7057_v44  ;;  %2170 = vmatpush.bf16.msrb.mxu3 %v6070_v60  ;;  %2072 = vmatpush.bf16.msrb.mxu1 %v6066_v51  ;;  %7066 = vrcp.f32 %v3123_v41  ;;  %v1746_v36 = vpop.f32.mrf.mxu2  ;;  %v3667_v42 = vunpack.c.l.bf16 %v8530_v39  ;;  %v5782_v59 = vor.u32 %v6682_v63, %v5779_v50  ;;  %v5777_v41 = vld [vmem:[#allocation8 + $0x118] sm:$0xf]  ;;  %v6746_v60 = vld [vmem:[#allocation8 + $0x31c] sm:$0xf] }
 0x2a3   :  { %10477 = vst [vmem:[#allocation46_spill] sm:$0xff] %v8681_v7  ;;  %v2294_v21 = vxor.u32 2147516416, %v8684_v49  ;;  %v1795_v62 = vpop.f32.mrf.mxu3  ;;  %7068 = vpow2.f32 %v2511_v34  ;;  %v1747_v9 = vadd.f32 %v1746_v36, %v8577_v43  ;;  %v6686_v34 = vld [vmem:[#allocation8 + $0x134] sm:$0xf0]  ;;  %v8696_v51 = vpack.c.bf16 %v3482_v32, %v3484_v5 }
 0x2a4   :  { %v2803_v22 = vunpack.c.l.bf16 %v2734_v14  ;;  %v2804_v45 = vunpack.c.h.bf16 %v2734_v14  ;;  %v1650_v55 = vpop.f32.mrf.mxu0  ;;  %v5778_v48 = vor.u32 %v6686_v34, %v5777_v41  ;;  %2122 = vmatpush.bf16.msrb.mxu2 %v5782_v59 }
 0x2a5   :  { %v1699_v23 = vpop.f32.mrf.mxu1  ;;  %v2371_v3 = vunpack.c.l.bf16 %v2294_v21  ;;  %v2372_v56 = vunpack.c.h.bf16 %v2294_v21  ;;  %v1796_v26 = vadd.f32 %v1795_v62, %v1747_v9  ;;  %v1651_v44 = vadd.f32 %v1650_v55, %v8544_v25 }
 0x2a6   :  { %v2931_v30 = vadd.f32 1.0, %v2803_v22  ;;  %v2932_v31 = vadd.f32 1.0, %v2804_v45  ;;  %v7063_v14 = vpop.eup %7062  ;;  %v6035_v22 = vld [vmem:[#allocation8 + $0x338] sm:$0xf0]  ;;  %v3787_v9 = vunpack.c.l.bf16 %v8692_v37  ;;  %2024 = vmatpush.bf16.msrb.mxu0 %v5778_v48 }
 0x2a7   :  { %v2525_v33 = vmul.f32 1.442695, %v2371_v3  ;;  %v2527_v36 = vmul.f32 1.442695, %v2372_v56  ;;  %v7065_v45 = vpop.eup %7064  ;;  %v8698_v35 = vpack.c.bf16 %v1796_v26, %v1698_v29  ;;  %v1700_v21 = vadd.f32 %v1699_v23, %v1651_v44 }
 0x2a8   :  { %v3054_v2 = vpack.c.bf16 %v2932_v31, %v2931_v30  ;;  %v6038_v62 = vor.u32 %v6746_v60, %v6035_v22  ;;  %v7067_v55 = vpop.eup %7066  ;;  %v3125_v63 = vmul.f32 %v7065_v45, %v8418_v54  ;;  %v3795_v29 = vunpack.c.l.bf16 %v8696_v51  ;;  %v6033_v45 = vld [vmem:[#allocation8 + $0x318] sm:$0xf] }
 0x2a9   :  { %7070 = vpow2.f32 %v2525_v33  ;;  %v7069_v5 = vpop.eup %7068  ;;  %v3127_v30 = vmul.f32 %v7067_v55, %v8420_v38  ;;  %v2298_v31 = vxor.u32 2147516416, %v8698_v35  ;;  %v3565_v23 = vunpack.c.l.bf16 %v8598_v12 }
 0x2aa   :  { %v3150_v50 = vunpack.c.h.bf16 %v3054_v2  ;;  %v3151_v32 = vunpack.c.l.bf16 %v3054_v2  ;;  %7072 = vpow2.f32 %v2527_v36  ;;  %2171 = vmatpush.bf16.msrb.mxu3 %v6038_v62  ;;  %v3566_v3 = vunpack.c.h.bf16 %v8598_v12  ;;  %v1748_v26 = vpop.f32.mrf.mxu2  ;;  %v6750_v62 = vld [vmem:[#allocation8 + $0x334] sm:$0xf0] }
 0x2ab   :  { %v2738_v56 = vpack.c.bf16 %v7069_v5, %v7063_v14  ;;  %v1797_v44 = vpop.f32.mrf.mxu3  ;;  %v3128_v59 = vpack.c.bf16 %v3125_v63, %v3127_v30  ;;  %v2379_v48 = vunpack.c.l.bf16 %v2298_v31  ;;  %v2380_v41 = vunpack.c.h.bf16 %v2298_v31 }
 0x2ac   :  { %7074 = vrcp.f32 %v3150_v50  ;;  %v1653_v34 = vpop.f32.mrf.mxu0  ;;  %v1749_v36 = vadd.f32 %v1748_v26, %v8577_v43  ;;  %v10478_v14 = vunpack.c.l.bf16 %v8501_v27  ;;  %v3923_v5 = vmul.f32 %v3795_v29, %v3667_v42 }
 0x2ad   :  { %7076 = vrcp.f32 %v3151_v32  ;;  %v1702_v60 = vpop.f32.mrf.mxu1  ;;  %v2811_v2 = vunpack.c.l.bf16 %v2738_v56  ;;  %v2812_v33 = vunpack.c.h.bf16 %v2738_v56  ;;  %v1654_v22 = vadd.f32 %v1653_v34, %v8544_v25  ;;  %v10479_v56 = vld [vmem:[#allocation25_spill] sm:$0xff] }
 0x2ae   :  { %v2541_v55 = vmul.f32 1.442695, %v2379_v48  ;;  %v2543_v12 = vmul.f32 1.442695, %v2380_v41  ;;  %v3915_v50 = vmul.f32 %v3787_v9, %v10478_v14  ;;  %v1798_v31 = vadd.f32 %v1797_v44, %v1749_v36  ;;  %1848 = vmatmul.bf16.gmra.mxu0 %v8135_v57  ;;  %1897 = vmatmul.bf16.gmra.mxu1 %v10479_v56 }
 0x2af   :  { %v7071_v63 = vpop.eup %7070  ;;  %v2939_v32 = vadd.f32 1.0, %v2811_v2  ;;  %v2940_v30 = vadd.f32 1.0, %v2812_v33  ;;  %v1703_v19 = vadd.f32 %v1702_v60, %v1654_v22  ;;  %v3693_v11 = vunpack.c.l.bf16 %v3128_v59  ;;  %1946 = vmatmul.bf16.gmra.mxu2 %v8135_v57  ;;  %1995 = vmatmul.bf16.gmra.mxu3 %v10479_v56 }
 0x2b0   :  { %v7073_v26 = vpop.eup %7072  ;;  %v3694_v34 = vunpack.c.h.bf16 %v3128_v59  ;;  %7078 = vpow2.f32 %v2541_v55  ;;  %v6034_v48 = vor.u32 %v6750_v62, %v6033_v45  ;;  %v8715_v29 = vpack.c.bf16 %v1798_v31, %v1700_v21 }
 0x2b1   :  { %v2742_v42 = vpack.c.bf16 %v7073_v26, %v7071_v63  ;;  %7080 = vpow2.f32 %v2543_v12  ;;  %v8717_v44 = vpack.c.bf16 %v2940_v30, %v2939_v32  ;;  %v3573_v2 = vunpack.c.l.bf16 %v8632_v61 }
 0x2b2   :  { %v7075_v9 = vpop.eup %7074  ;;  %v3574_v59 = vunpack.c.h.bf16 %v8632_v61  ;;  %2073 = vmatpush.bf16.msrb.mxu1 %v6034_v48  ;;  %v8722_v33 = vpack.c.bf16 %v3923_v5, %v3915_v50  ;;  %v2302_v62 = vxor.u32 2147516416, %v8715_v29  ;;  %v1751_v21 = vpop.f32.mrf.mxu2  ;;  %v3821_v12 = vmul.f32 %v3693_v11, %v3565_v23  ;;  %v6674_v48 = vld [vmem:[#allocation8 + $0xdc] sm:$0xf]  ;;  %v5745_v11 = vld [vmem:[#allocation8 + $0xd8] sm:$0xf] }
 0x2b3   :  { %v7077_v41 = vpop.eup %7076  ;;  %v3153_v60 = vmul.f32 %v7075_v9, %v8418_v54  ;;  %v2819_v22 = vunpack.c.l.bf16 %v2742_v42  ;;  %v2820_v45 = vunpack.c.h.bf16 %v2742_v42  ;;  %v1800_v55 = vpop.f32.mrf.mxu3  ;;  %v3822_v14 = vmul.f32 %v3694_v34, %v3566_v3  ;;  %v5747_v9 = vld [vmem:[#allocation8 + $0xf8] sm:$0xf0]  ;;  %v6678_v23 = vld [vmem:[#allocation8 + $0xf4] sm:$0xf0] }
 0x2b4   :  { %10480 = vst [vmem:[#allocation47_spill] sm:$0xff] %v8722_v33  ;;  %v3155_v36 = vmul.f32 %v7077_v41, %v8420_v38  ;;  %v1752_v63 = vadd.f32 %v1751_v21, %v8577_v43  ;;  %v1655_v32 = vpop.f32.mrf.mxu0  ;;  %v3178_v31 = vunpack.c.h.bf16 %v8717_v44  ;;  %v2387_v5 = vunpack.c.l.bf16 %v2302_v62  ;;  %v6738_v3 = vld [vmem:[#allocation8 + $0x2dc] sm:$0xf] }
 0x2b5   :  { %v1704_v30 = vpop.f32.mrf.mxu1  ;;  %v2947_v26 = vadd.f32 1.0, %v2819_v22  ;;  %v2948_v50 = vadd.f32 1.0, %v2820_v45  ;;  %v2388_v42 = vunpack.c.h.bf16 %v2302_v62  ;;  %v1656_v56 = vadd.f32 %v1655_v32, %v8544_v25 }
 0x2b6   :  { %v3156_v61 = vpack.c.bf16 %v3153_v60, %v3155_v36  ;;  %v7079_v41 = vpop.eup %7078  ;;  %v1801_v33 = vadd.f32 %v1800_v55, %v1752_v63  ;;  %v5750_v57 = vor.u32 %v6674_v48, %v5747_v9  ;;  %v2557_v13 = vmul.f32 1.442695, %v2387_v5  ;;  %v6003_v60 = vld [vmem:[#allocation8 + $0x2f8] sm:$0xf0] }
 0x2b7   :  { %v7081_v34 = vpop.eup %7080  ;;  %v5746_v7 = vor.u32 %v6678_v23, %v5745_v11  ;;  %v2559_v22 = vmul.f32 1.442695, %v2388_v42  ;;  %v1705_v4 = vadd.f32 %v1704_v30, %v1656_v56  ;;  %v6006_v63 = vor.u32 %v6738_v3, %v6003_v60  ;;  %v6742_v30 = vld [vmem:[#allocation8 + $0x2f4] sm:$0xf0] }
 0x2b8   :  { %v3701_v21 = vunpack.c.l.bf16 %v3156_v61  ;;  %v3702_v58 = vunpack.c.h.bf16 %v3156_v61  ;;  %v2746_v36 = vpack.c.bf16 %v7081_v34, %v7079_v41  ;;  %v8729_v45 = vpack.c.bf16 %v1801_v33, %v1703_v19  ;;  %2123 = vmatpush.bf16.msrb.mxu2 %v5750_v57  ;;  %v6001_v33 = vld [vmem:[#allocation8 + $0x2d8] sm:$0xf] }
 0x2b9   :  { %7082 = vpow2.f32 %v2557_v13  ;;  %2025 = vmatpush.bf16.msrb.mxu0 %v5746_v7  ;;  %2172 = vmatpush.bf16.msrb.mxu3 %v6006_v63  ;;  %v3179_v19 = vunpack.c.l.bf16 %v8717_v44  ;;  %v10483_v57 = vunpack.c.l.bf16 %v8646_v16  ;;  %v6002_v23 = vor.u32 %v6742_v30, %v6001_v33 }
 0x2ba   :  { %v3829_v62 = vmul.f32 %v3701_v21, %v3573_v2  ;;  %v3830_v55 = vmul.f32 %v3702_v58, %v3574_v59  ;;  %v2827_v32 = vunpack.c.l.bf16 %v2746_v36  ;;  %v2828_v48 = vunpack.c.h.bf16 %v2746_v36  ;;  %v1753_v61 = vpop.f32.mrf.mxu2  ;;  %v10484_v36 = vld [vmem:[#allocation26_spill] sm:$0xff] }
 0x2bb   :  { %7084 = vpow2.f32 %v2559_v22  ;;  %v2306_v9 = vxor.u32 2147516416, %v8729_v45  ;;  %v1802_v5 = vpop.f32.mrf.mxu3  ;;  %v1754_v42 = vadd.f32 %v1753_v61, %v8577_v43  ;;  %v8743_v44 = vpack.c.bf16 %v8595_v52, %v8591_v8  ;;  %v10485_v22 = vld [vmem:[#allocation27_spill] sm:$0xff]  ;;  %2074 = vmatpush.bf16.msrb.mxu1 %v6002_v23  ;;  %v6670_v61 = vld [vmem:[#allocation8 + $0xb4] sm:$0xf0] }
 0x2bc   :  { %v8732_v11 = vpack.c.bf16 %v3829_v62, %v3821_v12  ;;  %v8734_v41 = vpack.c.bf16 %v3830_v55, %v3822_v14  ;;  %7086 = vrcp.f32 %v10483_v57  ;;  %v2955_v13 = vadd.f32 1.0, %v2827_v32  ;;  %v1658_v2 = vpop.f32.mrf.mxu0  ;;  %v6730_v32 = vld [vmem:[#allocation8 + $0x29c] sm:$0xf] }
 0x2bd   :  { %v2956_v58 = vadd.f32 1.0, %v2828_v48  ;;  %v2395_v7 = vunpack.c.l.bf16 %v2306_v9  ;;  %v2396_v56 = vunpack.c.h.bf16 %v2306_v9  ;;  %v1707_v59 = vpop.f32.mrf.mxu1  ;;  %v1659_v12 = vadd.f32 %v1658_v2, %v8544_v25 }
 0x2be   :  { %10481 = vst [vmem:[#allocation48_spill] sm:$0xff] %v8732_v11  ;;  %v3062_v14 = vpack.c.bf16 %v2948_v50, %v2947_v26  ;;  %7088 = vrcp.f32 %v3178_v31  ;;  %v1803_v21 = vadd.f32 %v1802_v5, %v1754_v42  ;;  %1853 = vmatmul.bf16.gmra.mxu0 %v10484_v36  ;;  %1902 = vmatmul.bf16.gmra.mxu1 %v10485_v22 }
 0x2bf   :  { %10482 = vst [vmem:[#allocation49_spill] sm:$0xff] %v8734_v41  ;;  %v2573_v16 = vmul.f32 1.442695, %v2395_v7  ;;  %v2575_v3 = vmul.f32 1.442695, %v2396_v56  ;;  %v7083_v34 = vpop.eup %7082  ;;  %v1708_v60 = vadd.f32 %v1707_v59, %v1659_v12  ;;  %7090 = vrcp.f32 %v3179_v19  ;;  %1951 = vmatmul.bf16.gmra.mxu2 %v10484_v36  ;;  %2000 = vmatmul.bf16.gmra.mxu3 %v10485_v22 }
 0x2c0   :  { %v3206_v62 = vunpack.c.h.bf16 %v3062_v14  ;;  %v3207_v52 = vunpack.c.l.bf16 %v3062_v14  ;;  %v8750_v26 = vpack.c.bf16 %v2956_v58, %v2955_v13  ;;  %v8754_v63 = vpack.c.bf16 %v1803_v21, %v1705_v4 }
 0x2c1   :  { %v7085_v55 = vpop.eup %7084  ;;  %7092 = vpow2.f32 %v2573_v16 }
 0x2c2   :  { %v8752_v31 = vpop.eup %7086  ;;  %v2750_v50 = vpack.c.bf16 %v7085_v55, %v7083_v34  ;;  %7094 = vpow2.f32 %v2575_v3  ;;  %v2310_v57 = vxor.u32 2147516416, %v8754_v63  ;;  %v1756_v13 = vpop.f32.mrf.mxu2  ;;  %v3234_v30 = vunpack.c.h.bf16 %v8750_v26  ;;  %v6666_v3 = vld [vmem:[#allocation8 + $0x9c] sm:$0xf] }
 0x2c3   :  { %7096 = vrcp.f32 %v3206_v62  ;;  %v1805_v58 = vpop.f32.mrf.mxu3  ;;  %v1757_v2 = vadd.f32 %v1756_v13, %v8577_v43  ;;  %v5715_v34 = vld [vmem:[#allocation8 + $0xb8] sm:$0xf0] }
 0x2c4   :  { %v2835_v5 = vunpack.c.l.bf16 %v2750_v50  ;;  %v2836_v19 = vunpack.c.h.bf16 %v2750_v50  ;;  %7098 = vrcp.f32 %v3207_v52  ;;  %v7089_v7 = vpop.eup %7088  ;;  %v1660_v59 = vpop.f32.mrf.mxu0  ;;  %v2403_v14 = vunpack.c.l.bf16 %v2310_v57  ;;  %v5713_v50 = vld [vmem:[#allocation8 + $0x98] sm:$0xf] }
 0x2c5   :  { %v1709_v33 = vpop.f32.mrf.mxu1  ;;  %v7091_v42 = vpop.eup %7090  ;;  %v2404_v16 = vunpack.c.h.bf16 %v2310_v57  ;;  %v1806_v62 = vadd.f32 %v1805_v58, %v1757_v2  ;;  %v1661_v55 = vadd.f32 %v1660_v59, %v8544_v25  ;;  %v5718_v52 = vor.u32 %v6666_v3, %v5715_v34 }
 0x2c6   :  { %v2963_v12 = vadd.f32 1.0, %v2835_v5  ;;  %v2964_v23 = vadd.f32 1.0, %v2836_v19  ;;  %v3181_v13 = vmul.f32 %v7089_v7, %v8418_v54  ;;  %v2589_v9 = vmul.f32 1.442695, %v2403_v14  ;;  %v5971_v5 = vld [vmem:[#allocation8 + $0x2b8] sm:$0xf0] }
 0x2c7   :  { %v7093_v21 = vpop.eup %7092  ;;  %v2591_v48 = vmul.f32 1.442695, %v2404_v16  ;;  %v5714_v56 = vor.u32 %v6670_v61, %v5713_v50  ;;  %v3183_v19 = vmul.f32 %v7091_v42, %v8420_v38  ;;  %v8768_v41 = vpack.c.bf16 %v1806_v62, %v1708_v60  ;;  %2124 = vmatpush.bf16.msrb.mxu2 %v5718_v52  ;;  %v6734_v52 = vld [vmem:[#allocation8 + $0x2b4] sm:$0xf0] }
 0x2c8   :  { %v7095_v8 = vpop.eup %7094  ;;  %v1710_v58 = vadd.f32 %v1709_v33, %v1661_v55  ;;  %v5974_v2 = vor.u32 %v6730_v32, %v5971_v5  ;;  %7100 = vpow2.f32 %v2589_v9  ;;  %v3589_v14 = vunpack.c.l.bf16 %v8684_v49 }
 0x2c9   :  { %v7097_v57 = vpop.eup %7096  ;;  %v2754_v4 = vpack.c.bf16 %v7095_v8, %v7093_v21  ;;  %2026 = vmatpush.bf16.msrb.mxu0 %v5714_v56  ;;  %v3184_v3 = vpack.c.bf16 %v3181_v13, %v3183_v19  ;;  %7102 = vpow2.f32 %v2591_v48  ;;  %v2314_v61 = vxor.u32 2147516416, %v8768_v41  ;;  %v5969_v48 = vld [vmem:[#allocation8 + $0x298] sm:$0xf] }
 0x2ca   :  { %v7099_v59 = vpop.eup %7098  ;;  %v3209_v7 = vmul.f32 %v7097_v57, %v8418_v54  ;;  %2173 = vmatpush.bf16.msrb.mxu3 %v5974_v2  ;;  %v3590_v8 = vunpack.c.h.bf16 %v8684_v49  ;;  %v1758_v60 = vpop.f32.mrf.mxu2  ;;  %v8775_v32 = vpack.c.bf16 %v2964_v23, %v2963_v12  ;;  %v3235_v9 = vunpack.c.l.bf16 %v8750_v26 }
 0x2cb   :  { %v2843_v16 = vunpack.c.l.bf16 %v2754_v4  ;;  %v1807_v42 = vpop.f32.mrf.mxu3  ;;  %v3211_v33 = vmul.f32 %v7099_v59, %v8420_v38  ;;  %7104 = vrcp.f32 %v3234_v30  ;;  %v2844_v56 = vunpack.c.h.bf16 %v2754_v4  ;;  %v10486_v59 = vld [vmem:[#allocation28_spill] sm:$0xff] }
 0x2cc   :  { %v2411_v34 = vunpack.c.l.bf16 %v2314_v61  ;;  %v2412_v21 = vunpack.c.h.bf16 %v2314_v61  ;;  %v1663_v62 = vpop.f32.mrf.mxu0  ;;  %v3709_v50 = vunpack.c.l.bf16 %v3184_v3  ;;  %v1759_v13 = vadd.f32 %v1758_v60, %v8577_v43  ;;  %v10487_v61 = vld [vmem:[#allocation29_spill] sm:$0xff] }
 0x2cd   :  { %v1712_v55 = vpop.f32.mrf.mxu1  ;;  %v1664_v49 = vadd.f32 %v1663_v62, %v8544_v25  ;;  %v5970_v5 = vor.u32 %v6734_v52, %v5969_v48  ;;  %v3212_v19 = vpack.c.bf16 %v3209_v7, %v3211_v33  ;;  %v2971_v57 = vadd.f32 1.0, %v2843_v16 }
 0x2ce   :  { %v2605_v12 = vmul.f32 1.442695, %v2411_v34  ;;  %v2607_v23 = vmul.f32 1.442695, %v2412_v21  ;;  %v3710_v2 = vunpack.c.h.bf16 %v3184_v3  ;;  %v7101_v26 = vpop.eup %7100  ;;  %v1808_v30 = vadd.f32 %v1807_v42, %v1759_v13  ;;  %1858 = vmatmul.bf16.gmra.mxu0 %v10486_v59  ;;  %1907 = vmatmul.bf16.gmra.mxu1 %v10487_v61 }
 0x2cf   :  { %v1713_v4 = vadd.f32 %v1712_v55, %v1664_v49  ;;  %v3717_v11 = vunpack.c.l.bf16 %v3212_v19  ;;  %v3718_v22 = vunpack.c.h.bf16 %v3212_v19  ;;  %v7103_v36 = vpop.eup %7102  ;;  %v2972_v53 = vadd.f32 1.0, %v2844_v56  ;;  %1956 = vmatmul.bf16.gmra.mxu2 %v10486_v59  ;;  %2005 = vmatmul.bf16.gmra.mxu3 %v10487_v61 }
 0x2d0   :  { %7106 = vpow2.f32 %v2605_v12  ;;  %v10488_v7 = vunpack.c.l.bf16 %v8661_v28  ;;  %v3262_v3 = vunpack.c.h.bf16 %v8775_v32  ;;  %v2758_v42 = vpack.c.bf16 %v7103_v36, %v7101_v26  ;;  %2075 = vmatpush.bf16.msrb.mxu1 %v5970_v5  ;;  %v5683_v12 = vld [vmem:[#allocation8 + $0x78] sm:$0xf0] }
 0x2d1   :  { %v7105_v60 = vpop.eup %7104  ;;  %7108 = vpow2.f32 %v2607_v23  ;;  %v8787_v33 = vpack.c.bf16 %v1808_v30, %v1710_v58  ;;  %v3845_v34 = vmul.f32 %v3717_v11, %v3589_v14  ;;  %v10489_v21 = vunpack.c.h.bf16 %v8661_v28 }
 0x2d2   :  { %v3837_v16 = vmul.f32 %v3709_v50, %v10488_v7  ;;  %v3846_v62 = vmul.f32 %v3718_v22, %v3590_v8  ;;  %7110 = vrcp.f32 %v3235_v9  ;;  %v3263_v55 = vunpack.c.l.bf16 %v8775_v32  ;;  %v1761_v13 = vpop.f32.mrf.mxu2  ;;  %v6658_v9 = vld [vmem:[#allocation8 + $0x5c] sm:$0xf]  ;;  %v5681_v7 = vld [vmem:[#allocation8 + $0x58] sm:$0xf] }
 0x2d3   :  { %v3838_v56 = vmul.f32 %v3710_v2, %v10489_v21  ;;  %v2851_v48 = vunpack.c.l.bf16 %v2758_v42  ;;  %v2852_v52 = vunpack.c.h.bf16 %v2758_v42  ;;  %v2318_v50 = vxor.u32 2147516416, %v8787_v33  ;;  %v1810_v49 = vpop.f32.mrf.mxu3  ;;  %v6722_v42 = vld [vmem:[#allocation8 + $0x25c] sm:$0xf] }
 0x2d4   :  { %v8793_v19 = vpack.c.bf16 %v3845_v34, %v3837_v16  ;;  %v1762_v36 = vadd.f32 %v1761_v13, %v8577_v43  ;;  %v1665_v58 = vpop.f32.mrf.mxu0  ;;  %v3237_v28 = vmul.f32 %v7105_v60, %v8418_v54  ;;  %7112 = vrcp.f32 %v3262_v3  ;;  %v6662_v16 = vld [vmem:[#allocation8 + $0x74] sm:$0xf0]  ;;  %v5939_v3 = vld [vmem:[#allocation8 + $0x278] sm:$0xf0] }
 0x2d5   :  { %v1714_v5 = vpop.f32.mrf.mxu1  ;;  %v8796_v11 = vpack.c.bf16 %v3846_v62, %v3838_v56  ;;  %v2979_v22 = vadd.f32 1.0, %v2851_v48  ;;  %v2980_v14 = vadd.f32 1.0, %v2852_v52  ;;  %v2419_v8 = vunpack.c.l.bf16 %v2318_v50 }
 0x2d6   :  { %10490 = vst [vmem:[#allocation50_spill] sm:$0xff] %v8793_v19  ;;  %v2420_v32 = vunpack.c.h.bf16 %v2318_v50  ;;  %v7107_v23 = vpop.eup %7106  ;;  %v1811_v2 = vadd.f32 %v1810_v49, %v1762_v36  ;;  %v1666_v26 = vadd.f32 %v1665_v58, %v8544_v25  ;;  %v5686_v30 = vor.u32 %v6658_v9, %v5683_v12 }
 0x2d7   :  { %10491 = vst [vmem:[#allocation51_spill] sm:$0xff] %v8796_v11  ;;  %7114 = vrcp.f32 %v3263_v55  ;;  %v7109_v34 = vpop.eup %7108  ;;  %v2621_v21 = vmul.f32 1.442695, %v2419_v8  ;;  %v5682_v60 = vor.u32 %v6662_v16, %v5681_v7  ;;  %v8800_v62 = vpack.c.bf16 %v2972_v53, %v2971_v57 }
 0x2d8   :  { %v2623_v56 = vmul.f32 1.442695, %v2420_v32  ;;  %v7111_v48 = vpop.eup %7110  ;;  %v8802_v52 = vpack.c.bf16 %v7109_v34, %v7107_v23  ;;  %v8804_v50 = vpack.c.bf16 %v1811_v2, %v1713_v4  ;;  %v1715_v13 = vadd.f32 %v1714_v5, %v1666_v26  ;;  %2125 = vmatpush.bf16.msrb.mxu2 %v5686_v30  ;;  %v5937_v5 = vld [vmem:[#allocation8 + $0x258] sm:$0xf] }
 0x2d9   :  { %v5942_v49 = vor.u32 %v6722_v42, %v5939_v3  ;;  %v10492_v36 = vunpack.c.l.bf16 %v8743_v44  ;;  %v8812_v55 = vpack.c.bf16 %v8609_v46, %v8605_v24  ;;  %7116 = vpow2.f32 %v2621_v21  ;;  %2027 = vmatpush.bf16.msrb.mxu0 %v5682_v60  ;;  %v6726_v32 = vld [vmem:[#allocation8 + $0x274] sm:$0xf0] }
 0x2da   :  { %v3239_v53 = vmul.f32 %v7111_v48, %v8420_v38  ;;  %v7113_v57 = vpop.eup %7112  ;;  %v2859_v8 = vunpack.c.l.bf16 %v8802_v52  ;;  %7118 = vpow2.f32 %v2623_v56  ;;  %v2322_v4 = vxor.u32 2147516416, %v8804_v50  ;;  %v1763_v46 = vpop.f32.mrf.mxu2 }
 0x2db   :  { %v8808_v58 = vadd.f32 1.0, %v10492_v36  ;;  %2174 = vmatpush.bf16.msrb.mxu3 %v5942_v49  ;;  %v8817_v9 = vpack.c.bf16 %v2980_v14, %v2979_v22  ;;  %v3597_v12 = vunpack.c.l.bf16 %v8698_v35  ;;  %v1812_v23 = vpop.f32.mrf.mxu3  ;;  %v5938_v2 = vor.u32 %v6726_v32, %v5937_v5  ;;  %v6650_v49 = vld [vmem:[#allocation8 + $0x1c] sm:$0xf] }
 0x2dc   :  { %v8821_v26 = vpack.c.bf16 %v3237_v28, %v3239_v53  ;;  %v2427_v7 = vunpack.c.l.bf16 %v2322_v4  ;;  %v1668_v16 = vpop.f32.mrf.mxu0  ;;  %v3605_v34 = vunpack.c.l.bf16 %v8715_v29  ;;  %v3606_v21 = vunpack.c.h.bf16 %v8715_v29 }
 0x2dd   :  { %v7115_v30 = vpop.eup %7114  ;;  %v1717_v42 = vpop.f32.mrf.mxu1  ;;  %v3290_v22 = vunpack.c.h.bf16 %v8800_v62  ;;  %v1764_v14 = vadd.f32 %v1763_v46, %v8577_v43  ;;  %v1669_v56 = vadd.f32 %v1668_v16, %v8544_v25  ;;  %2076 = vmatpush.bf16.msrb.mxu1 %v5938_v2  ;;  %v3265_v60 = vmul.f32 %v7113_v57, %v8418_v54  ;;  %v10493_v46 = vld [vmem:[#allocation32_spill] sm:$0xff]  ;;  %v5651_v2 = vld [vmem:[#allocation8 + $0x38] sm:$0xf0]  ;;  %v5649_v16 = vld [vmem:[#allocation8 + $0x18] sm:$0xf] }
 0x2de   :  { %v3267_v28 = vmul.f32 %v7115_v30, %v8420_v38  ;;  %v8830_v3 = vadd.f32 1.0, %v2859_v8  ;;  %v2637_v48 = vmul.f32 1.442695, %v2427_v7  ;;  %v3291_v36 = vunpack.c.l.bf16 %v8800_v62  ;;  %1863 = vmatmul.bf16.gmra.mxu0 %v8311_v20  ;;  %1912 = vmatmul.bf16.gmra.mxu1 %v10493_v46  ;;  %v6654_v57 = vld [vmem:[#allocation8 + $0x34] sm:$0xf0] }
 0x2df   :  { %v7117_v29 = vpop.eup %7116  ;;  %v1813_v5 = vadd.f32 %v1812_v23, %v1764_v14  ;;  %v1718_v32 = vadd.f32 %v1717_v42, %v1669_v56  ;;  %v3725_v8 = vunpack.c.l.bf16 %v8821_v26  ;;  %v2860_v7 = vunpack.c.h.bf16 %v8802_v52  ;;  %1961 = vmatmul.bf16.gmra.mxu2 %v8311_v20  ;;  %2010 = vmatmul.bf16.gmra.mxu3 %v10493_v46  ;;  %v6714_v42 = vld [vmem:[#allocation8 + $0x21c] sm:$0xf]  ;;  %v5905_v56 = vld [vmem:[#allocation8 + $0x218] sm:$0xf] }
 0x2e0   :  { %v3268_v24 = vpack.c.bf16 %v3265_v60, %v3267_v28  ;;  %v7119_v30 = vpop.eup %7118  ;;  %v2428_v11 = vunpack.c.h.bf16 %v2322_v4  ;;  %v5654_v62 = vor.u32 %v6650_v49, %v5651_v2  ;;  %v5650_v23 = vor.u32 %v6654_v57, %v5649_v16  ;;  %v5907_v14 = vld [vmem:[#allocation8 + $0x238] sm:$0xf0]  ;;  %v6718_v60 = vld [vmem:[#allocation8 + $0x234] sm:$0xf0] }
 0x2e1   :  { %v2766_v53 = vpack.c.bf16 %v7119_v30, %v7117_v29  ;;  %v8840_v19 = vpack.c.bf16 %v1813_v5, %v1715_v13  ;;  %v5910_v61 = vor.u32 %v6714_v42, %v5907_v14  ;;  %v3726_v28 = vunpack.c.h.bf16 %v8821_v26 }
 0x2e2   :  { %2126 = vmatpush.bf16.msrb.mxu2 %v5654_v62  ;;  %2028 = vmatpush.bf16.msrb.mxu0 %v5650_v23  ;;  %v5906_v52 = vor.u32 %v6718_v60, %v5905_v56  ;;  %v3733_v4 = vunpack.c.l.bf16 %v3268_v24  ;;  %v3734_v59 = vunpack.c.h.bf16 %v3268_v24  ;;  %7120 = vrcp.f32 %v3290_v22  ;;  %v1766_v2 = vpop.f32.mrf.mxu2 }
 0x2e3   :  { %v2867_v20 = vunpack.c.l.bf16 %v2766_v53  ;;  %v2868_v46 = vunpack.c.h.bf16 %v2766_v53  ;;  %v2326_v49 = vxor.u32 2147516416, %v8840_v19  ;;  %v1815_v16 = vpop.f32.mrf.mxu3  ;;  %2175 = vmatpush.bf16.msrb.mxu3 %v5910_v61  ;;  %v3853_v29 = vmul.f32 %v3725_v8, %v3597_v12 }
 0x2e4   :  { %v1767_v13 = vadd.f32 %v1766_v2, %v8577_v43  ;;  %v1670_v5 = vpop.f32.mrf.mxu0  ;;  %2077 = vmatpush.bf16.msrb.mxu1 %v5906_v52  ;;  %v3861_v26 = vmul.f32 %v3733_v4, %v3605_v34  ;;  %v3862_v30 = vmul.f32 %v3734_v59, %v3606_v21  ;;  %7122 = vrcp.f32 %v3291_v36 }
 0x2e5   :  { %v1719_v57 = vpop.f32.mrf.mxu1  ;;  %v2639_v62 = vmul.f32 1.442695, %v2428_v11  ;;  %v2435_v23 = vunpack.c.l.bf16 %v2326_v49  ;;  %v2436_v24 = vunpack.c.h.bf16 %v2326_v49  ;;  %v10494_v22 = vunpack.c.h.bf16 %v8698_v35 }
 0x2e6   :  { %v2988_v42 = vadd.f32 1.0, %v2860_v7  ;;  %v1816_v14 = vadd.f32 %v1815_v16, %v1767_v13  ;;  %v1671_v56 = vadd.f32 %v1670_v5, %v8544_v25  ;;  %v8848_v61 = vpack.c.bf16 %v3861_v26, %v3853_v29 }
 0x2e7   :  { %v3854_v53 = vmul.f32 %v3726_v28, %v10494_v22  ;;  %v2995_v12 = vadd.f32 1.0, %v2867_v20  ;;  %7124 = vpow2.f32 %v2637_v48  ;;  %v2653_v8 = vmul.f32 1.442695, %v2435_v23 }
 0x2e8   :  { %10495 = vst [vmem:[#allocation52_spill] sm:$0xff] %v8848_v61  ;;  %v7121_v34 = vpop.eup %7120  ;;  %v2996_v59 = vadd.f32 1.0, %v2868_v46  ;;  %v2655_v21 = vmul.f32 1.442695, %v2436_v24  ;;  %v8852_v11 = vpack.c.bf16 %v1816_v14, %v1718_v32  ;;  %v1720_v36 = vadd.f32 %v1719_v57, %v1671_v56  ;;  %v10500_v14 = vld [vmem:[#allocation35_spill] sm:$0xff] }
 0x2e9   :  { %v8850_v60 = vpack.c.bf16 %v3862_v30, %v3854_v53  ;;  %v10497_v35 = vunpack.c.h.bf16 %v8743_v44  ;;  %7126 = vpow2.f32 %v2639_v62  ;;  %v3174_v7 = vmul.f32 %v8617_v17, %v8418_v54 }
 0x2ea   :  { %v3319_v52 = vunpack.c.l.bf16 %v8817_v9  ;;  %v7123_v20 = vpop.eup %7122  ;;  %v2849_v48 = vunpack.c.l.bf16 %v8812_v55  ;;  %v2850_v4 = vunpack.c.h.bf16 %v8812_v55  ;;  %v2337_v46 = vxor.u32 2147516416, %v8540_v40  ;;  %v1768_v32 = vpop.f32.mrf.mxu2 }
 0x2eb   :  { %10496 = vst [vmem:[#allocation53_spill] sm:$0xff] %v8850_v60  ;;  %v2970_v28 = vadd.f32 1.0, %v10497_v35  ;;  %7128 = vpow2.f32 %v2653_v8  ;;  %v1817_v49 = vpop.f32.mrf.mxu3  ;;  %v3176_v44 = vmul.f32 %v8635_v6, %v8420_v38  ;;  %v3202_v2 = vmul.f32 %v8648_v47, %v8418_v54  ;;  %v6838_v60 = vld [vmem:[#allocation11 + $0x1f4] sm:$0xf0] }
 0x2ec   :  { %v10498_v17 = vunpack.c.h.bf16 %v8817_v9  ;;  %v3082_v16 = vpack.c.bf16 %v2988_v42, %v8830_v3  ;;  %v1673_v29 = vpop.f32.mrf.mxu0  ;;  %v3204_v55 = vmul.f32 %v8659_v0, %v8420_v38  ;;  %v3293_v5 = vmul.f32 %v7121_v34, %v8418_v54  ;;  %v10499_v42 = vld [vmem:[#allocation34_spill] sm:$0xff] }
 0x2ed   :  { %v1722_v13 = vpop.f32.mrf.mxu1  ;;  %v8872_v57 = vpack.c.bf16 %v2996_v59, %v2995_v12  ;;  %v7125_v26 = vpop.eup %7124  ;;  %v1769_v6 = vadd.f32 %v1768_v32, %v8577_v43  ;;  %v1674_v47 = vadd.f32 %v1673_v29, %v8544_v25  ;;  %v3295_v9 = vmul.f32 %v7123_v20, %v8420_v38 }
 0x2ee   :  { %7130 = vrcp.f32 %v10498_v17  ;;  %v2457_v30 = vunpack.c.l.bf16 %v2337_v46  ;;  %v2458_v3 = vunpack.c.h.bf16 %v2337_v46  ;;  %v10353_v62 = vxor.u32 2147516416, %v8579_v15  ;;  %1868 = vmatmul.bf16.gmra.mxu0 %v10499_v42  ;;  %1917 = vmatmul.bf16.gmra.mxu1 %v10500_v14 }
 0x2ef   :  { %7132 = vpow2.f32 %v2655_v21  ;;  %v8879_v23 = vpack.c.bf16 %v2970_v28, %v8808_v58  ;;  %v7127_v0 = vpop.eup %7126  ;;  %v8881_v24 = vadd.f32 1.0, %v2849_v48  ;;  %v1818_v22 = vadd.f32 %v1817_v49, %v1769_v6  ;;  %1966 = vmatmul.bf16.gmra.mxu2 %v10499_v42  ;;  %2015 = vmatmul.bf16.gmra.mxu3 %v10500_v14 }
 0x2f0   :  { %7134 = vrcp.f32 %v3319_v52  ;;  %v1723_v53 = vadd.f32 %v1722_v13, %v1674_v47  ;;  %v3346_v56 = vunpack.c.h.bf16 %v3082_v16  ;;  %v8885_v8 = vadd.f32 1.0, %v2850_v4  ;;  %v6321_v47 = vld [vmem:[#allocation11 + $0x170] sm:$0xf] }
 0x2f1   :  { %v7129_v12 = vpop.eup %7128  ;;  %v8889_v34 = vpack.c.bf16 %v3174_v7, %v3176_v44  ;;  %v8893_v58 = vmul.f32 %v8668_v10, %v8418_v54  ;;  %v3347_v59 = vunpack.c.l.bf16 %v3082_v16  ;;  %v8895_v35 = vpack.c.bf16 %v1818_v22, %v1720_v36  ;;  %v6193_v22 = vld [vmem:[#allocation11 + $0x70] sm:$0xf] }
 0x2f2   :  { %v8897_v28 = vpack.c.bf16 %v3202_v2, %v3204_v55  ;;  %v3296_v52 = vpack.c.bf16 %v3293_v5, %v3295_v9  ;;  %v3374_v20 = vunpack.c.h.bf16 %v8872_v57  ;;  %v2697_v4 = vmul.f32 1.442695, %v2457_v30  ;;  %v1771_v36 = vpop.f32.mrf.mxu2  ;;  %v6822_v9 = vld [vmem:[#allocation11 + $0x174] sm:$0xf0] }
 0x2f3   :  { %10501 = vst [vmem:[#allocation54_spill] sm:$0xff] %v8895_v35  ;;  %v8900_v46 = vmul.f32 1.442695, %v2458_v3  ;;  %v2465_v7 = vunpack.c.l.bf16 %v10353_v62  ;;  %v3613_v49 = vunpack.c.l.bf16 %v8729_v45  ;;  %v2770_v44 = vpack.c.bf16 %v7127_v0, %v7125_v26  ;;  %v1820_v17 = vpop.f32.mrf.mxu3 }
 0x2f4   :  { %v7131_v21 = vpop.eup %7130  ;;  %7136 = vrcp.f32 %v3346_v56  ;;  %v3375_v2 = vunpack.c.l.bf16 %v8872_v57  ;;  %v3614_v16 = vunpack.c.h.bf16 %v8729_v45  ;;  %v1772_v29 = vadd.f32 %v1771_v36, %v8577_v43  ;;  %v1675_v13 = vpop.f32.mrf.mxu0  ;;  %v6790_v45 = vld [vmem:[#allocation11 + $0x74] sm:$0xf0]  ;;  %v6385_v56 = vld [vmem:[#allocation11 + $0x1f0] sm:$0xf] }
 0x2f5   :  { %v7133_v48 = vpop.eup %7132  ;;  %v3321_v32 = vmul.f32 %v7131_v21, %v8418_v54  ;;  %v1724_v55 = vpop.f32.mrf.mxu1  ;;  %7138 = vrcp.f32 %v3347_v59  ;;  %v3621_v30 = vunpack.c.l.bf16 %v8754_v63  ;;  %v3741_v26 = vunpack.c.l.bf16 %v3296_v52 }
 0x2f6   :  { %v7135_v10 = vpop.eup %7134  ;;  %v2774_v6 = vpack.c.bf16 %v7133_v48, %v7129_v12  ;;  %7140 = vrcp.f32 %v3374_v20  ;;  %v1821_v3 = vadd.f32 %v1820_v17, %v1772_v29  ;;  %v1676_v0 = vadd.f32 %v1675_v13, %v8544_v25  ;;  %v7465_v17 = vld [vmem:[#allocation10] sm:$0xff] }
 0x2f7   :  { %v3323_v5 = vmul.f32 %v7135_v10, %v8420_v38  ;;  %v6322_v57 = vor.u32 %v6822_v9, %v6321_v47  ;;  %v2875_v36 = vunpack.c.l.bf16 %v2770_v44  ;;  %v6194_v62 = vor.u32 %v6790_v45, %v6193_v22 }
 0x2f8   :  { %v3742_v10 = vunpack.c.h.bf16 %v3296_v52  ;;  %7142 = vrcp.f32 %v3375_v2  ;;  %v2876_v12 = vunpack.c.h.bf16 %v2770_v44  ;;  %v8912_v59 = vpack.c.bf16 %v1821_v3, %v1723_v53 }
 0x2f9   :  { %v3324_v21 = vpack.c.bf16 %v3321_v32, %v3323_v5  ;;  %v1725_v48 = vadd.f32 %v1724_v55, %v1676_v0  ;;  %4883 = vmatpush.bf16.msra.mxu2 %v6322_v57  ;;  %v6386_v61 = vor.u32 %v6838_v60, %v6385_v56  ;;  %v8914_v29 = vperm.slane %v7465_v17, 4  ;;  %4785 = vmatpush.bf16.msra.mxu0 %v6194_v62 }
 0x2fa   :  { %v7137_v20 = vpop.eup %7136  ;;  %v3622_v13 = vunpack.c.h.bf16 %v8754_v63  ;;  %7144 = vpow2.f32 %v2697_v4  ;;  %v10502_v52 = vxor.u32 2147516416, %v8579_v15  ;;  %v2883_v44 = vunpack.c.l.bf16 %v2774_v6  ;;  %v1773_v60 = vpop.f32.mrf.mxu2 }
 0x2fb   :  { %v3749_v25 = vunpack.c.l.bf16 %v3324_v21  ;;  %v3750_v32 = vunpack.c.h.bf16 %v3324_v21  ;;  %v7139_v5 = vpop.eup %7138  ;;  %4932 = vmatpush.bf16.msra.mxu3 %v6386_v61  ;;  %v3869_v53 = vmul.f32 %v3741_v26, %v3613_v49  ;;  %v2884_v47 = vunpack.c.h.bf16 %v2774_v6  ;;  %v1822_v9 = vpop.f32.mrf.mxu3 }
 0x2fc   :  { %v2466_v2 = vunpack.c.h.bf16 %v10502_v52  ;;  %v7141_v55 = vpop.eup %7140  ;;  %v3870_v0 = vmul.f32 %v3742_v10, %v3614_v16  ;;  %v2713_v62 = vmul.f32 1.442695, %v2465_v7  ;;  %v3003_v22 = vadd.f32 1.0, %v2875_v36  ;;  %v1834_v63 = vpop.f32.mrf.mxu0 }
 0x2fd   :  { %v3877_v3 = vmul.f32 %v3749_v25, %v3621_v30  ;;  %v3878_v57 = vmul.f32 %v3750_v32, %v3622_v13  ;;  %v3004_v45 = vadd.f32 1.0, %v2876_v12  ;;  %v1883_v56 = vpop.f32.mrf.mxu1  ;;  %v3349_v4 = vmul.f32 %v7137_v20, %v8418_v54  ;;  %v10505_v20 = vld [vmem:[#allocation19_spill] sm:$0xff] }
 0x2fe   :  { %v7143_v21 = vpop.eup %7142  ;;  %v1774_v52 = vadd.f32 %v1773_v60, %v8577_v43  ;;  %v1835_v61 = vadd.f32 %v1834_v63, %v8914_v29  ;;  %v2715_v26 = vmul.f32 1.442695, %v2466_v2  ;;  %v3011_v30 = vadd.f32 1.0, %v2883_v44  ;;  %2029 = vmatmul.bf16.vlgmr.msrb.gmra.mxu0 %v7981_v1  ;;  %2078 = vmatmul.bf16.vlgmr.msrb.gmra.mxu1 %v10505_v20 }
 0x2ff   :  { %v8922_v49 = vpack.c.bf16 %v3877_v3, %v3869_v53  ;;  %v8924_v6 = vpack.c.bf16 %v3878_v57, %v3870_v0  ;;  %v3351_v16 = vmul.f32 %v7139_v5, %v8420_v38  ;;  %v3377_v7 = vmul.f32 %v7141_v55, %v8418_v54  ;;  %2127 = vmatmul.bf16.vlgmr.msrb.gmra.mxu2 %v7981_v1 }
 0x300   :  { %v3012_v36 = vadd.f32 1.0, %v2884_v47  ;;  %v1823_v10 = vadd.f32 %v1822_v9, %v1774_v52  ;;  %v1884_v12 = vadd.f32 %v1883_v56, %v1835_v61  ;;  %v3379_v43 = vmul.f32 %v7143_v21, %v8420_v38  ;;  %v8931_v25 = vpop.eup %7144  ;;  %2176 = vmatmul.bf16.vlgmr.msrb.gmra.mxu3 %v10505_v20 }
 0x301   :  { %10503 = vst [vmem:[#allocation55_spill] sm:$0xff] %v8922_v49  ;;  %7146 = vpow2.f32 %v8900_v46  ;;  %v8936_v13 = vperm.slane %v7465_v17, 5  ;;  %v3352_v32 = vpack.c.bf16 %v3349_v4, %v3351_v16  ;;  %v3668_v5 = vunpack.c.h.bf16 %v8530_v39 }
 0x302   :  { %10504 = vst [vmem:[#allocation56_spill] sm:$0xff] %v8924_v6  ;;  %7148 = vpow2.f32 %v2713_v62  ;;  %v8939_v2 = vpack.c.bf16 %v1823_v10, %v1725_v48  ;;  %v3380_v44 = vpack.c.bf16 %v3377_v7, %v3379_v43  ;;  %v3090_v53 = vpack.c.bf16 %v3004_v45, %v3003_v22  ;;  %v1932_v60 = vpop.f32.mrf.mxu2 }
 0x303   :  { %7150 = vpow2.f32 %v2715_v26  ;;  %v3757_v55 = vunpack.c.l.bf16 %v3352_v32  ;;  %v3788_v47 = vunpack.c.h.bf16 %v8692_v37  ;;  %v3796_v46 = vunpack.c.h.bf16 %v8696_v51  ;;  %v1981_v9 = vpop.f32.mrf.mxu3 }
 0x304   :  { %10506 = vst [vmem:[#allocation19_spill] sm:$0xff] %v8939_v2  ;;  %v3629_v1 = vunpack.c.l.bf16 %v8768_v41  ;;  %v3765_v17 = vunpack.c.l.bf16 %v3380_v44  ;;  %v3758_v3 = vunpack.c.h.bf16 %v3352_v32  ;;  %v3094_v0 = vpack.c.bf16 %v3012_v36, %v3011_v30  ;;  %v1836_v57 = vpop.f32.mrf.mxu0 }
 0x305   :  { %v1933_v39 = vadd.f32 %v1932_v60, %v8936_v13  ;;  %v1885_v48 = vpop.f32.mrf.mxu1  ;;  %v3637_v62 = vunpack.c.l.bf16 %v8787_v33  ;;  %v3638_v22 = vunpack.c.h.bf16 %v8787_v33  ;;  %v3766_v45 = vunpack.c.h.bf16 %v3380_v44  ;;  %v10509_v60 = vld [vmem:[#allocation45_spill] sm:$0xff] }
 0x306   :  { %v3630_v37 = vunpack.c.h.bf16 %v8768_v41  ;;  %v3885_v63 = vmul.f32 %v3757_v55, %v3629_v1  ;;  %v3402_v51 = vunpack.c.h.bf16 %v3090_v53  ;;  %v3403_v56 = vunpack.c.l.bf16 %v3090_v53 }
 0x307   :  { %v7147_v4 = vpop.eup %7146  ;;  %v1982_v21 = vadd.f32 %v1981_v9, %v1933_v39  ;;  %v1837_v52 = vadd.f32 %v1836_v57, %v8914_v29  ;;  %v3893_v61 = vmul.f32 %v3765_v17, %v3637_v62  ;;  %v3894_v26 = vmul.f32 %v3766_v45, %v3638_v22 }
 0x308   :  { %v7149_v30 = vpop.eup %7148  ;;  %v3660_v16 = vunpack.c.h.bf16 %v8501_v27  ;;  %v3886_v7 = vmul.f32 %v3758_v3, %v3630_v37  ;;  %v3430_v36 = vunpack.c.h.bf16 %v3094_v0  ;;  %v3924_v10 = vmul.f32 %v3796_v46, %v3668_v5  ;;  %v10512_v37 = vld [vmem:[#allocation30_spill] sm:$0xff] }
 0x309   :  { %v7151_v20 = vpop.eup %7150  ;;  %v8950_v33 = vpack.c.bf16 %v1982_v21, %v1884_v12  ;;  %v1886_v43 = vadd.f32 %v1885_v48, %v1837_v52  ;;  %v3077_v41 = vpack.c.bf16 %v8885_v8, %v8881_v24  ;;  %v8954_v32 = vpack.c.bf16 %v3893_v61, %v3885_v63  ;;  %v10510_v24 = vld [vmem:[#allocation46_spill] sm:$0xff] }
 0x30a   :  { %v8956_v44 = vpack.c.bf16 %v3894_v26, %v3886_v7  ;;  %7152 = vrcp.f32 %v3402_v51  ;;  %v3431_v53 = vunpack.c.l.bf16 %v3094_v0  ;;  %v3916_v55 = vmul.f32 %v3788_v47, %v3660_v16  ;;  %v1934_v12 = vpop.f32.mrf.mxu2  ;;  %v10515_v26 = vld [vmem:[#allocation21_spill] sm:$0xff] }
 0x30b   :  { %10507 = vst [vmem:[#allocation57_spill] sm:$0xff] %v8954_v32  ;;  %v3707_v1 = vunpack.c.l.bf16 %v8889_v34  ;;  %v3283_v27 = vunpack.c.h.bf16 %v8879_v23  ;;  %v3284_v5 = vunpack.c.l.bf16 %v8879_v23  ;;  %7154 = vrcp.f32 %v3403_v56  ;;  %v1983_v46 = vpop.f32.mrf.mxu3  ;;  %v6257_v7 = vld [vmem:[#allocation11 + $0xf0] sm:$0xf]  ;;  %v6802_v32 = vld [vmem:[#allocation11 + $0xd4] sm:$0xf0] }
 0x30c   :  { %10508 = vst [vmem:[#allocation58_spill] sm:$0xff] %v8956_v44  ;;  %v3232_v9 = vmul.f32 %v10509_v60, %v8420_v38  ;;  %v3258_v8 = vmul.f32 %v10510_v24, %v8418_v54  ;;  %7156 = vrcp.f32 %v3430_v36  ;;  %v8965_v17 = vpack.c.bf16 %v3924_v10, %v3916_v55  ;;  %v1839_v3 = vpop.f32.mrf.mxu0  ;;  %v6806_v36 = vld [vmem:[#allocation11 + $0xf4] sm:$0xf0]  ;;  %v6241_v44 = vld [vmem:[#allocation11 + $0xd0] sm:$0xf] }
 0x30d   :  { %v1888_v47 = vpop.f32.mrf.mxu1  ;;  %v3715_v0 = vunpack.c.l.bf16 %v8897_v28  ;;  %v3716_v39 = vunpack.c.h.bf16 %v8897_v28  ;;  %v3260_v23 = vmul.f32 %v8752_v31, %v8420_v38  ;;  %v3311_v57 = vunpack.c.h.bf16 %v3077_v41  ;;  %v10514_v31 = vld [vmem:[#allocation20_spill] sm:$0xff] }
 0x30e   :  { %10511 = vst [vmem:[#allocation45_spill] sm:$0xff] %v8965_v17  ;;  %v1935_v48 = vadd.f32 %v1934_v12, %v8936_v13  ;;  %v1840_v62 = vadd.f32 %v1839_v3, %v8914_v29  ;;  %v3312_v22 = vunpack.c.l.bf16 %v3077_v41  ;;  %7158 = vrcp.f32 %v3431_v53  ;;  %2034 = vmatmul.bf16.gmra.mxu0 %v10514_v31  ;;  %2083 = vmatmul.bf16.gmra.mxu1 %v10515_v26 }
 0x30f   :  { %v2785_v45 = vpack.c.bf16 %v7147_v4, %v8931_v25  ;;  %v10513_v63 = vunpack.c.l.bf16 %v10512_v37  ;;  %v3708_v56 = vunpack.c.h.bf16 %v8889_v34  ;;  %7160 = vrcp.f32 %v3283_v27  ;;  %2132 = vmatmul.bf16.gmra.mxu2 %v10514_v31  ;;  %v10516_v25 = vld [vmem:[#allocation37_spill] sm:$0xff] }
 0x310   :  { %v7153_v21 = vpop.eup %7152  ;;  %v2789_v28 = vpack.c.bf16 %v7151_v20, %v7149_v30  ;;  %v1984_v52 = vadd.f32 %v1983_v46, %v1935_v48  ;;  %v1889_v61 = vadd.f32 %v1888_v47, %v1840_v62  ;;  %7162 = vrcp.f32 %v3284_v5  ;;  %2181 = vmatmul.bf16.gmra.mxu3 %v10515_v26 }
 0x311   :  { %v3835_v51 = vmul.f32 %v3707_v1, %v10513_v63  ;;  %v7155_v16 = vpop.eup %7154  ;;  %v10517_v4 = vunpack.c.l.bf16 %v10516_v25  ;;  %v10518_v10 = vunpack.c.h.bf16 %v10516_v25  ;;  %v8986_v20 = vpack.c.bf16 %v8893_v58, %v3232_v9 }
 0x312   :  { %7164 = vrcp.f32 %v3311_v57  ;;  %v7157_v41 = vpop.eup %7156  ;;  %v6258_v53 = vor.u32 %v6806_v36, %v6257_v7  ;;  %v8988_v55 = vpack.c.bf16 %v1984_v52, %v1886_v43  ;;  %v8990_v1 = vpack.c.bf16 %v3258_v8, %v3260_v23  ;;  %v1937_v58 = vpop.f32.mrf.mxu2 }
 0x313   :  { %v3843_v34 = vmul.f32 %v3715_v0, %v10517_v4  ;;  %v3844_v30 = vmul.f32 %v3716_v39, %v10518_v10  ;;  %7166 = vrcp.f32 %v3312_v22  ;;  %v2905_v27 = vunpack.c.l.bf16 %v2785_v45  ;;  %v1986_v9 = vpop.f32.mrf.mxu3 }
 0x314   :  { %v2906_v5 = vunpack.c.h.bf16 %v2785_v45  ;;  %v10519_v12 = vunpack.c.h.bf16 %v10512_v37  ;;  %v3433_v60 = vmul.f32 %v7157_v41, %v8418_v54  ;;  %v7159_v24 = vpop.eup %7158  ;;  %v2913_v3 = vunpack.c.l.bf16 %v2789_v28  ;;  %4834 = vmatpush.bf16.msra.mxu1 %v6258_v53  ;;  %v1841_v57 = vpop.f32.mrf.mxu0  ;;  %v6313_v53 = vld [vmem:[#allocation11 + $0x160] sm:$0xf] }
 0x315   :  { %v2914_v47 = vunpack.c.h.bf16 %v2789_v28  ;;  %v3405_v0 = vmul.f32 %v7153_v21, %v8418_v54  ;;  %v3407_v43 = vmul.f32 %v7155_v16, %v8420_v38  ;;  %v7161_v8 = vpop.eup %7160  ;;  %v2283_v39 = vxor.u32 2147516416, %v8950_v33  ;;  %v1890_v48 = vpop.f32.mrf.mxu1 }
 0x316   :  { %v3836_v46 = vmul.f32 %v3708_v56, %v10519_v12  ;;  %v1938_v23 = vadd.f32 %v1937_v58, %v8936_v13  ;;  %v3723_v62 = vunpack.c.l.bf16 %v8986_v20  ;;  %v3435_v22 = vmul.f32 %v7159_v24, %v8420_v38  ;;  %v7163_v45 = vpop.eup %7162  ;;  %v6185_v12 = vld [vmem:[#allocation11 + $0x60] sm:$0xf] }
 0x317   :  { %v9001_v37 = vpack.c.bf16 %v3843_v34, %v3835_v51  ;;  %v3033_v52 = vadd.f32 1.0, %v2905_v27  ;;  %v1842_v26 = vadd.f32 %v1841_v57, %v8914_v29  ;;  %v3034_v36 = vadd.f32 1.0, %v2906_v5  ;;  %v6820_v27 = vld [vmem:[#allocation11 + $0x164] sm:$0xf0]  ;;  %v6818_v34 = vld [vmem:[#allocation11 + $0x154] sm:$0xf0] }
 0x318   :  { %v9003_v63 = vpack.c.bf16 %v3844_v30, %v3836_v46  ;;  %v7165_v28 = vpop.eup %7164  ;;  %v1987_v31 = vadd.f32 %v1986_v9, %v1938_v23  ;;  %v9008_v16 = vpack.c.bf16 %v3433_v60, %v3435_v22  ;;  %v9010_v25 = vadd.f32 1.0, %v2913_v3  ;;  %v10522_v46 = vld [vmem:[#allocation33_spill] sm:$0xff]  ;;  %v6788_v9 = vld [vmem:[#allocation11 + $0x64] sm:$0xf0]  ;;  %v6249_v22 = vld [vmem:[#allocation11 + $0xe0] sm:$0xf] }
 0x319   :  { %10520 = vst [vmem:[#allocation46_spill] sm:$0xff] %v9001_v37  ;;  %v7167_v7 = vpop.eup %7166  ;;  %v9012_v4 = vadd.f32 1.0, %v2914_v47  ;;  %v9014_v51 = vpack.c.bf16 %v3405_v0, %v3407_v43  ;;  %v2349_v10 = vunpack.c.l.bf16 %v2283_v39  ;;  %v1891_v41 = vadd.f32 %v1890_v48, %v1842_v26  ;;  %v6377_v0 = vld [vmem:[#allocation11 + $0x1e0] sm:$0xf]  ;;  %v6836_v43 = vld [vmem:[#allocation11 + $0x1e4] sm:$0xf0] }
 0x31a   :  { %10521 = vst [vmem:[#allocation30_spill] sm:$0xff] %v9003_v63  ;;  %v9017_v30 = vpack.c.bf16 %v1987_v31, %v1889_v61  ;;  %v10523_v60 = vunpack.c.l.bf16 %v10522_v46  ;;  %v9024_v5 = vmul.f32 %v7161_v8, %v8418_v54  ;;  %v9027_v3 = vmul.f32 %v7163_v45, %v8420_v38  ;;  %v6804_v45 = vld [vmem:[#allocation11 + $0xe4] sm:$0xf0]  ;;  %v1939_v31 = vpop.f32.mrf.mxu2  ;;  %v10524_v63 = vld [vmem:[#allocation22_spill] sm:$0xff] }
 0x31b   :  { %v9030_v47 = vmul.f32 %v7165_v28, %v8418_v54  ;;  %v3645_v61 = vunpack.c.l.bf16 %v8804_v50  ;;  %v6314_v58 = vor.u32 %v6820_v27, %v6313_v53  ;;  %v9034_v23 = vmul.f32 %v7167_v7, %v8420_v38  ;;  %v1988_v26 = vpop.f32.mrf.mxu3  ;;  %v6305_v7 = vld [vmem:[#allocation11 + $0x150] sm:$0xf] }
 0x31c   :  { %v9021_v24 = vmul.f32 %v3723_v62, %v10523_v60  ;;  %v3781_v57 = vunpack.c.l.bf16 %v9008_v16  ;;  %v2350_v48 = vunpack.c.h.bf16 %v2283_v39  ;;  %v6186_v8 = vor.u32 %v6788_v9, %v6185_v12  ;;  %v1844_v56 = vpop.f32.mrf.mxu0  ;;  %v6177_v9 = vld [vmem:[#allocation11 + $0x50] sm:$0xf] }
 0x31d   :  { %v6378_v62 = vor.u32 %v6836_v43, %v6377_v0  ;;  %v3773_v28 = vunpack.c.l.bf16 %v9014_v51  ;;  %v3646_v60 = vunpack.c.h.bf16 %v8804_v50  ;;  %v2481_v53 = vmul.f32 1.442695, %v2349_v10  ;;  %4884 = vmatpush.bf16.msra.mxu2 %v6314_v58  ;;  %v1893_v21 = vpop.f32.mrf.mxu1  ;;  %v6786_v0 = vld [vmem:[#allocation11 + $0x54] sm:$0xf0]  ;;  %v6369_v43 = vld [vmem:[#allocation11 + $0x1d0] sm:$0xf] }
 0x31e   :  { %v6250_v27 = vor.u32 %v6804_v45, %v6249_v22  ;;  %v3653_v17 = vunpack.c.l.bf16 %v8840_v19  ;;  %4786 = vmatpush.bf16.msra.mxu0 %v6186_v8  ;;  %v1940_v39 = vadd.f32 %v1939_v31, %v8936_v13  ;;  %v1845_v12 = vadd.f32 %v1844_v56, %v8914_v29  ;;  %v6834_v45 = vld [vmem:[#allocation11 + $0x1d4] sm:$0xf0]  ;;  %v10525_v56 = vld [vmem:[#allocation23_spill] sm:$0xff] }
 0x31f   :  { %4933 = vmatpush.bf16.msra.mxu3 %v6378_v62  ;;  %v3774_v50 = vunpack.c.h.bf16 %v9014_v51  ;;  %v3105_v10 = vpack.c.bf16 %v3034_v36, %v3033_v52  ;;  %v6306_v58 = vor.u32 %v6818_v34, %v6305_v7  ;;  %v6178_v22 = vor.u32 %v6786_v0, %v6177_v9  ;;  %2039 = vmatmul.bf16.gmra.mxu0 %v10524_v63  ;;  %v6297_v7 = vld [vmem:[#allocation11 + $0x140] sm:$0xf]  ;;  %v6784_v0 = vld [vmem:[#allocation11 + $0x44] sm:$0xf0] }
 0x320   :  { %4835 = vmatpush.bf16.msra.mxu1 %v6250_v27  ;;  %v3909_v6 = vmul.f32 %v3781_v57, %v3653_v17  ;;  %v3782_v8 = vunpack.c.h.bf16 %v9008_v16  ;;  %v2483_v62 = vmul.f32 1.442695, %v2350_v48  ;;  %v1989_v49 = vadd.f32 %v1988_v26, %v1940_v39  ;;  %2137 = vmatmul.bf16.gmra.mxu2 %v10524_v63  ;;  %v6169_v9 = vld [vmem:[#allocation11 + $0x40] sm:$0xf] }
 0x321   :  { %v1894_v31 = vadd.f32 %v1893_v21, %v1845_v12  ;;  %2088 = vmatmul.bf16.gmra.mxu1 %v10525_v56  ;;  %v3901_v37 = vmul.f32 %v3773_v28, %v3645_v61  ;;  %v2287_v51 = vxor.u32 2147516416, %v8988_v55  ;;  %2186 = vmatmul.bf16.gmra.mxu3 %v10525_v56  ;;  %v6370_v52 = vor.u32 %v6834_v45, %v6369_v43  ;;  %v6361_v43 = vld [vmem:[#allocation11 + $0x1c0] sm:$0xf] }
 0x322   :  { %v6242_v36 = vor.u32 %v6802_v32, %v6241_v44  ;;  %v3654_v17 = vunpack.c.h.bf16 %v8840_v19  ;;  %v9050_v34 = vpack.c.bf16 %v1989_v49, %v1891_v41  ;;  %4885 = vmatpush.bf16.msra.mxu2 %v6306_v58  ;;  %4787 = vmatpush.bf16.msra.mxu0 %v6178_v22  ;;  %v3732_v21 = vunpack.c.h.bf16 %v8990_v1  ;;  %v1942_v32 = vpop.f32.mrf.mxu2 }
 0x323   :  { %v9053_v16 = vpack.c.bf16 %v3909_v6, %v3901_v37  ;;  %v3109_v61 = vpack.c.bf16 %v9012_v4, %v9010_v25  ;;  %7168 = vpow2.f32 %v2481_v53  ;;  %4934 = vmatpush.bf16.msra.mxu3 %v6370_v52  ;;  %v3902_v63 = vmul.f32 %v3774_v50, %v3646_v60  ;;  %v1991_v19 = vpop.f32.mrf.mxu3 }
 0x324   :  { %10526 = vst [vmem:[#allocation20_spill] sm:$0xff] %v9050_v34  ;;  %4836 = vmatpush.bf16.msra.mxu1 %v6242_v36  ;;  %v3910_v57 = vmul.f32 %v3782_v8, %v3654_v17  ;;  %v3507_v48 = vunpack.c.h.bf16 %v3105_v10  ;;  %7170 = vpow2.f32 %v2483_v62  ;;  %v3289_v49 = vpack.c.bf16 %v9024_v5, %v9027_v3  ;;  %v1846_v26 = vpop.f32.mrf.mxu0  ;;  %v6816_v5 = vld [vmem:[#allocation11 + $0x144] sm:$0xf0] }
 0x325   :  { %10527 = vst [vmem:[#allocation21_spill] sm:$0xff] %v9053_v16  ;;  %v9061_v44 = vpack.c.bf16 %v9030_v47, %v9034_v23  ;;  %v3508_v6 = vunpack.c.l.bf16 %v3105_v10  ;;  %v10528_v37 = vxor.u32 2147516416, %v8852_v11  ;;  %v2357_v4 = vunpack.c.l.bf16 %v2287_v51  ;;  %v1895_v28 = vpop.f32.mrf.mxu1  ;;  %v6832_v10 = vld [vmem:[#allocation11 + $0x1c4] sm:$0xf0] }
 0x326   :  { %v1943_v41 = vadd.f32 %v1942_v32, %v8936_v13  ;;  %v9066_v60 = vpack.c.bf16 %v3910_v57, %v3902_v63  ;;  %v2334_v53 = vxor.u32 2147516416, %v8895_v35  ;;  %v2358_v27 = vunpack.c.h.bf16 %v2287_v51  ;;  %v10547_v35 = vld [vmem:[#allocation26_spill] sm:$0xff] }
 0x327   :  { %v2443_v25 = vunpack.c.l.bf16 %v10528_v37  ;;  %v3535_v3 = vunpack.c.h.bf16 %v3109_v61  ;;  %v3536_v39 = vunpack.c.l.bf16 %v3109_v61  ;;  %v1847_v23 = vadd.f32 %v1846_v26, %v8914_v29 }
 0x328   :  { %10529 = vst [vmem:[#allocation37_spill] sm:$0xff] %v9066_v60  ;;  %v1992_v47 = vadd.f32 %v1991_v19, %v1943_v41  ;;  %v6298_v12 = vor.u32 %v6816_v5, %v6297_v7  ;;  %7172 = vrcp.f32 %v3507_v48  ;;  %v6170_v50 = vor.u32 %v6784_v0, %v6169_v9  ;;  %v6233_v0 = vld [vmem:[#allocation11 + $0xc0] sm:$0xf] }
 0x329   :  { %v3739_v58 = vunpack.c.l.bf16 %v3289_v49  ;;  %v3740_v22 = vunpack.c.h.bf16 %v3289_v49  ;;  %7174 = vrcp.f32 %v3508_v6  ;;  %v7169_v45 = vpop.eup %7168  ;;  %v2497_v8 = vmul.f32 1.442695, %v2357_v4 }
 0x32a   :  { %v9070_v62 = vpack.c.bf16 %v1992_v47, %v1894_v31  ;;  %v1896_v56 = vadd.f32 %v1895_v28, %v1847_v23  ;;  %4886 = vmatpush.bf16.msra.mxu2 %v6298_v12  ;;  %v6362_v51 = vor.u32 %v6832_v10, %v6361_v43  ;;  %v7171_v52 = vpop.eup %7170  ;;  %v2499_v36 = vmul.f32 1.442695, %v2358_v27  ;;  %4788 = vmatpush.bf16.msra.mxu0 %v6170_v50  ;;  %v1944_v6 = vpop.f32.mrf.mxu2  ;;  %v10537_v28 = vld [vmem:[#allocation36_spill] sm:$0xff] }
 0x32b   :  { %v10531_v17 = vunpack.c.h.bf16 %v10522_v46  ;;  %v10532_v61 = vunpack.c.h.bf16 %v8986_v20  ;;  %v3747_v57 = vunpack.c.l.bf16 %v9061_v44  ;;  %7176 = vrcp.f32 %v3535_v3  ;;  %v6800_v43 = vld [vmem:[#allocation11 + $0xc4] sm:$0xf0] }
 0x32c   :  { %10530 = vst [vmem:[#allocation33_spill] sm:$0xff] %v9070_v62  ;;  %v10533_v48 = vmov %v10528_v37  ;;  %v2669_v31 = vmul.f32 1.442695, %v2443_v25  ;;  %v2451_v19 = vunpack.c.l.bf16 %v2334_v53  ;;  %4935 = vmatpush.bf16.msra.mxu3 %v6362_v51  ;;  %7178 = vrcp.f32 %v3536_v39  ;;  %v1993_v37 = vpop.f32.mrf.mxu3  ;;  %v1849_v3 = vpop.f32.mrf.mxu0 }
 0x32d   :  { %v9076_v63 = vmul.f32 %v10532_v61, %v10531_v17  ;;  %v2444_v32 = vunpack.c.h.bf16 %v10533_v48  ;;  %v2338_v49 = vxor.u32 2147516416, %v8912_v59  ;;  %v10534_v46 = vunpack.c.l.bf16 %v8448_v18  ;;  %v1898_v39 = vpop.f32.mrf.mxu1  ;;  %v10542_v17 = vld [vmem:[#allocation24_spill] sm:$0xff] }
 0x32e   :  { %v10535_v20 = vunpack.c.l.bf16 %v8990_v1  ;;  %v10536_v41 = vunpack.c.h.bf16 %v8448_v18  ;;  %v10538_v27 = vunpack.c.l.bf16 %v10537_v28  ;;  %v7173_v7 = vpop.eup %7172  ;;  %v2731_v5 = vpack.c.bf16 %v7171_v52, %v7169_v45 }
 0x32f   :  { %7180 = vpow2.f32 %v2497_v8  ;;  %v3748_v47 = vunpack.c.h.bf16 %v9061_v44  ;;  %v10539_v23 = vunpack.c.h.bf16 %v10537_v28  ;;  %v7175_v12 = vpop.eup %7174  ;;  %v2452_v9 = vunpack.c.h.bf16 %v2334_v53  ;;  %2044 = vmatmul.bf16.gmra.mxu0 %v10542_v17  ;;  %v10543_v53 = vld [vmem:[#allocation25_spill] sm:$0xff] }
 0x330   :  { %v9086_v4 = vmul.f32 %v10535_v20, %v10534_v46  ;;  %v9090_v26 = vmul.f32 %v3732_v21, %v10536_v41  ;;  %v9094_v25 = vmul.f32 %v3739_v58, %v10538_v27  ;;  %7182 = vpow2.f32 %v2499_v36  ;;  %v10540_v58 = vld [vmem:[#allocation38_spill] sm:$0xff]  ;;  %2142 = vmatmul.bf16.gmra.mxu2 %v10542_v17 }
 0x331   :  { %v9099_v1 = vmul.f32 %v3740_v22, %v10539_v23  ;;  %v1945_v18 = vadd.f32 %v1944_v6, %v8936_v13  ;;  %v1850_v21 = vadd.f32 %v1849_v3, %v8914_v29  ;;  %7184 = vpow2.f32 %v2669_v31  ;;  %v7177_v44 = vpop.eup %7176  ;;  %2093 = vmatmul.bf16.gmra.mxu1 %v10543_v53  ;;  %2191 = vmatmul.bf16.gmra.mxu3 %v10543_v53 }
 0x332   :  { %v2671_v50 = vmul.f32 1.442695, %v2444_v32  ;;  %v2685_v10 = vmul.f32 1.442695, %v2451_v19  ;;  %v10541_v45 = vunpack.c.l.bf16 %v10540_v58  ;;  %v2459_v51 = vunpack.c.l.bf16 %v2338_v49  ;;  %v7179_v61 = vpop.eup %7178 }
 0x333   :  { %v1994_v22 = vadd.f32 %v1993_v37, %v1945_v18  ;;  %v1899_v52 = vadd.f32 %v1898_v39, %v1850_v21  ;;  %v3510_v36 = vmul.f32 %v7173_v7, %v8418_v54  ;;  %v2797_v48 = vunpack.c.l.bf16 %v2731_v5  ;;  %v1947_v39 = vpop.f32.mrf.mxu2 }
 0x334   :  { %v9105_v8 = vmul.f32 %v3747_v57, %v10541_v45  ;;  %v2798_v6 = vunpack.c.h.bf16 %v2731_v5  ;;  %v6234_v32 = vor.u32 %v6800_v43, %v6233_v0  ;;  %v3512_v57 = vmul.f32 %v7175_v12, %v8420_v38  ;;  %v1851_v0 = vpop.f32.mrf.mxu0  ;;  %v6289_v45 = vld [vmem:[#allocation11 + $0x130] sm:$0xf] }
 0x335   :  { %v2687_v31 = vmul.f32 1.442695, %v2452_v9  ;;  %v2460_v19 = vunpack.c.h.bf16 %v2338_v49  ;;  %v2342_v37 = vxor.u32 2147516416, %v8939_v2  ;;  %v9114_v46 = vpack.c.bf16 %v1994_v22, %v1896_v56  ;;  %v7181_v20 = vpop.eup %7180  ;;  %v1996_v49 = vpop.f32.mrf.mxu3 }
 0x336   :  { %v3675_v41 = vunpack.c.l.bf16 %v8540_v40  ;;  %7186 = vpow2.f32 %v2671_v50  ;;  %4837 = vmatpush.bf16.msra.mxu1 %v6234_v32  ;;  %v10544_v27 = vunpack.c.h.bf16 %v10540_v58  ;;  %v7183_v5 = vpop.eup %7182  ;;  %v2701_v3 = vmul.f32 1.442695, %v2459_v51  ;;  %v1900_v43 = vpop.f32.mrf.mxu1  ;;  %v6814_v51 = vld [vmem:[#allocation11 + $0x134] sm:$0xf0] }
 0x337   :  { %7188 = vpow2.f32 %v2685_v10  ;;  %v3538_v23 = vmul.f32 %v7177_v44, %v8418_v54  ;;  %v3540_v56 = vmul.f32 %v7179_v61, %v8420_v38  ;;  %v9124_v12 = vpop.eup %7184  ;;  %v2925_v9 = vadd.f32 1.0, %v2797_v48  ;;  %v6161_v61 = vld [vmem:[#allocation11 + $0x30] sm:$0xf]  ;;  %v6782_v32 = vld [vmem:[#allocation11 + $0x34] sm:$0xf0] }
 0x338   :  { %v9120_v7 = vmul.f32 %v3748_v47, %v10544_v27  ;;  %v2926_v18 = vadd.f32 1.0, %v2798_v6  ;;  %v1948_v21 = vadd.f32 %v1947_v39, %v8936_v13  ;;  %v3513_v50 = vpack.c.bf16 %v3510_v36, %v3512_v57  ;;  %v6353_v48 = vld [vmem:[#allocation11 + $0x1b0] sm:$0xf]  ;;  %v6830_v39 = vld [vmem:[#allocation11 + $0x1b4] sm:$0xf0] }
 0x339   :  { %7190 = vpow2.f32 %v2687_v31  ;;  %v2703_v47 = vmul.f32 1.442695, %v2460_v19  ;;  %v2467_v58 = vunpack.c.l.bf16 %v2342_v37  ;;  %v2468_v10 = vunpack.c.h.bf16 %v2342_v37 }
 0x33a   :  { %v2735_v22 = vpack.c.bf16 %v7183_v5, %v7181_v20  ;;  %v1997_v17 = vadd.f32 %v1996_v49, %v1948_v21  ;;  %v1852_v44 = vadd.f32 %v1851_v0, %v8914_v29  ;;  %v6290_v53 = vor.u32 %v6814_v51, %v6289_v45 }
 0x33b   :  { %7192 = vpow2.f32 %v2701_v3  ;;  %v2291_v6 = vxor.u32 2147516416, %v9017_v30  ;;  %v6162_v27 = vor.u32 %v6782_v32, %v6161_v61  ;;  %v3541_v36 = vpack.c.bf16 %v3538_v23, %v3540_v56  ;;  %v6225_v32 = vld [vmem:[#allocation11 + $0xb0] sm:$0xf] }
 0x33c   :  { %v7187_v57 = vpop.eup %7186  ;;  %v9129_v31 = vpack.c.bf16 %v2926_v18, %v2925_v9  ;;  %v9131_v19 = vpack.c.bf16 %v1997_v17, %v1899_v52  ;;  %v1901_v37 = vadd.f32 %v1900_v43, %v1852_v44  ;;  %4887 = vmatpush.bf16.msra.mxu2 %v6290_v53  ;;  %v3803_v20 = vunpack.c.l.bf16 %v3513_v50  ;;  %v1949_v52 = vpop.f32.mrf.mxu2 }
 0x33d   :  { %v7189_v5 = vpop.eup %7188  ;;  %7194 = vpow2.f32 %v2703_v47  ;;  %v2717_v49 = vmul.f32 1.442695, %v2467_v58  ;;  %v2719_v21 = vmul.f32 1.442695, %v2468_v10  ;;  %4789 = vmatpush.bf16.msra.mxu0 %v6162_v27  ;;  %v6354_v0 = vor.u32 %v6830_v39, %v6353_v48  ;;  %v1998_v17 = vpop.f32.mrf.mxu3  ;;  %v6798_v48 = vld [vmem:[#allocation11 + $0xb4] sm:$0xf0] }
 0x33e   :  { %10545 = vst [vmem:[#allocation22_spill] sm:$0xff] %v9131_v19  ;;  %v2805_v3 = vunpack.c.l.bf16 %v2735_v22  ;;  %v3683_v45 = vunpack.c.l.bf16 %v8579_v15  ;;  %v3684_v51 = vunpack.c.h.bf16 %v8579_v15  ;;  %v3804_v23 = vunpack.c.h.bf16 %v3513_v50  ;;  %v1854_v53 = vpop.f32.mrf.mxu0  ;;  %v1903_v61 = vpop.f32.mrf.mxu1 }
 0x33f   :  { %v7191_v56 = vpop.eup %7190  ;;  %v2806_v9 = vunpack.c.h.bf16 %v2735_v22  ;;  %v2365_v18 = vunpack.c.l.bf16 %v2291_v6  ;;  %4936 = vmatpush.bf16.msra.mxu3 %v6354_v0  ;;  %v3811_v43 = vunpack.c.l.bf16 %v3541_v36  ;;  %v3812_v44 = vunpack.c.h.bf16 %v3541_v36  ;;  %2049 = vmatmul.bf16.gmra.mxu0 %v10547_v35 }
 0x340   :  { %v3129_v47 = vunpack.c.h.bf16 %v9129_v31  ;;  %v2366_v58 = vunpack.c.h.bf16 %v2291_v6  ;;  %v2295_v10 = vxor.u32 2147516416, %v9050_v34  ;;  %v3931_v15 = vmul.f32 %v3803_v20, %v3675_v41  ;;  %v10548_v41 = vld [vmem:[#allocation27_spill] sm:$0xff]  ;;  %2147 = vmatmul.bf16.gmra.mxu2 %v10547_v35 }
 0x341   :  { %v7193_v50 = vpop.eup %7192  ;;  %v1950_v22 = vadd.f32 %v1949_v52, %v8936_v13  ;;  %v1855_v27 = vadd.f32 %v1854_v53, %v8914_v29  ;;  %v6226_v39 = vor.u32 %v6798_v48, %v6225_v32  ;;  %v3939_v0 = vmul.f32 %v3811_v43, %v3683_v45  ;;  %2098 = vmatmul.bf16.gmra.mxu1 %v10548_v41  ;;  %v6345_v43 = vld [vmem:[#allocation11 + $0x1a0] sm:$0xf]  ;;  %v6828_v32 = vld [vmem:[#allocation11 + $0x1a4] sm:$0xf0] }
 0x342   :  { %v3130_v36 = vunpack.c.l.bf16 %v9129_v31  ;;  %v2933_v28 = vadd.f32 1.0, %v2805_v3  ;;  %v10546_v6 = vunpack.c.h.bf16 %v8540_v40  ;;  %v3940_v16 = vmul.f32 %v3812_v44, %v3684_v51  ;;  %2196 = vmatmul.bf16.gmra.mxu3 %v10548_v41 }
 0x343   :  { %v7195_v34 = vpop.eup %7194  ;;  %v2934_v2 = vadd.f32 1.0, %v2806_v9  ;;  %v1999_v14 = vadd.f32 %v1998_v17, %v1950_v22  ;;  %v1904_v42 = vadd.f32 %v1903_v61, %v1855_v27  ;;  %v9146_v20 = vpack.c.bf16 %v3939_v0, %v3931_v15  ;;  %4838 = vmatpush.bf16.msra.mxu1 %v6226_v39  ;;  %v6780_v17 = vld [vmem:[#allocation11 + $0x24] sm:$0xf0] }
 0x344   :  { %v3932_v60 = vmul.f32 %v3804_v23, %v10546_v6  ;;  %v9149_v52 = vpack.c.bf16 %v7187_v57, %v9124_v12  ;;  %7196 = vpow2.f32 %v2717_v49  ;;  %v2513_v31 = vmul.f32 1.442695, %v2365_v18  ;;  %v6812_v49 = vld [vmem:[#allocation11 + $0x124] sm:$0xf0]  ;;  %v6153_v18 = vld [vmem:[#allocation11 + $0x20] sm:$0xf] }
 0x345   :  { %10549 = vst [vmem:[#allocation23_spill] sm:$0xff] %v9146_v20  ;;  %7198 = vpow2.f32 %v2719_v21  ;;  %v2515_v3 = vmul.f32 1.442695, %v2366_v58  ;;  %v2373_v45 = vunpack.c.l.bf16 %v2295_v10  ;;  %v9155_v51 = vpack.c.bf16 %v1999_v14, %v1901_v37  ;;  %v1952_v14 = vpop.f32.mrf.mxu2  ;;  %v2001_v57 = vpop.f32.mrf.mxu3  ;;  %v6145_v6 = vld [vmem:[#allocation11 + $0x10] sm:$0xf] }
 0x346   :  { %v9153_v40 = vpack.c.bf16 %v3940_v16, %v3932_v60  ;;  %7200 = vrcp.f32 %v3129_v47  ;;  %v9159_v23 = vpack.c.bf16 %v9086_v4, %v9021_v24  ;;  %v9163_v12 = vpack.c.bf16 %v9090_v26, %v9076_v63  ;;  %v1856_v26 = vpop.f32.mrf.mxu0 }
 0x347   :  { %10551 = vst [vmem:[#allocation38_spill] sm:$0xff] %v9155_v51  ;;  %v9167_v35 = vpack.c.bf16 %v9105_v8, %v9094_v25  ;;  %v9169_v16 = vpack.c.bf16 %v7191_v56, %v7189_v5  ;;  %7202 = vrcp.f32 %v3130_v36  ;;  %v3055_v60 = vpack.c.bf16 %v2934_v2, %v2933_v28  ;;  %v1905_v25 = vpop.f32.mrf.mxu1  ;;  %v6281_v28 = vld [vmem:[#allocation11 + $0x120] sm:$0xf]  ;;  %v6337_v36 = vld [vmem:[#allocation11 + $0x190] sm:$0xf] }
 0x348   :  { %10550 = vst [vmem:[#allocation36_spill] sm:$0xff] %v9153_v40  ;;  %v9173_v37 = vpack.c.bf16 %v9120_v7, %v9099_v1  ;;  %7204 = vpow2.f32 %v2513_v31  ;;  %v1953_v63 = vadd.f32 %v1952_v14, %v8936_v13  ;;  %v2891_v8 = vunpack.c.l.bf16 %v9149_v52 }
 0x349   :  { %10552 = vst [vmem:[#allocation24_spill] sm:$0xff] %v9159_v23  ;;  %v2892_v5 = vunpack.c.h.bf16 %v9149_v52  ;;  %7206 = vpow2.f32 %v2515_v3  ;;  %v2529_v2 = vmul.f32 1.442695, %v2373_v45  ;;  %v2374_v1 = vunpack.c.h.bf16 %v2295_v10 }
 0x34a   :  { %10553 = vst [vmem:[#allocation25_spill] sm:$0xff] %v9163_v12  ;;  %v7197_v21 = vpop.eup %7196  ;;  %v2002_v7 = vadd.f32 %v2001_v57, %v1953_v63  ;;  %v1857_v56 = vadd.f32 %v1856_v26, %v8914_v29  ;;  %v6282_v9 = vor.u32 %v6812_v49, %v6281_v28  ;;  %v2899_v47 = vunpack.c.l.bf16 %v9169_v16  ;;  %v6217_v28 = vld [vmem:[#allocation11 + $0xa0] sm:$0xf] }
 0x34b   :  { %10554 = vst [vmem:[#allocation26_spill] sm:$0xff] %v9167_v35  ;;  %v7199_v44 = vpop.eup %7198  ;;  %v2786_v58 = vpack.c.bf16 %v7195_v34, %v7193_v50  ;;  %v3157_v53 = vunpack.c.h.bf16 %v3055_v60  ;;  %v6154_v61 = vor.u32 %v6780_v17, %v6153_v18  ;;  %v3158_v15 = vunpack.c.l.bf16 %v3055_v60 }
 0x34c   :  { %10555 = vst [vmem:[#allocation27_spill] sm:$0xff] %v9173_v37  ;;  %v7201_v48 = vpop.eup %7200  ;;  %v9182_v22 = vpack.c.bf16 %v2002_v7, %v1904_v42  ;;  %v1906_v27 = vadd.f32 %v1905_v25, %v1857_v56  ;;  %4888 = vmatpush.bf16.msra.mxu2 %v6282_v9  ;;  %v6346_v10 = vor.u32 %v6828_v32, %v6345_v43  ;;  %v3019_v0 = vadd.f32 1.0, %v2891_v8 }
 0x34d   :  { %v7203_v39 = vpop.eup %7202  ;;  %v2299_v41 = vxor.u32 2147516416, %v9070_v62  ;;  %4790 = vmatpush.bf16.msra.mxu0 %v6154_v61  ;;  %v2900_v50 = vunpack.c.h.bf16 %v9169_v16  ;;  %v2790_v52 = vpack.c.bf16 %v7199_v44, %v7197_v21  ;;  %7208 = vpow2.f32 %v2529_v2  ;;  %v1954_v14 = vpop.f32.mrf.mxu2  ;;  %v6796_v2 = vld [vmem:[#allocation11 + $0xa4] sm:$0xf0]  ;;  %v10571_v62 = vld [vmem:[#allocation35_spill] sm:$0xff] }
 0x34e   :  { %10556 = vst [vmem:[#allocation59_spill] sm:$0xff] %v9182_v22  ;;  %v7205_v34 = vpop.eup %7204  ;;  %v2531_v31 = vmul.f32 1.442695, %v2374_v1  ;;  %4937 = vmatpush.bf16.msra.mxu3 %v6346_v10  ;;  %v3020_v3 = vadd.f32 1.0, %v2892_v5  ;;  %v9188_v45 = vadd.f32 1.0, %v2899_v47  ;;  %v2907_v60 = vunpack.c.l.bf16 %v2786_v58  ;;  %v2003_v57 = vpop.f32.mrf.mxu3  ;;  %v10557_v47 = vld [vmem:[#allocation28_spill] sm:$0xff] }
 0x34f   :  { %v7207_v42 = vpop.eup %7206  ;;  %7210 = vrcp.f32 %v3157_v53  ;;  %v2908_v63 = vunpack.c.h.bf16 %v2786_v58  ;;  %v3132_v26 = vmul.f32 %v7201_v48, %v8418_v54  ;;  %v3134_v25 = vmul.f32 %v7203_v39, %v8420_v38  ;;  %v1859_v8 = vpop.f32.mrf.mxu0  ;;  %2054 = vmatmul.bf16.gmra.mxu0 %v10557_v47  ;;  %v10558_v58 = vld [vmem:[#allocation29_spill] sm:$0xff]  ;;  %v6792_v48 = vld [vmem:[#allocation11 + $0x84] sm:$0xf0] }
 0x350   :  { %7212 = vrcp.f32 %v3158_v15  ;;  %v1908_v16 = vpop.f32.mrf.mxu1  ;;  %v2381_v49 = vunpack.c.l.bf16 %v2299_v41  ;;  %v1955_v21 = vadd.f32 %v1954_v14, %v8936_v13  ;;  %v1860_v5 = vadd.f32 %v1859_v8, %v8914_v29  ;;  %2152 = vmatmul.bf16.gmra.mxu2 %v10557_v47 }
 0x351   :  { %v6218_v1 = vor.u32 %v6796_v2, %v6217_v28  ;;  %v9194_v7 = vadd.f32 1.0, %v2900_v50  ;;  %v2915_v56 = vunpack.c.l.bf16 %v2790_v52  ;;  %v2916_v9 = vunpack.c.h.bf16 %v2790_v52  ;;  %2103 = vmatmul.bf16.gmra.mxu1 %v10558_v58 }
 0x352   :  { %7214 = vpow2.f32 %v2531_v31  ;;  %v9196_v18 = vpack.c.bf16 %v7207_v42, %v7205_v34  ;;  %v2382_v17 = vunpack.c.h.bf16 %v2299_v41  ;;  %v2004_v43 = vadd.f32 %v2003_v57, %v1955_v21  ;;  %2201 = vmatmul.bf16.gmra.mxu3 %v10558_v58 }
 0x353   :  { %v1909_v44 = vadd.f32 %v1908_v16, %v1860_v5  ;;  %v7209_v53 = vpop.eup %7208  ;;  %v9200_v61 = vpack.c.bf16 %v3132_v26, %v3134_v25  ;;  %v3567_v32 = vunpack.c.l.bf16 %v8950_v33  ;;  %v3098_v15 = vpack.c.bf16 %v3020_v3, %v3019_v0  ;;  %4839 = vmatpush.bf16.msra.mxu1 %v6218_v1 }
 0x354   :  { %v9206_v39 = vadd.f32 1.0, %v2907_v60  ;;  %v9208_v41 = vadd.f32 1.0, %v2908_v63  ;;  %v2545_v34 = vmul.f32 1.442695, %v2381_v49  ;;  %v9210_v50 = vpack.c.bf16 %v2004_v43, %v1906_v27 }
 0x355   :  { %v7211_v10 = vpop.eup %7210  ;;  %v9212_v31 = vadd.f32 1.0, %v2915_v56  ;;  %v2303_v57 = vxor.u32 2147516416, %v9114_v46  ;;  %v9217_v26 = vadd.f32 1.0, %v2916_v9  ;;  %v2813_v0 = vunpack.c.l.bf16 %v9196_v18  ;;  %v1957_v63 = vpop.f32.mrf.mxu2  ;;  %v6273_v56 = vld [vmem:[#allocation11 + $0x110] sm:$0xf] }
 0x356   :  { %10559 = vst [vmem:[#allocation28_spill] sm:$0xff] %v9210_v50  ;;  %v7213_v52 = vpop.eup %7212  ;;  %v2547_v60 = vmul.f32 1.442695, %v2382_v17  ;;  %v2006_v27 = vpop.f32.mrf.mxu3  ;;  %v3695_v8 = vunpack.c.l.bf16 %v9200_v61  ;;  %v2814_v16 = vunpack.c.h.bf16 %v9196_v18  ;;  %v1958_v28 = vadd.f32 %v1957_v63, %v8936_v13  ;;  %v6810_v9 = vld [vmem:[#allocation11 + $0x114] sm:$0xf0] }
 0x357   :  { %v1861_v2 = vpop.f32.mrf.mxu0  ;;  %v3458_v21 = vunpack.c.h.bf16 %v3098_v15  ;;  %v3160_v5 = vmul.f32 %v7211_v10, %v8418_v54  ;;  %v3162_v1 = vmul.f32 %v7213_v52, %v8420_v38  ;;  %7216 = vpow2.f32 %v2545_v34  ;;  %v6778_v18 = vld [vmem:[#allocation11 + $0x14] sm:$0xf0] }
 0x358   :  { %v7215_v25 = vpop.eup %7214  ;;  %v1910_v49 = vpop.f32.mrf.mxu1  ;;  %v3459_v17 = vunpack.c.l.bf16 %v3098_v15  ;;  %v2389_v43 = vunpack.c.l.bf16 %v2303_v57  ;;  %v2007_v47 = vadd.f32 %v2006_v27, %v1958_v28  ;;  %v1862_v58 = vadd.f32 %v1861_v2, %v8914_v29  ;;  %v6826_v10 = vld [vmem:[#allocation11 + $0x194] sm:$0xf0] }
 0x359   :  { %v6274_v3 = vor.u32 %v6810_v9, %v6273_v56  ;;  %v9227_v63 = vpack.c.bf16 %v7215_v25, %v7209_v53  ;;  %7218 = vpow2.f32 %v2547_v60  ;;  %v2390_v4 = vunpack.c.h.bf16 %v2303_v57 }
 0x35a   :  { %v6146_v24 = vor.u32 %v6778_v18, %v6145_v6  ;;  %v9229_v14 = vpack.c.bf16 %v2007_v47, %v1909_v44  ;;  %v1911_v34 = vadd.f32 %v1910_v49, %v1862_v58  ;;  %v6338_v52 = vor.u32 %v6826_v10, %v6337_v36  ;;  %v6209_v36 = vld [vmem:[#allocation11 + $0x90] sm:$0xf]  ;;  %v6265_v18 = vld [vmem:[#allocation11 + $0x100] sm:$0xf]  ;;  %v6776_v44 = vld [vmem:[#allocation11 + $0x4] sm:$0xf0] }
 0x35b   :  { %4889 = vmatpush.bf16.msra.mxu2 %v6274_v3  ;;  %7220 = vrcp.f32 %v3458_v21  ;;  %v2307_v27 = vxor.u32 2147516416, %v9131_v19  ;;  %v9235_v28 = vpack.c.bf16 %v9194_v7, %v9188_v45  ;;  %v9237_v53 = vpack.c.bf16 %v3160_v5, %v3162_v1  ;;  %v6794_v3 = vld [vmem:[#allocation11 + $0x94] sm:$0xf0] }
 0x35c   :  { %10560 = vst [vmem:[#allocation29_spill] sm:$0xff] %v9229_v14  ;;  %4791 = vmatpush.bf16.msra.mxu0 %v6146_v24  ;;  %7222 = vrcp.f32 %v3459_v17  ;;  %v2561_v57 = vmul.f32 1.442695, %v2389_v43  ;;  %4938 = vmatpush.bf16.msra.mxu3 %v6338_v52  ;;  %v3696_v25 = vunpack.c.h.bf16 %v9200_v61  ;;  %v9242_v2 = vadd.f32 1.0, %v2813_v0 }
 0x35d   :  { %v7217_v60 = vpop.eup %7216  ;;  %v9244_v24 = vadd.f32 1.0, %v2814_v16  ;;  %v1959_v45 = vpop.f32.mrf.mxu2  ;;  %v6210_v49 = vor.u32 %v6794_v3, %v6209_v36  ;;  %v9248_v21 = vmul.f32 %v3695_v8, %v3567_v32  ;;  %v2821_v5 = vunpack.c.l.bf16 %v9227_v63  ;;  %v10561_v3 = vld [vmem:[#allocation31_spill] sm:$0xff] }
 0x35e   :  { %v2008_v7 = vpop.f32.mrf.mxu3  ;;  %v2822_v1 = vunpack.c.h.bf16 %v9227_v63  ;;  %v2563_v56 = vmul.f32 1.442695, %v2390_v4  ;;  %v2397_v61 = vunpack.c.l.bf16 %v2307_v27  ;;  %v1960_v0 = vadd.f32 %v1959_v45, %v8936_v13  ;;  %v10562_v45 = vld [vmem:[#allocation32_spill] sm:$0xff] }
 0x35f   :  { %v1864_v9 = vpop.f32.mrf.mxu0  ;;  %v7219_v43 = vpop.eup %7218  ;;  %4840 = vmatpush.bf16.msra.mxu1 %v6210_v49  ;;  %v3486_v47 = vunpack.c.h.bf16 %v9235_v28  ;;  %v3703_v32 = vunpack.c.l.bf16 %v9237_v53  ;;  %7224 = vpow2.f32 %v2561_v57  ;;  %v2311_v8 = vxor.u32 2147516416, %v9155_v51  ;;  %2059 = vmatmul.bf16.gmra.mxu0 %v10561_v3  ;;  %v6808_v49 = vld [vmem:[#allocation11 + $0x104] sm:$0xf0] }
 0x360   :  { %v1913_v17 = vpop.f32.mrf.mxu1  ;;  %v1865_v16 = vadd.f32 %v1864_v9, %v8914_v29  ;;  %v3487_v4 = vunpack.c.l.bf16 %v9235_v28  ;;  %v2398_v10 = vunpack.c.h.bf16 %v2307_v27  ;;  %v2009_v52 = vadd.f32 %v2008_v7, %v1960_v0  ;;  %v6137_v9 = vld [vmem:[#allocation11] sm:$0xf]  ;;  %2157 = vmatmul.bf16.gmra.mxu2 %v10561_v3  ;;  %v6824_v7 = vld [vmem:[#allocation11 + $0x184] sm:$0xf0] }
 0x361   :  { %v7221_v58 = vpop.eup %7220  ;;  %2108 = vmatmul.bf16.gmra.mxu1 %v10562_v45  ;;  %7226 = vrcp.f32 %v3486_v47  ;;  %v3704_v6 = vunpack.c.h.bf16 %v9237_v53  ;;  %v6266_v28 = vor.u32 %v6808_v49, %v6265_v18  ;;  %v6138_v57 = vor.u32 %v6776_v44, %v6137_v9  ;;  %v6329_v27 = vld [vmem:[#allocation11 + $0x180] sm:$0xf] }
 0x362   :  { %v7223_v63 = vpop.eup %7222  ;;  %v1914_v36 = vadd.f32 %v1913_v17, %v1865_v16  ;;  %7228 = vpow2.f32 %v2563_v56  ;;  %2206 = vmatmul.bf16.gmra.mxu3 %v10562_v45  ;;  %v6201_v17 = vld [vmem:[#allocation11 + $0x80] sm:$0xf]  ;;  %v9263_v0 = vpack.c.bf16 %v7219_v43, %v7217_v60  ;;  %v2577_v16 = vmul.f32 1.442695, %v2397_v61 }
 0x363   :  { %v9265_v15 = vpack.c.bf16 %v2009_v52, %v1911_v34  ;;  %v6330_v42 = vor.u32 %v6824_v7, %v6329_v27  ;;  %4890 = vmatpush.bf16.msra.mxu2 %v6266_v28  ;;  %4792 = vmatpush.bf16.msra.mxu0 %v6138_v57  ;;  %v6202_v53 = vor.u32 %v6792_v48, %v6201_v17  ;;  %7230 = vrcp.f32 %v3487_v4 }
 0x364   :  { %v3461_v56 = vmul.f32 %v7221_v58, %v8418_v54  ;;  %v3463_v47 = vmul.f32 %v7223_v63, %v8420_v38  ;;  %v10564_v44 = vunpack.c.h.bf16 %v8950_v33  ;;  %v9273_v3 = vadd.f32 1.0, %v2821_v5 }
 0x365   :  { %10563 = vst [vmem:[#allocation31_spill] sm:$0xff] %v9265_v15  ;;  %v2579_v60 = vmul.f32 1.442695, %v2398_v10  ;;  %v2405_v43 = vunpack.c.l.bf16 %v2311_v8  ;;  %v1962_v34 = vpop.f32.mrf.mxu2  ;;  %4939 = vmatpush.bf16.msra.mxu3 %v6330_v42  ;;  %v7225_v52 = vpop.eup %7224  ;;  %v10565_v45 = vunpack.c.l.bf16 %v8988_v55  ;;  %v9279_v58 = vadd.f32 1.0, %v2822_v1  ;;  %4841 = vmatpush.bf16.msra.mxu1 %v6202_v53 }
 0x366   :  { %v9271_v18 = vmul.f32 %v3696_v25, %v10564_v44  ;;  %v2011_v61 = vpop.f32.mrf.mxu3  ;;  %v2406_v63 = vunpack.c.h.bf16 %v2311_v8  ;;  %v1963_v4 = vadd.f32 %v1962_v34, %v8936_v13  ;;  %v10566_v10 = vunpack.c.h.bf16 %v8988_v55 }
 0x367   :  { %v9277_v48 = vmul.f32 %v3703_v32, %v10565_v45  ;;  %v1866_v33 = vpop.f32.mrf.mxu0  ;;  %v7227_v5 = vpop.eup %7226  ;;  %v2829_v42 = vunpack.c.l.bf16 %v9263_v0  ;;  %7232 = vpow2.f32 %v2577_v16  ;;  %v2315_v1 = vxor.u32 2147516416, %v9182_v22  ;;  %v10578_v22 = vld [vmem:[#allocation43_spill] sm:$0xff] }
 0x368   :  { %v1915_v25 = vpop.f32.mrf.mxu1  ;;  %v9284_v49 = vmul.f32 %v3704_v6, %v10566_v10  ;;  %v7229_v32 = vpop.eup %7228  ;;  %v2012_v28 = vadd.f32 %v2011_v61, %v1963_v4  ;;  %v1867_v8 = vadd.f32 %v1866_v33, %v8914_v29  ;;  %v3464_v57 = vpack.c.bf16 %v3461_v56, %v3463_v47 }
 0x369   :  { %7234 = vpow2.f32 %v2579_v60  ;;  %v2593_v7 = vmul.f32 1.442695, %v2405_v43  ;;  %v3489_v55 = vmul.f32 %v7227_v5, %v8418_v54  ;;  %v7231_v6 = vpop.eup %7230  ;;  %v2595_v17 = vmul.f32 1.442695, %v2406_v63  ;;  %v10568_v43 = vld [vmem:[#allocation54_spill] sm:$0xff] }
 0x36a   :  { %v2319_v53 = vxor.u32 2147516416, %v9210_v50  ;;  %v9293_v44 = vpack.c.bf16 %v2012_v28, %v1914_v36  ;;  %v1916_v16 = vadd.f32 %v1915_v25, %v1867_v8  ;;  %v9295_v34 = vadd.f32 1.0, %v2829_v42 }
 0x36b   :  { %v9297_v45 = vpack.c.bf16 %v7229_v32, %v7225_v52  ;;  %v3491_v56 = vmul.f32 %v7231_v6, %v8420_v38  ;;  %v2413_v47 = vunpack.c.l.bf16 %v2315_v1  ;;  %v2414_v60 = vunpack.c.h.bf16 %v2315_v1 }
 0x36c   :  { %10567 = vst [vmem:[#allocation32_spill] sm:$0xff] %v9293_v44  ;;  %v3669_v4 = vunpack.c.l.bf16 %v10568_v43  ;;  %v3789_v33 = vunpack.c.l.bf16 %v3464_v57  ;;  %7236 = vpow2.f32 %v2593_v7  ;;  %v2323_v63 = vxor.u32 2147516416, %v9229_v14 }
 0x36d   :  { %v7233_v5 = vpop.eup %7232  ;;  %v1964_v36 = vpop.f32.mrf.mxu2  ;;  %v3492_v25 = vpack.c.bf16 %v3489_v55, %v3491_v56  ;;  %v3670_v42 = vunpack.c.h.bf16 %v10568_v43  ;;  %7238 = vpow2.f32 %v2595_v17  ;;  %v2421_v52 = vunpack.c.l.bf16 %v2319_v53 }
 0x36e   :  { %v2013_v10 = vpop.f32.mrf.mxu3  ;;  %v2327_v32 = vxor.u32 2147516416, %v9265_v15  ;;  %v3790_v6 = vunpack.c.h.bf16 %v3464_v57  ;;  %v1965_v61 = vadd.f32 %v1964_v36, %v8936_v13  ;;  %v2609_v50 = vmul.f32 1.442695, %v2413_v47  ;;  %v10570_v15 = vld [vmem:[#allocation34_spill] sm:$0xff] }
 0x36f   :  { %v1869_v28 = vpop.f32.mrf.mxu0  ;;  %v7235_v1 = vpop.eup %7234  ;;  %v3797_v7 = vunpack.c.l.bf16 %v3492_v25  ;;  %v3798_v9 = vunpack.c.h.bf16 %v3492_v25  ;;  %v2611_v19 = vmul.f32 1.442695, %v2414_v60  ;;  %v2422_v40 = vunpack.c.h.bf16 %v2319_v53  ;;  %2064 = vmatmul.bf16.gmra.mxu0 %v10570_v15 }
 0x370   :  { %v1918_v8 = vpop.f32.mrf.mxu1  ;;  %v1870_v27 = vadd.f32 %v1869_v28, %v8914_v29  ;;  %v10569_v55 = vunpack.c.l.bf16 %v8852_v11  ;;  %v2429_v17 = vunpack.c.l.bf16 %v2323_v63  ;;  %v2014_v43 = vadd.f32 %v2013_v10, %v1965_v61  ;;  %2162 = vmatmul.bf16.gmra.mxu2 %v10570_v15 }
 0x371   :  { %2113 = vmatmul.bf16.gmra.mxu1 %v10571_v62  ;;  %v3925_v57 = vmul.f32 %v3797_v7, %v3669_v4  ;;  %v2430_v51 = vunpack.c.h.bf16 %v2323_v63  ;;  %v2437_v36 = vunpack.c.l.bf16 %v2327_v32  ;;  %v10572_v47 = vunpack.c.h.bf16 %v8852_v11 }
 0x372   :  { %v3917_v56 = vmul.f32 %v3789_v33, %v10569_v55  ;;  %v1919_v20 = vadd.f32 %v1918_v8, %v1870_v27  ;;  %2211 = vmatmul.bf16.gmra.mxu3 %v10571_v62  ;;  %v3926_v60 = vmul.f32 %v3798_v9, %v3670_v42  ;;  %v7237_v25 = vpop.eup %7236  ;;  %v9315_v33 = vpack.c.bf16 %v7235_v1, %v7233_v5 }
 0x373   :  { %v3918_v53 = vmul.f32 %v3790_v6, %v10572_v47  ;;  %v2625_v61 = vmul.f32 1.442695, %v2421_v52  ;;  %v9317_v27 = vpack.c.bf16 %v2014_v43, %v1916_v16  ;;  %v7239_v28 = vpop.eup %7238  ;;  %v10575_v4 = vunpack.c.h.bf16 %v9263_v0  ;;  %v6854_v43 = vld [vmem:[#allocation11 + $0x274] sm:$0xf0] }
 0x374   :  { %v9319_v10 = vpack.c.bf16 %v3925_v57, %v3917_v56  ;;  %7240 = vpow2.f32 %v2609_v50  ;;  %v2627_v15 = vmul.f32 1.442695, %v2422_v40  ;;  %v2837_v11 = vunpack.c.l.bf16 %v9297_v45  ;;  %v6886_v56 = vld [vmem:[#allocation11 + $0x374] sm:$0xf0]  ;;  %v6641_v57 = vld [vmem:[#allocation11 + $0x3f0] sm:$0xf] }
 0x375   :  { %10573 = vst [vmem:[#allocation54_spill] sm:$0xff] %v9317_v27  ;;  %v9323_v63 = vadd.f32 1.0, %v10575_v4  ;;  %v9325_v62 = vpack.c.bf16 %v3926_v60, %v3918_v53  ;;  %7242 = vpow2.f32 %v2611_v19  ;;  %v2641_v9 = vmul.f32 1.442695, %v2429_v17  ;;  %v1967_v42 = vpop.f32.mrf.mxu2  ;;  %v6577_v19 = vld [vmem:[#allocation11 + $0x370] sm:$0xf] }
 0x376   :  { %10574 = vst [vmem:[#allocation34_spill] sm:$0xff] %v9319_v10  ;;  %v2438_v5 = vunpack.c.h.bf16 %v2327_v32  ;;  %v2016_v52 = vpop.f32.mrf.mxu3  ;;  %v2838_v16 = vunpack.c.h.bf16 %v9297_v45  ;;  %v2643_v8 = vmul.f32 1.442695, %v2430_v51  ;;  %v2657_v6 = vmul.f32 1.442695, %v2437_v36  ;;  %v10580_v10 = vld [vmem:[#allocation48_spill] sm:$0xff] }
 0x377   :  { %10576 = vst [vmem:[#allocation35_spill] sm:$0xff] %v9325_v62  ;;  %v1968_v1 = vadd.f32 %v1967_v42, %v8936_v13  ;;  %v1871_v0 = vpop.f32.mrf.mxu0  ;;  %v2845_v50 = vunpack.c.l.bf16 %v9315_v33  ;;  %v9331_v40 = vpack.c.bf16 %v7239_v28, %v7237_v25  ;;  %7244 = vpow2.f32 %v2625_v61  ;;  %v6449_v51 = vld [vmem:[#allocation11 + $0x270] sm:$0xf]  ;;  %v6902_v60 = vld [vmem:[#allocation11 + $0x3f4] sm:$0xf0] }
 0x378   :  { %v1920_v7 = vpop.f32.mrf.mxu1  ;;  %v2331_v55 = vxor.u32 2147516416, %v9293_v44  ;;  %7246 = vpow2.f32 %v2627_v15  ;;  %v1872_v17 = vadd.f32 %v1871_v0, %v8914_v29  ;;  %v6578_v45 = vor.u32 %v6886_v56, %v6577_v19 }
 0x379   :  { %v2017_v32 = vadd.f32 %v2016_v52, %v1968_v1  ;;  %7248 = vpow2.f32 %v2641_v9  ;;  %v2659_v36 = vmul.f32 1.442695, %v2438_v5  ;;  %v2335_v47 = vxor.u32 2147516416, %v9317_v27  ;;  %v7466_v1 = vld [vmem:[#allocation10] sm:$0xff] }
 0x37a   :  { %v6450_v53 = vor.u32 %v6854_v43, %v6449_v51  ;;  %v7241_v25 = vpop.eup %7240  ;;  %7250 = vpow2.f32 %v2643_v8  ;;  %v1921_v28 = vadd.f32 %v1920_v7, %v1872_v17  ;;  %5079 = vmatpush.bf16.msrb.mxu2 %v6578_v45  ;;  %v6642_v4 = vor.u32 %v6902_v60, %v6641_v57 }
 0x37b   :  { %v9336_v61 = vpack.c.bf16 %v2017_v32, %v1919_v20  ;;  %v7243_v15 = vpop.eup %7242  ;;  %v9338_v42 = vadd.f32 1.0, %v2837_v11  ;;  %v2846_v29 = vunpack.c.h.bf16 %v9315_v33  ;;  %v2445_v52 = vunpack.c.l.bf16 %v2331_v55 }
 0x37c   :  { %v9341_v9 = vperm.slane %v7466_v1, 6  ;;  %4981 = vmatpush.bf16.msrb.mxu0 %v6450_v53  ;;  %v2853_v5 = vunpack.c.l.bf16 %v9331_v40  ;;  %7252 = vpow2.f32 %v2657_v6  ;;  %v2446_v0 = vunpack.c.h.bf16 %v2331_v55  ;;  %5128 = vmatpush.bf16.msrb.mxu3 %v6642_v4 }
 0x37d   :  { %10577 = vst [vmem:[#allocation60_spill] sm:$0xff] %v9336_v61  ;;  %v2339_v20 = vxor.u32 2147516416, %v9336_v61  ;;  %v7245_v8 = vpop.eup %7244  ;;  %v9345_v7 = vadd.f32 1.0, %v2838_v16  ;;  %7254 = vpow2.f32 %v2659_v36  ;;  %v2453_v19 = vunpack.c.l.bf16 %v2335_v47  ;;  %v1969_v33 = vpop.f32.mrf.mxu2 }
 0x37e   :  { %v2018_v56 = vpop.f32.mrf.mxu3  ;;  %v7247_v32 = vpop.eup %7246  ;;  %v9348_v17 = vadd.f32 1.0, %v2845_v50  ;;  %v2763_v45 = vpack.c.bf16 %v7243_v15, %v7241_v25  ;;  %v2454_v6 = vunpack.c.h.bf16 %v2335_v47  ;;  %v2673_v53 = vmul.f32 1.442695, %v2445_v52  ;;  %v10579_v52 = vld [vmem:[#allocation44_spill] sm:$0xff] }
 0x37f   :  { %v2030_v55 = vpop.f32.mrf.mxu0  ;;  %v7249_v57 = vpop.eup %7248  ;;  %v2461_v60 = vunpack.c.l.bf16 %v2339_v20  ;;  %v1970_v16 = vadd.f32 %v1969_v33, %v8936_v13  ;;  %v9353_v11 = vadd.f32 1.0, %v2846_v29  ;;  %v2854_v61 = vunpack.c.h.bf16 %v9331_v40  ;;  %4793 = vmatmul.bf16.vlgmr.msra.gmra.mxu0 %v10578_v22  ;;  %v10581_v29 = vld [vmem:[#allocation49_spill] sm:$0xff] }
 0x380   :  { %v2079_v43 = vpop.f32.mrf.mxu1  ;;  %v2031_v4 = vadd.f32 %v2030_v55, %v9341_v9  ;;  %v7251_v36 = vpop.eup %7250  ;;  %v9356_v50 = vadd.f32 1.0, %v2853_v5  ;;  %v2675_v25 = vmul.f32 1.442695, %v2446_v0  ;;  %v2689_v15 = vmul.f32 1.442695, %v2453_v19  ;;  %4891 = vmatmul.bf16.vlgmr.msra.gmra.mxu2 %v10580_v10 }
 0x381   :  { %v2462_v51 = vunpack.c.h.bf16 %v2339_v20  ;;  %v2019_v47 = vadd.f32 %v2018_v56, %v1970_v16  ;;  %4842 = vmatmul.bf16.vlgmr.msra.gmra.mxu1 %v10579_v52  ;;  %v2861_v13 = vunpack.c.l.bf16 %v2763_v45  ;;  %v2767_v33 = vpack.c.bf16 %v7247_v32, %v7245_v8 }
 0x382   :  { %v2080_v27 = vadd.f32 %v2079_v43, %v2031_v4  ;;  %v7253_v62 = vpop.eup %7252  ;;  %v2691_v55 = vmul.f32 1.442695, %v2454_v6  ;;  %4940 = vmatmul.bf16.vlgmr.msra.gmra.mxu3 %v10581_v29  ;;  %v9362_v40 = vperm.slane %v7466_v1, 7  ;;  %v2771_v0 = vpack.c.bf16 %v7251_v36, %v7249_v57 }
 0x383   :  { %v7255_v5 = vpop.eup %7254  ;;  %7256 = vpow2.f32 %v2673_v53  ;;  %v2705_v20 = vmul.f32 1.442695, %v2461_v60  ;;  %v9364_v19 = vpack.c.bf16 %v2019_v47, %v1921_v28  ;;  %v9366_v56 = vadd.f32 1.0, %v2854_v61 }
 0x384   :  { %v2862_v43 = vunpack.c.h.bf16 %v2763_v45  ;;  %7258 = vpow2.f32 %v2675_v25  ;;  %v2707_v32 = vmul.f32 1.442695, %v2462_v51  ;;  %v9371_v29 = vadd.f32 1.0, %v2861_v13 }
 0x385   :  { %10582 = vst [vmem:[#allocation61_spill] sm:$0xff] %v9364_v19  ;;  %7260 = vpow2.f32 %v2689_v15  ;;  %v2343_v6 = vxor.u32 2147516416, %v9364_v19  ;;  %v2128_v1 = vpop.f32.mrf.mxu2  ;;  %v9373_v57 = vpack.c.bf16 %v7255_v5, %v7253_v62  ;;  %v2869_v53 = vunpack.c.l.bf16 %v2767_v33 }
 0x386   :  { %10583 = vst [vmem:[#allocation62_spill] sm:$0xff] %v9366_v56  ;;  %v2177_v4 = vpop.f32.mrf.mxu3  ;;  %7262 = vpow2.f32 %v2691_v55  ;;  %v2129_v61 = vadd.f32 %v2128_v1, %v9362_v40  ;;  %v2870_v60 = vunpack.c.h.bf16 %v2767_v33  ;;  %v2877_v36 = vunpack.c.l.bf16 %v2771_v0 }
 0x387   :  { %10584 = vst [vmem:[#allocation63_spill] sm:$0xff] %v9371_v29  ;;  %v2032_v28 = vpop.f32.mrf.mxu0  ;;  %7264 = vpow2.f32 %v2705_v20  ;;  %v2469_v25 = vunpack.c.l.bf16 %v2343_v6  ;;  %v3106_v47 = vpack.c.bf16 %v9208_v41, %v9206_v39  ;;  %v9379_v8 = vadd.f32 1.0, %v2862_v43 }
 0x388   :  { %v2081_v45 = vpop.f32.mrf.mxu1  ;;  %v2178_v15 = vadd.f32 %v2177_v4, %v2129_v61  ;;  %v2033_v51 = vadd.f32 %v2032_v28, %v9341_v9  ;;  %v2878_v62 = vunpack.c.h.bf16 %v2771_v0  ;;  %7266 = vpow2.f32 %v2707_v32 }
 0x389   :  { %v7257_v13 = vpop.eup %7256  ;;  %10585 = vst [vmem:[#allocation64_spill] sm:$0xff] %v9379_v8  ;;  %v2470_v55 = vunpack.c.h.bf16 %v2343_v6  ;;  %v2885_v1 = vunpack.c.l.bf16 %v9373_v57  ;;  %v3514_v20 = vunpack.c.h.bf16 %v3106_v47  ;;  %v9384_v4 = vadd.f32 1.0, %v2869_v53  ;;  %v6866_v8 = vld [vmem:[#allocation11 + $0x2d4] sm:$0xf0] }
 0x38a   :  { %v7259_v5 = vpop.eup %7258  ;;  %v9382_v16 = vpack.c.bf16 %v2178_v15, %v2080_v27  ;;  %v2082_v33 = vadd.f32 %v2081_v45, %v2033_v51  ;;  %v9386_v61 = vadd.f32 1.0, %v2870_v60  ;;  %v3515_v41 = vunpack.c.l.bf16 %v3106_v47 }
 0x38b   :  { %v7261_v10 = vpop.eup %7260  ;;  %10586 = vst [vmem:[#allocation65_spill] sm:$0xff] %v9384_v4  ;;  %v9389_v28 = vadd.f32 1.0, %v2877_v36  ;;  %v2721_v32 = vmul.f32 1.442695, %v2469_v25  ;;  %v9393_v15 = vadd.f32 1.0, %v2878_v62  ;;  %v2886_v45 = vunpack.c.h.bf16 %v9373_v57 }
 0x38c   :  { %10587 = vst [vmem:[#allocation66_spill] sm:$0xff] %v9386_v61  ;;  %v7263_v43 = vpop.eup %7262  ;;  %v2284_v6 = vxor.u32 2147516416, %v9382_v16  ;;  %v2723_v53 = vmul.f32 1.442695, %v2470_v55  ;;  %7268 = vrcp.f32 %v3514_v20  ;;  %v9396_v52 = vadd.f32 1.0, %v2885_v1 }
 0x38d   :  { %10588 = vst [vmem:[#allocation67_spill] sm:$0xff] %v9389_v28  ;;  %v7265_v27 = vpop.eup %7264  ;;  %v2130_v51 = vpop.f32.mrf.mxu2  ;;  %v2779_v47 = vpack.c.bf16 %v7259_v5, %v7257_v13  ;;  %v3110_v62 = vpack.c.bf16 %v9217_v26, %v9212_v31  ;;  %7270 = vrcp.f32 %v3515_v41  ;;  %v2783_v57 = vpack.c.bf16 %v7263_v43, %v7261_v10  ;;  %v10591_v5 = vld [vmem:[#allocation46_spill] sm:$0xff]  ;;  %v10594_v10 = vld [vmem:[#allocation51_spill] sm:$0xff]  ;;  %v6433_v61 = vld [vmem:[#allocation11 + $0x250] sm:$0xf] }
 0x38e   :  { %10589 = vst [vmem:[#allocation68_spill] sm:$0xff] %v9393_v15  ;;  %v2179_v60 = vpop.f32.mrf.mxu3  ;;  %v2351_v39 = vunpack.c.l.bf16 %v2284_v6  ;;  %v2352_v36 = vunpack.c.h.bf16 %v2284_v6  ;;  %v7267_v0 = vpop.eup %7266  ;;  %v2131_v25 = vadd.f32 %v2130_v51, %v9362_v40  ;;  %7272 = vpow2.f32 %v2721_v32  ;;  %v10592_v6 = vld [vmem:[#allocation30_spill] sm:$0xff]  ;;  %v6497_v4 = vld [vmem:[#allocation11 + $0x2d0] sm:$0xf] }
 0x38f   :  { %10590 = vst [vmem:[#allocation69_spill] sm:$0xff] %v9396_v52  ;;  %v2035_v22 = vpop.f32.mrf.mxu0  ;;  %7274 = vpow2.f32 %v2723_v53  ;;  %4798 = vmatmul.bf16.gmra.mxu0 %v10591_v5  ;;  %v3542_v14 = vunpack.c.h.bf16 %v3110_v62  ;;  %v2893_v52 = vunpack.c.l.bf16 %v2779_v47  ;;  %v2894_v51 = vunpack.c.h.bf16 %v2779_v47  ;;  %v6870_v31 = vld [vmem:[#allocation11 + $0x2f4] sm:$0xf0] }
 0x390   :  { %v2084_v19 = vpop.f32.mrf.mxu1  ;;  %v2036_v44 = vadd.f32 %v2035_v22, %v9341_v9  ;;  %v2485_v55 = vmul.f32 1.442695, %v2351_v39  ;;  %v2487_v20 = vmul.f32 1.442695, %v2352_v36  ;;  %v2180_v1 = vadd.f32 %v2179_v60, %v2131_v25  ;;  %v6513_v22 = vld [vmem:[#allocation11 + $0x2f0] sm:$0xf] }
 0x391   :  { %4847 = vmatmul.bf16.gmra.mxu1 %v10592_v6  ;;  %v9404_v15 = vpack.c.bf16 %v7267_v0, %v7265_v27  ;;  %v10593_v26 = vld [vmem:[#allocation50_spill] sm:$0xff]  ;;  %v6514_v41 = vor.u32 %v6870_v31, %v6513_v22  ;;  %v9410_v43 = vadd.f32 1.0, %v2886_v45  ;;  %v2901_v32 = vunpack.c.l.bf16 %v2783_v57  ;;  %v10596_v60 = vld [vmem:[#allocation19_spill] sm:$0xff] }
 0x392   :  { %v2085_v13 = vadd.f32 %v2084_v19, %v2036_v44  ;;  %7276 = vpow2.f32 %v2485_v55  ;;  %4896 = vmatmul.bf16.gmra.mxu2 %v10593_v26  ;;  %4945 = vmatmul.bf16.gmra.mxu3 %v10594_v10  ;;  %v7269_v39 = vpop.eup %7268  ;;  %v9408_v44 = vpack.c.bf16 %v2180_v1, %v2082_v33  ;;  %v3543_v19 = vunpack.c.l.bf16 %v3110_v62 }
 0x393   :  { %7278 = vpow2.f32 %v2487_v20  ;;  %10595 = vst [vmem:[#allocation70_spill] sm:$0xff] %v9410_v43  ;;  %v2902_v53 = vunpack.c.h.bf16 %v2783_v57  ;;  %v7271_v27 = vpop.eup %7270  ;;  %5030 = vmatpush.bf16.msrb.mxu1 %v6514_v41  ;;  %v3517_v55 = vmul.f32 %v7269_v39, %v8418_v54  ;;  %v9416_v1 = vadd.f32 1.0, %v2893_v52 }
 0x394   :  { %v2288_v47 = vxor.u32 2147516416, %v9408_v44  ;;  %7280 = vrcp.f32 %v3542_v14  ;;  %v7273_v33 = vpop.eup %7272  ;;  %v2909_v45 = vunpack.c.l.bf16 %v9404_v15  ;;  %v3519_v31 = vmul.f32 %v7271_v27, %v8420_v38 }
 0x395   :  { %v2133_v36 = vpop.f32.mrf.mxu2  ;;  %10597 = vst [vmem:[#allocation19_spill] sm:$0xff] %v9416_v1  ;;  %v7275_v41 = vpop.eup %7274  ;;  %v9421_v0 = vadd.f32 1.0, %v2894_v51  ;;  %7282 = vrcp.f32 %v3543_v19  ;;  %v9423_v39 = vadd.f32 1.0, %v2901_v32  ;;  %v9425_v20 = vadd.f32 1.0, %v2902_v53 }
 0x396   :  { %v2182_v25 = vpop.f32.mrf.mxu3  ;;  %v2134_v62 = vadd.f32 %v2133_v36, %v9362_v40  ;;  %v2359_v10 = vunpack.c.l.bf16 %v2288_v47  ;;  %v2360_v26 = vunpack.c.h.bf16 %v2288_v47  ;;  %v9429_v27 = vpack.c.bf16 %v3517_v55, %v3519_v31 }
 0x397   :  { %v2037_v57 = vpop.f32.mrf.mxu0  ;;  %10598 = vst [vmem:[#allocation71_spill] sm:$0xff] %v9421_v0  ;;  %v9431_v51 = vadd.f32 1.0, %v2909_v45  ;;  %v9437_v53 = vpack.c.bf16 %v7275_v41, %v7273_v33  ;;  %v6505_v41 = vld [vmem:[#allocation11 + $0x2e0] sm:$0xf] }
 0x398   :  { %v2086_v22 = vpop.f32.mrf.mxu1  ;;  %v7277_v14 = vpop.eup %7276  ;;  %10599 = vst [vmem:[#allocation72_spill] sm:$0xff] %v9423_v39  ;;  %v2183_v52 = vadd.f32 %v2182_v25, %v2134_v62  ;;  %v2038_v6 = vadd.f32 %v2037_v57, %v9341_v9  ;;  %v2501_v1 = vmul.f32 1.442695, %v2359_v10  ;;  %v2503_v43 = vmul.f32 1.442695, %v2360_v26 }
 0x399   :  { %10600 = vst [vmem:[#allocation73_spill] sm:$0xff] %v9425_v20  ;;  %v7279_v5 = vpop.eup %7278  ;;  %v6569_v57 = vld [vmem:[#allocation11 + $0x360] sm:$0xf]  ;;  %v6884_v10 = vld [vmem:[#allocation11 + $0x364] sm:$0xf0] }
 0x39a   :  { %10601 = vst [vmem:[#allocation74_spill] sm:$0xff] %v9431_v51  ;;  %v2732_v0 = vpack.c.bf16 %v7279_v5, %v7277_v14  ;;  %v9433_v47 = vpack.c.bf16 %v2183_v52, %v2085_v13  ;;  %v9435_v19 = vadd.f32 %v2086_v22, %v2038_v6  ;;  %v7281_v32 = vpop.eup %7280  ;;  %7284 = vpow2.f32 %v2501_v1  ;;  %v6441_v26 = vld [vmem:[#allocation11 + $0x260] sm:$0xf]  ;;  %v6852_v5 = vld [vmem:[#allocation11 + $0x264] sm:$0xf0] }
 0x39b   :  { %7286 = vpow2.f32 %v2503_v43  ;;  %v6570_v45 = vor.u32 %v6884_v10, %v6569_v57  ;;  %v6633_v13 = vld [vmem:[#allocation11 + $0x3e0] sm:$0xf]  ;;  %v6900_v14 = vld [vmem:[#allocation11 + $0x3e4] sm:$0xf0]  ;;  %v7283_v6 = vpop.eup %7282  ;;  %v6442_v22 = vor.u32 %v6852_v5, %v6441_v26  ;;  %v6561_v10 = vld [vmem:[#allocation11 + $0x350] sm:$0xf]  ;;  %v3545_v28 = vmul.f32 %v7281_v32, %v8418_v54 }
 0x39c   :  { %v2799_v55 = vunpack.c.l.bf16 %v2732_v0  ;;  %v2800_v31 = vunpack.c.h.bf16 %v2732_v0  ;;  %v6634_v52 = vor.u32 %v6900_v14, %v6633_v13  ;;  %v2292_v33 = vxor.u32 2147516416, %v9433_v47  ;;  %v6868_v25 = vld [vmem:[#allocation11 + $0x2e4] sm:$0xf0]  ;;  %v6882_v39 = vld [vmem:[#allocation11 + $0x354] sm:$0xf0] }
 0x39d   :  { %v2135_v36 = vpop.f32.mrf.mxu2  ;;  %5080 = vmatpush.bf16.msrb.mxu2 %v6570_v45  ;;  %v6506_v0 = vor.u32 %v6868_v25, %v6505_v41  ;;  %4982 = vmatpush.bf16.msrb.mxu0 %v6442_v22  ;;  %v6850_v1 = vld [vmem:[#allocation11 + $0x254] sm:$0xf0]  ;;  %v6562_v25 = vor.u32 %v6882_v39, %v6561_v10  ;;  %v3547_v32 = vmul.f32 %v7283_v6, %v8420_v38 }
 0x39e   :  { %v2184_v62 = vpop.f32.mrf.mxu3  ;;  %v2927_v51 = vadd.f32 1.0, %v2799_v55  ;;  %v2928_v20 = vadd.f32 1.0, %v2800_v31  ;;  %5129 = vmatpush.bf16.msrb.mxu3 %v6634_v52  ;;  %v2367_v26 = vunpack.c.l.bf16 %v2292_v33  ;;  %v2368_v5 = vunpack.c.h.bf16 %v2292_v33  ;;  %v6625_v55 = vld [vmem:[#allocation11 + $0x3d0] sm:$0xf]  ;;  %v6898_v41 = vld [vmem:[#allocation11 + $0x3d4] sm:$0xf0] }
 0x39f   :  { %v2040_v43 = vpop.f32.mrf.mxu0  ;;  %v2136_v13 = vadd.f32 %v2135_v36, %v9362_v40  ;;  %5031 = vmatpush.bf16.msrb.mxu1 %v6506_v0  ;;  %v6434_v45 = vor.u32 %v6850_v1, %v6433_v61  ;;  %4803 = vmatmul.bf16.gmra.mxu0 %v9159_v23  ;;  %v10603_v61 = vld [vmem:[#allocation53_spill] sm:$0xff]  ;;  %v6626_v39 = vor.u32 %v6898_v41, %v6625_v55 }
 0x3a0   :  { %v2089_v57 = vpop.f32.mrf.mxu1  ;;  %v2041_v14 = vadd.f32 %v2040_v43, %v9341_v9  ;;  %v3052_v31 = vpack.c.bf16 %v2928_v20, %v2927_v51  ;;  %v7285_v22 = vpop.eup %7284  ;;  %v2517_v52 = vmul.f32 1.442695, %v2367_v26  ;;  %v2519_v29 = vmul.f32 1.442695, %v2368_v5  ;;  %v10602_v51 = vld [vmem:[#allocation52_spill] sm:$0xff] }
 0x3a1   :  { %v2185_v33 = vadd.f32 %v2184_v62, %v2136_v13  ;;  %4852 = vmatmul.bf16.gmra.mxu1 %v9163_v12  ;;  %v7287_v36 = vpop.eup %7286  ;;  %v6498_v1 = vor.u32 %v6866_v8, %v6497_v4  ;;  %5081 = vmatpush.bf16.msrb.mxu2 %v6562_v25  ;;  %v9454_v62 = vpack.c.bf16 %v3545_v28, %v3547_v32  ;;  %v10606_v25 = vunpack.c.l.bf16 %v8912_v59 }
 0x3a2   :  { %v2090_v56 = vadd.f32 %v2089_v57, %v2041_v14  ;;  %v3136_v43 = vunpack.c.h.bf16 %v3052_v31  ;;  %v3137_v20 = vunpack.c.l.bf16 %v3052_v31  ;;  %4901 = vmatmul.bf16.gmra.mxu2 %v10602_v51  ;;  %4950 = vmatmul.bf16.gmra.mxu3 %v10603_v61  ;;  %v2736_v0 = vpack.c.bf16 %v7287_v36, %v7285_v22  ;;  %v6553_v36 = vld [vmem:[#allocation11 + $0x340] sm:$0xf] }
 0x3a3   :  { %7288 = vpow2.f32 %v2517_v52  ;;  %v9452_v6 = vpack.c.bf16 %v2185_v33, %v9435_v19  ;;  %4983 = vmatpush.bf16.msrb.mxu0 %v6434_v45  ;;  %v10604_v57 = vunpack.c.h.bf16 %v9404_v15  ;;  %5130 = vmatpush.bf16.msrb.mxu3 %v6626_v39  ;;  %v3813_v31 = vunpack.c.l.bf16 %v9454_v62 }
 0x3a4   :  { %7290 = vrcp.f32 %v3136_v43  ;;  %5032 = vmatpush.bf16.msrb.mxu1 %v6498_v1  ;;  %v2807_v8 = vunpack.c.l.bf16 %v2736_v0  ;;  %v2808_v4 = vunpack.c.h.bf16 %v2736_v0  ;;  %v10607_v45 = vunpack.c.l.bf16 %v9429_v27  ;;  %v6880_v43 = vld [vmem:[#allocation11 + $0x344] sm:$0xf0]  ;;  %v6425_v1 = vld [vmem:[#allocation11 + $0x240] sm:$0xf] }
 0x3a5   :  { %v9458_v10 = vadd.f32 1.0, %v10604_v57  ;;  %7292 = vrcp.f32 %v3137_v20  ;;  %v2296_v19 = vxor.u32 2147516416, %v9452_v6  ;;  %v2138_v13 = vpop.f32.mrf.mxu2  ;;  %v6554_v39 = vor.u32 %v6880_v43, %v6553_v36  ;;  %v6848_v0 = vld [vmem:[#allocation11 + $0x244] sm:$0xf0]  ;;  %v6617_v57 = vld [vmem:[#allocation11 + $0x3c0] sm:$0xf] }
 0x3a6   :  { %v2187_v14 = vpop.f32.mrf.mxu3  ;;  %7294 = vpow2.f32 %v2519_v29  ;;  %v2139_v28 = vadd.f32 %v2138_v13, %v9362_v40  ;;  %v3933_v41 = vmul.f32 %v10607_v45, %v10606_v25  ;;  %v2935_v32 = vadd.f32 1.0, %v2807_v8 }
 0x3a7   :  { %10605 = vst [vmem:[#allocation75_spill] sm:$0xff] %v9458_v10  ;;  %v2042_v15 = vpop.f32.mrf.mxu0  ;;  %v2936_v22 = vadd.f32 1.0, %v2808_v4  ;;  %v2375_v52 = vunpack.c.l.bf16 %v2296_v19  ;;  %v2376_v33 = vunpack.c.h.bf16 %v2296_v19  ;;  %v10608_v13 = vunpack.c.l.bf16 %v10596_v60  ;;  %v6896_v4 = vld [vmem:[#allocation11 + $0x3c4] sm:$0xf0]  ;;  %5082 = vmatpush.bf16.msrb.mxu2 %v6554_v39 }
 0x3a8   :  { %v2091_v55 = vpop.f32.mrf.mxu1  ;;  %v2188_v20 = vadd.f32 %v2187_v14, %v2139_v28  ;;  %v2043_v29 = vadd.f32 %v2042_v15, %v9341_v9  ;;  %v6426_v8 = vor.u32 %v6848_v0, %v6425_v1  ;;  %v6618_v14 = vor.u32 %v6896_v4, %v6617_v57 }
 0x3a9   :  { %v3941_v5 = vmul.f32 %v3813_v31, %v10608_v13  ;;  %v7289_v26 = vpop.eup %7288  ;;  %v3056_v61 = vpack.c.bf16 %v2936_v22, %v2935_v32  ;;  %v2533_v51 = vmul.f32 1.442695, %v2375_v52  ;;  %v2535_v25 = vmul.f32 1.442695, %v2376_v33  ;;  %v6489_v13 = vld [vmem:[#allocation11 + $0x2c0] sm:$0xf] }
 0x3aa   :  { %v7291_v45 = vpop.eup %7290  ;;  %v9472_v19 = vpack.c.bf16 %v2188_v20, %v2090_v56  ;;  %v2092_v12 = vadd.f32 %v2091_v55, %v2043_v29  ;;  %4984 = vmatpush.bf16.msrb.mxu0 %v6426_v8  ;;  %v3814_v31 = vunpack.c.h.bf16 %v9454_v62  ;;  %5131 = vmatpush.bf16.msrb.mxu3 %v6618_v14  ;;  %v3806_v56 = vunpack.c.h.bf16 %v9429_v27 }
 0x3ab   :  { %v9474_v28 = vpack.c.bf16 %v3941_v5, %v3933_v41  ;;  %v7293_v15 = vpop.eup %7292  ;;  %v3164_v36 = vunpack.c.h.bf16 %v3056_v61  ;;  %v3165_v43 = vunpack.c.l.bf16 %v3056_v61  ;;  %7296 = vpow2.f32 %v2533_v51  ;;  %v6609_v61 = vld [vmem:[#allocation11 + $0x3b0] sm:$0xf] }
 0x3ac   :  { %10609 = vst [vmem:[#allocation76_spill] sm:$0xff] %v9472_v19  ;;  %v7295_v32 = vpop.eup %7294  ;;  %7298 = vpow2.f32 %v2535_v25  ;;  %v2300_v52 = vxor.u32 2147516416, %v9472_v19  ;;  %v3139_v55 = vmul.f32 %v7291_v45, %v8418_v54  ;;  %v3141_v5 = vmul.f32 %v7293_v15, %v8420_v38  ;;  %v6864_v25 = vld [vmem:[#allocation11 + $0x2c4] sm:$0xf0] }
 0x3ad   :  { %10610 = vst [vmem:[#allocation77_spill] sm:$0xff] %v9474_v28  ;;  %7300 = vrcp.f32 %v3164_v36  ;;  %v2140_v51 = vpop.f32.mrf.mxu2  ;;  %v2740_v62 = vpack.c.bf16 %v7295_v32, %v7289_v26  ;;  %v10611_v1 = vunpack.c.l.bf16 %v9437_v53  ;;  %v10613_v8 = vunpack.c.h.bf16 %v10596_v60 }
 0x3ae   :  { %v2189_v41 = vpop.f32.mrf.mxu3  ;;  %7302 = vrcp.f32 %v3165_v43  ;;  %v2383_v33 = vunpack.c.l.bf16 %v2300_v52  ;;  %v2384_v20 = vunpack.c.h.bf16 %v2300_v52  ;;  %v2141_v27 = vadd.f32 %v2140_v51, %v9362_v40  ;;  %v6878_v51 = vld [vmem:[#allocation11 + $0x334] sm:$0xf0] }
 0x3af   :  { %v2045_v29 = vpop.f32.mrf.mxu0  ;;  %v9485_v0 = vadd.f32 1.0, %v10611_v1  ;;  %v3942_v4 = vmul.f32 %v3814_v31, %v10613_v8  ;;  %v10614_v45 = vunpack.c.h.bf16 %v9437_v53  ;;  %v10616_v36 = vunpack.c.h.bf16 %v8912_v59  ;;  %4808 = vmatmul.bf16.gmra.mxu0 %v9167_v35  ;;  %v6545_v31 = vld [vmem:[#allocation11 + $0x330] sm:$0xf] }
 0x3b0   :  { %v2094_v39 = vpop.f32.mrf.mxu1  ;;  %v2046_v57 = vadd.f32 %v2045_v29, %v9341_v9  ;;  %v2549_v14 = vmul.f32 1.442695, %v2383_v33  ;;  %v2551_v15 = vmul.f32 1.442695, %v2384_v20  ;;  %v9497_v52 = vpack.c.bf16 %v3139_v55, %v3141_v5  ;;  %v10617_v33 = vld [vmem:[#allocation55_spill] sm:$0xff]  ;;  %v10618_v20 = vld [vmem:[#allocation56_spill] sm:$0xff] }
 0x3b1   :  { %10612 = vst [vmem:[#allocation78_spill] sm:$0xff] %v9485_v0  ;;  %v9493_v26 = vadd.f32 1.0, %v10614_v45  ;;  %v3934_v43 = vmul.f32 %v3806_v56, %v10616_v36  ;;  %v7297_v32 = vpop.eup %7296  ;;  %v2190_v29 = vadd.f32 %v2189_v41, %v2141_v27  ;;  %4857 = vmatmul.bf16.gmra.mxu1 %v9173_v37  ;;  %v2815_v53 = vunpack.c.l.bf16 %v2740_v62  ;;  %v10619_v56 = vld [vmem:[#allocation20_spill] sm:$0xff]  ;;  %v6417_v55 = vld [vmem:[#allocation11 + $0x230] sm:$0xf] }
 0x3b2   :  { %v2095_v1 = vadd.f32 %v2094_v39, %v2046_v57  ;;  %v7299_v60 = vpop.eup %7298  ;;  %4906 = vmatmul.bf16.gmra.mxu2 %v10617_v33  ;;  %4955 = vmatmul.bf16.gmra.mxu3 %v10618_v20  ;;  %v6490_v59 = vor.u32 %v6864_v25, %v6489_v13  ;;  %v2816_v8 = vunpack.c.h.bf16 %v2740_v62  ;;  %7304 = vpow2.f32 %v2549_v14 }
 0x3b3   :  { %10615 = vst [vmem:[#allocation79_spill] sm:$0xff] %v9493_v26  ;;  %v7301_v5 = vpop.eup %7300  ;;  %v9506_v41 = vpack.c.bf16 %v2190_v29, %v2092_v12  ;;  %v9508_v39 = vpack.c.bf16 %v3942_v4, %v3934_v43  ;;  %7306 = vpow2.f32 %v2551_v15  ;;  %v9513_v45 = vpack.c.bf16 %v9277_v48, %v9248_v21  ;;  %v6892_v26 = vld [vmem:[#allocation11 + $0x3a4] sm:$0xf0] }
 0x3b4   :  { %v7303_v27 = vpop.eup %7302  ;;  %5033 = vmatpush.bf16.msrb.mxu1 %v6490_v59  ;;  %v9517_v13 = vpack.c.bf16 %v9284_v49, %v9271_v18  ;;  %v3697_v62 = vunpack.c.l.bf16 %v9497_v52  ;;  %v3059_v15 = vpack.c.bf16 %v9244_v24, %v9242_v2  ;;  %v3698_v36 = vunpack.c.h.bf16 %v9497_v52 }
 0x3b5   :  { %10620 = vst [vmem:[#allocation20_spill] sm:$0xff] %v9508_v39  ;;  %v2304_v25 = vxor.u32 2147516416, %v9506_v41  ;;  %v2143_v4 = vpop.f32.mrf.mxu2  ;;  %v3167_v21 = vmul.f32 %v7301_v5, %v8418_v54  ;;  %v3169_v48 = vmul.f32 %v7303_v27, %v8420_v38  ;;  %v9528_v29 = vadd.f32 1.0, %v2815_v53  ;;  %v6846_v27 = vld [vmem:[#allocation11 + $0x234] sm:$0xf0] }
 0x3b6   :  { %10621 = vst [vmem:[#allocation80_spill] sm:$0xff] %v9513_v45  ;;  %v2192_v14 = vpop.f32.mrf.mxu3  ;;  %v2144_v18 = vadd.f32 %v2143_v4, %v9362_v40  ;;  %v9530_v59 = vadd.f32 1.0, %v2816_v8  ;;  %v9532_v12 = vpack.c.bf16 %v7299_v60, %v7297_v32  ;;  %v6546_v5 = vor.u32 %v6878_v51, %v6545_v31  ;;  %v6894_v53 = vld [vmem:[#allocation11 + $0x3b4] sm:$0xf0] }
 0x3b7   :  { %10622 = vst [vmem:[#allocation81_spill] sm:$0xff] %v9517_v13  ;;  %v2047_v49 = vpop.f32.mrf.mxu0  ;;  %v2391_v57 = vunpack.c.l.bf16 %v2304_v25  ;;  %v2392_v2 = vunpack.c.h.bf16 %v2304_v25  ;;  %v6418_v20 = vor.u32 %v6846_v27, %v6417_v55  ;;  %v9537_v8 = vpack.c.bf16 %v9279_v58, %v9273_v3 }
 0x3b8   :  { %v2096_v43 = vpop.f32.mrf.mxu1  ;;  %v2193_v24 = vadd.f32 %v2192_v14, %v2144_v18  ;;  %v2048_v52 = vadd.f32 %v2047_v49, %v9341_v9  ;;  %v7305_v4 = vpop.eup %7304  ;;  %v3185_v32 = vunpack.c.h.bf16 %v3059_v15  ;;  %v3170_v33 = vpack.c.bf16 %v3167_v21, %v3169_v48  ;;  %5083 = vmatpush.bf16.msrb.mxu2 %v6546_v5 }
 0x3b9   :  { %v2565_v22 = vmul.f32 1.442695, %v2391_v57  ;;  %v7307_v60 = vpop.eup %7306  ;;  %v2567_v37 = vmul.f32 1.442695, %v2392_v2  ;;  %v10624_v51 = vunpack.c.l.bf16 %v9382_v16  ;;  %4985 = vmatpush.bf16.msrb.mxu0 %v6418_v20  ;;  %v6610_v55 = vor.u32 %v6894_v53, %v6609_v61  ;;  %v6481_v2 = vld [vmem:[#allocation11 + $0x2b0] sm:$0xf] }
 0x3ba   :  { %v9539_v25 = vpack.c.bf16 %v2193_v24, %v2095_v1  ;;  %v2097_v14 = vadd.f32 %v2096_v43, %v2048_v52  ;;  %v3186_v57 = vunpack.c.l.bf16 %v3059_v15  ;;  %v10625_v18 = vunpack.c.h.bf16 %v9382_v16  ;;  %v6862_v24 = vld [vmem:[#allocation11 + $0x2b4] sm:$0xf0] }
 0x3bb   :  { %v9543_v31 = vmul.f32 %v3697_v62, %v10624_v51  ;;  %7308 = vpow2.f32 %v2565_v22  ;;  %v2823_v58 = vunpack.c.l.bf16 %v9532_v12  ;;  %v2824_v21 = vunpack.c.h.bf16 %v9532_v12  ;;  %5132 = vmatpush.bf16.msrb.mxu3 %v6610_v55  ;;  %v10626_v55 = vld [vmem:[#allocation39_spill] sm:$0xff] }
 0x3bc   :  { %10623 = vst [vmem:[#allocation82_spill] sm:$0xff] %v9539_v25  ;;  %v9547_v3 = vmul.f32 %v3698_v36, %v10625_v18  ;;  %7310 = vpow2.f32 %v2567_v37  ;;  %v2308_v1 = vxor.u32 2147516416, %v9539_v25  ;;  %v2748_v48 = vpack.c.bf16 %v7307_v60, %v7305_v4  ;;  %v10627_v18 = vld [vmem:[#allocation40_spill] sm:$0xff] }
 0x3bd   :  { %v2145_v49 = vpop.f32.mrf.mxu2  ;;  %7312 = vrcp.f32 %v3185_v32  ;;  %v3213_v22 = vunpack.c.h.bf16 %v9537_v8  ;;  %v3705_v61 = vunpack.c.l.bf16 %v3170_v33  ;;  %v3706_v20 = vunpack.c.h.bf16 %v3170_v33 }
 0x3be   :  { %v2194_v43 = vpop.f32.mrf.mxu3  ;;  %v2399_v62 = vunpack.c.l.bf16 %v2308_v1  ;;  %v2400_v16 = vunpack.c.h.bf16 %v2308_v1  ;;  %v2146_v37 = vadd.f32 %v2145_v49, %v9362_v40  ;;  %v6482_v12 = vor.u32 %v6862_v24, %v6481_v2 }
 0x3bf   :  { %v2050_v15 = vpop.f32.mrf.mxu0  ;;  %7314 = vrcp.f32 %v3186_v57  ;;  %v3214_v4 = vunpack.c.l.bf16 %v9537_v8  ;;  %v2831_v32 = vunpack.c.l.bf16 %v2748_v48  ;;  %v2832_v33 = vunpack.c.h.bf16 %v2748_v48  ;;  %4813 = vmatmul.bf16.gmra.mxu0 %v10626_v55  ;;  %v10629_v8 = vld [vmem:[#allocation57_spill] sm:$0xff] }
 0x3c0   :  { %v2099_v36 = vpop.f32.mrf.mxu1  ;;  %v2051_v52 = vadd.f32 %v2050_v15, %v9341_v9  ;;  %v2581_v5 = vmul.f32 1.442695, %v2399_v62  ;;  %v2583_v27 = vmul.f32 1.442695, %v2400_v16  ;;  %7316 = vrcp.f32 %v3213_v22  ;;  %v10630_v22 = vld [vmem:[#allocation58_spill] sm:$0xff]  ;;  %5034 = vmatpush.bf16.msrb.mxu1 %v6482_v12 }
 0x3c1   :  { %v7309_v53 = vpop.eup %7308  ;;  %v2195_v60 = vadd.f32 %v2194_v43, %v2146_v37  ;;  %4862 = vmatmul.bf16.gmra.mxu1 %v10627_v18  ;;  %v10628_v49 = vunpack.c.l.bf16 %v9408_v44  ;;  %v9562_v57 = vadd.f32 1.0, %v2823_v58  ;;  %v9564_v62 = vadd.f32 1.0, %v2824_v21  ;;  %v6844_v18 = vld [vmem:[#allocation11 + $0x224] sm:$0xf0] }
 0x3c2   :  { %v2100_v51 = vadd.f32 %v2099_v36, %v2051_v52  ;;  %v7311_v1 = vpop.eup %7310  ;;  %7318 = vpow2.f32 %v2581_v5  ;;  %4911 = vmatmul.bf16.gmra.mxu2 %v10629_v8  ;;  %4960 = vmatmul.bf16.gmra.mxu3 %v10630_v22  ;;  %v10631_v43 = vunpack.c.h.bf16 %v9408_v44  ;;  %v3067_v58 = vpack.c.bf16 %v9323_v63, %v9295_v34 }
 0x3c3   :  { %v9560_v15 = vmul.f32 %v3705_v61, %v10628_v49  ;;  %v7313_v48 = vpop.eup %7312  ;;  %7320 = vpow2.f32 %v2583_v27  ;;  %v9572_v36 = vpack.c.bf16 %v2195_v60, %v2097_v14  ;;  %v9579_v37 = vadd.f32 1.0, %v2831_v32 }
 0x3c4   :  { %v9570_v16 = vmul.f32 %v3706_v20, %v10631_v43  ;;  %v3188_v2 = vmul.f32 %v7313_v48, %v8418_v54  ;;  %7322 = vrcp.f32 %v3214_v4  ;;  %v9581_v44 = vadd.f32 1.0, %v2832_v33  ;;  %v6537_v48 = vld [vmem:[#allocation11 + $0x320] sm:$0xf]  ;;  %v6876_v43 = vld [vmem:[#allocation11 + $0x324] sm:$0xf0] }
 0x3c5   :  { %10632 = vst [vmem:[#allocation83_spill] sm:$0xff] %v9572_v36  ;;  %v7315_v24 = vpop.eup %7314  ;;  %v2312_v20 = vxor.u32 2147516416, %v9572_v36  ;;  %v2148_v14 = vpop.f32.mrf.mxu2  ;;  %v9585_v34 = vpack.c.bf16 %v7311_v1, %v7309_v53  ;;  %v3241_v61 = vunpack.c.h.bf16 %v3067_v58  ;;  %v3242_v21 = vunpack.c.l.bf16 %v3067_v58  ;;  %v6409_v1 = vld [vmem:[#allocation11 + $0x220] sm:$0xf] }
 0x3c6   :  { %v2197_v52 = vpop.f32.mrf.mxu3  ;;  %v7317_v5 = vpop.eup %7316  ;;  %v2149_v63 = vadd.f32 %v2148_v14, %v9362_v40  ;;  %v3190_v4 = vmul.f32 %v7315_v24, %v8420_v38  ;;  %v6538_v53 = vor.u32 %v6876_v43, %v6537_v48  ;;  %v6601_v14 = vld [vmem:[#allocation11 + $0x3a0] sm:$0xf]  ;;  %v6410_v24 = vor.u32 %v6844_v18, %v6409_v1  ;;  %v10636_v18 = vld [vmem:[#allocation42_spill] sm:$0xff] }
 0x3c7   :  { %v2052_v27 = vpop.f32.mrf.mxu0  ;;  %v2407_v49 = vunpack.c.l.bf16 %v2312_v20  ;;  %v2408_v33 = vunpack.c.h.bf16 %v2312_v20  ;;  %v3216_v32 = vmul.f32 %v7317_v5, %v8418_v54  ;;  %v9594_v20 = vpack.c.bf16 %v9345_v7, %v9338_v42  ;;  %v6473_v43 = vld [vmem:[#allocation11 + $0x2a0] sm:$0xf] }
 0x3c8   :  { %v2101_v60 = vpop.f32.mrf.mxu1  ;;  %v7319_v22 = vpop.eup %7318  ;;  %v2198_v8 = vadd.f32 %v2197_v52, %v2149_v63  ;;  %v2053_v12 = vadd.f32 %v2052_v27, %v9341_v9  ;;  %v3191_v55 = vpack.c.bf16 %v3188_v2, %v3190_v4  ;;  %5084 = vmatpush.bf16.msrb.mxu2 %v6538_v53  ;;  %v6602_v27 = vor.u32 %v6892_v26, %v6601_v14  ;;  %v10670_v36 = vld [vmem:[#allocation23_spill] sm:$0xff] }
 0x3c9   :  { %v7321_v35 = vpop.eup %7320  ;;  %v2597_v23 = vmul.f32 1.442695, %v2407_v49  ;;  %v2599_v0 = vmul.f32 1.442695, %v2408_v33  ;;  %v2839_v48 = vunpack.c.l.bf16 %v9585_v34  ;;  %4986 = vmatpush.bf16.msrb.mxu0 %v6410_v24  ;;  %7324 = vrcp.f32 %v3241_v61 }
 0x3ca   :  { %v7323_v58 = vpop.eup %7322  ;;  %v9596_v52 = vpack.c.bf16 %v2198_v8, %v2100_v51  ;;  %v2102_v63 = vadd.f32 %v2101_v60, %v2053_v12  ;;  %v2840_v5 = vunpack.c.h.bf16 %v9585_v34  ;;  %5133 = vmatpush.bf16.msrb.mxu3 %v6602_v27  ;;  %v3711_v7 = vunpack.c.l.bf16 %v3191_v55  ;;  %v6860_v34 = vld [vmem:[#allocation11 + $0x2a4] sm:$0xf0] }
 0x3cb   :  { %v3218_v2 = vmul.f32 %v7323_v58, %v8420_v38  ;;  %7326 = vrcp.f32 %v3242_v21  ;;  %v9603_v51 = vpack.c.bf16 %v7321_v35, %v7319_v22  ;;  %v3269_v60 = vunpack.c.h.bf16 %v9594_v20 }
 0x3cc   :  { %10633 = vst [vmem:[#allocation84_spill] sm:$0xff] %v9596_v52  ;;  %v2316_v42 = vxor.u32 2147516416, %v9596_v52  ;;  %7328 = vpow2.f32 %v2597_v23  ;;  %v3712_v53 = vunpack.c.h.bf16 %v3191_v55  ;;  %v6474_v35 = vor.u32 %v6860_v34, %v6473_v43 }
 0x3cd   :  { %v2150_v8 = vpop.f32.mrf.mxu2  ;;  %v3219_v12 = vpack.c.bf16 %v3216_v32, %v3218_v2  ;;  %7330 = vpow2.f32 %v2599_v0  ;;  %v10634_v32 = vunpack.c.l.bf16 %v9017_v30  ;;  %v10637_v55 = vunpack.c.l.bf16 %v10619_v56 }
 0x3ce   :  { %v2199_v26 = vpop.f32.mrf.mxu3  ;;  %v2415_v4 = vunpack.c.l.bf16 %v2316_v42  ;;  %v2416_v61 = vunpack.c.h.bf16 %v2316_v42  ;;  %v2151_v1 = vadd.f32 %v2150_v8, %v9362_v40  ;;  %v10635_v42 = vld [vmem:[#allocation41_spill] sm:$0xff]  ;;  %5035 = vmatpush.bf16.msrb.mxu1 %v6474_v35 }
 0x3cf   :  { %v2055_v49 = vpop.f32.mrf.mxu0  ;;  %v3719_v22 = vunpack.c.l.bf16 %v3219_v12  ;;  %v3839_v24 = vmul.f32 %v3711_v7, %v10634_v32  ;;  %v3720_v58 = vunpack.c.h.bf16 %v3219_v12  ;;  %v7325_v0 = vpop.eup %7324  ;;  %4818 = vmatmul.bf16.gmra.mxu0 %v10635_v42  ;;  %v10639_v7 = vld [vmem:[#allocation37_spill] sm:$0xff] }
 0x3d0   :  { %v2104_v33 = vpop.f32.mrf.mxu1  ;;  %v2056_v21 = vadd.f32 %v2055_v49, %v9341_v9  ;;  %v2613_v23 = vmul.f32 1.442695, %v2415_v4  ;;  %v2615_v14 = vmul.f32 1.442695, %v2416_v61  ;;  %v2200_v27 = vadd.f32 %v2199_v26, %v2151_v1  ;;  %v10638_v61 = vld [vmem:[#allocation21_spill] sm:$0xff] }
 0x3d1   :  { %4867 = vmatmul.bf16.gmra.mxu1 %v10636_v18  ;;  %v3847_v8 = vmul.f32 %v3719_v22, %v10637_v55  ;;  %v3270_v49 = vunpack.c.l.bf16 %v9594_v20  ;;  %v7327_v43 = vpop.eup %7326  ;;  %v2847_v4 = vunpack.c.l.bf16 %v9603_v51  ;;  %v10640_v26 = vunpack.c.h.bf16 %v9017_v30  ;;  %v10644_v22 = vld [vmem:[#allocation38_spill] sm:$0xff]  ;;  %v6593_v32 = vld [vmem:[#allocation11 + $0x390] sm:$0xf] }
 0x3d2   :  { %v2105_v2 = vadd.f32 %v2104_v33, %v2056_v21  ;;  %7332 = vpow2.f32 %v2613_v23  ;;  %4916 = vmatmul.bf16.gmra.mxu2 %v10638_v61  ;;  %4965 = vmatmul.bf16.gmra.mxu3 %v10639_v7  ;;  %v10641_v33 = vunpack.c.h.bf16 %v10619_v56  ;;  %v7329_v1 = vpop.eup %7328  ;;  %v9622_v21 = vpack.c.bf16 %v2200_v27, %v2102_v63 }
 0x3d3   :  { %v3840_v12 = vmul.f32 %v3712_v53, %v10640_v26  ;;  %7334 = vpow2.f32 %v2615_v14  ;;  %v9624_v20 = vpack.c.bf16 %v3847_v8, %v3839_v24  ;;  %v7331_v23 = vpop.eup %7330  ;;  %v9627_v55 = vadd.f32 1.0, %v2839_v48  ;;  %v6401_v48 = vld [vmem:[#allocation11 + $0x210] sm:$0xf] }
 0x3d4   :  { %v3848_v34 = vmul.f32 %v3720_v58, %v10641_v33  ;;  %10642 = vst [vmem:[#allocation85_spill] sm:$0xff] %v9622_v21  ;;  %v9629_v61 = vadd.f32 1.0, %v2840_v5  ;;  %7336 = vrcp.f32 %v3269_v60  ;;  %v2320_v30 = vxor.u32 2147516416, %v9622_v21  ;;  %v6874_v33 = vld [vmem:[#allocation11 + $0x314] sm:$0xf0] }
 0x3d5   :  { %10643 = vst [vmem:[#allocation86_spill] sm:$0xff] %v9624_v20  ;;  %v2153_v56 = vpop.f32.mrf.mxu2  ;;  %v3244_v63 = vmul.f32 %v7325_v0, %v8418_v54  ;;  %v3246_v35 = vmul.f32 %v7327_v43, %v8420_v38  ;;  %7338 = vrcp.f32 %v3270_v49  ;;  %v2848_v14 = vunpack.c.h.bf16 %v9603_v51 }
 0x3d6   :  { %v9631_v7 = vpack.c.bf16 %v3848_v34, %v3840_v12  ;;  %v2202_v53 = vpop.f32.mrf.mxu3  ;;  %v9637_v24 = vadd.f32 1.0, %v2847_v4  ;;  %v2154_v5 = vadd.f32 %v2153_v56, %v9362_v40  ;;  %v9641_v60 = vpack.c.bf16 %v7331_v23, %v7329_v1  ;;  %v6529_v12 = vld [vmem:[#allocation11 + $0x310] sm:$0xf]  ;;  %v6842_v56 = vld [vmem:[#allocation11 + $0x214] sm:$0xf0] }
 0x3d7   :  { %v2057_v58 = vpop.f32.mrf.mxu0  ;;  %v2423_v8 = vunpack.c.l.bf16 %v2320_v30  ;;  %v2424_v26 = vunpack.c.h.bf16 %v2320_v30  ;;  %v3075_v0 = vpack.c.bf16 %v9353_v11, %v9348_v17  ;;  %v6530_v34 = vor.u32 %v6874_v33, %v6529_v12  ;;  %v6890_v30 = vld [vmem:[#allocation11 + $0x394] sm:$0xf0] }
 0x3d8   :  { %10645 = vst [vmem:[#allocation38_spill] sm:$0xff] %v9631_v7  ;;  %v2106_v27 = vpop.f32.mrf.mxu1  ;;  %v7333_v49 = vpop.eup %7332  ;;  %v2203_v43 = vadd.f32 %v2202_v53, %v2154_v5  ;;  %v2058_v4 = vadd.f32 %v2057_v58, %v9341_v9  ;;  %v6402_v42 = vor.u32 %v6842_v56, %v6401_v48  ;;  %v3247_v10 = vpack.c.bf16 %v3244_v63, %v3246_v35  ;;  %v10647_v35 = vld [vmem:[#allocation62_spill] sm:$0xff]  ;;  %v6465_v56 = vld [vmem:[#allocation11 + $0x290] sm:$0xf] }
 0x3d9   :  { %v7335_v18 = vpop.eup %7334  ;;  %v2629_v1 = vmul.f32 1.442695, %v2423_v8  ;;  %v2631_v23 = vmul.f32 1.442695, %v2424_v26  ;;  %v9647_v25 = vadd.f32 1.0, %v2848_v14  ;;  %5085 = vmatpush.bf16.msrb.mxu2 %v6530_v34  ;;  %v6594_v53 = vor.u32 %v6890_v30, %v6593_v32 }
 0x3da   :  { %v7337_v21 = vpop.eup %7336  ;;  %v9649_v11 = vpack.c.bf16 %v2203_v43, %v2105_v2  ;;  %v2107_v17 = vadd.f32 %v2106_v27, %v2058_v4  ;;  %v2855_v58 = vunpack.c.l.bf16 %v9641_v60  ;;  %v2856_v12 = vunpack.c.h.bf16 %v9641_v60  ;;  %4987 = vmatpush.bf16.msrb.mxu0 %v6402_v42 }
 0x3db   :  { %v7339_v5 = vpop.eup %7338  ;;  %v3272_v8 = vmul.f32 %v7337_v21, %v8418_v54  ;;  %v3297_v26 = vunpack.c.h.bf16 %v3075_v0  ;;  %7340 = vpow2.f32 %v2629_v1  ;;  %5134 = vmatpush.bf16.msrb.mxu3 %v6594_v53  ;;  %v3079_v2 = vpack.c.bf16 %v10647_v35, %v9356_v50  ;;  %v6858_v1 = vld [vmem:[#allocation11 + $0x294] sm:$0xf0] }
 0x3dc   :  { %10646 = vst [vmem:[#allocation87_spill] sm:$0xff] %v9649_v11  ;;  %v2324_v63 = vxor.u32 2147516416, %v9649_v11  ;;  %v3298_v14 = vunpack.c.l.bf16 %v3075_v0  ;;  %7342 = vpow2.f32 %v2631_v23  ;;  %v3274_v27 = vmul.f32 %v7339_v5, %v8420_v38 }
 0x3dd   :  { %v2155_v48 = vpop.f32.mrf.mxu2  ;;  %v3727_v33 = vunpack.c.l.bf16 %v3247_v10  ;;  %v3728_v43 = vunpack.c.h.bf16 %v3247_v10  ;;  %v9658_v60 = vpack.c.bf16 %v7335_v18, %v7333_v49  ;;  %7344 = vrcp.f32 %v3297_v26  ;;  %v10648_v49 = vld [vmem:[#allocation47_spill] sm:$0xff] }
 0x3de   :  { %v2204_v32 = vpop.f32.mrf.mxu3  ;;  %v2431_v42 = vunpack.c.l.bf16 %v2324_v63  ;;  %v2432_v21 = vunpack.c.h.bf16 %v2324_v63  ;;  %v2156_v30 = vadd.f32 %v2155_v48, %v9362_v40  ;;  %v6466_v0 = vor.u32 %v6858_v1, %v6465_v56  ;;  %v10649_v63 = vld [vmem:[#allocation45_spill] sm:$0xff] }
 0x3df   :  { %v2060_v4 = vpop.f32.mrf.mxu0  ;;  %v3275_v23 = vpack.c.bf16 %v3272_v8, %v3274_v27  ;;  %7346 = vrcp.f32 %v3298_v14  ;;  %v3325_v5 = vunpack.c.h.bf16 %v3079_v2  ;;  %4823 = vmatmul.bf16.gmra.mxu0 %v10648_v49  ;;  %v9664_v26 = vadd.f32 1.0, %v2855_v58  ;;  %v10653_v8 = vld [vmem:[#allocation35_spill] sm:$0xff]  ;;  %v6840_v49 = vld [vmem:[#allocation11 + $0x204] sm:$0xf0] }
 0x3e0   :  { %v2109_v34 = vpop.f32.mrf.mxu1  ;;  %v2061_v50 = vadd.f32 %v2060_v4, %v9341_v9  ;;  %v2645_v53 = vmul.f32 1.442695, %v2431_v42  ;;  %v2647_v35 = vmul.f32 1.442695, %v2432_v21  ;;  %v2205_v10 = vadd.f32 %v2204_v32, %v2156_v30  ;;  %v10652_v4 = vld [vmem:[#allocation34_spill] sm:$0xff]  ;;  %5036 = vmatpush.bf16.msrb.mxu1 %v6466_v0  ;;  %v10655_v42 = vld [vmem:[#allocation33_spill] sm:$0xff] }
 0x3e1   :  { %4872 = vmatmul.bf16.gmra.mxu1 %v10649_v63  ;;  %v3735_v51 = vunpack.c.l.bf16 %v3275_v23  ;;  %v3736_v52 = vunpack.c.h.bf16 %v3275_v23  ;;  %v7341_v19 = vpop.eup %7340  ;;  %10650 = vst [vmem:[#allocation62_spill] sm:$0xff] %v9664_v26  ;;  %v9666_v48 = vadd.f32 1.0, %v2856_v12  ;;  %v3326_v14 = vunpack.c.l.bf16 %v3079_v2  ;;  %v10662_v0 = vld [vmem:[#allocation63_spill] sm:$0xff] }
 0x3e2   :  { %v2110_v18 = vadd.f32 %v2109_v34, %v2061_v50  ;;  %7348 = vpow2.f32 %v2645_v53  ;;  %4921 = vmatmul.bf16.gmra.mxu2 %v10652_v4  ;;  %4970 = vmatmul.bf16.gmra.mxu3 %v10653_v8  ;;  %v7343_v27 = vpop.eup %7342  ;;  %v9670_v32 = vpack.c.bf16 %v2205_v10, %v2107_v17  ;;  %v10656_v21 = vunpack.c.l.bf16 %v10655_v42  ;;  %v10663_v8 = vld [vmem:[#allocation64_spill] sm:$0xff]  ;;  %v6393_v63 = vld [vmem:[#allocation11 + $0x200] sm:$0xf] }
 0x3e3   :  { %10651 = vst [vmem:[#allocation88_spill] sm:$0xff] %v9666_v48  ;;  %7350 = vpow2.f32 %v2647_v35  ;;  %v10657_v56 = vunpack.c.l.bf16 %v9114_v46  ;;  %v7345_v1 = vpop.eup %7344  ;;  %v2863_v12 = vunpack.c.l.bf16 %v9658_v60  ;;  %v10658_v30 = vunpack.c.h.bf16 %v10655_v42  ;;  %v10671_v48 = vld [vmem:[#allocation36_spill] sm:$0xff] }
 0x3e4   :  { %10654 = vst [vmem:[#allocation89_spill] sm:$0xff] %v9670_v32  ;;  %v3855_v34 = vmul.f32 %v3727_v33, %v10656_v21  ;;  %v10659_v23 = vunpack.c.h.bf16 %v9114_v46  ;;  %7352 = vrcp.f32 %v3325_v5  ;;  %v2864_v17 = vunpack.c.h.bf16 %v9658_v60  ;;  %v6521_v5 = vld [vmem:[#allocation11 + $0x300] sm:$0xf] }
 0x3e5   :  { %v3863_v58 = vmul.f32 %v3735_v51, %v10657_v56  ;;  %v3856_v50 = vmul.f32 %v3728_v43, %v10658_v30  ;;  %v2328_v53 = vxor.u32 2147516416, %v9670_v32  ;;  %v2158_v33 = vpop.f32.mrf.mxu2  ;;  %v7347_v51 = vpop.eup %7346  ;;  %7354 = vrcp.f32 %v3326_v14  ;;  %v6872_v30 = vld [vmem:[#allocation11 + $0x304] sm:$0xf0] }
 0x3e6   :  { %v3864_v2 = vmul.f32 %v3736_v52, %v10659_v23  ;;  %v2207_v35 = vpop.f32.mrf.mxu3  ;;  %v2159_v42 = vadd.f32 %v2158_v33, %v9362_v40  ;;  %v3300_v23 = vmul.f32 %v7345_v1, %v8418_v54  ;;  %v6522_v33 = vor.u32 %v6872_v30, %v6521_v5  ;;  %v6856_v5 = vld [vmem:[#allocation11 + $0x284] sm:$0xf0] }
 0x3e7   :  { %v9684_v10 = vpack.c.bf16 %v3863_v58, %v3855_v34  ;;  %v2062_v43 = vpop.f32.mrf.mxu0  ;;  %v2439_v52 = vunpack.c.l.bf16 %v2328_v53  ;;  %v2440_v60 = vunpack.c.h.bf16 %v2328_v53  ;;  %v9693_v34 = vpack.c.bf16 %v10663_v8, %v10662_v0 }
 0x3e8   :  { %v2111_v56 = vpop.f32.mrf.mxu1  ;;  %v9688_v46 = vpack.c.bf16 %v3864_v2, %v3856_v50  ;;  %v7349_v58 = vpop.eup %7348  ;;  %v2208_v4 = vadd.f32 %v2207_v35, %v2159_v42  ;;  %v2063_v21 = vadd.f32 %v2062_v43, %v9341_v9  ;;  %v6585_v50 = vld [vmem:[#allocation11 + $0x380] sm:$0xf]  ;;  %v3302_v14 = vmul.f32 %v7347_v51, %v8420_v38  ;;  %5086 = vmatpush.bf16.msrb.mxu2 %v6522_v33 }
 0x3e9   :  { %10660 = vst [vmem:[#allocation33_spill] sm:$0xff] %v9684_v10  ;;  %v7351_v2 = vpop.eup %7350  ;;  %v9697_v53 = vpack.c.bf16 %v7343_v27, %v7341_v19  ;;  %v2661_v11 = vmul.f32 1.442695, %v2439_v52  ;;  %v2663_v32 = vmul.f32 1.442695, %v2440_v60  ;;  %v6394_v1 = vor.u32 %v6840_v49, %v6393_v63 }
 0x3ea   :  { %10661 = vst [vmem:[#allocation90_spill] sm:$0xff] %v9688_v46  ;;  %v6888_v46 = vld [vmem:[#allocation11 + $0x384] sm:$0xf0]  ;;  %v7353_v10 = vpop.eup %7352  ;;  %v9699_v8 = vadd.f32 1.0, %v2863_v12  ;;  %v9701_v0 = vpack.c.bf16 %v2208_v4, %v2110_v18  ;;  %v2112_v35 = vadd.f32 %v2111_v56, %v2063_v21  ;;  %v9703_v43 = vadd.f32 1.0, %v2864_v17 }
 0x3eb   :  { %v6586_v42 = vor.u32 %v6888_v46, %v6585_v50  ;;  %7356 = vpow2.f32 %v2661_v11  ;;  %4988 = vmatpush.bf16.msrb.mxu0 %v6394_v1  ;;  %v3303_v51 = vpack.c.bf16 %v3300_v23, %v3302_v14  ;;  %v3328_v19 = vmul.f32 %v7353_v10, %v8418_v54  ;;  %v7355_v27 = vpop.eup %7354  ;;  %v10667_v23 = vld [vmem:[#allocation65_spill] sm:$0xff] }
 0x3ec   :  { %10664 = vst [vmem:[#allocation63_spill] sm:$0xff] %v9699_v8  ;;  %v2772_v52 = vpack.c.bf16 %v7351_v2, %v7349_v58  ;;  %7358 = vpow2.f32 %v2663_v32  ;;  %v2332_v49 = vxor.u32 2147516416, %v9701_v0  ;;  %v3624_v63 = vunpack.c.h.bf16 %v10644_v22  ;;  %v6457_v32 = vld [vmem:[#allocation11 + $0x280] sm:$0xf]  ;;  %v10668_v58 = vld [vmem:[#allocation66_spill] sm:$0xff] }
 0x3ed   :  { %10665 = vst [vmem:[#allocation64_spill] sm:$0xff] %v9701_v0  ;;  %5135 = vmatpush.bf16.msrb.mxu3 %v6586_v42  ;;  %v2871_v18 = vunpack.c.l.bf16 %v9697_v53  ;;  %v2872_v4 = vunpack.c.h.bf16 %v9697_v53  ;;  %v2160_v12 = vpop.f32.mrf.mxu2  ;;  %v3330_v11 = vmul.f32 %v7355_v27, %v8420_v38  ;;  %v3353_v21 = vunpack.c.h.bf16 %v9693_v34 }
 0x3ee   :  { %10666 = vst [vmem:[#allocation91_spill] sm:$0xff] %v9703_v43  ;;  %v2209_v17 = vpop.f32.mrf.mxu3  ;;  %v2447_v56 = vunpack.c.l.bf16 %v2332_v49  ;;  %v2448_v10 = vunpack.c.h.bf16 %v2332_v49  ;;  %v3743_v30 = vunpack.c.l.bf16 %v3303_v51  ;;  %v9714_v33 = vpack.c.bf16 %v10668_v58, %v10667_v23 }
 0x3ef   :  { %v2065_v46 = vpop.f32.mrf.mxu0  ;;  %v2161_v50 = vadd.f32 %v2160_v12, %v9362_v40  ;;  %v6458_v2 = vor.u32 %v6856_v5, %v6457_v32  ;;  %v3331_v53 = vpack.c.bf16 %v3328_v19, %v3330_v11  ;;  %v2879_v1 = vunpack.c.l.bf16 %v2772_v52  ;;  %4828 = vmatmul.bf16.gmra.mxu0 %v10670_v36  ;;  %v10672_v19 = vld [vmem:[#allocation22_spill] sm:$0xff] }
 0x3f0   :  { %v2114_v60 = vpop.f32.mrf.mxu1  ;;  %10669 = vst [vmem:[#allocation65_spill] sm:$0xff] %v9714_v33  ;;  %v2066_v14 = vadd.f32 %v2065_v46, %v9341_v9  ;;  %v2677_v42 = vmul.f32 1.442695, %v2447_v56  ;;  %v2679_v27 = vmul.f32 1.442695, %v2448_v10  ;;  %v3744_v0 = vunpack.c.h.bf16 %v3303_v51 }
 0x3f1   :  { %v7357_v49 = vpop.eup %7356  ;;  %v2210_v43 = vadd.f32 %v2209_v17, %v2161_v50  ;;  %4877 = vmatmul.bf16.gmra.mxu1 %v10671_v48  ;;  %v3751_v26 = vunpack.c.l.bf16 %v3331_v53  ;;  %v3752_v23 = vunpack.c.h.bf16 %v3331_v53  ;;  %v9720_v33 = vadd.f32 1.0, %v2871_v18 }
 0x3f2   :  { %v2115_v8 = vadd.f32 %v2114_v60, %v2066_v14  ;;  %v7359_v58 = vpop.eup %7358  ;;  %v2880_v12 = vunpack.c.h.bf16 %v2772_v52  ;;  %7360 = vpow2.f32 %v2677_v42  ;;  %4926 = vmatmul.bf16.gmra.mxu2 %v9474_v28  ;;  %4975 = vmatmul.bf16.gmra.mxu3 %v9508_v39  ;;  %v10673_v51 = vunpack.c.l.bf16 %v10672_v19 }
 0x3f3   :  { %v2776_v17 = vpack.c.bf16 %v7359_v58, %v7357_v49  ;;  %7362 = vpow2.f32 %v2679_v27  ;;  %v9726_v56 = vpack.c.bf16 %v2210_v43, %v2112_v35  ;;  %5037 = vmatpush.bf16.msrb.mxu1 %v6458_v2  ;;  %v10674_v10 = vunpack.c.l.bf16 %v10644_v22  ;;  %v10676_v43 = vld [vmem:[#allocation28_spill] sm:$0xff] }
 0x3f4   :  { %v3871_v11 = vmul.f32 %v3743_v30, %v10673_v51  ;;  %v9730_v60 = vadd.f32 1.0, %v2872_v4  ;;  %v10675_v52 = vunpack.c.h.bf16 %v10672_v19  ;;  %v3880_v32 = vmul.f32 %v3752_v23, %v3624_v63  ;;  %v6821_v23 = vld [vmem:[#allocation11 + $0x174] sm:$0xf] }
 0x3f5   :  { %v3879_v46 = vmul.f32 %v3751_v26, %v10674_v10  ;;  %v3354_v5 = vunpack.c.l.bf16 %v9693_v34  ;;  %v9735_v50 = vadd.f32 1.0, %v2879_v1  ;;  %v2336_v30 = vxor.u32 2147516416, %v9726_v56  ;;  %v2163_v14 = vpop.f32.mrf.mxu2  ;;  %v6837_v63 = vld [vmem:[#allocation11 + $0x1f4] sm:$0xf]  ;;  %v6803_v34 = vld [vmem:[#allocation11 + $0xe4] sm:$0xf] }
 0x3f6   :  { %v3872_v18 = vmul.f32 %v3744_v0, %v10675_v52  ;;  %v2212_v53 = vpop.f32.mrf.mxu3  ;;  %v9741_v22 = vadd.f32 1.0, %v2880_v12  ;;  %v2164_v26 = vadd.f32 %v2163_v14, %v9362_v40  ;;  %v2887_v1 = vunpack.c.l.bf16 %v2776_v17  ;;  %v4139_v12 = vld [vmem:[%s10292_s6] sm:$0x3]  ;;  %v6195_v14 = vld [vmem:[#allocation11 + $0x78] sm:$0xf0] }
 0x3f7   :  { %v9738_v35 = vpack.c.bf16 %v3879_v46, %v3871_v11  ;;  %v2067_v4 = vpop.f32.mrf.mxu0  ;;  %v2455_v27 = vunpack.c.l.bf16 %v2336_v30  ;;  %v2456_v49 = vunpack.c.h.bf16 %v2336_v30  ;;  %7364 = vrcp.f32 %v3353_v21  ;;  %v6323_v46 = vld [vmem:[#allocation11 + $0x178] sm:$0xf0]  ;;  %v6789_v52 = vld [vmem:[#allocation11 + $0x74] sm:$0xf] }
 0x3f8   :  { %v2116_v42 = vpop.f32.mrf.mxu1  ;;  %v9744_v0 = vpack.c.bf16 %v3880_v32, %v3872_v18  ;;  %v7361_v58 = vpop.eup %7360  ;;  %v2888_v19 = vunpack.c.h.bf16 %v2776_v17  ;;  %v2213_v51 = vadd.f32 %v2212_v53, %v2164_v26  ;;  %v2068_v11 = vadd.f32 %v2067_v4, %v9341_v9 }
 0x3f9   :  { %v9753_v10 = vpack.c.bf16 %v9560_v15, %v9543_v31  ;;  %v7363_v18 = vpop.eup %7362  ;;  %v2693_v32 = vmul.f32 1.442695, %v2455_v27  ;;  %v2695_v30 = vmul.f32 1.442695, %v2456_v49  ;;  %v9757_v21 = vpack.c.bf16 %v9570_v16, %v9547_v3  ;;  %v6387_v31 = vld [vmem:[#allocation11 + $0x1f8] sm:$0xf0] }
 0x3fa   :  { %v6326_v17 = vor.u32 %v6821_v23, %v6323_v46  ;;  %v2780_v9 = vpack.c.bf16 %v7363_v18, %v7361_v58  ;;  %v9759_v53 = vpack.c.bf16 %v2213_v51, %v2115_v8  ;;  %v9761_v26 = vadd.f32 %v2116_v42, %v2068_v11  ;;  %v6805_v15 = vld [vmem:[#allocation11 + $0xf4] sm:$0xf]  ;;  %v6259_v49 = vld [vmem:[#allocation11 + $0xf8] sm:$0xf0] }
 0x3fb   :  { %10677 = vst [vmem:[#allocation66_spill] sm:$0xff] %v9753_v10  ;;  %v6198_v4 = vor.u32 %v6789_v52, %v6195_v14  ;;  %7366 = vpow2.f32 %v2693_v32  ;;  %v9763_v2 = vperm.slane %v4139_v12, 0  ;;  %v6390_v27 = vor.u32 %v6837_v63, %v6387_v31  ;;  %v6787_v14 = vld [vmem:[#allocation11 + $0x64] sm:$0xf] }
 0x3fc   :  { %10678 = vst [vmem:[#allocation23_spill] sm:$0xff] %v9757_v21  ;;  %5275 = vmatpush.bf16.msra.mxu2 %v6326_v17  ;;  %v3060_v3 = vpack.c.bf16 %v9530_v59, %v9528_v29  ;;  %v2895_v16 = vunpack.c.l.bf16 %v2780_v9  ;;  %7368 = vpow2.f32 %v2695_v30  ;;  %v2340_v8 = vxor.u32 2147516416, %v9759_v53  ;;  %v6819_v30 = vld [vmem:[#allocation11 + $0x164] sm:$0xf]  ;;  %v6315_v17 = vld [vmem:[#allocation11 + $0x168] sm:$0xf0] }
 0x3fd   :  { %5177 = vmatpush.bf16.msra.mxu0 %v6198_v4  ;;  %v3064_v42 = vpack.c.bf16 %v9564_v62, %v9562_v57  ;;  %v9770_v23 = vpop.eup %7364  ;;  %v9772_v58 = vadd.f32 1.0, %v2887_v1  ;;  %v9774_v51 = vadd.f32 1.0, %v2888_v19  ;;  %v2165_v11 = vpop.f32.mrf.mxu2  ;;  %5324 = vmatpush.bf16.msra.mxu3 %v6390_v27  ;;  %v6262_v12 = vor.u32 %v6805_v15, %v6259_v49  ;;  %v6187_v19 = vld [vmem:[#allocation11 + $0x68] sm:$0xf0]  ;;  %v6835_v4 = vld [vmem:[#allocation11 + $0x1e4] sm:$0xf] }
 0x3fe   :  { %v2214_v63 = vpop.f32.mrf.mxu3  ;;  %v3192_v46 = vunpack.c.h.bf16 %v3060_v3  ;;  %v2896_v29 = vunpack.c.h.bf16 %v2780_v9  ;;  %v2463_v59 = vunpack.c.l.bf16 %v2340_v8  ;;  %v2464_v52 = vunpack.c.h.bf16 %v2340_v8  ;;  %v6379_v9 = vld [vmem:[#allocation11 + $0x1e8] sm:$0xf0] }
 0x3ff   :  { %v4794_v18 = vpop.f32.mrf.mxu0  ;;  %7370 = vrcp.f32 %v3354_v5  ;;  %v2166_v57 = vadd.f32 %v2165_v11, %v9362_v40  ;;  %5226 = vmatpush.bf16.msra.mxu1 %v6262_v12  ;;  %v3193_v1 = vunpack.c.l.bf16 %v3060_v3  ;;  %v9780_v31 = vadd.f32 1.0, %v2895_v16  ;;  %4989 = vmatmul.bf16.vlgmr.msrb.gmra.mxu0 %v9513_v45  ;;  %v6251_v5 = vld [vmem:[#allocation11 + $0xe8] sm:$0xf0] }
 0x400   :  { %v4843_v32 = vpop.f32.mrf.mxu1  ;;  %v4795_v62 = vadd.f32 %v4794_v18, %v9763_v2  ;;  %7372 = vrcp.f32 %v3192_v46  ;;  %v2709_v15 = vmul.f32 1.442695, %v2463_v59  ;;  %v2711_v27 = vmul.f32 1.442695, %v2464_v52 }
 0x401   :  { %v3220_v49 = vunpack.c.h.bf16 %v3064_v42  ;;  %v7367_v8 = vpop.eup %7366  ;;  %v2215_v39 = vadd.f32 %v2214_v63, %v2166_v57  ;;  %5038 = vmatmul.bf16.vlgmr.msrb.gmra.mxu1 %v9517_v13  ;;  %7374 = vrcp.f32 %v3193_v1  ;;  %v3221_v40 = vunpack.c.l.bf16 %v3064_v42 }
 0x402   :  { %v4844_v28 = vadd.f32 %v4843_v32, %v4795_v62  ;;  %v7369_v3 = vpop.eup %7368  ;;  %v9784_v11 = vadd.f32 1.0, %v2896_v29  ;;  %7376 = vpow2.f32 %v2709_v15  ;;  %5087 = vmatmul.bf16.vlgmr.msrb.gmra.mxu2 %v9753_v10  ;;  %5136 = vmatmul.bf16.vlgmr.msrb.gmra.mxu3 %v9757_v21  ;;  %v6318_v16 = vor.u32 %v6819_v30, %v6315_v17 }
 0x403   :  { %v6190_v12 = vor.u32 %v6787_v14, %v6187_v19  ;;  %v2784_v63 = vpack.c.bf16 %v7369_v3, %v7367_v8  ;;  %7378 = vpow2.f32 %v2711_v27  ;;  %v9789_v46 = vpack.c.bf16 %v2215_v39, %v9761_v26 }
 0x404   :  { %v6382_v59 = vor.u32 %v6835_v4, %v6379_v9  ;;  %7380 = vrcp.f32 %v3220_v49  ;;  %5276 = vmatpush.bf16.msra.mxu2 %v6318_v16  ;;  %v6254_v29 = vor.u32 %v6803_v34, %v6251_v5  ;;  %v3068_v18 = vpack.c.bf16 %v9581_v44, %v9579_v37 }
 0x405   :  { %v9791_v52 = vpop.eup %7370  ;;  %5178 = vmatpush.bf16.msra.mxu0 %v6190_v12  ;;  %v2903_v30 = vunpack.c.l.bf16 %v2784_v63  ;;  %v2344_v17 = vxor.u32 2147516416, %v9789_v46  ;;  %v4892_v14 = vpop.f32.mrf.mxu2  ;;  %7382 = vrcp.f32 %v3221_v40  ;;  %v9799_v39 = vpack.c.bf16 %v9629_v61, %v9627_v55 }
 0x406   :  { %v7373_v32 = vpop.eup %7372  ;;  %v4941_v57 = vpop.f32.mrf.mxu3  ;;  %5325 = vmatpush.bf16.msra.mxu3 %v6382_v59  ;;  %v4893_v26 = vadd.f32 %v4892_v14, %v4844_v28  ;;  %5227 = vmatpush.bf16.msra.mxu1 %v6254_v29  ;;  %v3248_v4 = vunpack.c.h.bf16 %v3068_v18  ;;  %v3249_v37 = vunpack.c.l.bf16 %v3068_v18  ;;  %v2904_v9 = vunpack.c.h.bf16 %v2784_v63  ;;  %v6817_v18 = vld [vmem:[#allocation11 + $0x154] sm:$0xf] }
 0x407   :  { %v4796_v62 = vpop.f32.mrf.mxu0  ;;  %v3195_v19 = vmul.f32 %v7373_v32, %v8418_v54  ;;  %v7375_v44 = vpop.eup %7374  ;;  %v2471_v15 = vunpack.c.l.bf16 %v2344_v17  ;;  %v2472_v27 = vunpack.c.h.bf16 %v2344_v17  ;;  %v3276_v3 = vunpack.c.h.bf16 %v9799_v39  ;;  %v6307_v32 = vld [vmem:[#allocation11 + $0x158] sm:$0xf0] }
 0x408   :  { %v4845_v1 = vpop.f32.mrf.mxu1  ;;  %v7377_v8 = vpop.eup %7376  ;;  %v9803_v40 = vadd.f32 %v4941_v57, %v4893_v26  ;;  %v4797_v61 = vadd.f32 %v4796_v62, %v9763_v2  ;;  %v3197_v28 = vmul.f32 %v7375_v44, %v8420_v38  ;;  %7384 = vrcp.f32 %v3248_v4 }
 0x409   :  { %v7379_v55 = vpop.eup %7378  ;;  %v2725_v34 = vmul.f32 1.442695, %v2471_v15  ;;  %v2727_v5 = vmul.f32 1.442695, %v2472_v27  ;;  %7386 = vrcp.f32 %v3249_v37  ;;  %v9808_v12 = vadd.f32 1.0, %v2903_v30 }
 0x40a   :  { %v7381_v16 = vpop.eup %7380  ;;  %v2788_v63 = vpack.c.bf16 %v7379_v55, %v7377_v8  ;;  %v4846_v59 = vadd.f32 %v4845_v1, %v4797_v61  ;;  %v3198_v29 = vpack.c.bf16 %v3195_v19, %v3197_v28  ;;  %v9810_v14 = vadd.f32 1.0, %v2904_v9  ;;  %v6785_v9 = vld [vmem:[#allocation11 + $0x54] sm:$0xf] }
 0x40b   :  { %v7383_v17 = vpop.eup %7382  ;;  %7388 = vpow2.f32 %v2725_v34  ;;  %v3223_v57 = vmul.f32 %v7381_v16, %v8418_v54  ;;  %v3277_v26 = vunpack.c.l.bf16 %v9799_v39  ;;  %v6310_v15 = vor.u32 %v6817_v18, %v6307_v32  ;;  %v6833_v16 = vld [vmem:[#allocation11 + $0x1d4] sm:$0xf] }
 0x40c   :  { %7390 = vpow2.f32 %v2727_v5  ;;  %v3225_v62 = vmul.f32 %v7383_v17, %v8420_v38  ;;  %v3713_v19 = vunpack.c.l.bf16 %v3198_v29  ;;  %v3714_v44 = vunpack.c.h.bf16 %v3198_v29  ;;  %v6179_v5 = vld [vmem:[#allocation11 + $0x58] sm:$0xf0] }
 0x40d   :  { %v4894_v37 = vpop.f32.mrf.mxu2  ;;  %7392 = vrcp.f32 %v3276_v3  ;;  %v2911_v8 = vunpack.c.l.bf16 %v2788_v63  ;;  %v2912_v61 = vunpack.c.h.bf16 %v2788_v63  ;;  %v6371_v17 = vld [vmem:[#allocation11 + $0x1d8] sm:$0xf0]  ;;  %v10679_v49 = vunpack.c.l.bf16 %v9433_v47  ;;  %5277 = vmatpush.bf16.msra.mxu2 %v6310_v15  ;;  %v6801_v63 = vld [vmem:[#allocation11 + $0xd4] sm:$0xf] }
 0x40e   :  { %v4943_v1 = vpop.f32.mrf.mxu3  ;;  %v7385_v27 = vpop.eup %7384  ;;  %v4895_v28 = vadd.f32 %v4894_v37, %v4846_v59  ;;  %v3226_v34 = vpack.c.bf16 %v3223_v57, %v3225_v62  ;;  %v10680_v3 = vunpack.c.h.bf16 %v9433_v47  ;;  %v6243_v59 = vld [vmem:[#allocation11 + $0xd8] sm:$0xf0]  ;;  %7394 = vrcp.f32 %v3277_v26 }
 0x40f   :  { %v4799_v55 = vpop.f32.mrf.mxu0  ;;  %v7387_v4 = vpop.eup %7386  ;;  %v3841_v42 = vmul.f32 %v3713_v19, %v10679_v49  ;;  %v3251_v18 = vmul.f32 %v7385_v27, %v8418_v54  ;;  %4994 = vmatmul.bf16.gmra.mxu0 %v9624_v20  ;;  %v6182_v47 = vor.u32 %v6785_v9, %v6179_v5  ;;  %v6374_v49 = vor.u32 %v6833_v16, %v6371_v17  ;;  %v10683_v9 = vld [vmem:[#allocation62_spill] sm:$0xff] }
 0x410   :  { %v4848_v39 = vpop.f32.mrf.mxu1  ;;  %v4800_v30 = vadd.f32 %v4799_v55, %v9763_v2  ;;  %v3842_v29 = vmul.f32 %v3714_v44, %v10680_v3  ;;  %v9823_v32 = vadd.f32 %v4943_v1, %v4895_v28  ;;  %v3721_v57 = vunpack.c.l.bf16 %v3226_v34 }
 0x411   :  { %v3722_v62 = vunpack.c.h.bf16 %v3226_v34  ;;  %v3253_v37 = vmul.f32 %v7387_v4, %v8420_v38  ;;  %v7389_v21 = vpop.eup %7388  ;;  %5043 = vmatmul.bf16.gmra.mxu1 %v9631_v7  ;;  %v10681_v44 = vunpack.c.l.bf16 %v9452_v6  ;;  %v10682_v1 = vunpack.c.h.bf16 %v9452_v6  ;;  %5179 = vmatpush.bf16.msra.mxu0 %v6182_v47  ;;  %v6815_v47 = vld [vmem:[#allocation11 + $0x144] sm:$0xf] }
 0x412   :  { %v4849_v10 = vadd.f32 %v4848_v39, %v4800_v30  ;;  %v7391_v19 = vpop.eup %7390  ;;  %v6246_v55 = vor.u32 %v6801_v63, %v6243_v59  ;;  %v9834_v34 = vadd.f32 1.0, %v2911_v8  ;;  %5326 = vmatpush.bf16.msra.mxu3 %v6374_v49  ;;  %v3076_v26 = vpack.c.bf16 %v9647_v25, %v9637_v24  ;;  %v10684_v39 = vld [vmem:[#allocation88_spill] sm:$0xff] }
 0x413   :  { %v3849_v15 = vmul.f32 %v3721_v57, %v10681_v44  ;;  %v3850_v27 = vmul.f32 %v3722_v62, %v10682_v1  ;;  %v9832_v28 = vpack.c.bf16 %v3251_v18, %v3253_v37  ;;  %v7393_v4 = vpop.eup %7392  ;;  %v2792_v30 = vpack.c.bf16 %v7391_v19, %v7389_v21  ;;  %v10687_v57 = vld [vmem:[#allocation83_spill] sm:$0xff]  ;;  %v6299_v49 = vld [vmem:[#allocation11 + $0x148] sm:$0xf0] }
 0x414   :  { %v3080_v5 = vpack.c.bf16 %v10684_v39, %v10683_v9  ;;  %v9840_v16 = vadd.f32 1.0, %v2912_v61  ;;  %5228 = vmatpush.bf16.msra.mxu1 %v6246_v55  ;;  %v3304_v59 = vunpack.c.h.bf16 %v3076_v26  ;;  %v3279_v61 = vmul.f32 %v7393_v4, %v8418_v54  ;;  %v6783_v19 = vld [vmem:[#allocation11 + $0x44] sm:$0xf]  ;;  %v7395_v44 = vpop.eup %7394  ;;  %v6363_v62 = vld [vmem:[#allocation11 + $0x1c8] sm:$0xf0] }
 0x415   :  { %v9842_v17 = vpack.c.bf16 %v3849_v15, %v3841_v42  ;;  %v9844_v6 = vpack.c.bf16 %v3850_v27, %v3842_v29  ;;  %v3729_v3 = vunpack.c.l.bf16 %v9832_v28  ;;  %v2919_v8 = vunpack.c.l.bf16 %v2792_v30  ;;  %v4897_v21 = vpop.f32.mrf.mxu2  ;;  %v10688_v27 = vld [vmem:[#allocation76_spill] sm:$0xff]  ;;  %v6831_v39 = vld [vmem:[#allocation11 + $0x1c4] sm:$0xf] }
 0x416   :  { %v2920_v18 = vunpack.c.h.bf16 %v2792_v30  ;;  %v4946_v63 = vpop.f32.mrf.mxu3  ;;  %v4898_v25 = vadd.f32 %v4897_v21, %v4849_v10  ;;  %v3305_v29 = vunpack.c.l.bf16 %v3076_v26  ;;  %v3332_v37 = vunpack.c.h.bf16 %v3080_v5  ;;  %v6171_v10 = vld [vmem:[#allocation11 + $0x48] sm:$0xf0] }
 0x417   :  { %10685 = vst [vmem:[#allocation36_spill] sm:$0xff] %v9842_v17  ;;  %5092 = vmatmul.bf16.gmra.mxu2 %v9842_v17  ;;  %5141 = vmatmul.bf16.gmra.mxu3 %v9844_v6  ;;  %v4801_v24 = vpop.f32.mrf.mxu0  ;;  %v9851_v15 = vadd.f32 1.0, %v2919_v8  ;;  %v10689_v55 = vunpack.c.l.bf16 %v10688_v27  ;;  %v3730_v9 = vunpack.c.h.bf16 %v9832_v28  ;;  %v3281_v4 = vmul.f32 %v7395_v44, %v8420_v38  ;;  %v6235_v17 = vld [vmem:[#allocation11 + $0xc8] sm:$0xf0] }
 0x418   :  { %10686 = vst [vmem:[#allocation22_spill] sm:$0xff] %v9844_v6  ;;  %v4850_v42 = vpop.f32.mrf.mxu1  ;;  %v4802_v1 = vadd.f32 %v4801_v24, %v9763_v2  ;;  %v9857_v21 = vadd.f32 %v4946_v63, %v4898_v25  ;;  %7396 = vrcp.f32 %v3304_v59  ;;  %v3333_v26 = vunpack.c.l.bf16 %v3080_v5  ;;  %v6799_v6 = vld [vmem:[#allocation11 + $0xc4] sm:$0xf] }
 0x419   :  { %v3857_v30 = vmul.f32 %v3729_v3, %v10689_v55  ;;  %v9860_v8 = vadd.f32 1.0, %v2920_v18  ;;  %7398 = vrcp.f32 %v3305_v29  ;;  %v6302_v24 = vor.u32 %v6815_v47, %v6299_v49  ;;  %v10690_v18 = vld [vmem:[#allocation65_spill] sm:$0xff]  ;;  %v10693_v49 = vld [vmem:[#allocation68_spill] sm:$0xff] }
 0x41a   :  { %v4851_v7 = vadd.f32 %v4850_v42, %v4802_v1  ;;  %v3282_v20 = vpack.c.bf16 %v3279_v61, %v3281_v4  ;;  %7400 = vrcp.f32 %v3332_v37  ;;  %v6174_v3 = vor.u32 %v6783_v19, %v6171_v10 }
 0x41b   :  { %v6366_v28 = vor.u32 %v6831_v39, %v6363_v62  ;;  %7402 = vrcp.f32 %v3333_v26  ;;  %5278 = vmatpush.bf16.msra.mxu2 %v6302_v24  ;;  %v6238_v63 = vor.u32 %v6799_v6, %v6235_v17  ;;  %v3356_v25 = vmul.f32 %v9770_v23, %v8418_v54  ;;  %v10692_v6 = vld [vmem:[#allocation67_spill] sm:$0xff] }
 0x41c   :  { %v3358_v5 = vmul.f32 %v9791_v52, %v8420_v38  ;;  %v3737_v59 = vunpack.c.l.bf16 %v3282_v20  ;;  %v3738_v44 = vunpack.c.h.bf16 %v3282_v20  ;;  %5180 = vmatpush.bf16.msra.mxu0 %v6174_v3  ;;  %v3381_v42 = vunpack.c.h.bf16 %v10690_v18 }
 0x41d   :  { %5327 = vmatpush.bf16.msra.mxu3 %v6366_v28  ;;  %v3382_v61 = vunpack.c.l.bf16 %v10690_v18  ;;  %v4899_v29 = vpop.f32.mrf.mxu2  ;;  %v10691_v62 = vunpack.c.h.bf16 %v10688_v27  ;;  %5229 = vmatpush.bf16.msra.mxu1 %v6238_v63  ;;  %v9873_v52 = vpack.c.bf16 %v10693_v49, %v10692_v6  ;;  %v10694_v10 = vunpack.c.l.bf16 %v9506_v41  ;;  %v10699_v18 = vld [vmem:[#allocation90_spill] sm:$0xff]  ;;  %v10703_v49 = vld [vmem:[#allocation91_spill] sm:$0xff] }
 0x41e   :  { %v4948_v37 = vpop.f32.mrf.mxu3  ;;  %v3359_v23 = vpack.c.bf16 %v3356_v25, %v3358_v5  ;;  %v7397_v20 = vpop.eup %7396  ;;  %v4900_v19 = vadd.f32 %v4899_v29, %v4851_v7  ;;  %v10695_v4 = vunpack.c.h.bf16 %v9506_v41  ;;  %7404 = vrcp.f32 %v3381_v42 }
 0x41f   :  { %v3858_v47 = vmul.f32 %v3730_v9, %v10691_v62  ;;  %v4804_v1 = vpop.f32.mrf.mxu0  ;;  %v3865_v39 = vmul.f32 %v3737_v59, %v10694_v10  ;;  %v7399_v27 = vpop.eup %7398  ;;  %v3307_v24 = vmul.f32 %v7397_v20, %v8418_v54  ;;  %7406 = vrcp.f32 %v3382_v61  ;;  %v10700_v61 = vld [vmem:[#allocation69_spill] sm:$0xff]  ;;  %v10701_v62 = vld [vmem:[#allocation70_spill] sm:$0xff] }
 0x420   :  { %v4853_v55 = vpop.f32.mrf.mxu1  ;;  %v3866_v26 = vmul.f32 %v3738_v44, %v10695_v4  ;;  %v4805_v9 = vadd.f32 %v4804_v1, %v9763_v2  ;;  %v3759_v3 = vunpack.c.l.bf16 %v3359_v23  ;;  %v7401_v28 = vpop.eup %7400  ;;  %v9881_v63 = vadd.f32 %v4948_v37, %v4900_v19  ;;  %v10698_v44 = vld [vmem:[#allocation33_spill] sm:$0xff]  ;;  %v10704_v1 = vld [vmem:[#allocation59_spill] sm:$0xff] }
 0x421   :  { %v9883_v7 = vpack.c.bf16 %v3865_v39, %v3857_v30  ;;  %v3309_v5 = vmul.f32 %v7399_v27, %v8420_v38  ;;  %v7403_v59 = vpop.eup %7402  ;;  %4999 = vmatmul.bf16.gmra.mxu0 %v10698_v44  ;;  %5048 = vmatmul.bf16.gmra.mxu1 %v10699_v18  ;;  %v3335_v42 = vmul.f32 %v7401_v28, %v8418_v54  ;;  %v3760_v29 = vunpack.c.h.bf16 %v3359_v23  ;;  %v6781_v44 = vld [vmem:[#allocation11 + $0x34] sm:$0xf] }
 0x422   :  { %v9885_v25 = vpack.c.bf16 %v3866_v26, %v3858_v47  ;;  %v4854_v41 = vadd.f32 %v4853_v55, %v4805_v9  ;;  %v9893_v6 = vpack.c.bf16 %v10701_v62, %v10700_v61  ;;  %v3337_v30 = vmul.f32 %v7403_v59, %v8420_v38  ;;  %v10702_v47 = vld [vmem:[#allocation63_spill] sm:$0xff] }
 0x423   :  { %10696 = vst [vmem:[#allocation28_spill] sm:$0xff] %v9883_v7  ;;  %v3310_v37 = vpack.c.bf16 %v3307_v24, %v3309_v5  ;;  %v3084_v20 = vpack.c.bf16 %v10703_v49, %v10702_v47  ;;  %v3088_v19 = vpack.c.bf16 %v9730_v60, %v9720_v33  ;;  %v10705_v55 = vunpack.c.l.bf16 %v10704_v1  ;;  %v10707_v26 = vld [vmem:[#allocation31_spill] sm:$0xff] }
 0x424   :  { %10697 = vst [vmem:[#allocation62_spill] sm:$0xff] %v9885_v25  ;;  %v10706_v39 = vunpack.c.h.bf16 %v10704_v1  ;;  %v3409_v4 = vunpack.c.h.bf16 %v9873_v52  ;;  %v7405_v9 = vpop.eup %7404  ;;  %v3338_v24 = vpack.c.bf16 %v3335_v42, %v3337_v30  ;;  %v10708_v42 = vld [vmem:[#allocation82_spill] sm:$0xff]  ;;  %v10712_v13 = vunpack.c.h.bf16 %v10687_v57 }
 0x425   :  { %v9902_v10 = vmul.f32 %v3759_v3, %v10705_v55  ;;  %v3745_v28 = vunpack.c.l.bf16 %v3310_v37  ;;  %v3746_v5 = vunpack.c.h.bf16 %v3310_v37  ;;  %v3360_v59 = vunpack.c.h.bf16 %v3084_v20  ;;  %v7407_v61 = vpop.eup %7406  ;;  %v4902_v62 = vpop.f32.mrf.mxu2 }
 0x426   :  { %v9906_v23 = vmul.f32 %v3760_v29, %v10706_v39  ;;  %v4951_v33 = vpop.f32.mrf.mxu3  ;;  %v3384_v60 = vmul.f32 %v7405_v9, %v8418_v54  ;;  %v3361_v3 = vunpack.c.l.bf16 %v3084_v20  ;;  %v3388_v47 = vunpack.c.h.bf16 %v3088_v19 }
 0x427   :  { %v3389_v49 = vunpack.c.l.bf16 %v3088_v19  ;;  %5097 = vmatmul.bf16.gmra.mxu2 %v9883_v7  ;;  %5146 = vmatmul.bf16.gmra.mxu3 %v9885_v25  ;;  %v4903_v29 = vadd.f32 %v4902_v62, %v4854_v41  ;;  %v4806_v1 = vpop.f32.mrf.mxu0  ;;  %v3753_v39 = vunpack.c.l.bf16 %v3338_v24  ;;  %v10709_v30 = vunpack.c.l.bf16 %v10708_v42  ;;  %v6813_v19 = vld [vmem:[#allocation11 + $0x134] sm:$0xf]  ;;  %v6291_v7 = vld [vmem:[#allocation11 + $0x138] sm:$0xf0] }
 0x428   :  { %v4855_v55 = vpop.f32.mrf.mxu1  ;;  %v3754_v27 = vunpack.c.h.bf16 %v3338_v24  ;;  %v4807_v17 = vadd.f32 %v4806_v1, %v9763_v2  ;;  %v10710_v18 = vunpack.c.h.bf16 %v10708_v42  ;;  %v3386_v20 = vmul.f32 %v7407_v61, %v8420_v38  ;;  %v6163_v24 = vld [vmem:[#allocation11 + $0x38] sm:$0xf0]  ;;  %v6829_v1 = vld [vmem:[#allocation11 + $0x1b4] sm:$0xf] }
 0x429   :  { %v3873_v37 = vmul.f32 %v3745_v28, %v10709_v30  ;;  %7408 = vrcp.f32 %v3360_v59  ;;  %v9919_v25 = vadd.f32 %v4951_v33, %v4903_v29  ;;  %v10711_v41 = vunpack.c.l.bf16 %v10687_v57  ;;  %v6355_v30 = vld [vmem:[#allocation11 + $0x1b8] sm:$0xf0] }
 0x42a   :  { %v3874_v9 = vmul.f32 %v3746_v5, %v10710_v18  ;;  %v3882_v28 = vmul.f32 %v3754_v27, %v10712_v13  ;;  %7410 = vrcp.f32 %v3361_v3  ;;  %v4856_v42 = vadd.f32 %v4855_v55, %v4807_v17  ;;  %v6797_v5 = vld [vmem:[#allocation11 + $0xb4] sm:$0xf]  ;;  %v6227_v59 = vld [vmem:[#allocation11 + $0xb8] sm:$0xf0] }
 0x42b   :  { %v3881_v62 = vmul.f32 %v3753_v39, %v10711_v41  ;;  %v3387_v18 = vpack.c.bf16 %v3384_v60, %v3386_v20  ;;  %7412 = vrcp.f32 %v3388_v47  ;;  %v3410_v61 = vunpack.c.l.bf16 %v9873_v52  ;;  %v10716_v20 = vld [vmem:[#allocation85_spill] sm:$0xff] }
 0x42c   :  { %v9928_v33 = vpack.c.bf16 %v3882_v28, %v3874_v9  ;;  %7414 = vrcp.f32 %v3389_v49  ;;  %v6294_v29 = vor.u32 %v6813_v19, %v6291_v7  ;;  %v6166_v13 = vor.u32 %v6781_v44, %v6163_v24  ;;  %v10717_v28 = vld [vmem:[#allocation19_spill] sm:$0xff] }
 0x42d   :  { %v9926_v45 = vpack.c.bf16 %v3881_v62, %v3873_v37  ;;  %v3767_v39 = vunpack.c.l.bf16 %v3387_v18  ;;  %v3768_v57 = vunpack.c.h.bf16 %v3387_v18  ;;  %v6358_v27 = vor.u32 %v6829_v1, %v6355_v30  ;;  %v4904_v55 = vpop.f32.mrf.mxu2  ;;  %v10718_v24 = vld [vmem:[#allocation71_spill] sm:$0xff] }
 0x42e   :  { %10713 = vst [vmem:[#allocation88_spill] sm:$0xff] %v9928_v33  ;;  %5279 = vmatpush.bf16.msra.mxu2 %v6294_v29  ;;  %v6230_v3 = vor.u32 %v6797_v5, %v6227_v59  ;;  %7416 = vrcp.f32 %v3409_v4  ;;  %v3437_v17 = vunpack.c.h.bf16 %v9893_v6  ;;  %v3438_v60 = vunpack.c.l.bf16 %v9893_v6  ;;  %v4953_v52 = vpop.f32.mrf.mxu3  ;;  %5181 = vmatpush.bf16.msra.mxu0 %v6166_v13 }
 0x42f   :  { %v7409_v47 = vpop.eup %7408  ;;  %v10714_v37 = vunpack.c.l.bf16 %v10676_v43  ;;  %v10715_v49 = vunpack.c.h.bf16 %v10676_v43  ;;  %v3641_v19 = vunpack.c.l.bf16 %v10716_v20  ;;  %5328 = vmatpush.bf16.msra.mxu3 %v6358_v27  ;;  %7418 = vrcp.f32 %v3410_v61  ;;  %v4809_v41 = vpop.f32.mrf.mxu0 }
 0x430   :  { %v7411_v44 = vpop.eup %7410  ;;  %v4905_v4 = vadd.f32 %v4904_v55, %v4856_v42  ;;  %v4858_v62 = vpop.f32.mrf.mxu1  ;;  %v3363_v6 = vmul.f32 %v7409_v47, %v8418_v54  ;;  %5230 = vmatpush.bf16.msra.mxu1 %v6230_v3  ;;  %7420 = vrcp.f32 %v3437_v17  ;;  %v9940_v1 = vpack.c.bf16 %v10718_v24, %v10717_v28  ;;  %v10719_v47 = vld [vmem:[#allocation72_spill] sm:$0xff]  ;;  %v10720_v55 = vld [vmem:[#allocation73_spill] sm:$0xff] }
 0x431   :  { %v3895_v9 = vmul.f32 %v3767_v39, %v10714_v37  ;;  %v3896_v7 = vmul.f32 %v3768_v57, %v10715_v49  ;;  %v7413_v30 = vpop.eup %7412  ;;  %v4810_v43 = vadd.f32 %v4809_v41, %v9763_v2  ;;  %v3365_v42 = vmul.f32 %v7411_v44, %v8420_v38  ;;  %5004 = vmatmul.bf16.gmra.mxu0 %v9738_v35 }
 0x432   :  { %v7415_v59 = vpop.eup %7414  ;;  %v9950_v61 = vadd.f32 %v4953_v52, %v4905_v4  ;;  %v3391_v29 = vmul.f32 %v7413_v30, %v8418_v54  ;;  %v3642_v39 = vunpack.c.h.bf16 %v10716_v20  ;;  %7422 = vrcp.f32 %v3438_v60  ;;  %5053 = vmatmul.bf16.gmra.mxu1 %v9744_v0  ;;  %v6827_v52 = vld [vmem:[#allocation11 + $0x1a4] sm:$0xf] }
 0x433   :  { %v9944_v18 = vpack.c.bf16 %v3895_v9, %v9902_v10  ;;  %v9947_v5 = vpack.c.bf16 %v3896_v7, %v9906_v23  ;;  %v4859_v57 = vadd.f32 %v4858_v62, %v4810_v43  ;;  %v3366_v10 = vpack.c.bf16 %v3363_v6, %v3365_v42  ;;  %v10721_v6 = vld [vmem:[#allocation84_spill] sm:$0xff] }
 0x434   :  { %v3393_v13 = vmul.f32 %v7415_v59, %v8420_v38  ;;  %v7417_v27 = vpop.eup %7416  ;;  %v3092_v3 = vpack.c.bf16 %v9741_v22, %v9735_v50  ;;  %v3096_v17 = vpack.c.bf16 %v9774_v51, %v9772_v58  ;;  %v9964_v60 = vpack.c.bf16 %v10720_v55, %v10719_v47 }
 0x435   :  { %v7419_v37 = vpop.eup %7418  ;;  %v3761_v49 = vunpack.c.l.bf16 %v3366_v10  ;;  %v3762_v7 = vunpack.c.h.bf16 %v3366_v10  ;;  %v3412_v20 = vmul.f32 %v7417_v27, %v8418_v54  ;;  %v4907_v62 = vpop.f32.mrf.mxu2  ;;  %v10722_v28 = vunpack.c.l.bf16 %v10721_v6 }
 0x436   :  { %v3394_v9 = vpack.c.bf16 %v3391_v29, %v3393_v13  ;;  %v7421_v44 = vpop.eup %7420  ;;  %v3414_v4 = vmul.f32 %v7419_v37, %v8420_v38  ;;  %v3416_v41 = vunpack.c.h.bf16 %v3092_v3  ;;  %v3417_v50 = vunpack.c.l.bf16 %v3092_v3  ;;  %v4956_v58 = vpop.f32.mrf.mxu3 }
 0x437   :  { %v3444_v22 = vunpack.c.h.bf16 %v3096_v17  ;;  %v3889_v24 = vmul.f32 %v3761_v49, %v10722_v28  ;;  %v10723_v43 = vunpack.c.h.bf16 %v10721_v6  ;;  %5102 = vmatmul.bf16.gmra.mxu2 %v9926_v45  ;;  %5151 = vmatmul.bf16.gmra.mxu3 %v9928_v33  ;;  %v4908_v29 = vadd.f32 %v4907_v62, %v4859_v57  ;;  %v4811_v10 = vpop.f32.mrf.mxu0  ;;  %v6811_v49 = vld [vmem:[#allocation11 + $0x124] sm:$0xf]  ;;  %v6155_v62 = vld [vmem:[#allocation11 + $0x28] sm:$0xf0] }
 0x438   :  { %v3769_v51 = vunpack.c.l.bf16 %v3394_v9  ;;  %v3770_v30 = vunpack.c.h.bf16 %v3394_v9  ;;  %v7423_v59 = vpop.eup %7422  ;;  %v4860_v13 = vpop.f32.mrf.mxu1  ;;  %v3415_v27 = vpack.c.bf16 %v3412_v20, %v3414_v4  ;;  %v3440_v3 = vmul.f32 %v7421_v44, %v8418_v54  ;;  %v6779_v57 = vld [vmem:[#allocation11 + $0x24] sm:$0xf] }
 0x439   :  { %v3890_v42 = vmul.f32 %v3762_v7, %v10723_v43  ;;  %7424 = vrcp.f32 %v3416_v41  ;;  %v4812_v47 = vadd.f32 %v4811_v10, %v9763_v2  ;;  %v3442_v9 = vmul.f32 %v7423_v59, %v8420_v38  ;;  %v6283_v7 = vld [vmem:[#allocation11 + $0x128] sm:$0xf0] }
 0x43a   :  { %v3897_v55 = vmul.f32 %v3769_v51, %v3641_v19  ;;  %v3898_v37 = vmul.f32 %v3770_v30, %v3642_v39  ;;  %v9978_v6 = vadd.f32 %v4956_v58, %v4908_v29  ;;  %v3775_v28 = vunpack.c.l.bf16 %v3415_v27  ;;  %v6347_v19 = vld [vmem:[#allocation11 + $0x1a8] sm:$0xf0]  ;;  %v6795_v39 = vld [vmem:[#allocation11 + $0xa4] sm:$0xf]  ;;  %v10725_v30 = vld [vmem:[#allocation29_spill] sm:$0xff] }
 0x43b   :  { %v3776_v43 = vunpack.c.h.bf16 %v3415_v27  ;;  %7426 = vrcp.f32 %v3417_v50  ;;  %v4861_v20 = vadd.f32 %v4860_v13, %v4812_v47  ;;  %v3443_v41 = vpack.c.bf16 %v3440_v3, %v3442_v9  ;;  %v6219_v51 = vld [vmem:[#allocation11 + $0xa8] sm:$0xf0] }
 0x43c   :  { %v9980_v4 = vpack.c.bf16 %v3897_v55, %v3889_v24  ;;  %v9982_v44 = vpack.c.bf16 %v3898_v37, %v3890_v42  ;;  %v10726_v59 = vunpack.c.l.bf16 %v10725_v30  ;;  %v3445_v58 = vunpack.c.l.bf16 %v3096_v17 }
 0x43d   :  { %7428 = vrcp.f32 %v3444_v22  ;;  %v3466_v29 = vunpack.c.l.bf16 %v9940_v1  ;;  %v3783_v50 = vunpack.c.l.bf16 %v3443_v41  ;;  %v3784_v27 = vunpack.c.h.bf16 %v3443_v41  ;;  %v4909_v37 = vpop.f32.mrf.mxu2 }
 0x43e   :  { %10724 = vst [vmem:[#allocation83_spill] sm:$0xff] %v9982_v44  ;;  %v3903_v10 = vmul.f32 %v3775_v28, %v10726_v59  ;;  %v10727_v23 = vunpack.c.h.bf16 %v10725_v30  ;;  %v6286_v24 = vor.u32 %v6811_v49, %v6283_v7  ;;  %7430 = vrcp.f32 %v3445_v58  ;;  %v4958_v9 = vpop.f32.mrf.mxu3 }
 0x43f   :  { %v7425_v47 = vpop.eup %7424  ;;  %v6158_v42 = vor.u32 %v6779_v57, %v6155_v62  ;;  %v6350_v3 = vor.u32 %v6827_v52, %v6347_v19  ;;  %v6222_v55 = vor.u32 %v6795_v39, %v6219_v51  ;;  %v10728_v33 = vunpack.c.l.bf16 %v10707_v26  ;;  %v4814_v7 = vpop.f32.mrf.mxu0  ;;  %v10731_v39 = vld [vmem:[#allocation89_spill] sm:$0xff] }
 0x440   :  { %v3904_v13 = vmul.f32 %v3776_v43, %v10727_v23  ;;  %v10729_v17 = vunpack.c.h.bf16 %v10707_v26  ;;  %v3419_v59 = vmul.f32 %v7425_v47, %v8418_v54  ;;  %5280 = vmatpush.bf16.msra.mxu2 %v6286_v24  ;;  %v10730_v41 = vunpack.c.h.bf16 %v9940_v1  ;;  %v4863_v43 = vpop.f32.mrf.mxu1 }
 0x441   :  { %v3911_v28 = vmul.f32 %v3783_v50, %v10728_v33  ;;  %v7427_v23 = vpop.eup %7426  ;;  %v4910_v49 = vadd.f32 %v4909_v37, %v4861_v20  ;;  %5182 = vmatpush.bf16.msra.mxu0 %v6158_v42  ;;  %5329 = vmatpush.bf16.msra.mxu3 %v6350_v3  ;;  %v3493_v52 = vunpack.c.h.bf16 %v9964_v60  ;;  %v3494_v33 = vunpack.c.l.bf16 %v9964_v60  ;;  %v10732_v50 = vld [vmem:[#allocation54_spill] sm:$0xff] }
 0x442   :  { %v3912_v22 = vmul.f32 %v3784_v27, %v10729_v17  ;;  %7432 = vrcp.f32 %v10730_v41  ;;  %v4815_v26 = vadd.f32 %v4814_v7, %v9763_v2  ;;  %v3421_v1 = vmul.f32 %v7427_v23, %v8420_v38  ;;  %5231 = vmatpush.bf16.msra.mxu1 %v6222_v55  ;;  %5009 = vmatmul.bf16.gmra.mxu0 %v9944_v18  ;;  %v10736_v7 = vld [vmem:[#allocation79_spill] sm:$0xff]  ;;  %v6825_v27 = vld [vmem:[#allocation11 + $0x194] sm:$0xf] }
 0x443   :  { %7434 = vrcp.f32 %v3466_v29  ;;  %v9999_v57 = vpack.c.bf16 %v3911_v28, %v3903_v10  ;;  %v7429_v19 = vpop.eup %7428  ;;  %v10004_v20 = vadd.f32 %v4958_v9, %v4910_v49  ;;  %v3657_v51 = vunpack.c.l.bf16 %v10731_v39  ;;  %5058 = vmatmul.bf16.gmra.mxu1 %v9947_v5  ;;  %v10733_v9 = vld [vmem:[#allocation74_spill] sm:$0xff]  ;;  %v10734_v28 = vld [vmem:[#allocation75_spill] sm:$0xff] }
 0x444   :  { %v10001_v62 = vpack.c.bf16 %v3912_v22, %v3904_v13  ;;  %v3658_v30 = vunpack.c.h.bf16 %v10731_v39  ;;  %7436 = vrcp.f32 %v3493_v52  ;;  %v4864_v58 = vadd.f32 %v4863_v43, %v4815_v26  ;;  %v7431_v29 = vpop.eup %7430  ;;  %v10735_v49 = vld [vmem:[#allocation78_spill] sm:$0xff]  ;;  %v10737_v43 = vld [vmem:[#allocation87_spill] sm:$0xff] }
 0x445   :  { %v3422_v60 = vpack.c.bf16 %v3419_v59, %v3421_v1  ;;  %v3447_v10 = vmul.f32 %v7429_v19, %v8418_v54  ;;  %7438 = vrcp.f32 %v3494_v33  ;;  %v3100_v24 = vpack.c.bf16 %v9784_v11, %v9780_v31  ;;  %v4912_v11 = vpop.f32.mrf.mxu2 }
 0x446   :  { %v3104_v47 = vpack.c.bf16 %v9810_v14, %v9808_v12  ;;  %v3449_v3 = vmul.f32 %v7431_v29, %v8420_v38  ;;  %v10020_v17 = vpack.c.bf16 %v10734_v28, %v10733_v9  ;;  %v10025_v31 = vpack.c.bf16 %v10736_v7, %v10735_v49  ;;  %v4961_v12 = vpop.f32.mrf.mxu3  ;;  %v6809_v49 = vld [vmem:[#allocation11 + $0x114] sm:$0xf]  ;;  %v6275_v7 = vld [vmem:[#allocation11 + $0x118] sm:$0xf0] }
 0x447   :  { %v3777_v55 = vunpack.c.l.bf16 %v3422_v60  ;;  %v3778_v37 = vunpack.c.h.bf16 %v3422_v60  ;;  %v3472_v41 = vunpack.c.h.bf16 %v3100_v24  ;;  %v3473_v23 = vunpack.c.l.bf16 %v3100_v24  ;;  %5107 = vmatmul.bf16.gmra.mxu2 %v9980_v4  ;;  %5156 = vmatmul.bf16.gmra.mxu3 %v9982_v44  ;;  %v4816_v60 = vpop.f32.mrf.mxu0 }
 0x448   :  { %v7433_v42 = vpop.eup %7432  ;;  %v3450_v14 = vpack.c.bf16 %v3447_v10, %v3449_v3  ;;  %v10738_v52 = vunpack.c.l.bf16 %v10737_v43  ;;  %v3500_v1 = vunpack.c.h.bf16 %v3104_v47  ;;  %v4913_v39 = vadd.f32 %v4912_v11, %v4864_v58  ;;  %v4865_v29 = vpop.f32.mrf.mxu1 }
 0x449   :  { %v7435_v22 = vpop.eup %7434  ;;  %v3468_v59 = vmul.f32 %v7433_v42, %v8418_v54  ;;  %v10739_v24 = vunpack.c.h.bf16 %v10737_v43  ;;  %7440 = vrcp.f32 %v3472_v41  ;;  %v3501_v9 = vunpack.c.l.bf16 %v3104_v47  ;;  %v6777_v47 = vld [vmem:[#allocation11 + $0x14] sm:$0xf] }
 0x44a   :  { %v3905_v33 = vmul.f32 %v3777_v55, %v10738_v52  ;;  %v3470_v26 = vmul.f32 %v7435_v22, %v8420_v38  ;;  %v7437_v19 = vpop.eup %7436  ;;  %v4817_v3 = vadd.f32 %v4816_v60, %v9763_v2  ;;  %v3785_v55 = vunpack.c.l.bf16 %v3450_v14 }
 0x44b   :  { %v3906_v42 = vmul.f32 %v3778_v37, %v10739_v24  ;;  %v7439_v10 = vpop.eup %7438  ;;  %v3786_v28 = vunpack.c.h.bf16 %v3450_v14  ;;  %v10035_v52 = vadd.f32 %v4961_v12, %v4913_v39  ;;  %v3496_v13 = vmul.f32 %v7437_v19, %v8418_v54  ;;  %v6147_v24 = vld [vmem:[#allocation11 + $0x18] sm:$0xf0] }
 0x44c   :  { %v3471_v22 = vpack.c.bf16 %v3468_v59, %v3470_v26  ;;  %v3498_v58 = vmul.f32 %v7439_v10, %v8420_v38  ;;  %7442 = vrcp.f32 %v3473_v23  ;;  %v4866_v11 = vadd.f32 %v4865_v29, %v4817_v3  ;;  %v6339_v14 = vld [vmem:[#allocation11 + $0x198] sm:$0xf0]  ;;  %v6793_v26 = vld [vmem:[#allocation11 + $0x94] sm:$0xf]  ;;  %v10741_v10 = vld [vmem:[#allocation32_spill] sm:$0xff] }
 0x44d   :  { %v3913_v43 = vmul.f32 %v3785_v55, %v3657_v51  ;;  %v3914_v37 = vmul.f32 %v3786_v28, %v3658_v30  ;;  %7444 = vrcp.f32 %v3500_v1  ;;  %v6278_v59 = vor.u32 %v6809_v49, %v6275_v7  ;;  %v6211_v12 = vld [vmem:[#allocation11 + $0x98] sm:$0xf0]  ;;  %v4914_v28 = vpop.f32.mrf.mxu2 }
 0x44e   :  { %v3791_v41 = vunpack.c.l.bf16 %v3471_v22  ;;  %v3499_v60 = vpack.c.bf16 %v3496_v13, %v3498_v58  ;;  %v3792_v44 = vunpack.c.h.bf16 %v3471_v22  ;;  %v10742_v23 = vunpack.c.l.bf16 %v10741_v10  ;;  %v4963_v22 = vpop.f32.mrf.mxu3 }
 0x44f   :  { %v10039_v39 = vpack.c.bf16 %v3913_v43, %v3905_v33  ;;  %v10041_v19 = vpack.c.bf16 %v3914_v37, %v3906_v42  ;;  %7446 = vrcp.f32 %v3501_v9  ;;  %v7441_v51 = vpop.eup %7440  ;;  %v10743_v55 = vunpack.c.h.bf16 %v10741_v10  ;;  %5281 = vmatpush.bf16.msra.mxu2 %v6278_v59  ;;  %v4819_v37 = vpop.f32.mrf.mxu0 }
 0x450   :  { %v3919_v29 = vmul.f32 %v3791_v41, %v10742_v23  ;;  %v3799_v30 = vunpack.c.l.bf16 %v3499_v60  ;;  %v3800_v3 = vunpack.c.h.bf16 %v3499_v60  ;;  %v6150_v1 = vor.u32 %v6777_v47, %v6147_v24  ;;  %v4868_v9 = vpop.f32.mrf.mxu1 }
 0x451   :  { %10740 = vst [vmem:[#allocation76_spill] sm:$0xff] %v10041_v19  ;;  %v3920_v13 = vmul.f32 %v3792_v44, %v10743_v55  ;;  %v3475_v49 = vmul.f32 %v7441_v51, %v8418_v54  ;;  %v6342_v33 = vor.u32 %v6825_v27, %v6339_v14  ;;  %v6214_v7 = vor.u32 %v6793_v26, %v6211_v12 }
 0x452   :  { %v3521_v42 = vunpack.c.h.bf16 %v10020_v17  ;;  %v7443_v58 = vpop.eup %7442  ;;  %v4915_v43 = vadd.f32 %v4914_v28, %v4866_v11  ;;  %v10744_v41 = vunpack.c.l.bf16 %v10732_v50  ;;  %v10745_v10 = vunpack.c.h.bf16 %v10732_v50  ;;  %5183 = vmatpush.bf16.msra.mxu0 %v6150_v1 }
 0x453   :  { %v3522_v47 = vunpack.c.l.bf16 %v10020_v17  ;;  %v4820_v24 = vadd.f32 %v4819_v37, %v9763_v2  ;;  %v3477_v27 = vmul.f32 %v7443_v58, %v8420_v38  ;;  %5330 = vmatpush.bf16.msra.mxu3 %v6342_v33  ;;  %5232 = vmatpush.bf16.msra.mxu1 %v6214_v7  ;;  %v3549_v11 = vunpack.c.h.bf16 %v10025_v31  ;;  %v7445_v59 = vpop.eup %7444 }
 0x454   :  { %v3927_v60 = vmul.f32 %v3799_v30, %v10744_v41  ;;  %v3928_v44 = vmul.f32 %v3800_v3, %v10745_v10  ;;  %7448 = vrcp.f32 %v3521_v42  ;;  %v10057_v14 = vadd.f32 %v4963_v22, %v4915_v43  ;;  %5014 = vmatmul.bf16.gmra.mxu0 %v9999_v57  ;;  %5063 = vmatmul.bf16.gmra.mxu1 %v10001_v62  ;;  %v10746_v3 = vld [vmem:[#allocation64_spill] sm:$0xff] }
 0x455   :  { %7450 = vrcp.f32 %v3522_v47  ;;  %v7447_v50 = vpop.eup %7446  ;;  %v4869_v23 = vadd.f32 %v4868_v9, %v4820_v24  ;;  %v3478_v17 = vpack.c.bf16 %v3475_v49, %v3477_v27  ;;  %v3503_v51 = vmul.f32 %v7445_v59, %v8418_v54  ;;  %v4917_v58 = vpop.f32.mrf.mxu2 }
 0x456   :  { %v10059_v26 = vpack.c.bf16 %v3927_v60, %v3919_v29  ;;  %v10061_v12 = vpack.c.bf16 %v3928_v44, %v3920_v13  ;;  %v3550_v30 = vunpack.c.l.bf16 %v10025_v31  ;;  %v3665_v55 = vunpack.c.l.bf16 %v10746_v3  ;;  %v4966_v43 = vpop.f32.mrf.mxu3 }
 0x457   :  { %v3666_v1 = vunpack.c.h.bf16 %v10746_v3  ;;  %v3505_v29 = vmul.f32 %v7447_v50, %v8420_v38  ;;  %7452 = vrcp.f32 %v3549_v11  ;;  %v3793_v13 = vunpack.c.l.bf16 %v3478_v17  ;;  %5112 = vmatmul.bf16.gmra.mxu2 %v10039_v39  ;;  %5161 = vmatmul.bf16.gmra.mxu3 %v10041_v19 }
 0x458   :  { %v3794_v28 = vunpack.c.h.bf16 %v3478_v17  ;;  %7454 = vrcp.f32 %v3550_v30  ;;  %v3108_v22 = vpack.c.bf16 %v9840_v16, %v9834_v34  ;;  %v3673_v49 = vunpack.c.l.bf16 %v9726_v56  ;;  %v4821_v16 = vpop.f32.mrf.mxu0  ;;  %v4870_v44 = vpop.f32.mrf.mxu1  ;;  %v6775_v30 = vld [vmem:[#allocation11 + $0x4] sm:$0xf] }
 0x459   :  { %v3506_v33 = vpack.c.bf16 %v3503_v51, %v3505_v29  ;;  %v3674_v7 = vunpack.c.h.bf16 %v9726_v56  ;;  %v3112_v31 = vpack.c.bf16 %v9860_v8, %v9851_v15  ;;  %v3921_v37 = vmul.f32 %v3793_v13, %v3665_v55  ;;  %v6807_v51 = vld [vmem:[#allocation11 + $0x104] sm:$0xf] }
 0x45a   :  { %v7449_v42 = vpop.eup %7448  ;;  %v3922_v9 = vmul.f32 %v3794_v28, %v3666_v1  ;;  %v3528_v41 = vunpack.c.h.bf16 %v3108_v22  ;;  %v3529_v60 = vunpack.c.l.bf16 %v3108_v22  ;;  %v4918_v34 = vadd.f32 %v4917_v58, %v4869_v23  ;;  %v6267_v23 = vld [vmem:[#allocation11 + $0x108] sm:$0xf0]  ;;  %v6823_v22 = vld [vmem:[#allocation11 + $0x184] sm:$0xf] }
 0x45b   :  { %v7451_v10 = vpop.eup %7450  ;;  %v3801_v47 = vunpack.c.l.bf16 %v3506_v33  ;;  %v3802_v56 = vunpack.c.h.bf16 %v3506_v33  ;;  %v3524_v24 = vmul.f32 %v7449_v42, %v8418_v54  ;;  %v4822_v15 = vadd.f32 %v4821_v16, %v9763_v2  ;;  %v6139_v28 = vld [vmem:[#allocation11 + $0x8] sm:$0xf0] }
 0x45c   :  { %v3526_v8 = vmul.f32 %v7451_v10, %v8420_v38  ;;  %7456 = vrcp.f32 %v3528_v41  ;;  %v3556_v27 = vunpack.c.h.bf16 %v3112_v31  ;;  %v10081_v59 = vadd.f32 %v4966_v43, %v4918_v34  ;;  %v6331_v33 = vld [vmem:[#allocation11 + $0x188] sm:$0xf0] }
 0x45d   :  { %v7453_v11 = vpop.eup %7452  ;;  %v3929_v50 = vmul.f32 %v3801_v47, %v3673_v49  ;;  %v3930_v17 = vmul.f32 %v3802_v56, %v3674_v7  ;;  %7458 = vrcp.f32 %v3529_v60  ;;  %v4871_v55 = vadd.f32 %v4870_v44, %v4822_v15  ;;  %v6791_v7 = vld [vmem:[#allocation11 + $0x84] sm:$0xf]  ;;  %v6203_v43 = vld [vmem:[#allocation11 + $0x88] sm:$0xf0]  ;;  %v10748_v15 = vld [vmem:[#allocation61_spill] sm:$0xff] }
 0x45e   :  { %v7455_v3 = vpop.eup %7454  ;;  %v3527_v1 = vpack.c.bf16 %v3524_v24, %v3526_v8  ;;  %v3552_v29 = vmul.f32 %v7453_v11, %v8418_v54  ;;  %v3557_v13 = vunpack.c.l.bf16 %v3112_v31  ;;  %7460 = vrcp.f32 %v3556_v27  ;;  %v10747_v41 = vld [vmem:[#allocation60_spill] sm:$0xff]  ;;  %v4919_v24 = vpop.f32.mrf.mxu2 }
 0x45f   :  { %v10084_v42 = vpack.c.bf16 %v3929_v50, %v3921_v37  ;;  %v10086_v58 = vpack.c.bf16 %v3930_v17, %v3922_v9  ;;  %v3554_v49 = vmul.f32 %v7455_v3, %v8420_v38  ;;  %v3679_v60 = vunpack.c.l.bf16 %v10747_v41  ;;  %v4968_v9 = vpop.f32.mrf.mxu3 }
 0x460   :  { %v3807_v10 = vunpack.c.l.bf16 %v3527_v1  ;;  %v3808_v34 = vunpack.c.h.bf16 %v3527_v1  ;;  %7462 = vrcp.f32 %v3557_v13  ;;  %v6270_v44 = vor.u32 %v6807_v51, %v6267_v23  ;;  %v4824_v3 = vpop.f32.mrf.mxu0  ;;  %v4873_v19 = vpop.f32.mrf.mxu1 }
 0x461   :  { %v3555_v16 = vpack.c.bf16 %v3552_v29, %v3554_v49  ;;  %v6142_v31 = vor.u32 %v6775_v30, %v6139_v28  ;;  %v6334_v47 = vor.u32 %v6823_v22, %v6331_v33  ;;  %v3680_v37 = vunpack.c.h.bf16 %v10747_v41 }
 0x462   :  { %v7457_v56 = vpop.eup %7456  ;;  %v3687_v8 = vunpack.c.l.bf16 %v10748_v15  ;;  %v3688_v27 = vunpack.c.h.bf16 %v10748_v15  ;;  %v6206_v11 = vor.u32 %v6791_v7, %v6203_v43  ;;  %v4920_v17 = vadd.f32 %v4919_v24, %v4871_v55  ;;  %5282 = vmatpush.bf16.msra.mxu2 %v6270_v44 }
 0x463   :  { %v7459_v50 = vpop.eup %7458  ;;  %v3815_v1 = vunpack.c.l.bf16 %v3555_v16  ;;  %v3816_v13 = vunpack.c.h.bf16 %v3555_v16  ;;  %v3531_v51 = vmul.f32 %v7457_v56, %v8418_v54  ;;  %5184 = vmatpush.bf16.msra.mxu0 %v6142_v31  ;;  %v4825_v23 = vadd.f32 %v4824_v3, %v9763_v2  ;;  %5331 = vmatpush.bf16.msra.mxu3 %v6334_v47  ;;  %v6853_v3 = vld [vmem:[#allocation11 + $0x274] sm:$0xf] }
 0x464   :  { %v3935_v30 = vmul.f32 %v3807_v10, %v3679_v60  ;;  %v3533_v29 = vmul.f32 %v7459_v50, %v8420_v38  ;;  %5233 = vmatpush.bf16.msra.mxu1 %v6206_v11  ;;  %v7461_v28 = vpop.eup %7460  ;;  %v10096_v22 = vadd.f32 %v4968_v9, %v4920_v17  ;;  %v3936_v55 = vmul.f32 %v3808_v34, %v3680_v37  ;;  %v6885_v50 = vld [vmem:[#allocation11 + $0x374] sm:$0xf]  ;;  %v6579_v17 = vld [vmem:[#allocation11 + $0x378] sm:$0xf0] }
 0x465   :  { %v3943_v33 = vmul.f32 %v3815_v1, %v3687_v8  ;;  %v3944_v49 = vmul.f32 %v3816_v13, %v3688_v27  ;;  %v4874_v43 = vadd.f32 %v4873_v19, %v4825_v23  ;;  %5019 = vmatmul.bf16.gmra.mxu0 %v10059_v26  ;;  %5068 = vmatmul.bf16.gmra.mxu1 %v10061_v12  ;;  %v3681_v34 = vunpack.c.l.bf16 %v9759_v53  ;;  %v6451_v23 = vld [vmem:[#allocation11 + $0x278] sm:$0xf0] }
 0x466   :  { %v7463_v7 = vpop.eup %7462  ;;  %v3534_v41 = vpack.c.bf16 %v3531_v51, %v3533_v29  ;;  %v3559_v16 = vmul.f32 %v7461_v28, %v8418_v54  ;;  %v3682_v19 = vunpack.c.h.bf16 %v9759_v53  ;;  %v4922_v37 = vpop.f32.mrf.mxu2  ;;  %v3689_v9 = vunpack.c.l.bf16 %v9789_v46  ;;  %v6643_v29 = vld [vmem:[#allocation11 + $0x3f8] sm:$0xf0] }
 0x467   :  { %v10101_v60 = vpack.c.bf16 %v3943_v33, %v3935_v30  ;;  %v10103_v10 = vpack.c.bf16 %v3944_v49, %v3936_v55  ;;  %v3561_v44 = vmul.f32 %v7463_v7, %v8420_v38  ;;  %v4971_v24 = vpop.f32.mrf.mxu3  ;;  %5117 = vmatmul.bf16.gmra.mxu2 %v10084_v42  ;;  %5166 = vmatmul.bf16.gmra.mxu3 %v10086_v58  ;;  %v3690_v38 = vunpack.c.h.bf16 %v9789_v46  ;;  %v6901_v30 = vld [vmem:[#allocation11 + $0x3f4] sm:$0xf] }
 0x468   :  { %v3809_v31 = vunpack.c.l.bf16 %v3534_v41  ;;  %v3810_v47 = vunpack.c.h.bf16 %v3534_v41  ;;  %v4923_v54 = vadd.f32 %v4922_v37, %v4874_v43  ;;  %v4826_v15 = vpop.f32.mrf.mxu0  ;;  %v4875_v8 = vpop.f32.mrf.mxu1  ;;  %v6582_v51 = vor.u32 %v6885_v50, %v6579_v17  ;;  %v6883_v50 = vld [vmem:[#allocation11 + $0x364] sm:$0xf]  ;;  %v6571_v17 = vld [vmem:[#allocation11 + $0x368] sm:$0xf0] }
 0x469   :  { %v3562_v56 = vpack.c.bf16 %v3559_v16, %v3561_v44  ;;  %v4827_v53 = vadd.f32 %v4826_v15, %v9763_v2  ;;  %v6454_v49 = vor.u32 %v6853_v3, %v6451_v23  ;;  %v6646_v46 = vor.u32 %v6901_v30, %v6643_v29  ;;  %v6869_v16 = vld [vmem:[#allocation11 + $0x2f4] sm:$0xf]  ;;  %v6515_v44 = vld [vmem:[#allocation11 + $0x2f8] sm:$0xf0]  ;;  %v6851_v3 = vld [vmem:[#allocation11 + $0x264] sm:$0xf] }
 0x46a   :  { %v3937_v1 = vmul.f32 %v3809_v31, %v3681_v34  ;;  %v3938_v13 = vmul.f32 %v3810_v47, %v3682_v19  ;;  %v10113_v28 = vadd.f32 %v4971_v24, %v4923_v54  ;;  %5471 = vmatpush.bf16.msrb.mxu2 %v6582_v51  ;;  %v6518_v31 = vor.u32 %v6869_v16, %v6515_v44  ;;  %v6899_v51 = vld [vmem:[#allocation11 + $0x3e4] sm:$0xf]  ;;  %v6635_v23 = vld [vmem:[#allocation11 + $0x3e8] sm:$0xf0] }
 0x46b   :  { %v3817_v27 = vunpack.c.l.bf16 %v3562_v56  ;;  %v3818_v11 = vunpack.c.h.bf16 %v3562_v56  ;;  %v4876_v7 = vadd.f32 %v4875_v8, %v4827_v53  ;;  %5373 = vmatpush.bf16.msrb.mxu0 %v6454_v49  ;;  %5520 = vmatpush.bf16.msrb.mxu3 %v6646_v46 }
 0x46c   :  { %5422 = vmatpush.bf16.msrb.mxu1 %v6518_v31  ;;  %v6867_v31 = vld [vmem:[#allocation11 + $0x2e4] sm:$0xf] }
 0x46d   :  { %v3945_v33 = vmul.f32 %v3817_v27, %v3689_v9  ;;  %v3946_v55 = vmul.f32 %v3818_v11, %v3690_v38 }
 0x46e   :  { %v4924_v47 = vpop.f32.mrf.mxu2 }
 0x46f   :  { %v10115_v43 = vpack.c.bf16 %v3945_v33, %v3937_v1  ;;  %v10117_v41 = vpack.c.bf16 %v3946_v55, %v3938_v13  ;;  %v4973_v56 = vpop.f32.mrf.mxu3  ;;  %v4925_v34 = vadd.f32 %v4924_v47, %v4876_v7  ;;  %v6574_v1 = vor.u32 %v6883_v50, %v6571_v17  ;;  %v6443_v13 = vld [vmem:[#allocation11 + $0x268] sm:$0xf0]  ;;  %v6881_v17 = vld [vmem:[#allocation11 + $0x354] sm:$0xf] }
 0x470   :  { %v4829_v19 = vpop.f32.mrf.mxu0  ;;  %v4878_v37 = vpop.f32.mrf.mxu1  ;;  %v6446_v29 = vor.u32 %v6851_v3, %v6443_v13  ;;  %v6638_v33 = vor.u32 %v6899_v51, %v6635_v23  ;;  %v6507_v47 = vld [vmem:[#allocation11 + $0x2e8] sm:$0xf0]  ;;  %v6563_v3 = vld [vmem:[#allocation11 + $0x358] sm:$0xf0]  ;;  %v6897_v13 = vld [vmem:[#allocation11 + $0x3d4] sm:$0xf] }
 0x471   :  { %v4830_v24 = vadd.f32 %v4829_v19, %v9763_v2  ;;  %v10120_v9 = vadd.f32 %v4973_v56, %v4925_v34  ;;  %5472 = vmatpush.bf16.msrb.mxu2 %v6574_v1  ;;  %v10749_v19 = vld [vmem:[#allocation43_spill] sm:$0xff]  ;;  %v6566_v1 = vor.u32 %v6881_v17, %v6563_v3  ;;  %v6627_v51 = vld [vmem:[#allocation11 + $0x3d8] sm:$0xf0]  ;;  %v6427_v3 = vld [vmem:[#allocation11 + $0x248] sm:$0xf0] }
 0x472   :  { %5374 = vmatpush.bf16.msrb.mxu0 %v6446_v29  ;;  %5521 = vmatpush.bf16.msrb.mxu3 %v6638_v33 }
 0x473   :  { %v4879_v54 = vadd.f32 %v4878_v37, %v4830_v24  ;;  %v10750_v37 = vld [vmem:[#allocation44_spill] sm:$0xff] }
 0x475   :  { %5024 = vmatmul.bf16.gmra.mxu0 %v10101_v60  ;;  %5073 = vmatmul.bf16.gmra.mxu1 %v10103_v10 }
 0x476   :  { %v4927_v15 = vpop.f32.mrf.mxu2  ;;  %5473 = vmatpush.bf16.msrb.mxu2 %v6566_v1  ;;  %v6619_v1 = vld [vmem:[#allocation11 + $0x3c8] sm:$0xf0] }
 0x477   :  { %v4976_v8 = vpop.f32.mrf.mxu3  ;;  %5122 = vmatmul.bf16.gmra.mxu2 %v10115_v43  ;;  %5171 = vmatmul.bf16.gmra.mxu3 %v10117_v41  ;;  %v4928_v27 = vadd.f32 %v4927_v15, %v4879_v54 }
 0x478   :  { %v4831_v38 = vpop.f32.mrf.mxu0  ;;  %v4880_v11 = vpop.f32.mrf.mxu1 }
 0x479   :  { %v4832_v53 = vadd.f32 %v4831_v38, %v9763_v2  ;;  %v10127_v30 = vadd.f32 %v4976_v8, %v4928_v27  ;;  %v6510_v2 = vor.u32 %v6867_v31, %v6507_v47  ;;  %v10751_v8 = vld [vmem:[#allocation48_spill] sm:$0xff]  ;;  %v10752_v27 = vld [vmem:[#allocation49_spill] sm:$0xff]  ;;  %v6499_v47 = vld [vmem:[#allocation11 + $0x2d8] sm:$0xf0] }
 0x47a   :  { %v6865_v31 = vld [vmem:[#allocation11 + $0x2d4] sm:$0xf] }
 0x47b   :  { %v4881_v55 = vadd.f32 %v4880_v11, %v4832_v53  ;;  %5423 = vmatpush.bf16.msrb.mxu1 %v6510_v2  ;;  %v6849_v53 = vld [vmem:[#allocation11 + $0x254] sm:$0xf] }
 0x47e   :  { %v4929_v49 = vpop.f32.mrf.mxu2 }
 0x47f   :  { %v4978_v7 = vpop.f32.mrf.mxu3  ;;  %v4930_v46 = vadd.f32 %v4929_v49, %v4881_v55  ;;  %v6630_v55 = vor.u32 %v6897_v13, %v6627_v51 }
 0x480   :  { %v4990_v16 = vpop.f32.mrf.mxu0  ;;  %v5039_v44 = vpop.f32.mrf.mxu1 }
 0x481   :  { %v10129_v56 = vadd.f32 %v4978_v7, %v4930_v46  ;;  %v4991_v34 = vadd.f32 %v4990_v16, %v9803_v40  ;;  %v6435_v40 = vld [vmem:[#allocation11 + $0x258] sm:$0xf0]  ;;  %5522 = vmatpush.bf16.msrb.mxu3 %v6630_v55 }
 0x482   :  { %v6438_v33 = vor.u32 %v6849_v53, %v6435_v40  ;;  %v6895_v53 = vld [vmem:[#allocation11 + $0x3c4] sm:$0xf] }
 0x483   :  { %v5040_v24 = vadd.f32 %v5039_v44, %v4991_v34  ;;  %v6502_v34 = vor.u32 %v6865_v31, %v6499_v47  ;;  %v6622_v51 = vor.u32 %v6895_v53, %v6619_v1 }
 0x484   :  { %5375 = vmatpush.bf16.msrb.mxu0 %v6438_v33 }
 0x485   :  { %5185 = vmatmul.bf16.vlgmr.msra.gmra.mxu0 %v10749_v19  ;;  %5234 = vmatmul.bf16.vlgmr.msra.gmra.mxu1 %v10750_v37  ;;  %v10753_v37 = vld [vmem:[#allocation46_spill] sm:$0xff] }
 0x486   :  { %v5088_v54 = vpop.f32.mrf.mxu2  ;;  %5424 = vmatpush.bf16.msrb.mxu1 %v6502_v34  ;;  %5523 = vmatpush.bf16.msrb.mxu3 %v6622_v51  ;;  %v10757_v34 = vld [vmem:[#allocation24_spill] sm:$0xff] }
 0x487   :  { %v5137_v15 = vpop.f32.mrf.mxu3  ;;  %5283 = vmatmul.bf16.vlgmr.msra.gmra.mxu2 %v10751_v8  ;;  %5332 = vmatmul.bf16.vlgmr.msra.gmra.mxu3 %v10752_v27  ;;  %v5089_v38 = vadd.f32 %v5088_v54, %v5040_v24  ;;  %v10754_v24 = vld [vmem:[#allocation30_spill] sm:$0xff] }
 0x488   :  { %v4992_v11 = vpop.f32.mrf.mxu0  ;;  %v5041_v50 = vpop.f32.mrf.mxu1  ;;  %v10755_v54 = vld [vmem:[#allocation50_spill] sm:$0xff] }
 0x489   :  { %v5138_v23 = vadd.f32 %v5137_v15, %v5089_v38  ;;  %v4993_v29 = vadd.f32 %v4992_v11, %v9823_v32  ;;  %v10756_v15 = vld [vmem:[#allocation51_spill] sm:$0xff]  ;;  %v6555_v11 = vld [vmem:[#allocation11 + $0x348] sm:$0xf0] }
 0x48a   :  { %v6879_v38 = vld [vmem:[#allocation11 + $0x344] sm:$0xf] }
 0x48b   :  { %5569 = vst [vmem:[#allocation13] sm:$0xff] %v5138_v23  ;;  %v5042_v49 = vadd.f32 %v5041_v50, %v4993_v29  ;;  %v6847_v50 = vld [vmem:[#allocation11 + $0x244] sm:$0xf]  ;;  %v6558_v17 = vor.u32 %v6879_v38, %v6555_v11  ;;  %v6877_v38 = vld [vmem:[#allocation11 + $0x334] sm:$0xf] }
 0x48c   :  { %v6430_v13 = vor.u32 %v6847_v50, %v6427_v3  ;;  %v6845_v50 = vld [vmem:[#allocation11 + $0x234] sm:$0xf] }
 0x48d   :  { %5474 = vmatpush.bf16.msrb.mxu2 %v6558_v17  ;;  %v6419_v17 = vld [vmem:[#allocation11 + $0x238] sm:$0xf0]  ;;  %v6893_v3 = vld [vmem:[#allocation11 + $0x3b4] sm:$0xf] }
 0x48e   :  { %v5090_v7 = vpop.f32.mrf.mxu2  ;;  %5376 = vmatpush.bf16.msrb.mxu0 %v6430_v13  ;;  %v6422_v1 = vor.u32 %v6845_v50, %v6419_v17 }
 0x48f   :  { %v5091_v46 = vadd.f32 %v5090_v7, %v5042_v49  ;;  %v5139_v2 = vpop.f32.mrf.mxu3 }
 0x490   :  { %v4995_v16 = vpop.f32.mrf.mxu0  ;;  %v5044_v44 = vpop.f32.mrf.mxu1 }
 0x491   :  { %v5140_v19 = vadd.f32 %v5139_v2, %v5091_v46  ;;  %v4996_v32 = vadd.f32 %v4995_v16, %v9857_v21  ;;  %v6863_v46 = vld [vmem:[#allocation11 + $0x2c4] sm:$0xf]  ;;  %v6491_v16 = vld [vmem:[#allocation11 + $0x2c8] sm:$0xf0] }
 0x492   :  { %v6494_v31 = vor.u32 %v6863_v46, %v6491_v16  ;;  %5377 = vmatpush.bf16.msrb.mxu0 %v6422_v1  ;;  %v6483_v46 = vld [vmem:[#allocation11 + $0x2b8] sm:$0xf0] }
 0x493   :  { %5571 = vst [vmem:[#allocation13 + $0x10] sm:$0xff] %v5140_v19  ;;  %v5045_v40 = vadd.f32 %v5044_v44, %v4996_v32  ;;  %v10758_v19 = vld [vmem:[#allocation25_spill] sm:$0xff] }
 0x494   :  { %5425 = vmatpush.bf16.msrb.mxu1 %v6494_v31 }
 0x495   :  { %5190 = vmatmul.bf16.gmra.mxu0 %v10753_v37  ;;  %5239 = vmatmul.bf16.gmra.mxu1 %v10754_v24 }
 0x497   :  { %5288 = vmatmul.bf16.gmra.mxu2 %v10755_v54  ;;  %5337 = vmatmul.bf16.gmra.mxu3 %v10756_v15  ;;  %v10760_v54 = vld [vmem:[#allocation53_spill] sm:$0xff] }
 0x498   :  { %v4997_v8 = vpop.f32.mrf.mxu0  ;;  %v5046_v27 = vpop.f32.mrf.mxu1 }
 0x499   :  { %v4998_v55 = vadd.f32 %v4997_v8, %v9881_v63  ;;  %v10759_v63 = vld [vmem:[#allocation52_spill] sm:$0xff] }
 0x49a   :  { %v5093_v23 = vpop.f32.mrf.mxu2  ;;  %v5142_v29 = vpop.f32.mrf.mxu3 }
 0x49b   :  { %v5094_v21 = vadd.f32 %v5093_v23, %v5045_v40  ;;  %v5047_v47 = vadd.f32 %v5046_v27, %v4998_v55  ;;  %v6547_v27 = vld [vmem:[#allocation11 + $0x338] sm:$0xf0] }
 0x49c   :  { %v6550_v11 = vor.u32 %v6877_v38, %v6547_v27  ;;  %v6611_v40 = vld [vmem:[#allocation11 + $0x3b8] sm:$0xf0]  ;;  %v6843_v38 = vld [vmem:[#allocation11 + $0x224] sm:$0xf]  ;;  %v6411_v27 = vld [vmem:[#allocation11 + $0x228] sm:$0xf0] }
 0x49d   :  { %v5143_v33 = vadd.f32 %v5142_v29, %v5094_v21  ;;  %v6414_v17 = vor.u32 %v6843_v38, %v6411_v27  ;;  %v6595_v38 = vld [vmem:[#allocation11 + $0x398] sm:$0xf0] }
 0x49e   :  { %5475 = vmatpush.bf16.msrb.mxu2 %v6550_v11  ;;  %v6891_v11 = vld [vmem:[#allocation11 + $0x3a4] sm:$0xf] }
 0x49f   :  { %5573 = vst [vmem:[#allocation13 + $0x20] sm:$0xff] %v5143_v33  ;;  %5378 = vmatpush.bf16.msrb.mxu0 %v6414_v17 }
 0x4a0   :  { %v5000_v49 = vpop.f32.mrf.mxu0  ;;  %v5049_v7 = vpop.f32.mrf.mxu1 }
 0x4a1   :  { %v5001_v32 = vadd.f32 %v5000_v49, %v9919_v25  ;;  %v6614_v25 = vor.u32 %v6893_v3, %v6611_v40  ;;  %v6861_v49 = vld [vmem:[#allocation11 + $0x2b4] sm:$0xf]  ;;  %v6603_v3 = vld [vmem:[#allocation11 + $0x3a8] sm:$0xf0] }
 0x4a2   :  { %v5095_v2 = vpop.f32.mrf.mxu2  ;;  %v5144_v44 = vpop.f32.mrf.mxu3  ;;  %v6486_v16 = vor.u32 %v6861_v49, %v6483_v46 }
 0x4a3   :  { %v5096_v37 = vadd.f32 %v5095_v2, %v5047_v47  ;;  %v5050_v53 = vadd.f32 %v5049_v7, %v5001_v32  ;;  %5524 = vmatpush.bf16.msrb.mxu3 %v6614_v25  ;;  %v10761_v2 = vld [vmem:[#allocation26_spill] sm:$0xff] }
 0x4a4   :  { %5426 = vmatpush.bf16.msrb.mxu1 %v6486_v16  ;;  %v10765_v16 = vld [vmem:[#allocation39_spill] sm:$0xff] }
 0x4a5   :  { %5195 = vmatmul.bf16.gmra.mxu0 %v10757_v34  ;;  %5244 = vmatmul.bf16.gmra.mxu1 %v10758_v19  ;;  %v5145_v24 = vadd.f32 %v5144_v44, %v5096_v37  ;;  %v10762_v44 = vld [vmem:[#allocation27_spill] sm:$0xff] }
 0x4a7   :  { %5575 = vst [vmem:[#allocation13 + $0x30] sm:$0xff] %v5145_v24  ;;  %5293 = vmatmul.bf16.gmra.mxu2 %v10759_v63  ;;  %5342 = vmatmul.bf16.gmra.mxu3 %v10760_v54  ;;  %v10764_v24 = vld [vmem:[#allocation56_spill] sm:$0xff]  ;;  %v6875_v54 = vld [vmem:[#allocation11 + $0x324] sm:$0xf] }
 0x4a8   :  { %v5002_v15 = vpop.f32.mrf.mxu0  ;;  %v5051_v8 = vpop.f32.mrf.mxu1 }
 0x4a9   :  { %v5003_v21 = vadd.f32 %v5002_v15, %v9950_v61  ;;  %v10763_v61 = vld [vmem:[#allocation55_spill] sm:$0xff]  ;;  %v6539_v15 = vld [vmem:[#allocation11 + $0x328] sm:$0xf0] }
 0x4aa   :  { %v5098_v13 = vpop.f32.mrf.mxu2  ;;  %v5147_v51 = vpop.f32.mrf.mxu3 }
 0x4ab   :  { %v5099_v23 = vadd.f32 %v5098_v13, %v5050_v53  ;;  %v5052_v31 = vadd.f32 %v5051_v8, %v5003_v21  ;;  %v6542_v8 = vor.u32 %v6875_v54, %v6539_v15  ;;  %v6475_v21 = vld [vmem:[#allocation11 + $0x2a8] sm:$0xf0]  ;;  %v6889_v54 = vld [vmem:[#allocation11 + $0x394] sm:$0xf] }
 0x4ad   :  { %v5148_v29 = vadd.f32 %v5147_v51, %v5099_v23  ;;  %5476 = vmatpush.bf16.msrb.mxu2 %v6542_v8 }
 0x4af   :  { %5577 = vst [vmem:[#allocation13 + $0x40] sm:$0xff] %v5148_v29  ;;  %v6859_v29 = vld [vmem:[#allocation11 + $0x2a4] sm:$0xf] }
 0x4b0   :  { %v5005_v33 = vpop.f32.mrf.mxu0  ;;  %v5054_v55 = vpop.f32.mrf.mxu1 }
 0x4b1   :  { %v5006_v37 = vadd.f32 %v5005_v33, %v9978_v6  ;;  %v6606_v6 = vor.u32 %v6891_v11, %v6603_v3  ;;  %v6478_v33 = vor.u32 %v6859_v29, %v6475_v21  ;;  %v10769_v29 = vld [vmem:[#allocation41_spill] sm:$0xff]  ;;  %v10770_v21 = vld [vmem:[#allocation42_spill] sm:$0xff] }
 0x4b2   :  { %v5100_v7 = vpop.f32.mrf.mxu2  ;;  %v5149_v47 = vpop.f32.mrf.mxu3 }
 0x4b3   :  { %v5101_v34 = vadd.f32 %v5100_v7, %v5052_v31  ;;  %v5055_v50 = vadd.f32 %v5054_v55, %v5006_v37  ;;  %5525 = vmatpush.bf16.msrb.mxu3 %v6606_v6  ;;  %v10766_v31 = vld [vmem:[#allocation40_spill] sm:$0xff]  ;;  %5427 = vmatpush.bf16.msrb.mxu1 %v6478_v33  ;;  %v6873_v37 = vld [vmem:[#allocation11 + $0x314] sm:$0xf] }
 0x4b4   :  { %v6857_v6 = vld [vmem:[#allocation11 + $0x294] sm:$0xf] }
 0x4b5   :  { %5200 = vmatmul.bf16.gmra.mxu0 %v10761_v2  ;;  %5249 = vmatmul.bf16.gmra.mxu1 %v10762_v44  ;;  %v5150_v19 = vadd.f32 %v5149_v47, %v5101_v34  ;;  %v10768_v44 = vld [vmem:[#allocation58_spill] sm:$0xff] }
 0x4b7   :  { %5579 = vst [vmem:[#allocation13 + $0x50] sm:$0xff] %v5150_v19  ;;  %5298 = vmatmul.bf16.gmra.mxu2 %v10763_v61  ;;  %5347 = vmatmul.bf16.gmra.mxu3 %v10764_v24  ;;  %v6531_v61 = vld [vmem:[#allocation11 + $0x318] sm:$0xf0] }
 0x4b8   :  { %v5007_v32 = vpop.f32.mrf.mxu0  ;;  %v5056_v63 = vpop.f32.mrf.mxu1  ;;  %v6534_v24 = vor.u32 %v6873_v37, %v6531_v61  ;;  %v6587_v61 = vld [vmem:[#allocation11 + $0x388] sm:$0xf0] }
 0x4b9   :  { %v5008_v51 = vadd.f32 %v5007_v32, %v10004_v20  ;;  %v10767_v20 = vld [vmem:[#allocation57_spill] sm:$0xff] }
 0x4ba   :  { %v5103_v53 = vpop.f32.mrf.mxu2  ;;  %v5152_v1 = vpop.f32.mrf.mxu3  ;;  %v6841_v32 = vld [vmem:[#allocation11 + $0x214] sm:$0xf]  ;;  %5477 = vmatpush.bf16.msrb.mxu2 %v6534_v24 }
 0x4bb   :  { %v5104_v40 = vadd.f32 %v5103_v53, %v5055_v50  ;;  %v5057_v49 = vadd.f32 %v5056_v63, %v5008_v51  ;;  %v6403_v63 = vld [vmem:[#allocation11 + $0x218] sm:$0xf0] }
 0x4bc   :  { %v6406_v8 = vor.u32 %v6841_v32, %v6403_v63 }
 0x4bd   :  { %v5153_v13 = vadd.f32 %v5152_v1, %v5104_v40  ;;  %v6467_v40 = vld [vmem:[#allocation11 + $0x298] sm:$0xf0] }
 0x4be   :  { %5379 = vmatpush.bf16.msrb.mxu0 %v6406_v8 }
 0x4bf   :  { %5581 = vst [vmem:[#allocation13 + $0x60] sm:$0xff] %v5153_v13  ;;  %v6470_v13 = vor.u32 %v6857_v6, %v6467_v40 }
 0x4c0   :  { %v5010_v25 = vpop.f32.mrf.mxu0  ;;  %v5059_v23 = vpop.f32.mrf.mxu1 }
 0x4c1   :  { %v5011_v2 = vadd.f32 %v5010_v25, %v10035_v52  ;;  %v6598_v52 = vor.u32 %v6889_v54, %v6595_v38  ;;  %5428 = vmatpush.bf16.msrb.mxu1 %v6470_v13 }
 0x4c2   :  { %v5105_v55 = vpop.f32.mrf.mxu2  ;;  %v5154_v46 = vpop.f32.mrf.mxu3 }
 0x4c3   :  { %v5106_v7 = vadd.f32 %v5105_v55, %v5057_v49  ;;  %v5060_v15 = vadd.f32 %v5059_v23, %v5011_v2  ;;  %5526 = vmatpush.bf16.msrb.mxu3 %v6598_v52 }
 0x4c5   :  { %5205 = vmatmul.bf16.gmra.mxu0 %v10765_v16  ;;  %5254 = vmatmul.bf16.gmra.mxu1 %v10766_v31  ;;  %v5155_v47 = vadd.f32 %v5154_v46, %v5106_v7  ;;  %v10772_v46 = vld [vmem:[#allocation37_spill] sm:$0xff]  ;;  %v6871_v7 = vld [vmem:[#allocation11 + $0x304] sm:$0xf] }
 0x4c7   :  { %5583 = vst [vmem:[#allocation13 + $0x70] sm:$0xff] %v5155_v47  ;;  %5303 = vmatmul.bf16.gmra.mxu2 %v10767_v20  ;;  %5352 = vmatmul.bf16.gmra.mxu3 %v10768_v44  ;;  %v6523_v47 = vld [vmem:[#allocation11 + $0x308] sm:$0xf0]  ;;  %v6839_v20 = vld [vmem:[#allocation11 + $0x204] sm:$0xf] }
 0x4c8   :  { %v5012_v34 = vpop.f32.mrf.mxu0  ;;  %v5061_v19 = vpop.f32.mrf.mxu1  ;;  %v6526_v2 = vor.u32 %v6871_v7, %v6523_v47  ;;  %v6395_v44 = vld [vmem:[#allocation11 + $0x208] sm:$0xf0] }
 0x4c9   :  { %v5013_v3 = vadd.f32 %v5012_v34, %v10057_v14  ;;  %v10771_v14 = vld [vmem:[#allocation21_spill] sm:$0xff]  ;;  %v6887_v34 = vld [vmem:[#allocation11 + $0x384] sm:$0xf]  ;;  %v6398_v37 = vor.u32 %v6839_v20, %v6395_v44 }
 0x4ca   :  { %v5108_v27 = vpop.f32.mrf.mxu2  ;;  %v5157_v11 = vpop.f32.mrf.mxu3  ;;  %5478 = vmatpush.bf16.msrb.mxu2 %v6526_v2  ;;  %v10777_v44 = vld [vmem:[#allocation77_spill] sm:$0xff] }
 0x4cb   :  { %v5109_v50 = vadd.f32 %v5108_v27, %v5060_v15  ;;  %v5062_v51 = vadd.f32 %v5061_v19, %v5013_v3  ;;  %5380 = vmatpush.bf16.msrb.mxu0 %v6398_v37  ;;  %v6855_v27 = vld [vmem:[#allocation11 + $0x284] sm:$0xf] }
 0x4cd   :  { %v5158_v17 = vadd.f32 %v5157_v11, %v5109_v50  ;;  %v6459_v11 = vld [vmem:[#allocation11 + $0x288] sm:$0xf0] }
 0x4ce   :  { %v6462_v52 = vor.u32 %v6855_v27, %v6459_v11 }
 0x4cf   :  { %5585 = vst [vmem:[#allocation13 + $0x80] sm:$0xff] %v5158_v17 }
 0x4d0   :  { %5429 = vmatpush.bf16.msrb.mxu1 %v6462_v52  ;;  %v10779_v52 = vld [vmem:[#allocation80_spill] sm:$0xff] }
 0x4d1   :  { %v5015_v53 = vpop.f32.mrf.mxu0  ;;  %v5064_v1 = vpop.f32.mrf.mxu1 }
 0x4d2   :  { %v5110_v25 = vpop.f32.mrf.mxu2  ;;  %v5159_v23 = vpop.f32.mrf.mxu3  ;;  %v5016_v55 = vadd.f32 %v5015_v53, %v10081_v59  ;;  %v6590_v59 = vor.u32 %v6887_v34, %v6587_v61  ;;  %v10773_v53 = vld [vmem:[#allocation47_spill] sm:$0xff]  ;;  %v10778_v34 = vld [vmem:[#allocation20_spill] sm:$0xff] }
 0x4d3   :  { %v5111_v33 = vadd.f32 %v5110_v25, %v5062_v51  ;;  %v10776_v51 = vld [vmem:[#allocation35_spill] sm:$0xff] }
 0x4d4   :  { %v5065_v19 = vadd.f32 %v5064_v1, %v5016_v55  ;;  %5527 = vmatpush.bf16.msrb.mxu3 %v6590_v59  ;;  %v10774_v1 = vld [vmem:[#allocation45_spill] sm:$0xff] }
 0x4d5   :  { %5210 = vmatmul.bf16.gmra.mxu0 %v10769_v29  ;;  %5259 = vmatmul.bf16.gmra.mxu1 %v10770_v21  ;;  %v5160_v49 = vadd.f32 %v5159_v23, %v5111_v33 }
 0x4d7   :  { %5587 = vst [vmem:[#allocation13 + $0x90] sm:$0xff] %v5160_v49  ;;  %5308 = vmatmul.bf16.gmra.mxu2 %v10771_v14  ;;  %5357 = vmatmul.bf16.gmra.mxu3 %v10772_v46 }
 0x4d9   :  { %v5017_v16 = vpop.f32.mrf.mxu0  ;;  %v5066_v31 = vpop.f32.mrf.mxu1 }
 0x4da   :  { %v5113_v24 = vpop.f32.mrf.mxu2  ;;  %v5162_v32 = vpop.f32.mrf.mxu3  ;;  %v5018_v15 = vadd.f32 %v5017_v16, %v10096_v22  ;;  %v10775_v22 = vld [vmem:[#allocation34_spill] sm:$0xff] }
 0x4db   :  { %v5114_v63 = vadd.f32 %v5113_v24, %v5065_v19 }
 0x4dc   :  { %v5067_v50 = vadd.f32 %v5066_v31, %v5018_v15 }
 0x4dd   :  { %v5163_v54 = vadd.f32 %v5162_v32, %v5114_v63 }
 0x4df   :  { %5589 = vst [vmem:[#allocation13 + $0xa0] sm:$0xff] %v5163_v54 }
 0x4e2   :  { %v5020_v8 = vpop.f32.mrf.mxu0  ;;  %v5069_v38 = vpop.f32.mrf.mxu1 }
 0x4e3   :  { %v5115_v17 = vpop.f32.mrf.mxu2  ;;  %v5164_v3 = vpop.f32.mrf.mxu3  ;;  %v5021_v13 = vadd.f32 %v5020_v8, %v10113_v28 }
 0x4e4   :  { %v5116_v6 = vadd.f32 %v5115_v17, %v5067_v50  ;;  %v10780_v50 = vld [vmem:[#allocation81_spill] sm:$0xff] }
 0x4e5   :  { %5215 = vmatmul.bf16.gmra.mxu0 %v10773_v53  ;;  %5264 = vmatmul.bf16.gmra.mxu1 %v10774_v1  ;;  %v5070_v29 = vadd.f32 %v5069_v38, %v5021_v13  ;;  %v10781_v53 = vld [vmem:[#allocation66_spill] sm:$0xff]  ;;  %v10782_v1 = vld [vmem:[#allocation23_spill] sm:$0xff] }
 0x4e6   :  { %v5165_v40 = vadd.f32 %v5164_v3, %v5116_v6 }
 0x4e7   :  { %5313 = vmatmul.bf16.gmra.mxu2 %v10775_v22  ;;  %5362 = vmatmul.bf16.gmra.mxu3 %v10776_v51 }
 0x4e8   :  { %5591 = vst [vmem:[#allocation13 + $0xb0] sm:$0xff] %v5165_v40 }
 0x4ea   :  { %v5022_v25 = vpop.f32.mrf.mxu0  ;;  %v5071_v23 = vpop.f32.mrf.mxu1 }
 0x4eb   :  { %v5118_v21 = vpop.f32.mrf.mxu2  ;;  %v5167_v33 = vpop.f32.mrf.mxu3  ;;  %v5023_v14 = vadd.f32 %v5022_v25, %v10120_v9 }
 0x4ec   :  { %v5119_v49 = vadd.f32 %v5118_v21, %v5070_v29 }
 0x4ed   :  { %v5072_v31 = vadd.f32 %v5071_v23, %v5023_v14 }
 0x4ee   :  { %v5168_v55 = vadd.f32 %v5167_v33, %v5119_v49 }
 0x4f0   :  { %5593 = vst [vmem:[#allocation13 + $0xc0] sm:$0xff] %v5168_v55 }
 0x4f2   :  { %v5025_v46 = vpop.f32.mrf.mxu0  ;;  %v5074_v16 = vpop.f32.mrf.mxu1 }
 0x4f3   :  { %v5120_v7 = vpop.f32.mrf.mxu2  ;;  %v5169_v28 = vpop.f32.mrf.mxu3  ;;  %v5026_v20 = vadd.f32 %v5025_v46, %v10127_v30  ;;  %v10783_v46 = vld [vmem:[#allocation86_spill] sm:$0xff] }
 0x4f4   :  { %v5121_v47 = vadd.f32 %v5120_v7, %v5072_v31 }
 0x4f5   :  { %5220 = vmatmul.bf16.gmra.mxu0 %v10670_v36  ;;  %5269 = vmatmul.bf16.gmra.mxu1 %v10671_v48  ;;  %v5075_v37 = vadd.f32 %v5074_v16, %v5026_v20  ;;  %v7467_v36 = vld [vmem:[%s10292_s6] sm:$0x3]  ;;  %v10784_v16 = vld [vmem:[#allocation38_spill] sm:$0xff]  ;;  %s7660_s6 = smov [#allocation13]  }
 0x4f6   :  { %v5170_v2 = vadd.f32 %v5169_v28, %v5121_v47  ;;  %v10181_v48 = vperm.slane %v7467_v36, 1  ;;  %v10785_v28 = vld [vmem:[#allocation36_spill] sm:$0xff]  ;;  %v10786_v47 = vld [vmem:[#allocation22_spill] sm:$0xff]  ;;  %s5605_s12 = sshll.u32 %s7660_s6, 4  ;;  %s5606_s12 = int_to_ptr.vmem [resolvable:$true] %s5605_s12 }
 0x4f7   :  { %5318 = vmatmul.bf16.gmra.mxu2 %v10777_v44  ;;  %5367 = vmatmul.bf16.gmra.mxu3 %v10778_v34 }
 0x4f8   :  { %5595 = vst [vmem:[#allocation13 + $0xd0] sm:$0xff] %v5170_v2 }
 0x4fa   :  { %v5027_v9 = vpop.f32.mrf.mxu0  ;;  %v5076_v19 = vpop.f32.mrf.mxu1 }
 0x4fb   :  { %v5123_v61 = vpop.f32.mrf.mxu2  ;;  %v5172_v24 = vpop.f32.mrf.mxu3  ;;  %v5028_v30 = vadd.f32 %v5027_v9, %v10129_v56 }
 0x4fc   :  { %v5124_v32 = vadd.f32 %v5123_v61, %v5075_v37 }
 0x4fd   :  { %v5077_v8 = vadd.f32 %v5076_v19, %v5028_v30 }
 0x4fe   :  { %v5173_v59 = vadd.f32 %v5172_v24, %v5124_v32 }
 0x500   :  { %5597 = vst [vmem:[#allocation13 + $0xe0] sm:$0xff] %v5173_v59 }
 0x502   :  { %v5186_v63 = vpop.f32.mrf.mxu0  ;;  %v5235_v54 = vpop.f32.mrf.mxu1 }
 0x503   :  { %v5187_v15 = vadd.f32 %v5186_v63, %v10181_v48  ;;  %v5125_v38 = vpop.f32.mrf.mxu2  ;;  %v5174_v27 = vpop.f32.mrf.mxu3 }
 0x504   :  { %v5126_v17 = vadd.f32 %v5125_v38, %v5077_v8 }
 0x505   :  { %v5236_v11 = vadd.f32 %v5235_v54, %v5187_v15  ;;  %5381 = vmatmul.bf16.vlgmr.msrb.gmra.mxu0 %v10779_v52  ;;  %5430 = vmatmul.bf16.vlgmr.msrb.gmra.mxu1 %v10780_v50  ;;  %v10787_v54 = vld [vmem:[#allocation33_spill] sm:$0xff]  ;;  %v10788_v15 = vld [vmem:[#allocation90_spill] sm:$0xff] }
 0x506   :  { %v5175_v3 = vadd.f32 %v5174_v27, %v5126_v17  ;;  %v10789_v27 = vld [vmem:[#allocation28_spill] sm:$0xff] }
 0x507   :  { %5479 = vmatmul.bf16.vlgmr.msrb.gmra.mxu2 %v10781_v53  ;;  %5528 = vmatmul.bf16.vlgmr.msrb.gmra.mxu3 %v10782_v1 }
 0x508   :  { %5599 = vst [vmem:[#allocation13 + $0xf0] sm:$0xff] %v5175_v3 }
 0x50a   :  { %v5188_v56 = vpop.f32.mrf.mxu0  ;;  %v5237_v6 = vpop.f32.mrf.mxu1 }
 0x50b   :  { %v5189_v40 = vadd.f32 %v5188_v56, %v10181_v48  ;;  %v5284_v13 = vpop.f32.mrf.mxu2  ;;  %v5333_v22 = vpop.f32.mrf.mxu3 }
 0x50c   :  { %v5285_v25 = vadd.f32 %v5284_v13, %v5236_v11  ;;  %v10790_v11 = vld [vmem:[#allocation62_spill] sm:$0xff] }
 0x50d   :  { %v5238_v51 = vadd.f32 %v5237_v6, %v5189_v40 }
 0x50e   :  { %v10190_v23 = vadd.f32 %v5333_v22, %v5285_v25 }
 0x512   :  { %v5191_v29 = vpop.f32.mrf.mxu0  ;;  %v5240_v21 = vpop.f32.mrf.mxu1 }
 0x513   :  { %v5192_v33 = vadd.f32 %v5191_v29, %v10181_v48  ;;  %v5286_v49 = vpop.f32.mrf.mxu2  ;;  %v5335_v55 = vpop.f32.mrf.mxu3 }
 0x514   :  { %v5287_v31 = vadd.f32 %v5286_v49, %v5238_v51  ;;  %v10791_v49 = vld [vmem:[#allocation88_spill] sm:$0xff] }
 0x515   :  { %v5241_v14 = vadd.f32 %v5240_v21, %v5192_v33  ;;  %5386 = vmatmul.bf16.gmra.mxu0 %v10783_v46  ;;  %5435 = vmatmul.bf16.gmra.mxu1 %v10784_v16 }
 0x516   :  { %v10195_v7 = vadd.f32 %v5335_v55, %v5287_v31 }
 0x517   :  { %5484 = vmatmul.bf16.gmra.mxu2 %v10785_v28  ;;  %5533 = vmatmul.bf16.gmra.mxu3 %v10786_v47 }
 0x51a   :  { %v5193_v2 = vpop.f32.mrf.mxu0  ;;  %v5242_v20 = vpop.f32.mrf.mxu1 }
 0x51b   :  { %v5194_v44 = vadd.f32 %v5193_v2, %v10181_v48  ;;  %v5289_v34 = vpop.f32.mrf.mxu2  ;;  %v5338_v9 = vpop.f32.mrf.mxu3 }
 0x51c   :  { %v5290_v37 = vadd.f32 %v5289_v34, %v5241_v14 }
 0x51d   :  { %v5243_v19 = vadd.f32 %v5242_v20, %v5194_v44 }
 0x51e   :  { %v10200_v61 = vadd.f32 %v5338_v9, %v5290_v37  ;;  %v10792_v37 = vld [vmem:[#allocation83_spill] sm:$0xff] }
 0x522   :  { %v5196_v24 = vpop.f32.mrf.mxu0  ;;  %v5245_v32 = vpop.f32.mrf.mxu1 }
 0x523   :  { %v5197_v36 = vadd.f32 %v5196_v24, %v10181_v48  ;;  %v5291_v59 = vpop.f32.mrf.mxu2  ;;  %v5340_v30 = vpop.f32.mrf.mxu3 }
 0x524   :  { %v5292_v8 = vadd.f32 %v5291_v59, %v5243_v19 }
 0x525   :  { %v5246_v63 = vadd.f32 %v5245_v32, %v5197_v36  ;;  %5391 = vmatmul.bf16.gmra.mxu0 %v10787_v54  ;;  %5440 = vmatmul.bf16.gmra.mxu1 %v10788_v15 }
 0x526   :  { %v10205_v38 = vadd.f32 %v5340_v30, %v5292_v8 }
 0x527   :  { %5489 = vmatmul.bf16.gmra.mxu2 %v10789_v27  ;;  %5538 = vmatmul.bf16.gmra.mxu3 %v10790_v11 }
 0x52a   :  { %v5198_v52 = vpop.f32.mrf.mxu0  ;;  %v5247_v50 = vpop.f32.mrf.mxu1 }
 0x52b   :  { %v5199_v17 = vadd.f32 %v5198_v52, %v10181_v48  ;;  %v5294_v3 = vpop.f32.mrf.mxu2  ;;  %v5343_v53 = vpop.f32.mrf.mxu3 }
 0x52c   :  { %v5295_v56 = vadd.f32 %v5294_v3, %v5246_v63 }
 0x52d   :  { %v5248_v1 = vadd.f32 %v5247_v50, %v5199_v17  ;;  %v10793_v17 = vld [vmem:[#allocation76_spill] sm:$0xff] }
 0x52e   :  { %v10210_v6 = vadd.f32 %v5343_v53, %v5295_v56 }
 0x532   :  { %v5201_v40 = vpop.f32.mrf.mxu0  ;;  %v5250_v13 = vpop.f32.mrf.mxu1 }
 0x533   :  { %v5202_v22 = vadd.f32 %v5201_v40, %v10181_v48  ;;  %v5296_v51 = vpop.f32.mrf.mxu2  ;;  %v5345_v25 = vpop.f32.mrf.mxu3 }
 0x534   :  { %v5297_v21 = vadd.f32 %v5296_v51, %v5248_v1 }
 0x535   :  { %v5251_v29 = vadd.f32 %v5250_v13, %v5202_v22  ;;  %5396 = vmatmul.bf16.gmra.mxu0 %v9738_v35  ;;  %5445 = vmatmul.bf16.gmra.mxu1 %v9744_v0 }
 0x536   :  { %v10215_v33 = vadd.f32 %v5345_v25, %v5297_v21 }
 0x537   :  { %5494 = vmatmul.bf16.gmra.mxu2 %v9926_v45  ;;  %5543 = vmatmul.bf16.gmra.mxu3 %v10791_v49 }
 0x53a   :  { %v5203_v55 = vpop.f32.mrf.mxu0  ;;  %v5252_v14 = vpop.f32.mrf.mxu1 }
 0x53b   :  { %v5204_v46 = vadd.f32 %v5203_v55, %v10181_v48  ;;  %v5299_v16 = vpop.f32.mrf.mxu2  ;;  %v5348_v31 = vpop.f32.mrf.mxu3 }
 0x53c   :  { %v5300_v47 = vadd.f32 %v5299_v16, %v5251_v29 }
 0x53d   :  { %v5253_v28 = vadd.f32 %v5252_v14, %v5204_v46 }
 0x53e   :  { %v10220_v2 = vadd.f32 %v5348_v31, %v5300_v47 }
 0x542   :  { %v5206_v35 = vpop.f32.mrf.mxu0  ;;  %v5255_v20 = vpop.f32.mrf.mxu1 }
 0x543   :  { %v5207_v0 = vadd.f32 %v5206_v35, %v10181_v48  ;;  %v5301_v44 = vpop.f32.mrf.mxu2  ;;  %v5350_v34 = vpop.f32.mrf.mxu3 }
 0x544   :  { %v5302_v45 = vadd.f32 %v5301_v44, %v5253_v28 }
 0x545   :  { %v5256_v9 = vadd.f32 %v5255_v20, %v5207_v0  ;;  %5401 = vmatmul.bf16.gmra.mxu0 %v9944_v18  ;;  %5450 = vmatmul.bf16.gmra.mxu1 %v9947_v5 }
 0x546   :  { %v10225_v19 = vadd.f32 %v5350_v34, %v5302_v45 }
 0x547   :  { %5499 = vmatmul.bf16.gmra.mxu2 %v9980_v4  ;;  %5548 = vmatmul.bf16.gmra.mxu3 %v10792_v37 }
 0x54a   :  { %v5208_v24 = vpop.f32.mrf.mxu0  ;;  %v5257_v32 = vpop.f32.mrf.mxu1 }
 0x54b   :  { %v5209_v36 = vadd.f32 %v5208_v24, %v10181_v48  ;;  %v5304_v59 = vpop.f32.mrf.mxu2  ;;  %v5353_v30 = vpop.f32.mrf.mxu3 }
 0x54c   :  { %v5305_v54 = vadd.f32 %v5304_v59, %v5256_v9 }
 0x54d   :  { %v5258_v63 = vadd.f32 %v5257_v32, %v5209_v36 }
 0x54e   :  { %v10230_v15 = vadd.f32 %v5353_v30, %v5305_v54 }
 0x552   :  { %v5211_v18 = vpop.f32.mrf.mxu0  ;;  %v5260_v8 = vpop.f32.mrf.mxu1 }
 0x553   :  { %v5212_v5 = vadd.f32 %v5211_v18, %v10181_v48  ;;  %v5306_v27 = vpop.f32.mrf.mxu2  ;;  %v5355_v11 = vpop.f32.mrf.mxu3 }
 0x554   :  { %v5307_v4 = vadd.f32 %v5306_v27, %v5258_v63 }
 0x555   :  { %v5261_v52 = vadd.f32 %v5260_v8, %v5212_v5  ;;  %5406 = vmatmul.bf16.gmra.mxu0 %v9999_v57  ;;  %5455 = vmatmul.bf16.gmra.mxu1 %v10001_v62 }
 0x556   :  { %v10235_v50 = vadd.f32 %v5355_v11, %v5307_v4 }
 0x557   :  { %5504 = vmatmul.bf16.gmra.mxu2 %v10039_v39  ;;  %5553 = vmatmul.bf16.gmra.mxu3 %v10793_v17 }
 0x55a   :  { %v5213_v3 = vpop.f32.mrf.mxu0  ;;  %v5262_v53 = vpop.f32.mrf.mxu1 }
 0x55b   :  { %v5214_v1 = vadd.f32 %v5213_v3, %v10181_v48  ;;  %v5309_v56 = vpop.f32.mrf.mxu2  ;;  %v5358_v40 = vpop.f32.mrf.mxu3 }
 0x55c   :  { %v5310_v22 = vadd.f32 %v5309_v56, %v5261_v52 }
 0x55d   :  { %v5263_v13 = vadd.f32 %v5262_v53, %v5214_v1 }
 0x55e   :  { %v10240_v51 = vadd.f32 %v5358_v40, %v5310_v22 }
 0x562   :  { %v5216_v57 = vpop.f32.mrf.mxu0  ;;  %v5265_v25 = vpop.f32.mrf.mxu1 }
 0x563   :  { %v5217_v62 = vadd.f32 %v5216_v57, %v10181_v48  ;;  %v5311_v29 = vpop.f32.mrf.mxu2  ;;  %v5360_v21 = vpop.f32.mrf.mxu3 }
 0x564   :  { %v5312_v39 = vadd.f32 %v5311_v29, %v5263_v13 }
 0x565   :  { %v5266_v49 = vadd.f32 %v5265_v25, %v5217_v62  ;;  %5411 = vmatmul.bf16.gmra.mxu0 %v10059_v26  ;;  %5460 = vmatmul.bf16.gmra.mxu1 %v10061_v12 }
 0x566   :  { %v10245_v55 = vadd.f32 %v5360_v21, %v5312_v39 }
 0x567   :  { %5509 = vmatmul.bf16.gmra.mxu2 %v10084_v42  ;;  %5558 = vmatmul.bf16.gmra.mxu3 %v10086_v58 }
 0x56a   :  { %v5218_v14 = vpop.f32.mrf.mxu0  ;;  %v5267_v46 = vpop.f32.mrf.mxu1 }
 0x56b   :  { %v5219_v16 = vadd.f32 %v5218_v14, %v10181_v48  ;;  %v5314_v31 = vpop.f32.mrf.mxu2  ;;  %v5363_v28 = vpop.f32.mrf.mxu3 }
 0x56c   :  { %v5315_v35 = vadd.f32 %v5314_v31, %v5266_v49 }
 0x56d   :  { %v5268_v47 = vadd.f32 %v5267_v46, %v5219_v16 }
 0x56e   :  { %v10250_v20 = vadd.f32 %v5363_v28, %v5315_v35 }
 0x572   :  { %v5221_v26 = vpop.f32.mrf.mxu0  ;;  %v5270_v0 = vpop.f32.mrf.mxu1 }
 0x573   :  { %v5222_v12 = vadd.f32 %v5221_v26, %v10181_v48  ;;  %v5316_v44 = vpop.f32.mrf.mxu2  ;;  %v5365_v34 = vpop.f32.mrf.mxu3 }
 0x574   :  { %v5317_v42 = vadd.f32 %v5316_v44, %v5268_v47 }
 0x575   :  { %v5271_v9 = vadd.f32 %v5270_v0, %v5222_v12  ;;  %5416 = vmatmul.bf16.gmra.mxu0 %v10101_v60  ;;  %5465 = vmatmul.bf16.gmra.mxu1 %v10103_v10 }
 0x576   :  { %v10255_v58 = vadd.f32 %v5365_v34, %v5317_v42 }
 0x577   :  { %5514 = vmatmul.bf16.gmra.mxu2 %v10115_v43  ;;  %5563 = vmatmul.bf16.gmra.mxu3 %v10117_v41 }
 0x57a   :  { %v5223_v45 = vpop.f32.mrf.mxu0  ;;  %v5272_v37 = vpop.f32.mrf.mxu1 }
 0x57b   :  { %v5224_v24 = vadd.f32 %v5223_v45, %v10181_v48  ;;  %v5319_v32 = vpop.f32.mrf.mxu2  ;;  %v5368_v36 = vpop.f32.mrf.mxu3 }
 0x57c   :  { %v5320_v30 = vadd.f32 %v5319_v32, %v5271_v9 }
 0x57d   :  { %v5273_v59 = vadd.f32 %v5272_v37, %v5224_v24 }
 0x57e   :  { %v10260_v63 = vadd.f32 %v5368_v36, %v5320_v30 }
 0x582   :  { %v5382_v60 = vpop.f32.mrf.mxu0  ;;  %v5431_v54 = vpop.f32.mrf.mxu1 }
 0x583   :  { %v5321_v10 = vpop.f32.mrf.mxu2  ;;  %v5370_v18 = vpop.f32.mrf.mxu3  ;;  %v5383_v43 = vadd.f32 %v5382_v60, %v10190_v23 }
 0x584   :  { %v5322_v8 = vadd.f32 %v5321_v10, %v5273_v59 }
 0x585   :  { %v5432_v11 = vadd.f32 %v5431_v54, %v5383_v43 }
 0x586   :  { %v10262_v5 = vadd.f32 %v5370_v18, %v5322_v8 }
 0x58a   :  { %v5384_v41 = vpop.f32.mrf.mxu0  ;;  %v5433_v27 = vpop.f32.mrf.mxu1 }
 0x58b   :  { %v5480_v52 = vpop.f32.mrf.mxu2  ;;  %v5529_v48 = vpop.f32.mrf.mxu3  ;;  %v5385_v3 = vadd.f32 %v5384_v41, %v10195_v7 }
 0x58c   :  { %v5481_v4 = vadd.f32 %v5480_v52, %v5432_v11 }
 0x58d   :  { %v5434_v56 = vadd.f32 %v5433_v27, %v5385_v3 }
 0x58e   :  { %v5530_v17 = vadd.f32 %v5529_v48, %v5481_v4 }
 0x590   :  { %5570 = vst [vmem:[#allocation13 + $0x8] sm:$0xff] %v5530_v17 }
 0x592   :  { %v5387_v53 = vpop.f32.mrf.mxu0  ;;  %v5436_v1 = vpop.f32.mrf.mxu1 }
 0x593   :  { %v5482_v40 = vpop.f32.mrf.mxu2  ;;  %v5531_v13 = vpop.f32.mrf.mxu3  ;;  %v5388_v25 = vadd.f32 %v5387_v53, %v10200_v61 }
 0x594   :  { %v5483_v22 = vadd.f32 %v5482_v40, %v5434_v56 }
 0x595   :  { %v5437_v29 = vadd.f32 %v5436_v1, %v5388_v25 }
 0x596   :  { %v5532_v57 = vadd.f32 %v5531_v13, %v5483_v22 }
 0x598   :  { %5572 = vst [vmem:[#allocation13 + $0x18] sm:$0xff] %v5532_v57 }
 0x59a   :  { %v5389_v23 = vpop.f32.mrf.mxu0  ;;  %v5438_v62 = vpop.f32.mrf.mxu1 }
 0x59b   :  { %v5485_v21 = vpop.f32.mrf.mxu2  ;;  %v5534_v49 = vpop.f32.mrf.mxu3  ;;  %v5390_v7 = vadd.f32 %v5389_v23, %v10205_v38 }
 0x59c   :  { %v5486_v39 = vadd.f32 %v5485_v21, %v5437_v29 }
 0x59d   :  { %v5439_v31 = vadd.f32 %v5438_v62, %v5390_v7 }
 0x59e   :  { %v5535_v14 = vadd.f32 %v5534_v49, %v5486_v39 }
 0x5a0   :  { %5574 = vst [vmem:[#allocation13 + $0x28] sm:$0xff] %v5535_v14 }
 0x5a2   :  { %v5392_v46 = vpop.f32.mrf.mxu0  ;;  %v5441_v16 = vpop.f32.mrf.mxu1 }
 0x5a3   :  { %v5487_v28 = vpop.f32.mrf.mxu2  ;;  %v5536_v47 = vpop.f32.mrf.mxu3  ;;  %v5393_v61 = vadd.f32 %v5392_v46, %v10210_v6 }
 0x5a4   :  { %v5488_v35 = vadd.f32 %v5487_v28, %v5439_v31 }
 0x5a5   :  { %v5442_v44 = vadd.f32 %v5441_v16, %v5393_v61 }
 0x5a6   :  { %v5537_v26 = vadd.f32 %v5536_v47, %v5488_v35 }
 0x5a8   :  { %5576 = vst [vmem:[#allocation13 + $0x38] sm:$0xff] %v5537_v26 }
 0x5aa   :  { %v5394_v0 = vpop.f32.mrf.mxu0  ;;  %v5443_v12 = vpop.f32.mrf.mxu1 }
 0x5ab   :  { %v5490_v34 = vpop.f32.mrf.mxu2  ;;  %v5539_v9 = vpop.f32.mrf.mxu3  ;;  %v5395_v38 = vadd.f32 %v5394_v0, %v10215_v33 }
 0x5ac   :  { %v5491_v42 = vadd.f32 %v5490_v34, %v5442_v44 }
 0x5ad   :  { %v5444_v32 = vadd.f32 %v5443_v12, %v5395_v38 }
 0x5ae   :  { %v5540_v45 = vadd.f32 %v5539_v9, %v5491_v42 }
 0x5b0   :  { %5578 = vst [vmem:[#allocation13 + $0x48] sm:$0xff] %v5540_v45 }
 0x5b2   :  { %v5397_v37 = vpop.f32.mrf.mxu0  ;;  %v5446_v24 = vpop.f32.mrf.mxu1 }
 0x5b3   :  { %v5492_v36 = vpop.f32.mrf.mxu2  ;;  %v5541_v59 = vpop.f32.mrf.mxu3  ;;  %v5398_v6 = vadd.f32 %v5397_v37, %v10220_v2 }
 0x5b4   :  { %v5493_v30 = vadd.f32 %v5492_v36, %v5444_v32 }
 0x5b5   :  { %v5447_v18 = vadd.f32 %v5446_v24, %v5398_v6 }
 0x5b6   :  { %v5542_v60 = vadd.f32 %v5541_v59, %v5493_v30 }
 0x5b8   :  { %5580 = vst [vmem:[#allocation13 + $0x58] sm:$0xff] %v5542_v60 }
 0x5ba   :  { %v5399_v54 = vpop.f32.mrf.mxu0  ;;  %v5448_v10 = vpop.f32.mrf.mxu1 }
 0x5bb   :  { %v5495_v8 = vpop.f32.mrf.mxu2  ;;  %v5544_v43 = vpop.f32.mrf.mxu3  ;;  %v5400_v33 = vadd.f32 %v5399_v54, %v10225_v19 }
 0x5bc   :  { %v5496_v41 = vadd.f32 %v5495_v8, %v5447_v18 }
 0x5bd   :  { %v5449_v48 = vadd.f32 %v5448_v10, %v5400_v33 }
 0x5be   :  { %v5545_v27 = vadd.f32 %v5544_v43, %v5496_v41 }
 0x5c0   :  { %5582 = vst [vmem:[#allocation13 + $0x68] sm:$0xff] %v5545_v27 }
 0x5c2   :  { %v5402_v11 = vpop.f32.mrf.mxu0  ;;  %v5451_v52 = vpop.f32.mrf.mxu1 }
 0x5c3   :  { %v5497_v4 = vpop.f32.mrf.mxu2  ;;  %v5546_v17 = vpop.f32.mrf.mxu3  ;;  %v5403_v2 = vadd.f32 %v5402_v11, %v10230_v15 }
 0x5c4   :  { %v5498_v3 = vadd.f32 %v5497_v4, %v5449_v48 }
 0x5c5   :  { %v5452_v40 = vadd.f32 %v5451_v52, %v5403_v2 }
 0x5c6   :  { %v5547_v53 = vadd.f32 %v5546_v17, %v5498_v3 }
 0x5c8   :  { %5584 = vst [vmem:[#allocation13 + $0x78] sm:$0xff] %v5547_v53 }
 0x5ca   :  { %v5404_v1 = vpop.f32.mrf.mxu0  ;;  %v5453_v56 = vpop.f32.mrf.mxu1 }
 0x5cb   :  { %v5500_v13 = vpop.f32.mrf.mxu2  ;;  %v5549_v22 = vpop.f32.mrf.mxu3  ;;  %v5405_v19 = vadd.f32 %v5404_v1, %v10235_v50 }
 0x5cc   :  { %v5501_v57 = vadd.f32 %v5500_v13, %v5452_v40 }
 0x5cd   :  { %v5454_v29 = vadd.f32 %v5453_v56, %v5405_v19 }
 0x5ce   :  { %v5550_v25 = vadd.f32 %v5549_v22, %v5501_v57 }
 0x5d0   :  { %5586 = vst [vmem:[#allocation13 + $0x88] sm:$0xff] %v5550_v25 }
 0x5d2   :  { %v5407_v23 = vpop.f32.mrf.mxu0  ;;  %v5456_v62 = vpop.f32.mrf.mxu1 }
 0x5d3   :  { %v5502_v21 = vpop.f32.mrf.mxu2  ;;  %v5551_v49 = vpop.f32.mrf.mxu3  ;;  %v5408_v15 = vadd.f32 %v5407_v23, %v10240_v51 }
 0x5d4   :  { %v5503_v39 = vadd.f32 %v5502_v21, %v5454_v29 }
 0x5d5   :  { %v5457_v16 = vadd.f32 %v5456_v62, %v5408_v15 }
 0x5d6   :  { %v5552_v14 = vadd.f32 %v5551_v49, %v5503_v39 }
 0x5d8   :  { %5588 = vst [vmem:[#allocation13 + $0x98] sm:$0xff] %v5552_v14 }
 0x5da   :  { %v5409_v7 = vpop.f32.mrf.mxu0  ;;  %v5458_v46 = vpop.f32.mrf.mxu1 }
 0x5db   :  { %v5505_v31 = vpop.f32.mrf.mxu2  ;;  %v5554_v28 = vpop.f32.mrf.mxu3  ;;  %v5410_v50 = vadd.f32 %v5409_v7, %v10245_v55 }
 0x5dc   :  { %v5506_v47 = vadd.f32 %v5505_v31, %v5457_v16 }
 0x5dd   :  { %v5459_v61 = vadd.f32 %v5458_v46, %v5410_v50 }
 0x5de   :  { %v5555_v35 = vadd.f32 %v5554_v28, %v5506_v47 }
 0x5e0   :  { %5590 = vst [vmem:[#allocation13 + $0xa8] sm:$0xff] %v5555_v35 }
 0x5e2   :  { %v5412_v26 = vpop.f32.mrf.mxu0  ;;  %v5461_v0 = vpop.f32.mrf.mxu1 }
 0x5e3   :  { %v5507_v12 = vpop.f32.mrf.mxu2  ;;  %v5556_v44 = vpop.f32.mrf.mxu3  ;;  %v5413_v51 = vadd.f32 %v5412_v26, %v10250_v20 }
 0x5e4   :  { %v5508_v34 = vadd.f32 %v5507_v12, %v5459_v61 }
 0x5e5   :  { %v5462_v45 = vadd.f32 %v5461_v0, %v5413_v51 }
 0x5e6   :  { %v5557_v9 = vadd.f32 %v5556_v44, %v5508_v34 }
 0x5e8   :  { %5592 = vst [vmem:[#allocation13 + $0xb8] sm:$0xff] %v5557_v9 }
 0x5ea   :  { %v5414_v42 = vpop.f32.mrf.mxu0  ;;  %v5463_v32 = vpop.f32.mrf.mxu1 }
 0x5eb   :  { %v5510_v38 = vpop.f32.mrf.mxu2  ;;  %v5559_v37 = vpop.f32.mrf.mxu3  ;;  %v5415_v55 = vadd.f32 %v5414_v42, %v10255_v58 }
 0x5ec   :  { %v5511_v24 = vadd.f32 %v5510_v38, %v5462_v45 }
 0x5ed   :  { %v5464_v30 = vadd.f32 %v5463_v32, %v5415_v55 }
 0x5ee   :  { %v5560_v36 = vadd.f32 %v5559_v37, %v5511_v24 }
 0x5f0   :  { %5594 = vst [vmem:[#allocation13 + $0xc8] sm:$0xff] %v5560_v36 }
 0x5f2   :  { %v5417_v59 = vpop.f32.mrf.mxu0  ;;  %v5466_v20 = vpop.f32.mrf.mxu1 }
 0x5f3   :  { %v5512_v60 = vpop.f32.mrf.mxu2  ;;  %v5561_v6 = vpop.f32.mrf.mxu3  ;;  %v5418_v18 = vadd.f32 %v5417_v59, %v10260_v63 }
 0x5f4   :  { %v5513_v54 = vadd.f32 %v5512_v60, %v5464_v30 }
 0x5f5   :  { %v5467_v8 = vadd.f32 %v5466_v20, %v5418_v18 }
 0x5f6   :  { %v5562_v10 = vadd.f32 %v5561_v6, %v5513_v54 }
 0x5f8   :  { %5596 = vst [vmem:[#allocation13 + $0xd8] sm:$0xff] %v5562_v10 }
 0x5fa   :  { %v5419_v43 = vpop.f32.mrf.mxu0  ;;  %v5468_v58 = vpop.f32.mrf.mxu1 }
 0x5fb   :  { %v5515_v41 = vpop.f32.mrf.mxu2  ;;  %v5564_v27 = vpop.f32.mrf.mxu3  ;;  %v5420_v52 = vadd.f32 %v5419_v43, %v10262_v5 }
 0x5fc   :  { %v5516_v33 = vadd.f32 %v5515_v41, %v5467_v8 }
 0x5fd   :  { %v5469_v48 = vadd.f32 %v5468_v58, %v5420_v52 }
 0x5fe   :  { %v5565_v11 = vadd.f32 %v5564_v27, %v5516_v33 }
 0x600   :  { %5598 = vst [vmem:[#allocation13 + $0xe8] sm:$0xff] %v5565_v11 }
 0x603   :  { %v5517_v4 = vpop.f32.mrf.mxu2  ;;  %v5566_v17 = vpop.f32.mrf.mxu3 }
 0x604   :  { %v5518_v63 = vadd.f32 %v5517_v4, %v5469_v48 }
 0x606   :  { %v5567_v3 = vadd.f32 %v5566_v17, %v5518_v63 }
 0x608   :  { %5600 = vst [vmem:[#allocation13 + $0xf8] sm:$0xff] %v5567_v3 }
 0x609   :  { %5613 = dma.vmem_to_hbm [thread:$0]  %s5606_s12, 4096, %s5608_s1, [#allocation4], %s7651_s19, %s7651_s19, %s7652_s20  }
 0x60a   :  { %7644 = dma.done.wait [#allocation4], 4096  }
 0x60b   :  { %7645 = vsyncadd [#allocation4], 4294963200 }
 0x60c   :  { %5618 = vsyncpa [#allocation3], 1 }
 0x60d   :  { %5619 = vsyncpa [#allocation6], 1 }
 0x60e   :  { %5620 = vsyncpa [#allocation9], 1 }
 0x60f   :  { %5621 = vsyncpa [#allocation12], 1 }
 0x610   :  { %5622 = vsyncpa [#allocation4], 1 }

</bundles_post_ra>
